<compile_context>
chip_gen: v6e
topology: v6e:2x2x1
jax: 0.10.0
libtpu: 0.0.40
codegen_flags: <defaults>
</compile_context>

<pallas_src>
import functools

import jax
import jax.numpy as jnp
from jax.experimental import pallas as pl
from jax.experimental.pallas import tpu as pltpu


# ---------------------------------------------------------------------------
# Chip-aware tiling configuration
# ---------------------------------------------------------------------------
def _round_up(x, m):
    return (x + m - 1) // m * m


def _cdiv(a, b):
    return -(-a // b)


_TM_CAP = 512       # max M-tile rows (tiled kernels approach HBM roofline ~512)
_TK = 512           # K chunk for the (rare) large-K streaming fallback
_PACK_LANES = 128   # below this per-branch N, block-diagonal N-packing wins


@functools.lru_cache(maxsize=None)
def _chip_config():
    """(vmem_limit_bytes or None, per-call tile-byte budget, megacore?).

    v5e/v6e: 128 MiB VMEM, one TensorCore.  v7x: 64 MiB per TC, two TCs
    (megacore).  The default scoped-VMEM limit (16/32 MiB) is far below the
    physical capacity, so raise it explicitly (~3/4 of physical) and size the
    per-call tiles against ~80% of that (headroom for compiler scratch).
    """
    try:
        vmem_phys = int(pltpu.get_tpu_info().vmem_capacity_bytes)
    except Exception:
        # Unknown chip: keep the compiler's default limit, size tiles small.
        return None, 12 * 1024 * 1024, False
    megacore = vmem_phys <= 80 * 1024 * 1024      # v7x heuristic (64 MiB / TC)
    vmem_limit = (vmem_phys * 3) // 4             # ~48 MiB v7x, ~96 MiB v5e/v6e
    budget = (vmem_limit * 4) // 5
    return vmem_limit, budget, megacore


def _compiler_params(dimension_semantics, vmem_limit):
    if vmem_limit is None:
        return pltpu.CompilerParams(dimension_semantics=dimension_semantics)
    return pltpu.CompilerParams(dimension_semantics=dimension_semantics,
                                vmem_limit_bytes=vmem_limit)


def _choose_tm(m, cap, megacore):
    """Pick the M-tile size.

    Prefers (a) the largest tile <= cap (and <= _TM_CAP) that is a multiple of
    8 sublanes, (b) an exact divisor of M so the patch matrix never needs a
    padding copy, and (c) on v7x (megacore) an EVEN number of grid steps so
    both TensorCores get balanced work.  On single-TC chips (v5e/v6e) small M
    is NOT split: one fat step beats two half-size ones (~0.35 us/step).
    """
    cap = max(8, min(cap, _TM_CAP))
    cap -= cap % 8
    m8 = _round_up(m, 8)
    if m8 <= cap:
        if (not megacore) or m8 <= 16:
            return m8                                # one grid step
        return _round_up((m8 + 1) // 2, 8)           # two balanced steps (v7x)
    min_steps = _cdiv(m8, cap)
    if megacore and min_steps % 2:
        min_steps += 1
    max_steps = min_steps + max(2, min_steps // 2)
    for t in range(cap, 7, -8):                      # exact divisors: no A pad
        if m % t:
            continue
        steps = m // t
        if steps > max_steps:
            break
        if (not megacore) or steps % 2 == 0:
            return t
    return min(cap, _round_up(_cdiv(m8, min_steps), 8))   # fall back: pad M


# ---------------------------------------------------------------------------
# Pallas kernels: fused matmul + bias (+ ReLU / dual raw+ReLU epilogue)
# ---------------------------------------------------------------------------
def _mm_kernel(a_ref, w_ref, b_ref, o_ref, *, post_relu):
    out = jnp.dot(a_ref[...], w_ref[...], preferred_element_type=jnp.float32)
    out = out + b_ref[...]
    if post_relu:
        out = jnp.maximum(out, 0.0)
    o_ref[...] = out.astype(o_ref.dtype)


def _mm_dual_kernel(a_ref, w_ref, b_ref, raw_ref, relu_ref):
    out = jnp.dot(a_ref[...], w_ref[...], preferred_element_type=jnp.float32)
    out = out + b_ref[...]
    raw_ref[...] = out.astype(raw_ref.dtype)
    relu_ref[...] = jnp.maximum(out, 0.0).astype(relu_ref.dtype)


def _mm_ktiled_kernel(a_ref, w_ref, b_ref, o_ref, acc_ref, *, post_relu):
    @pl.when(pl.program_id(1) == 0)
    def _init():
        acc_ref[...] = jnp.zeros_like(acc_ref)

    acc_ref[...] += jnp.dot(a_ref[...], w_ref[...],
                            preferred_element_type=jnp.float32)

    @pl.when(pl.program_id(1) == pl.num_programs(1) - 1)
    def _finalize():
        out = acc_ref[...] + b_ref[...]
        if post_relu:
            out = jnp.maximum(out, 0.0)
        o_ref[...] = out.astype(o_ref.dtype)


def _mm_ktiled_dual_kernel(a_ref, w_ref, b_ref, raw_ref, relu_ref, acc_ref):
    @pl.when(pl.program_id(1) == 0)
    def _init():
        acc_ref[...] = jnp.zeros_like(acc_ref)

    acc_ref[...] += jnp.dot(a_ref[...], w_ref[...],
                            preferred_element_type=jnp.float32)

    @pl.when(pl.program_id(1) == pl.num_programs(1) - 1)
    def _finalize():
        out = acc_ref[...] + b_ref[...]
        raw_ref[...] = out.astype(raw_ref.dtype)
        relu_ref[...] = jnp.maximum(out, 0.0).astype(relu_ref.dtype)


def fused_matmul(a, w, bias, *, post_relu, out_dtype=jnp.bfloat16,
                 dual_relu=False):
    """relu?(a @ w + bias) as one pallas_call.

    a: (M,K) bf16 patches; w: (K,N) bf16 with BN scale pre-folded;
    bias: (1,N) f32.  `dual_relu=True` emits TWO outputs from the same f32
    accumulator: the raw f32 result plus its ReLU'd bf16 copy.
    """
    m, k = a.shape
    kw_, n = w.shape
    assert kw_ == k, (a.shape, w.shape)
    vmem_limit, budget, megacore = _chip_config()
    out_bytes = 6 if dual_relu else jnp.dtype(out_dtype).itemsize

    # Full-K resident-weight path whenever double-buffered A + resident W +
    # double-buffered out tiles fit the scoped-VMEM budget.  The K-tiled
    # streaming path (which re-streams W per M tile) is only a fallback.
    tm_cap = (budget - 2 * k * n - 4 * n) // (4 * k + 2 * n * out_bytes)

    if tm_cap >= 8:
        tm = _choose_tm(m, tm_cap, megacore)
        mp = _round_up(m, tm)
        a_in = a
        if mp != m:
            # Padded rows produce bias(+ReLU) garbage; they are sliced off at
            # the end of this function -- keep the slice if you touch this.
            a_in = jnp.pad(a, ((0, mp - m), (0, 0)))
        in_specs = [
            pl.BlockSpec((tm, k), lambda i: (i, 0)),
            pl.BlockSpec((k, n), lambda i: (0, 0)),    # resident across M steps
            pl.BlockSpec((1, n), lambda i: (0, 0)),
        ]
        if dual_relu:
            kernel = _mm_dual_kernel
            out_shape = (jax.ShapeDtypeStruct((mp, n), jnp.float32),
                         jax.ShapeDtypeStruct((mp, n), jnp.bfloat16))
            out_specs = [pl.BlockSpec((tm, n), lambda i: (i, 0)),
                         pl.BlockSpec((tm, n), lambda i: (i, 0))]
        else:
            kernel = functools.partial(_mm_kernel, post_relu=post_relu)
            out_shape = jax.ShapeDtypeStruct((mp, n), out_dtype)
            out_specs = pl.BlockSpec((tm, n), lambda i: (i, 0))
        res = pl.pallas_call(
            kernel,
            out_shape=out_shape,
            grid_spec=pltpu.PrefetchScalarGridSpec(
                num_scalar_prefetch=0,
                grid=(mp // tm,),
                in_specs=in_specs,
                out_specs=out_specs),
            compiler_params=_compiler_params(("parallel",), vmem_limit),
        )(a_in, w, bias)
    else:
        # Large-K streaming fallback: tile K with an f32 VMEM accumulator.
        tk = _TK
        tm_cap = (budget - 4 * tk * n - 4 * n) // (4 * tk + 4 * n + 2 * n * out_bytes)
        tm = _choose_tm(m, max(tm_cap, 8), megacore)
        mp = _round_up(m, tm)
        kp = _round_up(k, tk)
        a_in = jnp.pad(a, ((0, mp - m), (0, kp - k))) if (mp != m or kp != k) else a
        w_in = jnp.pad(w, ((0, kp - k), (0, 0))) if kp != k else w
        in_specs = [
            pl.BlockSpec((tm, tk), lambda i, kk: (i, kk)),
            pl.BlockSpec((tk, n), lambda i, kk: (kk, 0)),
            pl.BlockSpec((1, n), lambda i, kk: (0, 0)),   # constant -> one DMA
        ]
        if dual_relu:
            kernel = _mm_ktiled_dual_kernel
            out_shape = (jax.ShapeDtypeStruct((mp, n), jnp.float32),
                         jax.ShapeDtypeStruct((mp, n), jnp.bfloat16))
            out_specs = [pl.BlockSpec((tm, n), lambda i, kk: (i, 0)),
                         pl.BlockSpec((tm, n), lambda i, kk: (i, 0))]
        else:
            kernel = functools.partial(_mm_ktiled_kernel, post_relu=post_relu)
            out_shape = jax.ShapeDtypeStruct((mp, n), out_dtype)
            out_specs = pl.BlockSpec((tm, n), lambda i, kk: (i, 0))
        res = pl.pallas_call(
            kernel,
            out_shape=out_shape,
            grid_spec=pltpu.PrefetchScalarGridSpec(
                num_scalar_prefetch=0,
                grid=(mp // tm, kp // tk),
                in_specs=in_specs,
                out_specs=out_specs,
                scratch_shapes=[pltpu.VMEM((tm, n), jnp.float32)]),
            compiler_params=_compiler_params(("parallel", "arbitrary"),
                                             vmem_limit),
        )(a_in, w_in, bias)

    if dual_relu:
        raw, relu = res
        return (raw[:m], relu[:m]) if mp != m else (raw, relu)
    return res[:m] if mp != m else res


# ---------------------------------------------------------------------------
# im2col glue (XLA-side; fuses under jit)
# ---------------------------------------------------------------------------
def _im2col_taps(x, ksize, stride, padding):
    """Return KH*KW shifted tap views, each (N,Ho,Wo,C), plus (Ho, Wo)."""
    n, h, w, c = x.shape
    kh_, kw_ = ksize
    if padding:
        x = jnp.pad(x, ((0, 0), (padding, padding), (padding, padding), (0, 0)))
    hp, wp = h + 2 * padding, w + 2 * padding
    ho = (hp - kh_) // stride + 1
    wo = (wp - kw_) // stride + 1
    taps = []
    for kh in range(kh_):
        for kw in range(kw_):
            taps.append(x[:, kh:kh + (ho - 1) * stride + 1:stride,
                          kw:kw + (wo - 1) * stride + 1:stride, :])
    return taps, ho, wo


def _im2col(x, ksize, stride, padding):
    taps, ho, wo = _im2col_taps(x, ksize, stride, padding)
    a = jnp.concatenate(taps, axis=-1).reshape(x.shape[0] * ho * wo, -1)
    return a, ho, wo


# ---------------------------------------------------------------------------
# Parameter init (deterministic; BN folded and weights pre-stacked / bf16)
# ---------------------------------------------------------------------------
class KeyGen:
    def __init__(self, seed):
        self.key = jax.random.PRNGKey(seed)

    def next(self):
        self.key, sub = jax.random.split(self.key)
        return sub


def _init_bn(kg, c):
    eps = 1e-5
    gamma = 1.0 + 0.1 * jax.random.normal(kg.next(), (c,), jnp.float32)
    beta = 0.1 * jax.random.normal(kg.next(), (c,), jnp.float32)
    # eval-mode BN with running_mean=0 / running_var=1 folded to scale/bias.
    # TODO(synk): if real BN stats are loaded, fold the mean into the bias too.
    return gamma / jnp.sqrt(1.0 + eps), beta


def init_conv_bn(kg, kh, kw, cin, cout):
    w = 0.1 * jax.random.normal(kg.next(), (kh, kw, cin, cout), jnp.float32)
    scale, bias = _init_bn(kg, cout)
    wm = (w * scale).reshape(kh * kw * cin, cout)          # BN scale folded
    return dict(w=wm.astype(jnp.bfloat16), bias=bias.reshape(1, cout))


def init_fused_preproc(kg, c0_in, c1_in, c):
    # preproc0 (1x1, c0_in->c) and preproc1 (1x1, c1_in->c) packed along N
    # via a block-diagonal weight: [s0|s1] @ blockdiag(W0,W1) = [t0|t1].
    w0 = 0.1 * jax.random.normal(kg.next(), (1, 1, c0_in, c), jnp.float32)
    s0, b0 = _init_bn(kg, c)
    w1 = 0.1 * jax.random.normal(kg.next(), (1, 1, c1_in, c), jnp.float32)
    s1, b1 = _init_bn(kg, c)
    wm = jnp.zeros((c0_in + c1_in, 2 * c), jnp.float32)
    wm = wm.at[:c0_in, :c].set((w0 * s0).reshape(c0_in, c))
    wm = wm.at[c0_in:, c:].set((w1 * s1).reshape(c1_in, c))
    bias = jnp.concatenate([b0, b1]).reshape(1, 2 * c)
    return dict(w=wm.astype(jnp.bfloat16), bias=bias)


def init_factorized_reduce(kg, cin, cout):
    # Both stride-2 1x1 branches packed along N (block-diagonal), shared BN.
    half = cout // 2
    w1 = 0.1 * jax.random.normal(kg.next(), (1, 1, cin, half), jnp.float32)
    w2 = 0.1 * jax.random.normal(kg.next(), (1, 1, cin, cout - half), jnp.float32)
    scale, bias = _init_bn(kg, cout)
    wm = jnp.zeros((2 * cin, cout), jnp.float32)
    wm = wm.at[:cin, :half].set((w1 * scale[:half]).reshape(cin, half))
    wm = wm.at[cin:, half:].set((w2 * scale[half:]).reshape(cin, cout - half))
    return dict(w=wm.astype(jnp.bfloat16), bias=bias.reshape(1, cout))


def init_factorized_reduce_split(kg, cin, cout):
    # Wide-channel variant: two separate branch matmuls (no block-diag zeros).
    half = cout // 2
    w1 = 0.1 * jax.random.normal(kg.next(), (1, 1, cin, half), jnp.float32)
    w2 = 0.1 * jax.random.normal(kg.next(), (1, 1, cin, cout - half), jnp.float32)
    scale, bias = _init_bn(kg, cout)
    return dict(
        w1=(w1.reshape(cin, half) * scale[:half]).astype(jnp.bfloat16),
        b1=bias[:half].reshape(1, half),
        w2=(w2.reshape(cin, cout - half) * scale[half:]).astype(jnp.bfloat16),
        b2=bias[half:].reshape(1, cout - half))


def init_node(kg, depth, c):
    # All `depth` edges fused: weights stacked along K, BN biases summed.
    ws, bias_sum = [], jnp.zeros((c,), jnp.float32)
    for _ in range(depth):
        w = 0.1 * jax.random.normal(kg.next(), (3, 3, c, c), jnp.float32)
        scale, bias = _init_bn(kg, c)
        ws.append((w * scale).reshape(9 * c, c))
        bias_sum = bias_sum + bias
    wm = jnp.concatenate(ws, axis=0)
    return dict(w=wm.astype(jnp.bfloat16), bias=bias_sum.reshape(1, c),
                depth=depth)


def init_cell(kg, num_nodes, channels, prev_ch, prev_prev_ch,
              reduction, prev_reduction):
    p = dict(reduction=reduction, prev_reduction=prev_reduction,
             channels=channels)
    if prev_reduction:
        if channels // 2 < _PACK_LANES:
            p['preproc0_fr'] = init_factorized_reduce(kg, prev_prev_ch, channels)
        else:
            p['preproc0_fr_split'] = init_factorized_reduce_split(
                kg, prev_prev_ch, channels)
        p['preproc1'] = init_conv_bn(kg, 1, 1, prev_ch, channels)
    else:
        if channels < _PACK_LANES:
            p['preproc01'] = init_fused_preproc(kg, prev_prev_ch, prev_ch, channels)
        else:
            p['preproc0'] = init_conv_bn(kg, 1, 1, prev_prev_ch, channels)
            p['preproc1'] = init_conv_bn(kg, 1, 1, prev_ch, channels)
    p['nodes'] = [init_node(kg, depth, channels)
                  for depth in range(2, num_nodes + 2)]
    return p


def init_darts_backbone(seed, in_channels, base_channels, num_layers,
                        num_nodes, stem_multiplier):
    kg = KeyGen(seed)
    params = {}
    stem_out = stem_multiplier * base_channels
    params['stem'] = init_conv_bn(kg, 3, 3, in_channels, stem_out)

    prev_prev_ch = stem_out
    prev_ch = stem_out
    out_ch = base_channels
    cells = []
    prev_reduction, reduction = False, False
    for i in range(num_layers):
        prev_reduction, reduction = reduction, False
        if i == num_layers // 3 or i == 2 * num_layers // 3:
            out_ch *= 2
            reduction = True
        cells.append(init_cell(kg, num_nodes, out_ch, prev_ch, prev_prev_ch,
                               reduction, prev_reduction))
        prev_prev_ch = prev_ch
        prev_ch = out_ch * num_nodes
    params['cells'] = cells
    return params


# ---------------------------------------------------------------------------
# Forward (mirrors DartsBackbone.forward in eval mode)
# ---------------------------------------------------------------------------
def apply_stem(p, x):
    # stem = Conv3x3-BN; its output is only ever consumed through ReLU-first
    # ops, so the ReLU is fused into the stem epilogue (consumers skip it).
    n = x.shape[0]
    a, ho, wo = _im2col(x, (3, 3), 1, 1)
    o = fused_matmul(a, p['w'], p['bias'], post_relu=True,
                     out_dtype=jnp.bfloat16)
    return o.reshape(n, ho, wo, -1)


def apply_node(node, tensors, reduction, n, need_raw):
    # Fused node: sum_j conv3x3(t_j) == [taps(t_0)|taps(t_1)|...] @ [W_0;W_1;...]
    # All edges' taps are concatenated along K in ONE pass (no per-edge patch
    # matrices and no second K-concat).
    taps_all = []
    ho = wo = None
    for j in range(node['depth']):
        stride = 2 if (reduction and j < 2) else 1
        taps, ho, wo = _im2col_taps(tensors[j], (3, 3), stride, 1)
        taps_all.extend(taps)
    a = jnp.concatenate(taps_all, axis=-1).reshape(n * ho * wo, -1)
    c = node['bias'].shape[1]
    if need_raw:
        raw, relu = fused_matmul(a, node['w'], node['bias'], post_relu=False,
                                 dual_relu=True)
        return raw.reshape(n, ho, wo, c), relu.reshape(n, ho, wo, c)
    o = fused_matmul(a, node['w'], node['bias'], post_relu=True,
                     out_dtype=jnp.bfloat16)
    return None, o.reshape(n, ho, wo, c)


def apply_cell(p, s0, s1, need_raw):
    """s0, s1 are already ReLU'd bf16 NHWC activations."""
    n = s1.shape[0]
    c = p['channels']
    if p['prev_reduction']:
        assert s0.shape[1] % 2 == 0 and s0.shape[2] % 2 == 0, (
            "FactorizedReduce requires even spatial dims", s0.shape)
        a1 = s0[:, ::2, ::2, :]
        a2 = s0[:, 1::2, 1::2, :]
        ho, wo = a1.shape[1], a1.shape[2]
        if 'preproc0_fr' in p:
            fr = p['preproc0_fr']
            a = jnp.concatenate([a1, a2], axis=-1).reshape(n * ho * wo, -1)
            t0 = fused_matmul(a, fr['w'], fr['bias'], post_relu=True,
                              out_dtype=jnp.bfloat16).reshape(n, ho, wo, c)
        else:
            fr = p['preproc0_fr_split']
            o1 = fused_matmul(a1.reshape(n * ho * wo, -1), fr['w1'], fr['b1'],
                              post_relu=True, out_dtype=jnp.bfloat16)
            o2 = fused_matmul(a2.reshape(n * ho * wo, -1), fr['w2'], fr['b2'],
                              post_relu=True, out_dtype=jnp.bfloat16)
            t0 = jnp.concatenate([o1, o2], axis=-1).reshape(n, ho, wo, c)
        pp1 = p['preproc1']
        h1, w1 = s1.shape[1], s1.shape[2]
        t1 = fused_matmul(s1.reshape(n * h1 * w1, -1), pp1['w'], pp1['bias'],
                          post_relu=True,
                          out_dtype=jnp.bfloat16).reshape(n, h1, w1, c)
    else:
        h1, w1 = s1.shape[1], s1.shape[2]
        assert s0.shape[1] == h1 and s0.shape[2] == w1
        if 'preproc01' in p:
            pp = p['preproc01']
            a = jnp.concatenate([s0, s1], axis=-1).reshape(n * h1 * w1, -1)
            out = fused_matmul(a, pp['w'], pp['bias'], post_relu=True,
                               out_dtype=jnp.bfloat16).reshape(n, h1, w1, 2 * c)
            t0, t1 = out[..., :c], out[..., c:]
        else:
            pp0, pp1 = p['preproc0'], p['preproc1']
            t0 = fused_matmul(s0.reshape(n * h1 * w1, -1), pp0['w'], pp0['bias'],
                              post_relu=True,
                              out_dtype=jnp.bfloat16).reshape(n, h1, w1, c)
            t1 = fused_matmul(s1.reshape(n * h1 * w1, -1), pp1['w'], pp1['bias'],
                              post_relu=True,
                              out_dtype=jnp.bfloat16).reshape(n, h1, w1, c)

    tensors = [t0, t1]
    raw_nodes = []
    for node in p['nodes']:
        raw, relu = apply_node(node, tensors, p['reduction'], n, need_raw)
        tensors.append(relu)                           # bf16, ReLU fused
        if need_raw:
            raw_nodes.append(raw)                      # f32, un-ReLU'd
    # TODO(synk): write each node's output directly into a channel-offset slice
    # of a preallocated (M, num_nodes*C) buffer (out_specs + aliasing) to drop
    # this concat's extra HBM pass.
    relu_out = jnp.concatenate(tensors[2:], axis=-1)   # feeds the next cells
    raw_out = jnp.concatenate(raw_nodes, axis=-1) if need_raw else None
    return relu_out, raw_out


def darts_backbone_forward(params, x_nchw, out_indices):
    x = jnp.transpose(x_nchw, (0, 2, 3, 1)).astype(jnp.bfloat16)
    s0 = s1 = apply_stem(params['stem'], x)
    outs = []
    for i, cell in enumerate(params['cells']):
        need_raw = i in out_indices
        relu_out, raw_out = apply_cell(cell, s0, s1, need_raw)
        s0, s1 = s1, relu_out
        if need_raw:
            outs.append(jnp.transpose(raw_out, (0, 3, 1, 2)).astype(jnp.float32))
    return tuple(outs)


# ---------------------------------------------------------------------------
if __name__ == "__main__":
    # Small configuration consistent with the module's constraints
    # (out_indices[-1] == num_layers - 1; reductions at num_layers//3, 2*num_layers//3).
    in_channels = 4
    base_channels = 8
    num_layers = 3
    num_nodes = 2
    stem_multiplier = 3
    out_indices = (num_layers - 1,)

    params = init_darts_backbone(0, in_channels, base_channels, num_layers,
                                 num_nodes, stem_multiplier)

    key = jax.random.PRNGKey(0)
    x = jax.random.normal(key, (2, in_channels, 16, 16), jnp.float32)  # NCHW

    fwd = jax.jit(lambda inp: darts_backbone_forward(params, inp, out_indices))
    outs = fwd(x)
    outs = jax.block_until_ready(outs)

    # sanity: final cell output has 2*base*num_nodes channels at 1/4 spatial res
    assert outs[0].shape == (2, 4 * base_channels * num_nodes, 4, 4), outs[0].shape
    assert bool(jnp.all(jnp.isfinite(outs[0])))
    print("KERNEL_OK")
</pallas_src>

<mosaic_0001>
module attributes {stable_mosaic.version = 11 : i64} {
  func.func @_mm_kernel(%arg0: i32, %arg1: memref<512x36xbf16, #tpu.memory_space<vmem>>, %arg2: memref<36x24xbf16, #tpu.memory_space<vmem>>, %arg3: memref<1x24xf32, #tpu.memory_space<vmem>>, %arg4: memref<512x24xbf16, #tpu.memory_space<vmem>>) attributes {dimension_semantics = [#tpu.dimension_semantics<parallel>], iteration_bounds = array<i64: 1>, scalar_prefetch = 0 : i64, scratch_operands = 0 : i64, tpu.core_type = #tpu.core_type<tc>, window_params = [{transform_indices = @transform_0, window_bounds = array<i64: 512, 36>}, {pipeline_mode = #tpu.pipeline_mode<synchronous>, transform_indices = @transform_1, window_bounds = array<i64: 36, 24>}, {pipeline_mode = #tpu.pipeline_mode<synchronous>, transform_indices = @transform_2, window_bounds = array<i64: 1, 24>}, {transform_indices = @transform_3, window_bounds = array<i64: 512, 24>}]} {
    %c0 = arith.constant 0 : index
    %c0_0 = arith.constant 0 : index
    %0 = vector.load %arg1[%c0, %c0_0] : memref<512x36xbf16, #tpu.memory_space<vmem>>, vector<512x36xbf16>
    %c0_1 = arith.constant 0 : index
    %c0_2 = arith.constant 0 : index
    %1 = vector.load %arg2[%c0_1, %c0_2] : memref<36x24xbf16, #tpu.memory_space<vmem>>, vector<36x24xbf16>
    %cst = arith.constant dense<0.000000e+00> : vector<512x24xf32>
    %2 = tpu.matmul %0, %1, %cst {dimension_numbers = #tpu.dot_dimension_numbers<[1], [0], [0], [1], [0, 0, 1, 1], [], []>} : vector<512x36xbf16>, vector<36x24xbf16>, vector<512x24xf32> -> vector<512x24xf32>
    %c0_3 = arith.constant 0 : index
    %c0_4 = arith.constant 0 : index
    %3 = vector.load %arg3[%c0_3, %c0_4] : memref<1x24xf32, #tpu.memory_space<vmem>>, vector<1x24xf32>
    %4 = vector.broadcast %3 : vector<1x24xf32> to vector<512x24xf32>
    %5 = arith.addf %2, %4 : vector<512x24xf32>
    %cst_5 = arith.constant 0.000000e+00 : f32
    %6 = vector.broadcast %cst_5 : f32 to vector<512x24xf32>
    %7 = arith.maximumf %5, %6 : vector<512x24xf32>
    %8 = arith.truncf %7 : vector<512x24xf32> to vector<512x24xbf16>
    %c0_6 = arith.constant 0 : index
    %c0_7 = arith.constant 0 : index
    %9 = vector.load %arg4[%c0_6, %c0_7] : memref<512x24xbf16, #tpu.memory_space<vmem>>, vector<512x24xbf16>
    tpu.vector_store %arg4[%c0_6, %c0_7], %8 {strides = array<i32>} : memref<512x24xbf16, #tpu.memory_space<vmem>>, vector<512x24xbf16>,
    return
  }
  func.func @transform_0(%arg0: i32) -> (i32, i32) {
    %c0_i32 = arith.constant 0 : i32
    %c0_i32_0 = arith.constant 0 : i32
    return %arg0, %c0_i32 : i32, i32
  }
  func.func @transform_1(%arg0: i32) -> (i32, i32) {
    %c0_i32 = arith.constant 0 : i32
    %c0_i32_0 = arith.constant 0 : i32
    %c0_i32_1 = arith.constant 0 : i32
    return %c0_i32, %c0_i32_0 : i32, i32
  }
  func.func @transform_2(%arg0: i32) -> (i32, i32) {
    %c0_i32 = arith.constant 0 : i32
    %c0_i32_0 = arith.constant 0 : i32
    %c0_i32_1 = arith.constant 0 : i32
    return %c0_i32, %c0_i32_0 : i32, i32
  }
  func.func @transform_3(%arg0: i32) -> (i32, i32) {
    %c0_i32 = arith.constant 0 : i32
    %c0_i32_0 = arith.constant 0 : i32
    return %arg0, %c0_i32 : i32, i32
  }
}

module attributes {stable_mosaic.version = 11 : i64} {
  func.func @_mm_kernel(%arg0: i32, %arg1: memref<512x48xbf16, #tpu.memory_space<vmem>>, %arg2: memref<48x16xbf16, #tpu.memory_space<vmem>>, %arg3: memref<1x16xf32, #tpu.memory_space<vmem>>, %arg4: memref<512x16xbf16, #tpu.memory_space<vmem>>) attributes {dimension_semantics = [#tpu.dimension_semantics<parallel>], iteration_bounds = array<i64: 1>, scalar_prefetch = 0 : i64, scratch_operands = 0 : i64, tpu.core_type = #tpu.core_type<tc>, window_params = [{transform_indices = @transform_0, window_bounds = array<i64: 512, 48>}, {pipeline_mode = #tpu.pipeline_mode<synchronous>, transform_indices = @transform_1, window_bounds = array<i64: 48, 16>}, {pipeline_mode = #tpu.pipeline_mode<synchronous>, transform_indices = @transform_2, window_bounds = array<i64: 1, 16>}, {transform_indices = @transform_3, window_bounds = array<i64: 512, 16>}]} {
    %c0 = arith.constant 0 : index
    %c0_0 = arith.constant 0 : index
    %0 = vector.load %arg1[%c0, %c0_0] : memref<512x48xbf16, #tpu.memory_space<vmem>>, vector<512x48xbf16>
    %c0_1 = arith.constant 0 : index
    %c0_2 = arith.constant 0 : index
    %1 = vector.load %arg2[%c0_1, %c0_2] : memref<48x16xbf16, #tpu.memory_space<vmem>>, vector<48x16xbf16>
    %cst = arith.constant dense<0.000000e+00> : vector<512x16xf32>
    %2 = tpu.matmul %0, %1, %cst {dimension_numbers = #tpu.dot_dimension_numbers<[1], [0], [0], [1], [0, 0, 1, 1], [], []>} : vector<512x48xbf16>, vector<48x16xbf16>, vector<512x16xf32> -> vector<512x16xf32>
    %c0_3 = arith.constant 0 : index
    %c0_4 = arith.constant 0 : index
    %3 = vector.load %arg3[%c0_3, %c0_4] : memref<1x16xf32, #tpu.memory_space<vmem>>, vector<1x16xf32>
    %4 = vector.broadcast %3 : vector<1x16xf32> to vector<512x16xf32>
    %5 = arith.addf %2, %4 : vector<512x16xf32>
    %cst_5 = arith.constant 0.000000e+00 : f32
    %6 = vector.broadcast %cst_5 : f32 to vector<512x16xf32>
    %7 = arith.maximumf %5, %6 : vector<512x16xf32>
    %8 = arith.truncf %7 : vector<512x16xf32> to vector<512x16xbf16>
    %c0_6 = arith.constant 0 : index
    %c0_7 = arith.constant 0 : index
    %9 = vector.load %arg4[%c0_6, %c0_7] : memref<512x16xbf16, #tpu.memory_space<vmem>>, vector<512x16xbf16>
    tpu.vector_store %arg4[%c0_6, %c0_7], %8 {strides = array<i32>} : memref<512x16xbf16, #tpu.memory_space<vmem>>, vector<512x16xbf16>,
    return
  }
  func.func @transform_0(%arg0: i32) -> (i32, i32) {
    %c0_i32 = arith.constant 0 : i32
    %c0_i32_0 = arith.constant 0 : i32
    return %arg0, %c0_i32 : i32, i32
  }
  func.func @transform_1(%arg0: i32) -> (i32, i32) {
    %c0_i32 = arith.constant 0 : i32
    %c0_i32_0 = arith.constant 0 : i32
    %c0_i32_1 = arith.constant 0 : i32
    return %c0_i32, %c0_i32_0 : i32, i32
  }
  func.func @transform_2(%arg0: i32) -> (i32, i32) {
    %c0_i32 = arith.constant 0 : i32
    %c0_i32_0 = arith.constant 0 : i32
    %c0_i32_1 = arith.constant 0 : i32
    return %c0_i32, %c0_i32_0 : i32, i32
  }
  func.func @transform_3(%arg0: i32) -> (i32, i32) {
    %c0_i32 = arith.constant 0 : i32
    %c0_i32_0 = arith.constant 0 : i32
    return %arg0, %c0_i32 : i32, i32
  }
}

module attributes {stable_mosaic.version = 11 : i64} {
  func.func @_mm_kernel(%arg0: i32, %arg1: memref<512x144xbf16, #tpu.memory_space<vmem>>, %arg2: memref<144x8xbf16, #tpu.memory_space<vmem>>, %arg3: memref<1x8xf32, #tpu.memory_space<vmem>>, %arg4: memref<512x8xbf16, #tpu.memory_space<vmem>>) attributes {dimension_semantics = [#tpu.dimension_semantics<parallel>], iteration_bounds = array<i64: 1>, scalar_prefetch = 0 : i64, scratch_operands = 0 : i64, tpu.core_type = #tpu.core_type<tc>, window_params = [{transform_indices = @transform_0, window_bounds = array<i64: 512, 144>}, {pipeline_mode = #tpu.pipeline_mode<synchronous>, transform_indices = @transform_1, window_bounds = array<i64: 144, 8>}, {pipeline_mode = #tpu.pipeline_mode<synchronous>, transform_indices = @transform_2, window_bounds = array<i64: 1, 8>}, {transform_indices = @transform_3, window_bounds = array<i64: 512, 8>}]} {
    %c0 = arith.constant 0 : index
    %c0_0 = arith.constant 0 : index
    %0 = vector.load %arg1[%c0, %c0_0] : memref<512x144xbf16, #tpu.memory_space<vmem>>, vector<512x144xbf16>
    %c0_1 = arith.constant 0 : index
    %c0_2 = arith.constant 0 : index
    %1 = vector.load %arg2[%c0_1, %c0_2] : memref<144x8xbf16, #tpu.memory_space<vmem>>, vector<144x8xbf16>
    %cst = arith.constant dense<0.000000e+00> : vector<512x8xf32>
    %2 = tpu.matmul %0, %1, %cst {dimension_numbers = #tpu.dot_dimension_numbers<[1], [0], [0], [1], [0, 0, 1, 1], [], []>} : vector<512x144xbf16>, vector<144x8xbf16>, vector<512x8xf32> -> vector<512x8xf32>
    %c0_3 = arith.constant 0 : index
    %c0_4 = arith.constant 0 : index
    %3 = vector.load %arg3[%c0_3, %c0_4] : memref<1x8xf32, #tpu.memory_space<vmem>>, vector<1x8xf32>
    %4 = vector.broadcast %3 : vector<1x8xf32> to vector<512x8xf32>
    %5 = arith.addf %2, %4 : vector<512x8xf32>
    %cst_5 = arith.constant 0.000000e+00 : f32
    %6 = vector.broadcast %cst_5 : f32 to vector<512x8xf32>
    %7 = arith.maximumf %5, %6 : vector<512x8xf32>
    %8 = arith.truncf %7 : vector<512x8xf32> to vector<512x8xbf16>
    %c0_6 = arith.constant 0 : index
    %c0_7 = arith.constant 0 : index
    %9 = vector.load %arg4[%c0_6, %c0_7] : memref<512x8xbf16, #tpu.memory_space<vmem>>, vector<512x8xbf16>
    tpu.vector_store %arg4[%c0_6, %c0_7], %8 {strides = array<i32>} : memref<512x8xbf16, #tpu.memory_space<vmem>>, vector<512x8xbf16>,
    return
  }
  func.func @transform_0(%arg0: i32) -> (i32, i32) {
    %c0_i32 = arith.constant 0 : i32
    %c0_i32_0 = arith.constant 0 : i32
    return %arg0, %c0_i32 : i32, i32
  }
  func.func @transform_1(%arg0: i32) -> (i32, i32) {
    %c0_i32 = arith.constant 0 : i32
    %c0_i32_0 = arith.constant 0 : i32
    %c0_i32_1 = arith.constant 0 : i32
    return %c0_i32, %c0_i32_0 : i32, i32
  }
  func.func @transform_2(%arg0: i32) -> (i32, i32) {
    %c0_i32 = arith.constant 0 : i32
    %c0_i32_0 = arith.constant 0 : i32
    %c0_i32_1 = arith.constant 0 : i32
    return %c0_i32, %c0_i32_0 : i32, i32
  }
  func.func @transform_3(%arg0: i32) -> (i32, i32) {
    %c0_i32 = arith.constant 0 : i32
    %c0_i32_0 = arith.constant 0 : i32
    return %arg0, %c0_i32 : i32, i32
  }
}

module attributes {stable_mosaic.version = 11 : i64} {
  func.func @_mm_kernel(%arg0: i32, %arg1: memref<512x216xbf16, #tpu.memory_space<vmem>>, %arg2: memref<216x8xbf16, #tpu.memory_space<vmem>>, %arg3: memref<1x8xf32, #tpu.memory_space<vmem>>, %arg4: memref<512x8xbf16, #tpu.memory_space<vmem>>) attributes {dimension_semantics = [#tpu.dimension_semantics<parallel>], iteration_bounds = array<i64: 1>, scalar_prefetch = 0 : i64, scratch_operands = 0 : i64, tpu.core_type = #tpu.core_type<tc>, window_params = [{transform_indices = @transform_0, window_bounds = array<i64: 512, 216>}, {pipeline_mode = #tpu.pipeline_mode<synchronous>, transform_indices = @transform_1, window_bounds = array<i64: 216, 8>}, {pipeline_mode = #tpu.pipeline_mode<synchronous>, transform_indices = @transform_2, window_bounds = array<i64: 1, 8>}, {transform_indices = @transform_3, window_bounds = array<i64: 512, 8>}]} {
    %c0 = arith.constant 0 : index
    %c0_0 = arith.constant 0 : index
    %0 = vector.load %arg1[%c0, %c0_0] : memref<512x216xbf16, #tpu.memory_space<vmem>>, vector<512x216xbf16>
    %c0_1 = arith.constant 0 : index
    %c0_2 = arith.constant 0 : index
    %1 = vector.load %arg2[%c0_1, %c0_2] : memref<216x8xbf16, #tpu.memory_space<vmem>>, vector<216x8xbf16>
    %cst = arith.constant dense<0.000000e+00> : vector<512x8xf32>
    %2 = tpu.matmul %0, %1, %cst {dimension_numbers = #tpu.dot_dimension_numbers<[1], [0], [0], [1], [0, 0, 1, 1], [], []>} : vector<512x216xbf16>, vector<216x8xbf16>, vector<512x8xf32> -> vector<512x8xf32>
    %c0_3 = arith.constant 0 : index
    %c0_4 = arith.constant 0 : index
    %3 = vector.load %arg3[%c0_3, %c0_4] : memref<1x8xf32, #tpu.memory_space<vmem>>, vector<1x8xf32>
    %4 = vector.broadcast %3 : vector<1x8xf32> to vector<512x8xf32>
    %5 = arith.addf %2, %4 : vector<512x8xf32>
    %cst_5 = arith.constant 0.000000e+00 : f32
    %6 = vector.broadcast %cst_5 : f32 to vector<512x8xf32>
    %7 = arith.maximumf %5, %6 : vector<512x8xf32>
    %8 = arith.truncf %7 : vector<512x8xf32> to vector<512x8xbf16>
    %c0_6 = arith.constant 0 : index
    %c0_7 = arith.constant 0 : index
    %9 = vector.load %arg4[%c0_6, %c0_7] : memref<512x8xbf16, #tpu.memory_space<vmem>>, vector<512x8xbf16>
    tpu.vector_store %arg4[%c0_6, %c0_7], %8 {strides = array<i32>} : memref<512x8xbf16, #tpu.memory_space<vmem>>, vector<512x8xbf16>,
    return
  }
  func.func @transform_0(%arg0: i32) -> (i32, i32) {
    %c0_i32 = arith.constant 0 : i32
    %c0_i32_0 = arith.constant 0 : i32
    return %arg0, %c0_i32 : i32, i32
  }
  func.func @transform_1(%arg0: i32) -> (i32, i32) {
    %c0_i32 = arith.constant 0 : i32
    %c0_i32_0 = arith.constant 0 : i32
    %c0_i32_1 = arith.constant 0 : i32
    return %c0_i32, %c0_i32_0 : i32, i32
  }
  func.func @transform_2(%arg0: i32) -> (i32, i32) {
    %c0_i32 = arith.constant 0 : i32
    %c0_i32_0 = arith.constant 0 : i32
    %c0_i32_1 = arith.constant 0 : i32
    return %c0_i32, %c0_i32_0 : i32, i32
  }
  func.func @transform_3(%arg0: i32) -> (i32, i32) {
    %c0_i32 = arith.constant 0 : i32
    %c0_i32_0 = arith.constant 0 : i32
    return %arg0, %c0_i32 : i32, i32
  }
}

module attributes {stable_mosaic.version = 11 : i64} {
  func.func @_mm_kernel(%arg0: i32, %arg1: memref<512x40xbf16, #tpu.memory_space<vmem>>, %arg2: memref<40x32xbf16, #tpu.memory_space<vmem>>, %arg3: memref<1x32xf32, #tpu.memory_space<vmem>>, %arg4: memref<512x32xbf16, #tpu.memory_space<vmem>>) attributes {dimension_semantics = [#tpu.dimension_semantics<parallel>], iteration_bounds = array<i64: 1>, scalar_prefetch = 0 : i64, scratch_operands = 0 : i64, tpu.core_type = #tpu.core_type<tc>, window_params = [{transform_indices = @transform_0, window_bounds = array<i64: 512, 40>}, {pipeline_mode = #tpu.pipeline_mode<synchronous>, transform_indices = @transform_1, window_bounds = array<i64: 40, 32>}, {pipeline_mode = #tpu.pipeline_mode<synchronous>, transform_indices = @transform_2, window_bounds = array<i64: 1, 32>}, {transform_indices = @transform_3, window_bounds = array<i64: 512, 32>}]} {
    %c0 = arith.constant 0 : index
    %c0_0 = arith.constant 0 : index
    %0 = vector.load %arg1[%c0, %c0_0] : memref<512x40xbf16, #tpu.memory_space<vmem>>, vector<512x40xbf16>
    %c0_1 = arith.constant 0 : index
    %c0_2 = arith.constant 0 : index
    %1 = vector.load %arg2[%c0_1, %c0_2] : memref<40x32xbf16, #tpu.memory_space<vmem>>, vector<40x32xbf16>
    %cst = arith.constant dense<0.000000e+00> : vector<512x32xf32>
    %2 = tpu.matmul %0, %1, %cst {dimension_numbers = #tpu.dot_dimension_numbers<[1], [0], [0], [1], [0, 0, 1, 1], [], []>} : vector<512x40xbf16>, vector<40x32xbf16>, vector<512x32xf32> -> vector<512x32xf32>
    %c0_3 = arith.constant 0 : index
    %c0_4 = arith.constant 0 : index
    %3 = vector.load %arg3[%c0_3, %c0_4] : memref<1x32xf32, #tpu.memory_space<vmem>>, vector<1x32xf32>
    %4 = vector.broadcast %3 : vector<1x32xf32> to vector<512x32xf32>
    %5 = arith.addf %2, %4 : vector<512x32xf32>
    %cst_5 = arith.constant 0.000000e+00 : f32
    %6 = vector.broadcast %cst_5 : f32 to vector<512x32xf32>
    %7 = arith.maximumf %5, %6 : vector<512x32xf32>
    %8 = arith.truncf %7 : vector<512x32xf32> to vector<512x32xbf16>
    %c0_6 = arith.constant 0 : index
    %c0_7 = arith.constant 0 : index
    %9 = vector.load %arg4[%c0_6, %c0_7] : memref<512x32xbf16, #tpu.memory_space<vmem>>, vector<512x32xbf16>
    tpu.vector_store %arg4[%c0_6, %c0_7], %8 {strides = array<i32>} : memref<512x32xbf16, #tpu.memory_space<vmem>>, vector<512x32xbf16>,
    return
  }
  func.func @transform_0(%arg0: i32) -> (i32, i32) {
    %c0_i32 = arith.constant 0 : i32
    %c0_i32_0 = arith.constant 0 : i32
    return %arg0, %c0_i32 : i32, i32
  }
  func.func @transform_1(%arg0: i32) -> (i32, i32) {
    %c0_i32 = arith.constant 0 : i32
    %c0_i32_0 = arith.constant 0 : i32
    %c0_i32_1 = arith.constant 0 : i32
    return %c0_i32, %c0_i32_0 : i32, i32
  }
  func.func @transform_2(%arg0: i32) -> (i32, i32) {
    %c0_i32 = arith.constant 0 : i32
    %c0_i32_0 = arith.constant 0 : i32
    %c0_i32_1 = arith.constant 0 : i32
    return %c0_i32, %c0_i32_0 : i32, i32
  }
  func.func @transform_3(%arg0: i32) -> (i32, i32) {
    %c0_i32 = arith.constant 0 : i32
    %c0_i32_0 = arith.constant 0 : i32
    return %arg0, %c0_i32 : i32, i32
  }
}

module attributes {stable_mosaic.version = 11 : i64} {
  func.func @_mm_kernel(%arg0: i32, %arg1: memref<128x32xbf16, #tpu.memory_space<vmem>>, %arg2: memref<32x32xbf16, #tpu.memory_space<vmem>>, %arg3: memref<1x32xf32, #tpu.memory_space<vmem>>, %arg4: memref<128x32xbf16, #tpu.memory_space<vmem>>) attributes {dimension_semantics = [#tpu.dimension_semantics<parallel>], iteration_bounds = array<i64: 1>, scalar_prefetch = 0 : i64, scratch_operands = 0 : i64, tpu.core_type = #tpu.core_type<tc>, window_params = [{transform_indices = @transform_0, window_bounds = array<i64: 128, 32>}, {pipeline_mode = #tpu.pipeline_mode<synchronous>, transform_indices = @transform_1, window_bounds = array<i64: 32, 32>}, {pipeline_mode = #tpu.pipeline_mode<synchronous>, transform_indices = @transform_2, window_bounds = array<i64: 1, 32>}, {transform_indices = @transform_3, window_bounds = array<i64: 128, 32>}]} {
    %c0 = arith.constant 0 : index
    %c0_0 = arith.constant 0 : index
    %0 = vector.load %arg1[%c0, %c0_0] : memref<128x32xbf16, #tpu.memory_space<vmem>>, vector<128x32xbf16>
    %c0_1 = arith.constant 0 : index
    %c0_2 = arith.constant 0 : index
    %1 = vector.load %arg2[%c0_1, %c0_2] : memref<32x32xbf16, #tpu.memory_space<vmem>>, vector<32x32xbf16>
    %cst = arith.constant dense<0.000000e+00> : vector<128x32xf32>
    %2 = tpu.matmul %0, %1, %cst {dimension_numbers = #tpu.dot_dimension_numbers<[1], [0], [0], [1], [0, 0, 1, 1], [], []>} : vector<128x32xbf16>, vector<32x32xbf16>, vector<128x32xf32> -> vector<128x32xf32>
    %c0_3 = arith.constant 0 : index
    %c0_4 = arith.constant 0 : index
    %3 = vector.load %arg3[%c0_3, %c0_4] : memref<1x32xf32, #tpu.memory_space<vmem>>, vector<1x32xf32>
    %4 = vector.broadcast %3 : vector<1x32xf32> to vector<128x32xf32>
    %5 = arith.addf %2, %4 : vector<128x32xf32>
    %cst_5 = arith.constant 0.000000e+00 : f32
    %6 = vector.broadcast %cst_5 : f32 to vector<128x32xf32>
    %7 = arith.maximumf %5, %6 : vector<128x32xf32>
    %8 = arith.truncf %7 : vector<128x32xf32> to vector<128x32xbf16>
    %c0_6 = arith.constant 0 : index
    %c0_7 = arith.constant 0 : index
    %9 = vector.load %arg4[%c0_6, %c0_7] : memref<128x32xbf16, #tpu.memory_space<vmem>>, vector<128x32xbf16>
    tpu.vector_store %arg4[%c0_6, %c0_7], %8 {strides = array<i32>} : memref<128x32xbf16, #tpu.memory_space<vmem>>, vector<128x32xbf16>,
    return
  }
  func.func @transform_0(%arg0: i32) -> (i32, i32) {
    %c0_i32 = arith.constant 0 : i32
    %c0_i32_0 = arith.constant 0 : i32
    return %arg0, %c0_i32 : i32, i32
  }
  func.func @transform_1(%arg0: i32) -> (i32, i32) {
    %c0_i32 = arith.constant 0 : i32
    %c0_i32_0 = arith.constant 0 : i32
    %c0_i32_1 = arith.constant 0 : i32
    return %c0_i32, %c0_i32_0 : i32, i32
  }
  func.func @transform_2(%arg0: i32) -> (i32, i32) {
    %c0_i32 = arith.constant 0 : i32
    %c0_i32_0 = arith.constant 0 : i32
    %c0_i32_1 = arith.constant 0 : i32
    return %c0_i32, %c0_i32_0 : i32, i32
  }
  func.func @transform_3(%arg0: i32) -> (i32, i32) {
    %c0_i32 = arith.constant 0 : i32
    %c0_i32_0 = arith.constant 0 : i32
    return %arg0, %c0_i32 : i32, i32
  }
}

module attributes {stable_mosaic.version = 11 : i64} {
  func.func @_mm_kernel(%arg0: i32, %arg1: memref<128x288xbf16, #tpu.memory_space<vmem>>, %arg2: memref<288x16xbf16, #tpu.memory_space<vmem>>, %arg3: memref<1x16xf32, #tpu.memory_space<vmem>>, %arg4: memref<128x16xbf16, #tpu.memory_space<vmem>>) attributes {dimension_semantics = [#tpu.dimension_semantics<parallel>], iteration_bounds = array<i64: 1>, scalar_prefetch = 0 : i64, scratch_operands = 0 : i64, tpu.core_type = #tpu.core_type<tc>, window_params = [{transform_indices = @transform_0, window_bounds = array<i64: 128, 288>}, {pipeline_mode = #tpu.pipeline_mode<synchronous>, transform_indices = @transform_1, window_bounds = array<i64: 288, 16>}, {pipeline_mode = #tpu.pipeline_mode<synchronous>, transform_indices = @transform_2, window_bounds = array<i64: 1, 16>}, {transform_indices = @transform_3, window_bounds = array<i64: 128, 16>}]} {
    %c0 = arith.constant 0 : index
    %c0_0 = arith.constant 0 : index
    %0 = vector.load %arg1[%c0, %c0_0] : memref<128x288xbf16, #tpu.memory_space<vmem>>, vector<128x288xbf16>
    %c0_1 = arith.constant 0 : index
    %c0_2 = arith.constant 0 : index
    %1 = vector.load %arg2[%c0_1, %c0_2] : memref<288x16xbf16, #tpu.memory_space<vmem>>, vector<288x16xbf16>
    %cst = arith.constant dense<0.000000e+00> : vector<128x16xf32>
    %2 = tpu.matmul %0, %1, %cst {dimension_numbers = #tpu.dot_dimension_numbers<[1], [0], [0], [1], [0, 0, 1, 1], [], []>} : vector<128x288xbf16>, vector<288x16xbf16>, vector<128x16xf32> -> vector<128x16xf32>
    %c0_3 = arith.constant 0 : index
    %c0_4 = arith.constant 0 : index
    %3 = vector.load %arg3[%c0_3, %c0_4] : memref<1x16xf32, #tpu.memory_space<vmem>>, vector<1x16xf32>
    %4 = vector.broadcast %3 : vector<1x16xf32> to vector<128x16xf32>
    %5 = arith.addf %2, %4 : vector<128x16xf32>
    %cst_5 = arith.constant 0.000000e+00 : f32
    %6 = vector.broadcast %cst_5 : f32 to vector<128x16xf32>
    %7 = arith.maximumf %5, %6 : vector<128x16xf32>
    %8 = arith.truncf %7 : vector<128x16xf32> to vector<128x16xbf16>
    %c0_6 = arith.constant 0 : index
    %c0_7 = arith.constant 0 : index
    %9 = vector.load %arg4[%c0_6, %c0_7] : memref<128x16xbf16, #tpu.memory_space<vmem>>, vector<128x16xbf16>
    tpu.vector_store %arg4[%c0_6, %c0_7], %8 {strides = array<i32>} : memref<128x16xbf16, #tpu.memory_space<vmem>>, vector<128x16xbf16>,
    return
  }
  func.func @transform_0(%arg0: i32) -> (i32, i32) {
    %c0_i32 = arith.constant 0 : i32
    %c0_i32_0 = arith.constant 0 : i32
    return %arg0, %c0_i32 : i32, i32
  }
  func.func @transform_1(%arg0: i32) -> (i32, i32) {
    %c0_i32 = arith.constant 0 : i32
    %c0_i32_0 = arith.constant 0 : i32
    %c0_i32_1 = arith.constant 0 : i32
    return %c0_i32, %c0_i32_0 : i32, i32
  }
  func.func @transform_2(%arg0: i32) -> (i32, i32) {
    %c0_i32 = arith.constant 0 : i32
    %c0_i32_0 = arith.constant 0 : i32
    %c0_i32_1 = arith.constant 0 : i32
    return %c0_i32, %c0_i32_0 : i32, i32
  }
  func.func @transform_3(%arg0: i32) -> (i32, i32) {
    %c0_i32 = arith.constant 0 : i32
    %c0_i32_0 = arith.constant 0 : i32
    return %arg0, %c0_i32 : i32, i32
  }
}

module attributes {stable_mosaic.version = 11 : i64} {
  func.func @_mm_kernel(%arg0: i32, %arg1: memref<128x432xbf16, #tpu.memory_space<vmem>>, %arg2: memref<432x16xbf16, #tpu.memory_space<vmem>>, %arg3: memref<1x16xf32, #tpu.memory_space<vmem>>, %arg4: memref<128x16xbf16, #tpu.memory_space<vmem>>) attributes {dimension_semantics = [#tpu.dimension_semantics<parallel>], iteration_bounds = array<i64: 1>, scalar_prefetch = 0 : i64, scratch_operands = 0 : i64, tpu.core_type = #tpu.core_type<tc>, window_params = [{transform_indices = @transform_0, window_bounds = array<i64: 128, 432>}, {pipeline_mode = #tpu.pipeline_mode<synchronous>, transform_indices = @transform_1, window_bounds = array<i64: 432, 16>}, {pipeline_mode = #tpu.pipeline_mode<synchronous>, transform_indices = @transform_2, window_bounds = array<i64: 1, 16>}, {transform_indices = @transform_3, window_bounds = array<i64: 128, 16>}]} {
    %c0 = arith.constant 0 : index
    %c0_0 = arith.constant 0 : index
    %0 = vector.load %arg1[%c0, %c0_0] : memref<128x432xbf16, #tpu.memory_space<vmem>>, vector<128x432xbf16>
    %c0_1 = arith.constant 0 : index
    %c0_2 = arith.constant 0 : index
    %1 = vector.load %arg2[%c0_1, %c0_2] : memref<432x16xbf16, #tpu.memory_space<vmem>>, vector<432x16xbf16>
    %cst = arith.constant dense<0.000000e+00> : vector<128x16xf32>
    %2 = tpu.matmul %0, %1, %cst {dimension_numbers = #tpu.dot_dimension_numbers<[1], [0], [0], [1], [0, 0, 1, 1], [], []>} : vector<128x432xbf16>, vector<432x16xbf16>, vector<128x16xf32> -> vector<128x16xf32>
    %c0_3 = arith.constant 0 : index
    %c0_4 = arith.constant 0 : index
    %3 = vector.load %arg3[%c0_3, %c0_4] : memref<1x16xf32, #tpu.memory_space<vmem>>, vector<1x16xf32>
    %4 = vector.broadcast %3 : vector<1x16xf32> to vector<128x16xf32>
    %5 = arith.addf %2, %4 : vector<128x16xf32>
    %cst_5 = arith.constant 0.000000e+00 : f32
    %6 = vector.broadcast %cst_5 : f32 to vector<128x16xf32>
    %7 = arith.maximumf %5, %6 : vector<128x16xf32>
    %8 = arith.truncf %7 : vector<128x16xf32> to vector<128x16xbf16>
    %c0_6 = arith.constant 0 : index
    %c0_7 = arith.constant 0 : index
    %9 = vector.load %arg4[%c0_6, %c0_7] : memref<128x16xbf16, #tpu.memory_space<vmem>>, vector<128x16xbf16>
    tpu.vector_store %arg4[%c0_6, %c0_7], %8 {strides = array<i32>} : memref<128x16xbf16, #tpu.memory_space<vmem>>, vector<128x16xbf16>,
    return
  }
  func.func @transform_0(%arg0: i32) -> (i32, i32) {
    %c0_i32 = arith.constant 0 : i32
    %c0_i32_0 = arith.constant 0 : i32
    return %arg0, %c0_i32 : i32, i32
  }
  func.func @transform_1(%arg0: i32) -> (i32, i32) {
    %c0_i32 = arith.constant 0 : i32
    %c0_i32_0 = arith.constant 0 : i32
    %c0_i32_1 = arith.constant 0 : i32
    return %c0_i32, %c0_i32_0 : i32, i32
  }
  func.func @transform_2(%arg0: i32) -> (i32, i32) {
    %c0_i32 = arith.constant 0 : i32
    %c0_i32_0 = arith.constant 0 : i32
    %c0_i32_1 = arith.constant 0 : i32
    return %c0_i32, %c0_i32_0 : i32, i32
  }
  func.func @transform_3(%arg0: i32) -> (i32, i32) {
    %c0_i32 = arith.constant 0 : i32
    %c0_i32_0 = arith.constant 0 : i32
    return %arg0, %c0_i32 : i32, i32
  }
}

module attributes {stable_mosaic.version = 11 : i64} {
  func.func @_mm_dual_kernel(%arg0: i32, %arg1: memref<32x576xbf16, #tpu.memory_space<vmem>>, %arg2: memref<576x32xbf16, #tpu.memory_space<vmem>>, %arg3: memref<1x32xf32, #tpu.memory_space<vmem>>, %arg4: memref<32x32xf32, #tpu.memory_space<vmem>>, %arg5: memref<32x32xbf16, #tpu.memory_space<vmem>>) attributes {dimension_semantics = [#tpu.dimension_semantics<parallel>], iteration_bounds = array<i64: 1>, scalar_prefetch = 0 : i64, scratch_operands = 0 : i64, tpu.core_type = #tpu.core_type<tc>, window_params = [{transform_indices = @transform_0, window_bounds = array<i64: 32, 576>}, {pipeline_mode = #tpu.pipeline_mode<synchronous>, transform_indices = @transform_1, window_bounds = array<i64: 576, 32>}, {pipeline_mode = #tpu.pipeline_mode<synchronous>, transform_indices = @transform_2, window_bounds = array<i64: 1, 32>}, {transform_indices = @transform_3, window_bounds = array<i64: 32, 32>}, {transform_indices = @transform_4, window_bounds = array<i64: 32, 32>}]} {
    %c0 = arith.constant 0 : index
    %c0_0 = arith.constant 0 : index
    %0 = vector.load %arg1[%c0, %c0_0] : memref<32x576xbf16, #tpu.memory_space<vmem>>, vector<32x576xbf16>
    %c0_1 = arith.constant 0 : index
    %c0_2 = arith.constant 0 : index
    %1 = vector.load %arg2[%c0_1, %c0_2] : memref<576x32xbf16, #tpu.memory_space<vmem>>, vector<576x32xbf16>
    %cst = arith.constant dense<0.000000e+00> : vector<32x32xf32>
    %2 = tpu.matmul %0, %1, %cst {dimension_numbers = #tpu.dot_dimension_numbers<[1], [0], [0], [1], [0, 0, 1, 1], [], []>} : vector<32x576xbf16>, vector<576x32xbf16>, vector<32x32xf32> -> vector<32x32xf32>
    %c0_3 = arith.constant 0 : index
    %c0_4 = arith.constant 0 : index
    %3 = vector.load %arg3[%c0_3, %c0_4] : memref<1x32xf32, #tpu.memory_space<vmem>>, vector<1x32xf32>
    %4 = vector.broadcast %3 : vector<1x32xf32> to vector<32x32xf32>
    %5 = arith.addf %2, %4 : vector<32x32xf32>
    %c0_5 = arith.constant 0 : index
    %c0_6 = arith.constant 0 : index
    %6 = vector.load %arg4[%c0_5, %c0_6] : memref<32x32xf32, #tpu.memory_space<vmem>>, vector<32x32xf32>
    tpu.vector_store %arg4[%c0_5, %c0_6], %5 {strides = array<i32>} : memref<32x32xf32, #tpu.memory_space<vmem>>, vector<32x32xf32>,
    %cst_7 = arith.constant 0.000000e+00 : f32
    %7 = vector.broadcast %cst_7 : f32 to vector<32x32xf32>
    %8 = arith.maximumf %5, %7 : vector<32x32xf32>
    %9 = arith.truncf %8 : vector<32x32xf32> to vector<32x32xbf16>
    %c0_8 = arith.constant 0 : index
    %c0_9 = arith.constant 0 : index
    %10 = vector.load %arg5[%c0_8, %c0_9] : memref<32x32xbf16, #tpu.memory_space<vmem>>, vector<32x32xbf16>
    tpu.vector_store %arg5[%c0_8, %c0_9], %9 {strides = array<i32>} : memref<32x32xbf16, #tpu.memory_space<vmem>>, vector<32x32xbf16>,
    return
  }
  func.func @transform_0(%arg0: i32) -> (i32, i32) {
    %c0_i32 = arith.constant 0 : i32
    %c0_i32_0 = arith.constant 0 : i32
    return %arg0, %c0_i32 : i32, i32
  }
  func.func @transform_1(%arg0: i32) -> (i32, i32) {
    %c0_i32 = arith.constant 0 : i32
    %c0_i32_0 = arith.constant 0 : i32
    %c0_i32_1 = arith.constant 0 : i32
    return %c0_i32, %c0_i32_0 : i32, i32
  }
  func.func @transform_2(%arg0: i32) -> (i32, i32) {
    %c0_i32 = arith.constant 0 : i32
    %c0_i32_0 = arith.constant 0 : i32
    %c0_i32_1 = arith.constant 0 : i32
    return %c0_i32, %c0_i32_0 : i32, i32
  }
  func.func @transform_3(%arg0: i32) -> (i32, i32) {
    %c0_i32 = arith.constant 0 : i32
    %c0_i32_0 = arith.constant 0 : i32
    return %arg0, %c0_i32 : i32, i32
  }
  func.func @transform_4(%arg0: i32) -> (i32, i32) {
    %c0_i32 = arith.constant 0 : i32
    %c0_i32_0 = arith.constant 0 : i32
    return %arg0, %c0_i32 : i32, i32
  }
}

module attributes {stable_mosaic.version = 11 : i64} {
  func.func @_mm_dual_kernel(%arg0: i32, %arg1: memref<32x864xbf16, #tpu.memory_space<vmem>>, %arg2: memref<864x32xbf16, #tpu.memory_space<vmem>>, %arg3: memref<1x32xf32, #tpu.memory_space<vmem>>, %arg4: memref<32x32xf32, #tpu.memory_space<vmem>>, %arg5: memref<32x32xbf16, #tpu.memory_space<vmem>>) attributes {dimension_semantics = [#tpu.dimension_semantics<parallel>], iteration_bounds = array<i64: 1>, scalar_prefetch = 0 : i64, scratch_operands = 0 : i64, tpu.core_type = #tpu.core_type<tc>, window_params = [{transform_indices = @transform_0, window_bounds = array<i64: 32, 864>}, {pipeline_mode = #tpu.pipeline_mode<synchronous>, transform_indices = @transform_1, window_bounds = array<i64: 864, 32>}, {pipeline_mode = #tpu.pipeline_mode<synchronous>, transform_indices = @transform_2, window_bounds = array<i64: 1, 32>}, {transform_indices = @transform_3, window_bounds = array<i64: 32, 32>}, {transform_indices = @transform_4, window_bounds = array<i64: 32, 32>}]} {
    %c0 = arith.constant 0 : index
    %c0_0 = arith.constant 0 : index
    %0 = vector.load %arg1[%c0, %c0_0] : memref<32x864xbf16, #tpu.memory_space<vmem>>, vector<32x864xbf16>
    %c0_1 = arith.constant 0 : index
    %c0_2 = arith.constant 0 : index
    %1 = vector.load %arg2[%c0_1, %c0_2] : memref<864x32xbf16, #tpu.memory_space<vmem>>, vector<864x32xbf16>
    %cst = arith.constant dense<0.000000e+00> : vector<32x32xf32>
    %2 = tpu.matmul %0, %1, %cst {dimension_numbers = #tpu.dot_dimension_numbers<[1], [0], [0], [1], [0, 0, 1, 1], [], []>} : vector<32x864xbf16>, vector<864x32xbf16>, vector<32x32xf32> -> vector<32x32xf32>
    %c0_3 = arith.constant 0 : index
    %c0_4 = arith.constant 0 : index
    %3 = vector.load %arg3[%c0_3, %c0_4] : memref<1x32xf32, #tpu.memory_space<vmem>>, vector<1x32xf32>
    %4 = vector.broadcast %3 : vector<1x32xf32> to vector<32x32xf32>
    %5 = arith.addf %2, %4 : vector<32x32xf32>
    %c0_5 = arith.constant 0 : index
    %c0_6 = arith.constant 0 : index
    %6 = vector.load %arg4[%c0_5, %c0_6] : memref<32x32xf32, #tpu.memory_space<vmem>>, vector<32x32xf32>
    tpu.vector_store %arg4[%c0_5, %c0_6], %5 {strides = array<i32>} : memref<32x32xf32, #tpu.memory_space<vmem>>, vector<32x32xf32>,
    %cst_7 = arith.constant 0.000000e+00 : f32
    %7 = vector.broadcast %cst_7 : f32 to vector<32x32xf32>
    %8 = arith.maximumf %5, %7 : vector<32x32xf32>
    %9 = arith.truncf %8 : vector<32x32xf32> to vector<32x32xbf16>
    %c0_8 = arith.constant 0 : index
    %c0_9 = arith.constant 0 : index
    %10 = vector.load %arg5[%c0_8, %c0_9] : memref<32x32xbf16, #tpu.memory_space<vmem>>, vector<32x32xbf16>
    tpu.vector_store %arg5[%c0_8, %c0_9], %9 {strides = array<i32>} : memref<32x32xbf16, #tpu.memory_space<vmem>>, vector<32x32xbf16>,
    return
  }
  func.func @transform_0(%arg0: i32) -> (i32, i32) {
    %c0_i32 = arith.constant 0 : i32
    %c0_i32_0 = arith.constant 0 : i32
    return %arg0, %c0_i32 : i32, i32
  }
  func.func @transform_1(%arg0: i32) -> (i32, i32) {
    %c0_i32 = arith.constant 0 : i32
    %c0_i32_0 = arith.constant 0 : i32
    %c0_i32_1 = arith.constant 0 : i32
    return %c0_i32, %c0_i32_0 : i32, i32
  }
  func.func @transform_2(%arg0: i32) -> (i32, i32) {
    %c0_i32 = arith.constant 0 : i32
    %c0_i32_0 = arith.constant 0 : i32
    %c0_i32_1 = arith.constant 0 : i32
    return %c0_i32, %c0_i32_0 : i32, i32
  }
  func.func @transform_3(%arg0: i32) -> (i32, i32) {
    %c0_i32 = arith.constant 0 : i32
    %c0_i32_0 = arith.constant 0 : i32
    return %arg0, %c0_i32 : i32, i32
  }
  func.func @transform_4(%arg0: i32) -> (i32, i32) {
    %c0_i32 = arith.constant 0 : i32
    %c0_i32_0 = arith.constant 0 : i32
    return %arg0, %c0_i32 : i32, i32
  }
}

</mosaic_0001>

<bundles_post_ra>
// kernel: _lambda_.12
= control target key start
LH: loop header
LB: loop body
LE: loop exit
PB: predicated region body
PF: predicated region fallthrough
CT: control target
= control target key end

     0   :  { %vm270_vm0 = vcmask 392192   ;;  %vm976_vm1 = vcmask 125952   ;;  %s1869_s1 = inlined_call_operand.vmem [shape: bf16[48,16], index: 1, kind: input, shape index: {}]   ;;  %s1870_s0 = inlined_call_operand.vmem [shape: bf16[512,48], index: 0, kind: input, shape index: {}]   ;;  %s1871_s2 = inlined_call_operand.vmem [shape: f32[1,16], index: 2, kind: input, shape index: {}]   ;;  %s1872_s3 = inlined_call_operand.vmem [shape: bf16[512,16], index: 3, kind: output, shape index: {}]  }
   0x1   :  { %v1352_v0 = vld [vmem:[%s1869_s1 + $0x10] sm:$0xff]   ;;  %v1353_v1 = vld [vmem:[%s1869_s1 + $0x8] sm:$0xff]   ;;  %v1354_v2 = vld [vmem:[%s1869_s1] sm:$0xff]  }
   0x2   :  { %1276 = vmatprep.subr.bf16.mxu0 %v1352_v0  ;;  %1346 = vmatprep.subr.bf16.mxu1 %v1352_v0  ;;  %v1355_v3 = vld [vmem:[%s1870_s0] sm:$0xff]   ;;  %v1357_v5 = vld [vmem:[%s1870_s0 + $0x8] sm:$0xff]   ;;  %v1359_v7 = vld [vmem:[%s1870_s0 + $0x10] sm:$0xff]  }
   0x3   :  { %1277 = vmatpush3.bf16.msra.mxu0 %v1352_v0  ;;  %1349 = vmatpush3.bf16.msra.mxu1 %v1352_v0  ;;  %v1356_v4 = vld [vmem:[%s1870_s0 + $0x80] sm:$0xff]   ;;  %v1358_v6 = vld [vmem:[%s1870_s0 + $0x88] sm:$0xff]   ;;  %v1360_v8 = vld [vmem:[%s1870_s0 + $0x90] sm:$0xff]  }
   0x4   :  { %1278 = vmatprep.subr.bf16.mxu0 %v1353_v1  ;;  %1347 = vmatprep.subr.bf16.mxu1 %v1353_v1  ;;  %v1361_v9 = vld [vmem:[%s1870_s0 + $0x18] sm:$0xff]   ;;  %v1363_v11 = vld [vmem:[%s1870_s0 + $0x20] sm:$0xff]   ;;  %v1365_v13 = vld [vmem:[%s1870_s0 + $0x28] sm:$0xff]  }
   0x5   :  { %1282 = vmatprep.mubr.msk.bf16.mxu0 %vm270_vm0, %v1355_v3  ;;  %1314 = vmatprep.mubr.msk.bf16.mxu1 %vm270_vm0, %v1356_v4  ;;  %v1362_v10 = vld [vmem:[%s1870_s0 + $0x98] sm:$0xff]   ;;  %v1364_v12 = vld [vmem:[%s1870_s0 + $0xa0] sm:$0xff]   ;;  %v1366_v14 = vld [vmem:[%s1870_s0 + $0xa8] sm:$0xff]  }
   0x6   :  { %v1367_v15 = vld [vmem:[%s1870_s0 + $0x30] sm:$0xff]   ;;  %v1369_v17 = vld [vmem:[%s1870_s0 + $0x38] sm:$0xff]   ;;  %v1371_v19 = vld [vmem:[%s1870_s0 + $0x40] sm:$0xff]  }
   0x7   :  { %1279 = vmatpush3.bf16.msra.mxu0 %v1353_v1  ;;  %1350 = vmatpush3.bf16.msra.mxu1 %v1353_v1  ;;  %v1368_v16 = vld [vmem:[%s1870_s0 + $0xb0] sm:$0xff]   ;;  %v1370_v18 = vld [vmem:[%s1870_s0 + $0xb8] sm:$0xff]   ;;  %v1372_v20 = vld [vmem:[%s1870_s0 + $0xc0] sm:$0xff]  }
   0x8   :  { %1280 = vmatprep.subr.bf16.mxu0 %v1354_v2  ;;  %1348 = vmatprep.subr.bf16.mxu1 %v1354_v2  ;;  %v1373_v21 = vld [vmem:[%s1870_s0 + $0x48] sm:$0xff]   ;;  %v1375_v23 = vld [vmem:[%s1870_s0 + $0x50] sm:$0xff]   ;;  %v1377_v25 = vld [vmem:[%s1870_s0 + $0x58] sm:$0xff]  }
   0x9   :  { %v1374_v22 = vld [vmem:[%s1870_s0 + $0xc8] sm:$0xff]   ;;  %v1376_v24 = vld [vmem:[%s1870_s0 + $0xd0] sm:$0xff]   ;;  %v1378_v26 = vld [vmem:[%s1870_s0 + $0xd8] sm:$0xff]  }
   0xa   :  { %v1379_v27 = vld [vmem:[%s1870_s0 + $0x60] sm:$0xff]   ;;  %v1381_v29 = vld [vmem:[%s1870_s0 + $0x68] sm:$0xff]   ;;  %v1383_v31 = vld [vmem:[%s1870_s0 + $0x70] sm:$0xff]  }
   0xb   :  { %1281 = vmatpush3.bf16.msra.mxu0 %v1354_v2  ;;  %1351 = vmatpush3.bf16.msra.mxu1 %v1354_v2  ;;  %v1380_v28 = vld [vmem:[%s1870_s0 + $0xe0] sm:$0xff]   ;;  %v1382_v30 = vld [vmem:[%s1870_s0 + $0xe8] sm:$0xff]   ;;  %v1384_v32 = vld [vmem:[%s1870_s0 + $0xf0] sm:$0xff]  }
   0xc   :  { %v1385_v33 = vld [vmem:[%s1870_s0 + $0x78] sm:$0xff]   ;;  %v1547_v35 = vld [vmem:[%s1871_s2] ss:$0 sm:$0xff] }
   0xd   :  { %v1386_v34 = vld [vmem:[%s1870_s0 + $0xf8] sm:$0xff]  }
   0xe   :  { %1283 = vmatmul.mubr.msk.bf16.vlgmr.msra.gmra.mxu0 %vm270_vm0, %v1357_v5  ;;  %1315 = vmatmul.mubr.msk.bf16.vlgmr.msra.gmra.mxu1 %vm270_vm0, %v1358_v6 }
   0xf   :  { %1286 = vmatprep.mubr.msk.bf16.mxu0 %vm270_vm0, %v1359_v7  ;;  %1318 = vmatprep.mubr.msk.bf16.mxu1 %vm270_vm0, %v1360_v8 }
  0x16   :  { %1287 = vmatmul.mubr.msk.bf16.gmra.mxu0 %vm270_vm0, %v1361_v9  ;;  %1319 = vmatmul.mubr.msk.bf16.gmra.mxu1 %vm270_vm0, %v1362_v10 }
  0x17   :  { %1290 = vmatprep.mubr.msk.bf16.mxu0 %vm270_vm0, %v1363_v11  ;;  %1322 = vmatprep.mubr.msk.bf16.mxu1 %vm270_vm0, %v1364_v12 }
  0x1e   :  { %1291 = vmatmul.mubr.msk.bf16.gmra.mxu0 %vm270_vm0, %v1365_v13  ;;  %1323 = vmatmul.mubr.msk.bf16.gmra.mxu1 %vm270_vm0, %v1366_v14 }
  0x1f   :  { %1294 = vmatprep.mubr.msk.bf16.mxu0 %vm270_vm0, %v1367_v15  ;;  %1326 = vmatprep.mubr.msk.bf16.mxu1 %vm270_vm0, %v1368_v16 }
  0x26   :  { %1295 = vmatmul.mubr.msk.bf16.gmra.mxu0 %vm270_vm0, %v1369_v17  ;;  %1327 = vmatmul.mubr.msk.bf16.gmra.mxu1 %vm270_vm0, %v1370_v18 }
  0x27   :  { %1298 = vmatprep.mubr.msk.bf16.mxu0 %vm270_vm0, %v1371_v19  ;;  %1330 = vmatprep.mubr.msk.bf16.mxu1 %vm270_vm0, %v1372_v20 }
  0x2e   :  { %1299 = vmatmul.mubr.msk.bf16.gmra.mxu0 %vm270_vm0, %v1373_v21  ;;  %1331 = vmatmul.mubr.msk.bf16.gmra.mxu1 %vm270_vm0, %v1374_v22 }
  0x2f   :  { %1302 = vmatprep.mubr.msk.bf16.mxu0 %vm270_vm0, %v1375_v23  ;;  %1334 = vmatprep.mubr.msk.bf16.mxu1 %vm270_vm0, %v1376_v24 }
  0x36   :  { %1303 = vmatmul.mubr.msk.bf16.gmra.mxu0 %vm270_vm0, %v1377_v25  ;;  %1335 = vmatmul.mubr.msk.bf16.gmra.mxu1 %vm270_vm0, %v1378_v26 }
  0x37   :  { %1306 = vmatprep.mubr.msk.bf16.mxu0 %vm270_vm0, %v1379_v27  ;;  %1338 = vmatprep.mubr.msk.bf16.mxu1 %vm270_vm0, %v1380_v28 }
  0x3e   :  { %1307 = vmatmul.mubr.msk.bf16.gmra.mxu0 %vm270_vm0, %v1381_v29  ;;  %1339 = vmatmul.mubr.msk.bf16.gmra.mxu1 %vm270_vm0, %v1382_v30 }
  0x3f   :  { %1310 = vmatprep.mubr.msk.bf16.mxu0 %vm270_vm0, %v1383_v31  ;;  %1342 = vmatprep.mubr.msk.bf16.mxu1 %vm270_vm0, %v1384_v32 }
  0x46   :  { %1311 = vmatmul.mubr.msk.bf16.gmra.mxu0 %vm270_vm0, %v1385_v33  ;;  %1343 = vmatmul.mubr.msk.bf16.gmra.mxu1 %vm270_vm0, %v1386_v34 }
  0xce   :  { %v1284_v36 = vpop.f32.mrf.mxu0  ;;  %v1316_v37 = vpop.f32.mrf.mxu1 }
  0xcf   :  { %v410_v38 = vadd.f32 %v1284_v36, %v1547_v35  ;;  %v538_v39 = vadd.f32 %v1316_v37, %v1547_v35 }
  0xd0   :  { %v401_v40 = vpop.f32.mrf.mxu0  ;;  %v529_v41 = vpop.f32.mrf.mxu1 }
  0xd1   :  { %v658_v42 = vmax.f32 %v410_v38, 0.0  ;;  %v690_v43 = vmax.f32 %v538_v39, 0.0  ;;  %v402_v44 = vadd.f32 %v1547_v35, %v401_v40  ;;  %v530_v45 = vadd.f32 %v1547_v35, %v529_v41 }
  0xd2   :  { %v1285_v46 = vpop.f32.mrf.mxu0  ;;  %v1317_v47 = vpop.f32.mrf.mxu1 }
  0xd3   :  { %v1179_v48 = vpack.c.bf16 %v658_v42, %v658_v42  ;;  %v1211_v49 = vpack.c.bf16 %v690_v43, %v690_v43  ;;  %v656_v50 = vmax.f32 %v402_v44, 0.0  ;;  %v688_v51 = vmax.f32 %v530_v45, 0.0 }
  0xd4   :  { %v413_v52 = vadd.f32 %v1285_v46, %v1547_v35  ;;  %v541_v53 = vadd.f32 %v1317_v47, %v1547_v35  ;;  %v404_v54 = vpop.f32.mrf.mxu0  ;;  %v532_v55 = vpop.f32.mrf.mxu1 }
  0xd5   :  { %979 = vst.msk [vmem:[%s1872_s3 + $0x8] sm:$0xf] %vm976_vm1, %v1179_v48  ;;  %1011 = vst.msk [vmem:[%s1872_s3 + $0x88] sm:$0xf] %vm976_vm1, %v1211_v49  ;;  %v1177_v56 = vpack.c.bf16 %v656_v50, %v656_v50  ;;  %v1209_v57 = vpack.c.bf16 %v688_v51, %v688_v51  ;;  %v405_v58 = vadd.f32 %v1547_v35, %v404_v54 }
  0xd6   :  { %v533_v59 = vadd.f32 %v1547_v35, %v532_v55  ;;  %v659_v60 = vmax.f32 %v413_v52, 0.0  ;;  %v691_v61 = vmax.f32 %v541_v53, 0.0  ;;  %v1288_v62 = vpop.f32.mrf.mxu0  ;;  %v1320_v63 = vpop.f32.mrf.mxu1 }
  0xd7   :  { %977 = vst.msk [vmem:[%s1872_s3] sm:$0xf] %vm976_vm1, %v1177_v56  ;;  %1009 = vst.msk [vmem:[%s1872_s3 + $0x80] sm:$0xf] %vm976_vm1, %v1209_v57  ;;  %v657_v0 = vmax.f32 %v405_v58, 0.0  ;;  %v426_v2 = vadd.f32 %v1288_v62, %v1547_v35  ;;  %v554_v3 = vadd.f32 %v1320_v63, %v1547_v35 }
  0xd8   :  { %v689_v1 = vmax.f32 %v533_v59, 0.0  ;;  %v1180_v4 = vpack.c.bf16 %v659_v60, %v659_v60  ;;  %v1212_v5 = vpack.c.bf16 %v691_v61, %v691_v61  ;;  %v417_v6 = vpop.f32.mrf.mxu0  ;;  %v545_v7 = vpop.f32.mrf.mxu1 }
  0xd9   :  { %v1178_v8 = vpack.c.bf16 %v657_v0, %v657_v0  ;;  %v662_v10 = vmax.f32 %v426_v2, 0.0  ;;  %v694_v11 = vmax.f32 %v554_v3, 0.0  ;;  %v418_v12 = vadd.f32 %v1547_v35, %v417_v6 }
  0xda   :  { %v1210_v9 = vpack.c.bf16 %v689_v1, %v689_v1  ;;  %980 = vst.msk [vmem:[%s1872_s3 + $0xc] sm:$0xf] %vm976_vm1, %v1180_v4  ;;  %1012 = vst.msk [vmem:[%s1872_s3 + $0x8c] sm:$0xf] %vm976_vm1, %v1212_v5  ;;  %v546_v13 = vadd.f32 %v1547_v35, %v545_v7  ;;  %v1289_v14 = vpop.f32.mrf.mxu0  ;;  %v1321_v15 = vpop.f32.mrf.mxu1 }
  0xdb   :  { %978 = vst.msk [vmem:[%s1872_s3 + $0x4] sm:$0xf] %vm976_vm1, %v1178_v8  ;;  %v1183_v16 = vpack.c.bf16 %v662_v10, %v662_v10  ;;  %v1215_v17 = vpack.c.bf16 %v694_v11, %v694_v11  ;;  %v429_v18 = vadd.f32 %v1289_v14, %v1547_v35  ;;  %v557_v19 = vadd.f32 %v1321_v15, %v1547_v35 }
  0xdc   :  { %1010 = vst.msk [vmem:[%s1872_s3 + $0x84] sm:$0xf] %vm976_vm1, %v1210_v9  ;;  %v660_v20 = vmax.f32 %v418_v12, 0.0  ;;  %v692_v21 = vmax.f32 %v546_v13, 0.0  ;;  %v420_v22 = vpop.f32.mrf.mxu0  ;;  %v548_v23 = vpop.f32.mrf.mxu1 }
  0xdd   :  { %983 = vst.msk [vmem:[%s1872_s3 + $0x18] sm:$0xf] %vm976_vm1, %v1183_v16  ;;  %1015 = vst.msk [vmem:[%s1872_s3 + $0x98] sm:$0xf] %vm976_vm1, %v1215_v17  ;;  %v663_v24 = vmax.f32 %v429_v18, 0.0  ;;  %v695_v25 = vmax.f32 %v557_v19, 0.0  ;;  %v421_v26 = vadd.f32 %v1547_v35, %v420_v22  ;;  %v549_v27 = vadd.f32 %v1547_v35, %v548_v23 }
  0xde   :  { %v1181_v28 = vpack.c.bf16 %v660_v20, %v660_v20  ;;  %v1213_v29 = vpack.c.bf16 %v692_v21, %v692_v21  ;;  %v1292_v30 = vpop.f32.mrf.mxu0  ;;  %v1324_v31 = vpop.f32.mrf.mxu1 }
  0xdf   :  { %v1184_v32 = vpack.c.bf16 %v663_v24, %v663_v24  ;;  %v1216_v33 = vpack.c.bf16 %v695_v25, %v695_v25  ;;  %v661_v34 = vmax.f32 %v421_v26, 0.0  ;;  %v693_v36 = vmax.f32 %v549_v27, 0.0 }
  0xe0   :  { %981 = vst.msk [vmem:[%s1872_s3 + $0x10] sm:$0xf] %vm976_vm1, %v1181_v28  ;;  %1013 = vst.msk [vmem:[%s1872_s3 + $0x90] sm:$0xf] %vm976_vm1, %v1213_v29  ;;  %v442_v37 = vadd.f32 %v1292_v30, %v1547_v35  ;;  %v570_v38 = vadd.f32 %v1324_v31, %v1547_v35  ;;  %v433_v39 = vpop.f32.mrf.mxu0  ;;  %v561_v40 = vpop.f32.mrf.mxu1 }
  0xe1   :  { %984 = vst.msk [vmem:[%s1872_s3 + $0x1c] sm:$0xf] %vm976_vm1, %v1184_v32  ;;  %1016 = vst.msk [vmem:[%s1872_s3 + $0x9c] sm:$0xf] %vm976_vm1, %v1216_v33  ;;  %v1182_v41 = vpack.c.bf16 %v661_v34, %v661_v34  ;;  %v1214_v42 = vpack.c.bf16 %v693_v36, %v693_v36  ;;  %v434_v43 = vadd.f32 %v1547_v35, %v433_v39 }
  0xe2   :  { %v562_v44 = vadd.f32 %v1547_v35, %v561_v40  ;;  %v666_v45 = vmax.f32 %v442_v37, 0.0  ;;  %v698_v46 = vmax.f32 %v570_v38, 0.0  ;;  %v1293_v47 = vpop.f32.mrf.mxu0  ;;  %v1325_v48 = vpop.f32.mrf.mxu1 }
  0xe3   :  { %982 = vst.msk [vmem:[%s1872_s3 + $0x14] sm:$0xf] %vm976_vm1, %v1182_v41  ;;  %1014 = vst.msk [vmem:[%s1872_s3 + $0x94] sm:$0xf] %vm976_vm1, %v1214_v42  ;;  %v664_v49 = vmax.f32 %v434_v43, 0.0  ;;  %v445_v51 = vadd.f32 %v1293_v47, %v1547_v35  ;;  %v573_v52 = vadd.f32 %v1325_v48, %v1547_v35 }
  0xe4   :  { %v696_v50 = vmax.f32 %v562_v44, 0.0  ;;  %v1187_v53 = vpack.c.bf16 %v666_v45, %v666_v45  ;;  %v1219_v54 = vpack.c.bf16 %v698_v46, %v698_v46  ;;  %v436_v55 = vpop.f32.mrf.mxu0  ;;  %v564_v56 = vpop.f32.mrf.mxu1 }
  0xe5   :  { %v1185_v57 = vpack.c.bf16 %v664_v49, %v664_v49  ;;  %v667_v59 = vmax.f32 %v445_v51, 0.0  ;;  %v699_v60 = vmax.f32 %v573_v52, 0.0  ;;  %v437_v61 = vadd.f32 %v1547_v35, %v436_v55 }
  0xe6   :  { %v1217_v58 = vpack.c.bf16 %v696_v50, %v696_v50  ;;  %987 = vst.msk [vmem:[%s1872_s3 + $0x28] sm:$0xf] %vm976_vm1, %v1187_v53  ;;  %1019 = vst.msk [vmem:[%s1872_s3 + $0xa8] sm:$0xf] %vm976_vm1, %v1219_v54  ;;  %v565_v62 = vadd.f32 %v1547_v35, %v564_v56  ;;  %v1296_v63 = vpop.f32.mrf.mxu0  ;;  %v1328_v0 = vpop.f32.mrf.mxu1 }
  0xe7   :  { %985 = vst.msk [vmem:[%s1872_s3 + $0x20] sm:$0xf] %vm976_vm1, %v1185_v57  ;;  %v1188_v1 = vpack.c.bf16 %v667_v59, %v667_v59  ;;  %v1220_v2 = vpack.c.bf16 %v699_v60, %v699_v60  ;;  %v458_v3 = vadd.f32 %v1296_v63, %v1547_v35  ;;  %v586_v4 = vadd.f32 %v1328_v0, %v1547_v35 }
  0xe8   :  { %1017 = vst.msk [vmem:[%s1872_s3 + $0xa0] sm:$0xf] %vm976_vm1, %v1217_v58  ;;  %v665_v5 = vmax.f32 %v437_v61, 0.0  ;;  %v697_v6 = vmax.f32 %v565_v62, 0.0  ;;  %v449_v7 = vpop.f32.mrf.mxu0  ;;  %v577_v8 = vpop.f32.mrf.mxu1 }
  0xe9   :  { %988 = vst.msk [vmem:[%s1872_s3 + $0x2c] sm:$0xf] %vm976_vm1, %v1188_v1  ;;  %1020 = vst.msk [vmem:[%s1872_s3 + $0xac] sm:$0xf] %vm976_vm1, %v1220_v2  ;;  %v670_v9 = vmax.f32 %v458_v3, 0.0  ;;  %v702_v10 = vmax.f32 %v586_v4, 0.0  ;;  %v450_v11 = vadd.f32 %v1547_v35, %v449_v7  ;;  %v578_v12 = vadd.f32 %v1547_v35, %v577_v8 }
  0xea   :  { %v1186_v13 = vpack.c.bf16 %v665_v5, %v665_v5  ;;  %v1218_v14 = vpack.c.bf16 %v697_v6, %v697_v6  ;;  %v1297_v15 = vpop.f32.mrf.mxu0  ;;  %v1329_v16 = vpop.f32.mrf.mxu1 }
  0xeb   :  { %v1191_v17 = vpack.c.bf16 %v670_v9, %v670_v9  ;;  %v1223_v18 = vpack.c.bf16 %v702_v10, %v702_v10  ;;  %v668_v19 = vmax.f32 %v450_v11, 0.0  ;;  %v700_v20 = vmax.f32 %v578_v12, 0.0 }
  0xec   :  { %986 = vst.msk [vmem:[%s1872_s3 + $0x24] sm:$0xf] %vm976_vm1, %v1186_v13  ;;  %1018 = vst.msk [vmem:[%s1872_s3 + $0xa4] sm:$0xf] %vm976_vm1, %v1218_v14  ;;  %v461_v21 = vadd.f32 %v1297_v15, %v1547_v35  ;;  %v589_v22 = vadd.f32 %v1329_v16, %v1547_v35  ;;  %v452_v23 = vpop.f32.mrf.mxu0  ;;  %v580_v24 = vpop.f32.mrf.mxu1 }
  0xed   :  { %991 = vst.msk [vmem:[%s1872_s3 + $0x38] sm:$0xf] %vm976_vm1, %v1191_v17  ;;  %1023 = vst.msk [vmem:[%s1872_s3 + $0xb8] sm:$0xf] %vm976_vm1, %v1223_v18  ;;  %v1189_v25 = vpack.c.bf16 %v668_v19, %v668_v19  ;;  %v1221_v26 = vpack.c.bf16 %v700_v20, %v700_v20  ;;  %v453_v27 = vadd.f32 %v1547_v35, %v452_v23 }
  0xee   :  { %v581_v28 = vadd.f32 %v1547_v35, %v580_v24  ;;  %v671_v29 = vmax.f32 %v461_v21, 0.0  ;;  %v703_v30 = vmax.f32 %v589_v22, 0.0  ;;  %v1300_v31 = vpop.f32.mrf.mxu0  ;;  %v1332_v32 = vpop.f32.mrf.mxu1 }
  0xef   :  { %989 = vst.msk [vmem:[%s1872_s3 + $0x30] sm:$0xf] %vm976_vm1, %v1189_v25  ;;  %1021 = vst.msk [vmem:[%s1872_s3 + $0xb0] sm:$0xf] %vm976_vm1, %v1221_v26  ;;  %v669_v33 = vmax.f32 %v453_v27, 0.0  ;;  %v474_v36 = vadd.f32 %v1300_v31, %v1547_v35  ;;  %v602_v37 = vadd.f32 %v1332_v32, %v1547_v35 }
  0xf0   :  { %v701_v34 = vmax.f32 %v581_v28, 0.0  ;;  %v1192_v38 = vpack.c.bf16 %v671_v29, %v671_v29  ;;  %v1224_v39 = vpack.c.bf16 %v703_v30, %v703_v30  ;;  %v465_v40 = vpop.f32.mrf.mxu0  ;;  %v593_v41 = vpop.f32.mrf.mxu1 }
  0xf1   :  { %v1190_v42 = vpack.c.bf16 %v669_v33, %v669_v33  ;;  %v674_v44 = vmax.f32 %v474_v36, 0.0  ;;  %v706_v45 = vmax.f32 %v602_v37, 0.0  ;;  %v466_v46 = vadd.f32 %v1547_v35, %v465_v40 }
  0xf2   :  { %v1222_v43 = vpack.c.bf16 %v701_v34, %v701_v34  ;;  %992 = vst.msk [vmem:[%s1872_s3 + $0x3c] sm:$0xf] %vm976_vm1, %v1192_v38  ;;  %1024 = vst.msk [vmem:[%s1872_s3 + $0xbc] sm:$0xf] %vm976_vm1, %v1224_v39  ;;  %v594_v47 = vadd.f32 %v1547_v35, %v593_v41  ;;  %v1301_v48 = vpop.f32.mrf.mxu0  ;;  %v1333_v49 = vpop.f32.mrf.mxu1 }
  0xf3   :  { %990 = vst.msk [vmem:[%s1872_s3 + $0x34] sm:$0xf] %vm976_vm1, %v1190_v42  ;;  %v1195_v50 = vpack.c.bf16 %v674_v44, %v674_v44  ;;  %v1227_v51 = vpack.c.bf16 %v706_v45, %v706_v45  ;;  %v477_v52 = vadd.f32 %v1301_v48, %v1547_v35  ;;  %v605_v53 = vadd.f32 %v1333_v49, %v1547_v35 }
  0xf4   :  { %1022 = vst.msk [vmem:[%s1872_s3 + $0xb4] sm:$0xf] %vm976_vm1, %v1222_v43  ;;  %v672_v54 = vmax.f32 %v466_v46, 0.0  ;;  %v704_v55 = vmax.f32 %v594_v47, 0.0  ;;  %v468_v56 = vpop.f32.mrf.mxu0  ;;  %v596_v57 = vpop.f32.mrf.mxu1 }
  0xf5   :  { %995 = vst.msk [vmem:[%s1872_s3 + $0x48] sm:$0xf] %vm976_vm1, %v1195_v50  ;;  %1027 = vst.msk [vmem:[%s1872_s3 + $0xc8] sm:$0xf] %vm976_vm1, %v1227_v51  ;;  %v675_v58 = vmax.f32 %v477_v52, 0.0  ;;  %v707_v59 = vmax.f32 %v605_v53, 0.0  ;;  %v469_v60 = vadd.f32 %v1547_v35, %v468_v56  ;;  %v597_v61 = vadd.f32 %v1547_v35, %v596_v57 }
  0xf6   :  { %v1193_v62 = vpack.c.bf16 %v672_v54, %v672_v54  ;;  %v1225_v63 = vpack.c.bf16 %v704_v55, %v704_v55  ;;  %v1304_v0 = vpop.f32.mrf.mxu0  ;;  %v1336_v1 = vpop.f32.mrf.mxu1 }
  0xf7   :  { %v1196_v2 = vpack.c.bf16 %v675_v58, %v675_v58  ;;  %v1228_v3 = vpack.c.bf16 %v707_v59, %v707_v59  ;;  %v673_v4 = vmax.f32 %v469_v60, 0.0  ;;  %v705_v5 = vmax.f32 %v597_v61, 0.0 }
  0xf8   :  { %993 = vst.msk [vmem:[%s1872_s3 + $0x40] sm:$0xf] %vm976_vm1, %v1193_v62  ;;  %1025 = vst.msk [vmem:[%s1872_s3 + $0xc0] sm:$0xf] %vm976_vm1, %v1225_v63  ;;  %v490_v6 = vadd.f32 %v1304_v0, %v1547_v35  ;;  %v618_v7 = vadd.f32 %v1336_v1, %v1547_v35  ;;  %v481_v8 = vpop.f32.mrf.mxu0  ;;  %v609_v9 = vpop.f32.mrf.mxu1 }
  0xf9   :  { %996 = vst.msk [vmem:[%s1872_s3 + $0x4c] sm:$0xf] %vm976_vm1, %v1196_v2  ;;  %1028 = vst.msk [vmem:[%s1872_s3 + $0xcc] sm:$0xf] %vm976_vm1, %v1228_v3  ;;  %v1194_v10 = vpack.c.bf16 %v673_v4, %v673_v4  ;;  %v1226_v11 = vpack.c.bf16 %v705_v5, %v705_v5  ;;  %v482_v12 = vadd.f32 %v1547_v35, %v481_v8 }
  0xfa   :  { %v610_v13 = vadd.f32 %v1547_v35, %v609_v9  ;;  %v678_v14 = vmax.f32 %v490_v6, 0.0  ;;  %v710_v15 = vmax.f32 %v618_v7, 0.0  ;;  %v1305_v16 = vpop.f32.mrf.mxu0  ;;  %v1337_v17 = vpop.f32.mrf.mxu1 }
  0xfb   :  { %994 = vst.msk [vmem:[%s1872_s3 + $0x44] sm:$0xf] %vm976_vm1, %v1194_v10  ;;  %1026 = vst.msk [vmem:[%s1872_s3 + $0xc4] sm:$0xf] %vm976_vm1, %v1226_v11  ;;  %v676_v18 = vmax.f32 %v482_v12, 0.0  ;;  %v493_v20 = vadd.f32 %v1305_v16, %v1547_v35  ;;  %v621_v21 = vadd.f32 %v1337_v17, %v1547_v35 }
  0xfc   :  { %v708_v19 = vmax.f32 %v610_v13, 0.0  ;;  %v1199_v22 = vpack.c.bf16 %v678_v14, %v678_v14  ;;  %v1231_v23 = vpack.c.bf16 %v710_v15, %v710_v15  ;;  %v484_v24 = vpop.f32.mrf.mxu0  ;;  %v612_v25 = vpop.f32.mrf.mxu1 }
  0xfd   :  { %v1197_v26 = vpack.c.bf16 %v676_v18, %v676_v18  ;;  %v679_v28 = vmax.f32 %v493_v20, 0.0  ;;  %v711_v29 = vmax.f32 %v621_v21, 0.0  ;;  %v485_v30 = vadd.f32 %v1547_v35, %v484_v24 }
  0xfe   :  { %v1229_v27 = vpack.c.bf16 %v708_v19, %v708_v19  ;;  %999 = vst.msk [vmem:[%s1872_s3 + $0x58] sm:$0xf] %vm976_vm1, %v1199_v22  ;;  %1031 = vst.msk [vmem:[%s1872_s3 + $0xd8] sm:$0xf] %vm976_vm1, %v1231_v23  ;;  %v613_v31 = vadd.f32 %v1547_v35, %v612_v25  ;;  %v1308_v32 = vpop.f32.mrf.mxu0  ;;  %v1340_v33 = vpop.f32.mrf.mxu1 }
  0xff   :  { %997 = vst.msk [vmem:[%s1872_s3 + $0x50] sm:$0xf] %vm976_vm1, %v1197_v26  ;;  %v1200_v34 = vpack.c.bf16 %v679_v28, %v679_v28  ;;  %v1232_v36 = vpack.c.bf16 %v711_v29, %v711_v29  ;;  %v506_v37 = vadd.f32 %v1308_v32, %v1547_v35  ;;  %v634_v38 = vadd.f32 %v1340_v33, %v1547_v35 }
 0x100   :  { %1029 = vst.msk [vmem:[%s1872_s3 + $0xd0] sm:$0xf] %vm976_vm1, %v1229_v27  ;;  %v677_v39 = vmax.f32 %v485_v30, 0.0  ;;  %v709_v40 = vmax.f32 %v613_v31, 0.0  ;;  %v497_v41 = vpop.f32.mrf.mxu0  ;;  %v625_v42 = vpop.f32.mrf.mxu1 }
 0x101   :  { %1000 = vst.msk [vmem:[%s1872_s3 + $0x5c] sm:$0xf] %vm976_vm1, %v1200_v34  ;;  %1032 = vst.msk [vmem:[%s1872_s3 + $0xdc] sm:$0xf] %vm976_vm1, %v1232_v36  ;;  %v682_v43 = vmax.f32 %v506_v37, 0.0  ;;  %v714_v44 = vmax.f32 %v634_v38, 0.0  ;;  %v498_v45 = vadd.f32 %v1547_v35, %v497_v41  ;;  %v626_v46 = vadd.f32 %v1547_v35, %v625_v42 }
 0x102   :  { %v1198_v47 = vpack.c.bf16 %v677_v39, %v677_v39  ;;  %v1230_v48 = vpack.c.bf16 %v709_v40, %v709_v40  ;;  %v1309_v49 = vpop.f32.mrf.mxu0  ;;  %v1341_v50 = vpop.f32.mrf.mxu1 }
 0x103   :  { %v1203_v51 = vpack.c.bf16 %v682_v43, %v682_v43  ;;  %v1235_v52 = vpack.c.bf16 %v714_v44, %v714_v44  ;;  %v680_v53 = vmax.f32 %v498_v45, 0.0  ;;  %v712_v54 = vmax.f32 %v626_v46, 0.0 }
 0x104   :  { %998 = vst.msk [vmem:[%s1872_s3 + $0x54] sm:$0xf] %vm976_vm1, %v1198_v47  ;;  %1030 = vst.msk [vmem:[%s1872_s3 + $0xd4] sm:$0xf] %vm976_vm1, %v1230_v48  ;;  %v509_v55 = vadd.f32 %v1309_v49, %v1547_v35  ;;  %v637_v56 = vadd.f32 %v1341_v50, %v1547_v35  ;;  %v500_v57 = vpop.f32.mrf.mxu0  ;;  %v628_v58 = vpop.f32.mrf.mxu1 }
 0x105   :  { %1003 = vst.msk [vmem:[%s1872_s3 + $0x68] sm:$0xf] %vm976_vm1, %v1203_v51  ;;  %1035 = vst.msk [vmem:[%s1872_s3 + $0xe8] sm:$0xf] %vm976_vm1, %v1235_v52  ;;  %v1201_v59 = vpack.c.bf16 %v680_v53, %v680_v53  ;;  %v1233_v60 = vpack.c.bf16 %v712_v54, %v712_v54  ;;  %v501_v61 = vadd.f32 %v1547_v35, %v500_v57 }
 0x106   :  { %v629_v62 = vadd.f32 %v1547_v35, %v628_v58  ;;  %v683_v63 = vmax.f32 %v509_v55, 0.0  ;;  %v715_v0 = vmax.f32 %v637_v56, 0.0  ;;  %v1312_v1 = vpop.f32.mrf.mxu0  ;;  %v1344_v2 = vpop.f32.mrf.mxu1 }
 0x107   :  { %1001 = vst.msk [vmem:[%s1872_s3 + $0x60] sm:$0xf] %vm976_vm1, %v1201_v59  ;;  %1033 = vst.msk [vmem:[%s1872_s3 + $0xe0] sm:$0xf] %vm976_vm1, %v1233_v60  ;;  %v681_v3 = vmax.f32 %v501_v61, 0.0  ;;  %v522_v5 = vadd.f32 %v1312_v1, %v1547_v35  ;;  %v650_v6 = vadd.f32 %v1344_v2, %v1547_v35 }
 0x108   :  { %v713_v4 = vmax.f32 %v629_v62, 0.0  ;;  %v1204_v7 = vpack.c.bf16 %v683_v63, %v683_v63  ;;  %v1236_v8 = vpack.c.bf16 %v715_v0, %v715_v0  ;;  %v513_v9 = vpop.f32.mrf.mxu0  ;;  %v641_v10 = vpop.f32.mrf.mxu1 }
 0x109   :  { %v1202_v11 = vpack.c.bf16 %v681_v3, %v681_v3  ;;  %v686_v13 = vmax.f32 %v522_v5, 0.0  ;;  %v718_v14 = vmax.f32 %v650_v6, 0.0  ;;  %v514_v15 = vadd.f32 %v1547_v35, %v513_v9 }
 0x10a   :  { %v1234_v12 = vpack.c.bf16 %v713_v4, %v713_v4  ;;  %1004 = vst.msk [vmem:[%s1872_s3 + $0x6c] sm:$0xf] %vm976_vm1, %v1204_v7  ;;  %1036 = vst.msk [vmem:[%s1872_s3 + $0xec] sm:$0xf] %vm976_vm1, %v1236_v8  ;;  %v642_v16 = vadd.f32 %v1547_v35, %v641_v10  ;;  %v1313_v17 = vpop.f32.mrf.mxu0  ;;  %v1345_v18 = vpop.f32.mrf.mxu1 }
 0x10b   :  { %1002 = vst.msk [vmem:[%s1872_s3 + $0x64] sm:$0xf] %vm976_vm1, %v1202_v11  ;;  %v1207_v19 = vpack.c.bf16 %v686_v13, %v686_v13  ;;  %v1239_v20 = vpack.c.bf16 %v718_v14, %v718_v14  ;;  %v525_v21 = vadd.f32 %v1313_v17, %v1547_v35  ;;  %v653_v22 = vadd.f32 %v1345_v18, %v1547_v35 }
 0x10c   :  { %1034 = vst.msk [vmem:[%s1872_s3 + $0xe4] sm:$0xf] %vm976_vm1, %v1234_v12  ;;  %v684_v23 = vmax.f32 %v514_v15, 0.0  ;;  %v716_v24 = vmax.f32 %v642_v16, 0.0  ;;  %v516_v25 = vpop.f32.mrf.mxu0  ;;  %v644_v26 = vpop.f32.mrf.mxu1 }
 0x10d   :  { %1007 = vst.msk [vmem:[%s1872_s3 + $0x78] sm:$0xf] %vm976_vm1, %v1207_v19  ;;  %1039 = vst.msk [vmem:[%s1872_s3 + $0xf8] sm:$0xf] %vm976_vm1, %v1239_v20  ;;  %v687_v27 = vmax.f32 %v525_v21, 0.0  ;;  %v719_v28 = vmax.f32 %v653_v22, 0.0  ;;  %v517_v29 = vadd.f32 %v1547_v35, %v516_v25  ;;  %v645_v30 = vadd.f32 %v1547_v35, %v644_v26 }
 0x10e   :  { %v1205_v31 = vpack.c.bf16 %v684_v23, %v684_v23  ;;  %v1237_v32 = vpack.c.bf16 %v716_v24, %v716_v24 }
 0x10f   :  { %v1208_v33 = vpack.c.bf16 %v687_v27, %v687_v27  ;;  %v1240_v34 = vpack.c.bf16 %v719_v28, %v719_v28  ;;  %v685_v36 = vmax.f32 %v517_v29, 0.0  ;;  %v717_v37 = vmax.f32 %v645_v30, 0.0 }
 0x110   :  { %1005 = vst.msk [vmem:[%s1872_s3 + $0x70] sm:$0xf] %vm976_vm1, %v1205_v31  ;;  %1037 = vst.msk [vmem:[%s1872_s3 + $0xf0] sm:$0xf] %vm976_vm1, %v1237_v32 }
 0x111   :  { %1008 = vst.msk [vmem:[%s1872_s3 + $0x7c] sm:$0xf] %vm976_vm1, %v1208_v33  ;;  %1040 = vst.msk [vmem:[%s1872_s3 + $0xfc] sm:$0xf] %vm976_vm1, %v1240_v34  ;;  %v1206_v35 = vpack.c.bf16 %v685_v36, %v685_v36  ;;  %v1238_v38 = vpack.c.bf16 %v717_v37, %v717_v37 }
 0x113   :  { %1006 = vst.msk [vmem:[%s1872_s3 + $0x74] sm:$0xf] %vm976_vm1, %v1206_v35  ;;  %1038 = vst.msk [vmem:[%s1872_s3 + $0xf4] sm:$0xf] %vm976_vm1, %v1238_v38 }

// kernel: _lambda_.11
= control target key start
LH: loop header
LB: loop body
LE: loop exit
PB: predicated region body
PF: predicated region fallthrough
CT: control target
= control target key end

     0   :  { %vm363_vm0 = vcmask 1041408   ;;  %vm266_vm1 = vcmask 293888   ;;  %vm976_vm2 = vcmask 191488   ;;  %s1871_s1 = inlined_call_operand.vmem [shape: bf16[36,24], index: 1, kind: input, shape index: {}]   ;;  %s1872_s0 = inlined_call_operand.vmem [shape: bf16[512,36], index: 0, kind: input, shape index: {}]   ;;  %s1873_s2 = inlined_call_operand.vmem [shape: f32[1,24], index: 2, kind: input, shape index: {}]   ;;  %s1874_s3 = inlined_call_operand.vmem [shape: bf16[512,24], index: 3, kind: output, shape index: {}]  }
   0x1   :  { %v1354_v0 = vld [vmem:[%s1871_s1 + $0x10] ss:$0 sps:$4 sm:$0x33]   ;;  %v1355_v1 = vld [vmem:[%s1871_s1 + $0x8] sm:$0xff]   ;;  %v1356_v3 = vld [vmem:[%s1871_s1] sm:$0xff]  }
   0x2   :  { %1352 = vmatprep.subr.msk.bf16.mxu0 %vm363_vm0, %v1354_v0  ;;  %1353 = vmatprep.subr.msk.bf16.mxu1 %vm363_vm0, %v1354_v0  ;;  %v365_v2 = vsel %vm363_vm0, %v1354_v0, 0  ;;  %v1357_v4 = vld [vmem:[%s1872_s0] sm:$0xff]   ;;  %v1359_v6 = vld [vmem:[%s1872_s0 + $0x8] sm:$0xff]   ;;  %v1361_v8 = vld [vmem:[%s1872_s0 + $0x10] sm:$0xff]  }
   0x3   :  { %1277 = vmatpush3.bf16.msra.mxu0 %v365_v2  ;;  %1349 = vmatpush3.bf16.msra.mxu1 %v365_v2  ;;  %v1358_v5 = vld [vmem:[%s1872_s0 + $0x80] sm:$0xff]   ;;  %v1360_v7 = vld [vmem:[%s1872_s0 + $0x88] sm:$0xff]   ;;  %v1362_v9 = vld [vmem:[%s1872_s0 + $0x90] sm:$0xff]  }
   0x4   :  { %1278 = vmatprep.subr.bf16.mxu0 %v1355_v1  ;;  %1347 = vmatprep.subr.bf16.mxu1 %v1355_v1  ;;  %v1363_v10 = vld [vmem:[%s1872_s0 + $0x18] sm:$0xff]   ;;  %v1365_v12 = vld [vmem:[%s1872_s0 + $0x20] sm:$0xff]   ;;  %v1367_v14 = vld [vmem:[%s1872_s0 + $0x28] sm:$0xff]  }
   0x5   :  { %1282 = vmatprep.mubr.msk.bf16.mxu0 %vm266_vm1, %v1357_v4  ;;  %1314 = vmatprep.mubr.msk.bf16.mxu1 %vm266_vm1, %v1358_v5  ;;  %v1364_v11 = vld [vmem:[%s1872_s0 + $0x98] sm:$0xff]   ;;  %v1366_v13 = vld [vmem:[%s1872_s0 + $0xa0] sm:$0xff]   ;;  %v1368_v15 = vld [vmem:[%s1872_s0 + $0xa8] sm:$0xff]  }
   0x6   :  { %v1369_v16 = vld [vmem:[%s1872_s0 + $0x30] sm:$0xff]   ;;  %v1371_v18 = vld [vmem:[%s1872_s0 + $0x38] sm:$0xff]   ;;  %v1373_v20 = vld [vmem:[%s1872_s0 + $0x40] sm:$0xff]  }
   0x7   :  { %1279 = vmatpush3.bf16.msra.mxu0 %v1355_v1  ;;  %1350 = vmatpush3.bf16.msra.mxu1 %v1355_v1  ;;  %v1370_v17 = vld [vmem:[%s1872_s0 + $0xb0] sm:$0xff]   ;;  %v1372_v19 = vld [vmem:[%s1872_s0 + $0xb8] sm:$0xff]   ;;  %v1374_v21 = vld [vmem:[%s1872_s0 + $0xc0] sm:$0xff]  }
   0x8   :  { %1280 = vmatprep.subr.bf16.mxu0 %v1356_v3  ;;  %1348 = vmatprep.subr.bf16.mxu1 %v1356_v3  ;;  %v1375_v22 = vld [vmem:[%s1872_s0 + $0x48] sm:$0xff]   ;;  %v1377_v24 = vld [vmem:[%s1872_s0 + $0x50] sm:$0xff]   ;;  %v1379_v26 = vld [vmem:[%s1872_s0 + $0x58] sm:$0xff]  }
   0x9   :  { %v1376_v23 = vld [vmem:[%s1872_s0 + $0xc8] sm:$0xff]   ;;  %v1378_v25 = vld [vmem:[%s1872_s0 + $0xd0] sm:$0xff]   ;;  %v1380_v27 = vld [vmem:[%s1872_s0 + $0xd8] sm:$0xff]  }
   0xa   :  { %v1381_v28 = vld [vmem:[%s1872_s0 + $0x60] sm:$0xff]   ;;  %v1383_v30 = vld [vmem:[%s1872_s0 + $0x68] sm:$0xff]   ;;  %v1385_v32 = vld [vmem:[%s1872_s0 + $0x70] sm:$0xff]  }
   0xb   :  { %1281 = vmatpush3.bf16.msra.mxu0 %v1356_v3  ;;  %1351 = vmatpush3.bf16.msra.mxu1 %v1356_v3  ;;  %v1382_v29 = vld [vmem:[%s1872_s0 + $0xe0] sm:$0xff]   ;;  %v1384_v31 = vld [vmem:[%s1872_s0 + $0xe8] sm:$0xff]   ;;  %v1386_v33 = vld [vmem:[%s1872_s0 + $0xf0] sm:$0xff]  }
   0xc   :  { %v1387_v34 = vld [vmem:[%s1872_s0 + $0x78] sm:$0xff]   ;;  %v1549_v36 = vld [vmem:[%s1873_s2] ss:$0 sm:$0xff] }
   0xd   :  { %v1388_v35 = vld [vmem:[%s1872_s0 + $0xf8] sm:$0xff]  }
   0xe   :  { %1283 = vmatmul.mubr.msk.bf16.vlgmr.msra.gmra.mxu0 %vm266_vm1, %v1359_v6  ;;  %1315 = vmatmul.mubr.msk.bf16.vlgmr.msra.gmra.mxu1 %vm266_vm1, %v1360_v7 }
   0xf   :  { %1286 = vmatprep.mubr.msk.bf16.mxu0 %vm266_vm1, %v1361_v8  ;;  %1318 = vmatprep.mubr.msk.bf16.mxu1 %vm266_vm1, %v1362_v9 }
  0x16   :  { %1287 = vmatmul.mubr.msk.bf16.gmra.mxu0 %vm266_vm1, %v1363_v10  ;;  %1319 = vmatmul.mubr.msk.bf16.gmra.mxu1 %vm266_vm1, %v1364_v11 }
  0x17   :  { %1290 = vmatprep.mubr.msk.bf16.mxu0 %vm266_vm1, %v1365_v12  ;;  %1322 = vmatprep.mubr.msk.bf16.mxu1 %vm266_vm1, %v1366_v13 }
  0x1e   :  { %1291 = vmatmul.mubr.msk.bf16.gmra.mxu0 %vm266_vm1, %v1367_v14  ;;  %1323 = vmatmul.mubr.msk.bf16.gmra.mxu1 %vm266_vm1, %v1368_v15 }
  0x1f   :  { %1294 = vmatprep.mubr.msk.bf16.mxu0 %vm266_vm1, %v1369_v16  ;;  %1326 = vmatprep.mubr.msk.bf16.mxu1 %vm266_vm1, %v1370_v17 }
  0x26   :  { %1295 = vmatmul.mubr.msk.bf16.gmra.mxu0 %vm266_vm1, %v1371_v18  ;;  %1327 = vmatmul.mubr.msk.bf16.gmra.mxu1 %vm266_vm1, %v1372_v19 }
  0x27   :  { %1298 = vmatprep.mubr.msk.bf16.mxu0 %vm266_vm1, %v1373_v20  ;;  %1330 = vmatprep.mubr.msk.bf16.mxu1 %vm266_vm1, %v1374_v21 }
  0x2e   :  { %1299 = vmatmul.mubr.msk.bf16.gmra.mxu0 %vm266_vm1, %v1375_v22  ;;  %1331 = vmatmul.mubr.msk.bf16.gmra.mxu1 %vm266_vm1, %v1376_v23 }
  0x2f   :  { %1302 = vmatprep.mubr.msk.bf16.mxu0 %vm266_vm1, %v1377_v24  ;;  %1334 = vmatprep.mubr.msk.bf16.mxu1 %vm266_vm1, %v1378_v25 }
  0x36   :  { %1303 = vmatmul.mubr.msk.bf16.gmra.mxu0 %vm266_vm1, %v1379_v26  ;;  %1335 = vmatmul.mubr.msk.bf16.gmra.mxu1 %vm266_vm1, %v1380_v27 }
  0x37   :  { %1306 = vmatprep.mubr.msk.bf16.mxu0 %vm266_vm1, %v1381_v28  ;;  %1338 = vmatprep.mubr.msk.bf16.mxu1 %vm266_vm1, %v1382_v29 }
  0x3e   :  { %1307 = vmatmul.mubr.msk.bf16.gmra.mxu0 %vm266_vm1, %v1383_v30  ;;  %1339 = vmatmul.mubr.msk.bf16.gmra.mxu1 %vm266_vm1, %v1384_v31 }
  0x3f   :  { %1310 = vmatprep.mubr.msk.bf16.mxu0 %vm266_vm1, %v1385_v32  ;;  %1342 = vmatprep.mubr.msk.bf16.mxu1 %vm266_vm1, %v1386_v33 }
  0x46   :  { %1311 = vmatmul.mubr.msk.bf16.gmra.mxu0 %vm266_vm1, %v1387_v34  ;;  %1343 = vmatmul.mubr.msk.bf16.gmra.mxu1 %vm266_vm1, %v1388_v35 }
  0xce   :  { %v1284_v37 = vpop.f32.mrf.mxu0  ;;  %v1316_v38 = vpop.f32.mrf.mxu1 }
  0xcf   :  { %v410_v39 = vadd.f32 %v1284_v37, %v1549_v36  ;;  %v538_v40 = vadd.f32 %v1316_v38, %v1549_v36 }
  0xd0   :  { %v401_v41 = vpop.f32.mrf.mxu0  ;;  %v529_v42 = vpop.f32.mrf.mxu1 }
  0xd1   :  { %v658_v43 = vmax.f32 %v410_v39, 0.0  ;;  %v690_v44 = vmax.f32 %v538_v40, 0.0  ;;  %v402_v45 = vadd.f32 %v1549_v36, %v401_v41  ;;  %v530_v46 = vadd.f32 %v1549_v36, %v529_v42 }
  0xd2   :  { %v1285_v47 = vpop.f32.mrf.mxu0  ;;  %v1317_v48 = vpop.f32.mrf.mxu1 }
  0xd3   :  { %v1179_v49 = vpack.c.bf16 %v658_v43, %v658_v43  ;;  %v1211_v50 = vpack.c.bf16 %v690_v44, %v690_v44  ;;  %v656_v51 = vmax.f32 %v402_v45, 0.0  ;;  %v688_v52 = vmax.f32 %v530_v46, 0.0 }
  0xd4   :  { %v413_v53 = vadd.f32 %v1285_v47, %v1549_v36  ;;  %v541_v54 = vadd.f32 %v1317_v48, %v1549_v36  ;;  %v404_v55 = vpop.f32.mrf.mxu0  ;;  %v532_v56 = vpop.f32.mrf.mxu1 }
  0xd5   :  { %979 = vst.msk [vmem:[%s1874_s3 + $0x8] sm:$0xf] %vm976_vm2, %v1179_v49  ;;  %1011 = vst.msk [vmem:[%s1874_s3 + $0x88] sm:$0xf] %vm976_vm2, %v1211_v50  ;;  %v1177_v57 = vpack.c.bf16 %v656_v51, %v656_v51  ;;  %v1209_v58 = vpack.c.bf16 %v688_v52, %v688_v52  ;;  %v405_v59 = vadd.f32 %v1549_v36, %v404_v55 }
  0xd6   :  { %v533_v60 = vadd.f32 %v1549_v36, %v532_v56  ;;  %v659_v61 = vmax.f32 %v413_v53, 0.0  ;;  %v691_v62 = vmax.f32 %v541_v54, 0.0  ;;  %v1288_v63 = vpop.f32.mrf.mxu0  ;;  %v1320_v0 = vpop.f32.mrf.mxu1 }
  0xd7   :  { %977 = vst.msk [vmem:[%s1874_s3] sm:$0xf] %vm976_vm2, %v1177_v57  ;;  %1009 = vst.msk [vmem:[%s1874_s3 + $0x80] sm:$0xf] %vm976_vm2, %v1209_v58  ;;  %v657_v1 = vmax.f32 %v405_v59, 0.0  ;;  %v426_v3 = vadd.f32 %v1288_v63, %v1549_v36  ;;  %v554_v4 = vadd.f32 %v1320_v0, %v1549_v36 }
  0xd8   :  { %v689_v2 = vmax.f32 %v533_v60, 0.0  ;;  %v1180_v5 = vpack.c.bf16 %v659_v61, %v659_v61  ;;  %v1212_v6 = vpack.c.bf16 %v691_v62, %v691_v62  ;;  %v417_v7 = vpop.f32.mrf.mxu0  ;;  %v545_v8 = vpop.f32.mrf.mxu1 }
  0xd9   :  { %v1178_v9 = vpack.c.bf16 %v657_v1, %v657_v1  ;;  %v662_v11 = vmax.f32 %v426_v3, 0.0  ;;  %v694_v12 = vmax.f32 %v554_v4, 0.0  ;;  %v418_v13 = vadd.f32 %v1549_v36, %v417_v7 }
  0xda   :  { %v1210_v10 = vpack.c.bf16 %v689_v2, %v689_v2  ;;  %980 = vst.msk [vmem:[%s1874_s3 + $0xc] sm:$0xf] %vm976_vm2, %v1180_v5  ;;  %1012 = vst.msk [vmem:[%s1874_s3 + $0x8c] sm:$0xf] %vm976_vm2, %v1212_v6  ;;  %v546_v14 = vadd.f32 %v1549_v36, %v545_v8  ;;  %v1289_v15 = vpop.f32.mrf.mxu0  ;;  %v1321_v16 = vpop.f32.mrf.mxu1 }
  0xdb   :  { %978 = vst.msk [vmem:[%s1874_s3 + $0x4] sm:$0xf] %vm976_vm2, %v1178_v9  ;;  %v1183_v17 = vpack.c.bf16 %v662_v11, %v662_v11  ;;  %v1215_v18 = vpack.c.bf16 %v694_v12, %v694_v12  ;;  %v429_v19 = vadd.f32 %v1289_v15, %v1549_v36  ;;  %v557_v20 = vadd.f32 %v1321_v16, %v1549_v36 }
  0xdc   :  { %1010 = vst.msk [vmem:[%s1874_s3 + $0x84] sm:$0xf] %vm976_vm2, %v1210_v10  ;;  %v660_v21 = vmax.f32 %v418_v13, 0.0  ;;  %v692_v22 = vmax.f32 %v546_v14, 0.0  ;;  %v420_v23 = vpop.f32.mrf.mxu0  ;;  %v548_v24 = vpop.f32.mrf.mxu1 }
  0xdd   :  { %983 = vst.msk [vmem:[%s1874_s3 + $0x18] sm:$0xf] %vm976_vm2, %v1183_v17  ;;  %1015 = vst.msk [vmem:[%s1874_s3 + $0x98] sm:$0xf] %vm976_vm2, %v1215_v18  ;;  %v663_v25 = vmax.f32 %v429_v19, 0.0  ;;  %v695_v26 = vmax.f32 %v557_v20, 0.0  ;;  %v421_v27 = vadd.f32 %v1549_v36, %v420_v23  ;;  %v549_v28 = vadd.f32 %v1549_v36, %v548_v24 }
  0xde   :  { %v1181_v29 = vpack.c.bf16 %v660_v21, %v660_v21  ;;  %v1213_v30 = vpack.c.bf16 %v692_v22, %v692_v22  ;;  %v1292_v31 = vpop.f32.mrf.mxu0  ;;  %v1324_v32 = vpop.f32.mrf.mxu1 }
  0xdf   :  { %v1184_v33 = vpack.c.bf16 %v663_v25, %v663_v25  ;;  %v1216_v34 = vpack.c.bf16 %v695_v26, %v695_v26  ;;  %v661_v35 = vmax.f32 %v421_v27, 0.0  ;;  %v693_v37 = vmax.f32 %v549_v28, 0.0 }
  0xe0   :  { %981 = vst.msk [vmem:[%s1874_s3 + $0x10] sm:$0xf] %vm976_vm2, %v1181_v29  ;;  %1013 = vst.msk [vmem:[%s1874_s3 + $0x90] sm:$0xf] %vm976_vm2, %v1213_v30  ;;  %v442_v38 = vadd.f32 %v1292_v31, %v1549_v36  ;;  %v570_v39 = vadd.f32 %v1324_v32, %v1549_v36  ;;  %v433_v40 = vpop.f32.mrf.mxu0  ;;  %v561_v41 = vpop.f32.mrf.mxu1 }
  0xe1   :  { %984 = vst.msk [vmem:[%s1874_s3 + $0x1c] sm:$0xf] %vm976_vm2, %v1184_v33  ;;  %1016 = vst.msk [vmem:[%s1874_s3 + $0x9c] sm:$0xf] %vm976_vm2, %v1216_v34  ;;  %v1182_v42 = vpack.c.bf16 %v661_v35, %v661_v35  ;;  %v1214_v43 = vpack.c.bf16 %v693_v37, %v693_v37  ;;  %v434_v44 = vadd.f32 %v1549_v36, %v433_v40 }
  0xe2   :  { %v562_v45 = vadd.f32 %v1549_v36, %v561_v41  ;;  %v666_v46 = vmax.f32 %v442_v38, 0.0  ;;  %v698_v47 = vmax.f32 %v570_v39, 0.0  ;;  %v1293_v48 = vpop.f32.mrf.mxu0  ;;  %v1325_v49 = vpop.f32.mrf.mxu1 }
  0xe3   :  { %982 = vst.msk [vmem:[%s1874_s3 + $0x14] sm:$0xf] %vm976_vm2, %v1182_v42  ;;  %1014 = vst.msk [vmem:[%s1874_s3 + $0x94] sm:$0xf] %vm976_vm2, %v1214_v43  ;;  %v664_v50 = vmax.f32 %v434_v44, 0.0  ;;  %v445_v52 = vadd.f32 %v1293_v48, %v1549_v36  ;;  %v573_v53 = vadd.f32 %v1325_v49, %v1549_v36 }
  0xe4   :  { %v696_v51 = vmax.f32 %v562_v45, 0.0  ;;  %v1187_v54 = vpack.c.bf16 %v666_v46, %v666_v46  ;;  %v1219_v55 = vpack.c.bf16 %v698_v47, %v698_v47  ;;  %v436_v56 = vpop.f32.mrf.mxu0  ;;  %v564_v57 = vpop.f32.mrf.mxu1 }
  0xe5   :  { %v1185_v58 = vpack.c.bf16 %v664_v50, %v664_v50  ;;  %v667_v60 = vmax.f32 %v445_v52, 0.0  ;;  %v699_v61 = vmax.f32 %v573_v53, 0.0  ;;  %v437_v62 = vadd.f32 %v1549_v36, %v436_v56 }
  0xe6   :  { %v1217_v59 = vpack.c.bf16 %v696_v51, %v696_v51  ;;  %987 = vst.msk [vmem:[%s1874_s3 + $0x28] sm:$0xf] %vm976_vm2, %v1187_v54  ;;  %1019 = vst.msk [vmem:[%s1874_s3 + $0xa8] sm:$0xf] %vm976_vm2, %v1219_v55  ;;  %v565_v63 = vadd.f32 %v1549_v36, %v564_v57  ;;  %v1296_v0 = vpop.f32.mrf.mxu0  ;;  %v1328_v1 = vpop.f32.mrf.mxu1 }
  0xe7   :  { %985 = vst.msk [vmem:[%s1874_s3 + $0x20] sm:$0xf] %vm976_vm2, %v1185_v58  ;;  %v1188_v2 = vpack.c.bf16 %v667_v60, %v667_v60  ;;  %v1220_v3 = vpack.c.bf16 %v699_v61, %v699_v61  ;;  %v458_v4 = vadd.f32 %v1296_v0, %v1549_v36  ;;  %v586_v5 = vadd.f32 %v1328_v1, %v1549_v36 }
  0xe8   :  { %1017 = vst.msk [vmem:[%s1874_s3 + $0xa0] sm:$0xf] %vm976_vm2, %v1217_v59  ;;  %v665_v6 = vmax.f32 %v437_v62, 0.0  ;;  %v697_v7 = vmax.f32 %v565_v63, 0.0  ;;  %v449_v8 = vpop.f32.mrf.mxu0  ;;  %v577_v9 = vpop.f32.mrf.mxu1 }
  0xe9   :  { %988 = vst.msk [vmem:[%s1874_s3 + $0x2c] sm:$0xf] %vm976_vm2, %v1188_v2  ;;  %1020 = vst.msk [vmem:[%s1874_s3 + $0xac] sm:$0xf] %vm976_vm2, %v1220_v3  ;;  %v670_v10 = vmax.f32 %v458_v4, 0.0  ;;  %v702_v11 = vmax.f32 %v586_v5, 0.0  ;;  %v450_v12 = vadd.f32 %v1549_v36, %v449_v8  ;;  %v578_v13 = vadd.f32 %v1549_v36, %v577_v9 }
  0xea   :  { %v1186_v14 = vpack.c.bf16 %v665_v6, %v665_v6  ;;  %v1218_v15 = vpack.c.bf16 %v697_v7, %v697_v7  ;;  %v1297_v16 = vpop.f32.mrf.mxu0  ;;  %v1329_v17 = vpop.f32.mrf.mxu1 }
  0xeb   :  { %v1191_v18 = vpack.c.bf16 %v670_v10, %v670_v10  ;;  %v1223_v19 = vpack.c.bf16 %v702_v11, %v702_v11  ;;  %v668_v20 = vmax.f32 %v450_v12, 0.0  ;;  %v700_v21 = vmax.f32 %v578_v13, 0.0 }
  0xec   :  { %986 = vst.msk [vmem:[%s1874_s3 + $0x24] sm:$0xf] %vm976_vm2, %v1186_v14  ;;  %1018 = vst.msk [vmem:[%s1874_s3 + $0xa4] sm:$0xf] %vm976_vm2, %v1218_v15  ;;  %v461_v22 = vadd.f32 %v1297_v16, %v1549_v36  ;;  %v589_v23 = vadd.f32 %v1329_v17, %v1549_v36  ;;  %v452_v24 = vpop.f32.mrf.mxu0  ;;  %v580_v25 = vpop.f32.mrf.mxu1 }
  0xed   :  { %991 = vst.msk [vmem:[%s1874_s3 + $0x38] sm:$0xf] %vm976_vm2, %v1191_v18  ;;  %1023 = vst.msk [vmem:[%s1874_s3 + $0xb8] sm:$0xf] %vm976_vm2, %v1223_v19  ;;  %v1189_v26 = vpack.c.bf16 %v668_v20, %v668_v20  ;;  %v1221_v27 = vpack.c.bf16 %v700_v21, %v700_v21  ;;  %v453_v28 = vadd.f32 %v1549_v36, %v452_v24 }
  0xee   :  { %v581_v29 = vadd.f32 %v1549_v36, %v580_v25  ;;  %v671_v30 = vmax.f32 %v461_v22, 0.0  ;;  %v703_v31 = vmax.f32 %v589_v23, 0.0  ;;  %v1300_v32 = vpop.f32.mrf.mxu0  ;;  %v1332_v33 = vpop.f32.mrf.mxu1 }
  0xef   :  { %989 = vst.msk [vmem:[%s1874_s3 + $0x30] sm:$0xf] %vm976_vm2, %v1189_v26  ;;  %1021 = vst.msk [vmem:[%s1874_s3 + $0xb0] sm:$0xf] %vm976_vm2, %v1221_v27  ;;  %v669_v34 = vmax.f32 %v453_v28, 0.0  ;;  %v474_v37 = vadd.f32 %v1300_v32, %v1549_v36  ;;  %v602_v38 = vadd.f32 %v1332_v33, %v1549_v36 }
  0xf0   :  { %v701_v35 = vmax.f32 %v581_v29, 0.0  ;;  %v1192_v39 = vpack.c.bf16 %v671_v30, %v671_v30  ;;  %v1224_v40 = vpack.c.bf16 %v703_v31, %v703_v31  ;;  %v465_v41 = vpop.f32.mrf.mxu0  ;;  %v593_v42 = vpop.f32.mrf.mxu1 }
  0xf1   :  { %v1190_v43 = vpack.c.bf16 %v669_v34, %v669_v34  ;;  %v674_v45 = vmax.f32 %v474_v37, 0.0  ;;  %v706_v46 = vmax.f32 %v602_v38, 0.0  ;;  %v466_v47 = vadd.f32 %v1549_v36, %v465_v41 }
  0xf2   :  { %v1222_v44 = vpack.c.bf16 %v701_v35, %v701_v35  ;;  %992 = vst.msk [vmem:[%s1874_s3 + $0x3c] sm:$0xf] %vm976_vm2, %v1192_v39  ;;  %1024 = vst.msk [vmem:[%s1874_s3 + $0xbc] sm:$0xf] %vm976_vm2, %v1224_v40  ;;  %v594_v48 = vadd.f32 %v1549_v36, %v593_v42  ;;  %v1301_v49 = vpop.f32.mrf.mxu0  ;;  %v1333_v50 = vpop.f32.mrf.mxu1 }
  0xf3   :  { %990 = vst.msk [vmem:[%s1874_s3 + $0x34] sm:$0xf] %vm976_vm2, %v1190_v43  ;;  %v1195_v51 = vpack.c.bf16 %v674_v45, %v674_v45  ;;  %v1227_v52 = vpack.c.bf16 %v706_v46, %v706_v46  ;;  %v477_v53 = vadd.f32 %v1301_v49, %v1549_v36  ;;  %v605_v54 = vadd.f32 %v1333_v50, %v1549_v36 }
  0xf4   :  { %1022 = vst.msk [vmem:[%s1874_s3 + $0xb4] sm:$0xf] %vm976_vm2, %v1222_v44  ;;  %v672_v55 = vmax.f32 %v466_v47, 0.0  ;;  %v704_v56 = vmax.f32 %v594_v48, 0.0  ;;  %v468_v57 = vpop.f32.mrf.mxu0  ;;  %v596_v58 = vpop.f32.mrf.mxu1 }
  0xf5   :  { %995 = vst.msk [vmem:[%s1874_s3 + $0x48] sm:$0xf] %vm976_vm2, %v1195_v51  ;;  %1027 = vst.msk [vmem:[%s1874_s3 + $0xc8] sm:$0xf] %vm976_vm2, %v1227_v52  ;;  %v675_v59 = vmax.f32 %v477_v53, 0.0  ;;  %v707_v60 = vmax.f32 %v605_v54, 0.0  ;;  %v469_v61 = vadd.f32 %v1549_v36, %v468_v57  ;;  %v597_v62 = vadd.f32 %v1549_v36, %v596_v58 }
  0xf6   :  { %v1193_v63 = vpack.c.bf16 %v672_v55, %v672_v55  ;;  %v1225_v0 = vpack.c.bf16 %v704_v56, %v704_v56  ;;  %v1304_v1 = vpop.f32.mrf.mxu0  ;;  %v1336_v2 = vpop.f32.mrf.mxu1 }
  0xf7   :  { %v1196_v3 = vpack.c.bf16 %v675_v59, %v675_v59  ;;  %v1228_v4 = vpack.c.bf16 %v707_v60, %v707_v60  ;;  %v673_v5 = vmax.f32 %v469_v61, 0.0  ;;  %v705_v6 = vmax.f32 %v597_v62, 0.0 }
  0xf8   :  { %993 = vst.msk [vmem:[%s1874_s3 + $0x40] sm:$0xf] %vm976_vm2, %v1193_v63  ;;  %1025 = vst.msk [vmem:[%s1874_s3 + $0xc0] sm:$0xf] %vm976_vm2, %v1225_v0  ;;  %v490_v7 = vadd.f32 %v1304_v1, %v1549_v36  ;;  %v618_v8 = vadd.f32 %v1336_v2, %v1549_v36  ;;  %v481_v9 = vpop.f32.mrf.mxu0  ;;  %v609_v10 = vpop.f32.mrf.mxu1 }
  0xf9   :  { %996 = vst.msk [vmem:[%s1874_s3 + $0x4c] sm:$0xf] %vm976_vm2, %v1196_v3  ;;  %1028 = vst.msk [vmem:[%s1874_s3 + $0xcc] sm:$0xf] %vm976_vm2, %v1228_v4  ;;  %v1194_v11 = vpack.c.bf16 %v673_v5, %v673_v5  ;;  %v1226_v12 = vpack.c.bf16 %v705_v6, %v705_v6  ;;  %v482_v13 = vadd.f32 %v1549_v36, %v481_v9 }
  0xfa   :  { %v610_v14 = vadd.f32 %v1549_v36, %v609_v10  ;;  %v678_v15 = vmax.f32 %v490_v7, 0.0  ;;  %v710_v16 = vmax.f32 %v618_v8, 0.0  ;;  %v1305_v17 = vpop.f32.mrf.mxu0  ;;  %v1337_v18 = vpop.f32.mrf.mxu1 }
  0xfb   :  { %994 = vst.msk [vmem:[%s1874_s3 + $0x44] sm:$0xf] %vm976_vm2, %v1194_v11  ;;  %1026 = vst.msk [vmem:[%s1874_s3 + $0xc4] sm:$0xf] %vm976_vm2, %v1226_v12  ;;  %v676_v19 = vmax.f32 %v482_v13, 0.0  ;;  %v493_v21 = vadd.f32 %v1305_v17, %v1549_v36  ;;  %v621_v22 = vadd.f32 %v1337_v18, %v1549_v36 }
  0xfc   :  { %v708_v20 = vmax.f32 %v610_v14, 0.0  ;;  %v1199_v23 = vpack.c.bf16 %v678_v15, %v678_v15  ;;  %v1231_v24 = vpack.c.bf16 %v710_v16, %v710_v16  ;;  %v484_v25 = vpop.f32.mrf.mxu0  ;;  %v612_v26 = vpop.f32.mrf.mxu1 }
  0xfd   :  { %v1197_v27 = vpack.c.bf16 %v676_v19, %v676_v19  ;;  %v679_v29 = vmax.f32 %v493_v21, 0.0  ;;  %v711_v30 = vmax.f32 %v621_v22, 0.0  ;;  %v485_v31 = vadd.f32 %v1549_v36, %v484_v25 }
  0xfe   :  { %v1229_v28 = vpack.c.bf16 %v708_v20, %v708_v20  ;;  %999 = vst.msk [vmem:[%s1874_s3 + $0x58] sm:$0xf] %vm976_vm2, %v1199_v23  ;;  %1031 = vst.msk [vmem:[%s1874_s3 + $0xd8] sm:$0xf] %vm976_vm2, %v1231_v24  ;;  %v613_v32 = vadd.f32 %v1549_v36, %v612_v26  ;;  %v1308_v33 = vpop.f32.mrf.mxu0  ;;  %v1340_v34 = vpop.f32.mrf.mxu1 }
  0xff   :  { %997 = vst.msk [vmem:[%s1874_s3 + $0x50] sm:$0xf] %vm976_vm2, %v1197_v27  ;;  %v1200_v35 = vpack.c.bf16 %v679_v29, %v679_v29  ;;  %v1232_v37 = vpack.c.bf16 %v711_v30, %v711_v30  ;;  %v506_v38 = vadd.f32 %v1308_v33, %v1549_v36  ;;  %v634_v39 = vadd.f32 %v1340_v34, %v1549_v36 }
 0x100   :  { %1029 = vst.msk [vmem:[%s1874_s3 + $0xd0] sm:$0xf] %vm976_vm2, %v1229_v28  ;;  %v677_v40 = vmax.f32 %v485_v31, 0.0  ;;  %v709_v41 = vmax.f32 %v613_v32, 0.0  ;;  %v497_v42 = vpop.f32.mrf.mxu0  ;;  %v625_v43 = vpop.f32.mrf.mxu1 }
 0x101   :  { %1000 = vst.msk [vmem:[%s1874_s3 + $0x5c] sm:$0xf] %vm976_vm2, %v1200_v35  ;;  %1032 = vst.msk [vmem:[%s1874_s3 + $0xdc] sm:$0xf] %vm976_vm2, %v1232_v37  ;;  %v682_v44 = vmax.f32 %v506_v38, 0.0  ;;  %v714_v45 = vmax.f32 %v634_v39, 0.0  ;;  %v498_v46 = vadd.f32 %v1549_v36, %v497_v42  ;;  %v626_v47 = vadd.f32 %v1549_v36, %v625_v43 }
 0x102   :  { %v1198_v48 = vpack.c.bf16 %v677_v40, %v677_v40  ;;  %v1230_v49 = vpack.c.bf16 %v709_v41, %v709_v41  ;;  %v1309_v50 = vpop.f32.mrf.mxu0  ;;  %v1341_v51 = vpop.f32.mrf.mxu1 }
 0x103   :  { %v1203_v52 = vpack.c.bf16 %v682_v44, %v682_v44  ;;  %v1235_v53 = vpack.c.bf16 %v714_v45, %v714_v45  ;;  %v680_v54 = vmax.f32 %v498_v46, 0.0  ;;  %v712_v55 = vmax.f32 %v626_v47, 0.0 }
 0x104   :  { %998 = vst.msk [vmem:[%s1874_s3 + $0x54] sm:$0xf] %vm976_vm2, %v1198_v48  ;;  %1030 = vst.msk [vmem:[%s1874_s3 + $0xd4] sm:$0xf] %vm976_vm2, %v1230_v49  ;;  %v509_v56 = vadd.f32 %v1309_v50, %v1549_v36  ;;  %v637_v57 = vadd.f32 %v1341_v51, %v1549_v36  ;;  %v500_v58 = vpop.f32.mrf.mxu0  ;;  %v628_v59 = vpop.f32.mrf.mxu1 }
 0x105   :  { %1003 = vst.msk [vmem:[%s1874_s3 + $0x68] sm:$0xf] %vm976_vm2, %v1203_v52  ;;  %1035 = vst.msk [vmem:[%s1874_s3 + $0xe8] sm:$0xf] %vm976_vm2, %v1235_v53  ;;  %v1201_v60 = vpack.c.bf16 %v680_v54, %v680_v54  ;;  %v1233_v61 = vpack.c.bf16 %v712_v55, %v712_v55  ;;  %v501_v62 = vadd.f32 %v1549_v36, %v500_v58 }
 0x106   :  { %v629_v63 = vadd.f32 %v1549_v36, %v628_v59  ;;  %v683_v0 = vmax.f32 %v509_v56, 0.0  ;;  %v715_v1 = vmax.f32 %v637_v57, 0.0  ;;  %v1312_v2 = vpop.f32.mrf.mxu0  ;;  %v1344_v3 = vpop.f32.mrf.mxu1 }
 0x107   :  { %1001 = vst.msk [vmem:[%s1874_s3 + $0x60] sm:$0xf] %vm976_vm2, %v1201_v60  ;;  %1033 = vst.msk [vmem:[%s1874_s3 + $0xe0] sm:$0xf] %vm976_vm2, %v1233_v61  ;;  %v681_v4 = vmax.f32 %v501_v62, 0.0  ;;  %v522_v6 = vadd.f32 %v1312_v2, %v1549_v36  ;;  %v650_v7 = vadd.f32 %v1344_v3, %v1549_v36 }
 0x108   :  { %v713_v5 = vmax.f32 %v629_v63, 0.0  ;;  %v1204_v8 = vpack.c.bf16 %v683_v0, %v683_v0  ;;  %v1236_v9 = vpack.c.bf16 %v715_v1, %v715_v1  ;;  %v513_v10 = vpop.f32.mrf.mxu0  ;;  %v641_v11 = vpop.f32.mrf.mxu1 }
 0x109   :  { %v1202_v12 = vpack.c.bf16 %v681_v4, %v681_v4  ;;  %v686_v14 = vmax.f32 %v522_v6, 0.0  ;;  %v718_v15 = vmax.f32 %v650_v7, 0.0  ;;  %v514_v16 = vadd.f32 %v1549_v36, %v513_v10 }
 0x10a   :  { %v1234_v13 = vpack.c.bf16 %v713_v5, %v713_v5  ;;  %1004 = vst.msk [vmem:[%s1874_s3 + $0x6c] sm:$0xf] %vm976_vm2, %v1204_v8  ;;  %1036 = vst.msk [vmem:[%s1874_s3 + $0xec] sm:$0xf] %vm976_vm2, %v1236_v9  ;;  %v642_v17 = vadd.f32 %v1549_v36, %v641_v11  ;;  %v1313_v18 = vpop.f32.mrf.mxu0  ;;  %v1345_v19 = vpop.f32.mrf.mxu1 }
 0x10b   :  { %1002 = vst.msk [vmem:[%s1874_s3 + $0x64] sm:$0xf] %vm976_vm2, %v1202_v12  ;;  %v1207_v20 = vpack.c.bf16 %v686_v14, %v686_v14  ;;  %v1239_v21 = vpack.c.bf16 %v718_v15, %v718_v15  ;;  %v525_v22 = vadd.f32 %v1313_v18, %v1549_v36  ;;  %v653_v23 = vadd.f32 %v1345_v19, %v1549_v36 }
 0x10c   :  { %1034 = vst.msk [vmem:[%s1874_s3 + $0xe4] sm:$0xf] %vm976_vm2, %v1234_v13  ;;  %v684_v24 = vmax.f32 %v514_v16, 0.0  ;;  %v716_v25 = vmax.f32 %v642_v17, 0.0  ;;  %v516_v26 = vpop.f32.mrf.mxu0  ;;  %v644_v27 = vpop.f32.mrf.mxu1 }
 0x10d   :  { %1007 = vst.msk [vmem:[%s1874_s3 + $0x78] sm:$0xf] %vm976_vm2, %v1207_v20  ;;  %1039 = vst.msk [vmem:[%s1874_s3 + $0xf8] sm:$0xf] %vm976_vm2, %v1239_v21  ;;  %v687_v28 = vmax.f32 %v525_v22, 0.0  ;;  %v719_v29 = vmax.f32 %v653_v23, 0.0  ;;  %v517_v30 = vadd.f32 %v1549_v36, %v516_v26  ;;  %v645_v31 = vadd.f32 %v1549_v36, %v644_v27 }
 0x10e   :  { %v1205_v32 = vpack.c.bf16 %v684_v24, %v684_v24  ;;  %v1237_v33 = vpack.c.bf16 %v716_v25, %v716_v25 }
 0x10f   :  { %v1208_v34 = vpack.c.bf16 %v687_v28, %v687_v28  ;;  %v1240_v35 = vpack.c.bf16 %v719_v29, %v719_v29  ;;  %v685_v37 = vmax.f32 %v517_v30, 0.0  ;;  %v717_v38 = vmax.f32 %v645_v31, 0.0 }
 0x110   :  { %1005 = vst.msk [vmem:[%s1874_s3 + $0x70] sm:$0xf] %vm976_vm2, %v1205_v32  ;;  %1037 = vst.msk [vmem:[%s1874_s3 + $0xf0] sm:$0xf] %vm976_vm2, %v1237_v33 }
 0x111   :  { %1008 = vst.msk [vmem:[%s1874_s3 + $0x7c] sm:$0xf] %vm976_vm2, %v1208_v34  ;;  %1040 = vst.msk [vmem:[%s1874_s3 + $0xfc] sm:$0xf] %vm976_vm2, %v1240_v35  ;;  %v1206_v36 = vpack.c.bf16 %v685_v37, %v685_v37  ;;  %v1238_v39 = vpack.c.bf16 %v717_v38, %v717_v38 }
 0x113   :  { %1006 = vst.msk [vmem:[%s1874_s3 + $0x74] sm:$0xf] %vm976_vm2, %v1206_v36  ;;  %1038 = vst.msk [vmem:[%s1874_s3 + $0xf4] sm:$0xf] %vm976_vm2, %v1238_v39 }

// kernel: _lambda_.13
= control target key start
LH: loop header
LB: loop body
LE: loop exit
PB: predicated region body
PF: predicated region fallthrough
CT: control target
= control target key end

     0   :  { %v1579_v0 = vmov 0   ;;  %vm446_vm0 = vcmask 130048   ;;  %vm1152_vm1 = vcmask 60416   ;;  %s2176_s1 = inlined_call_operand.vmem [shape: bf16[144,8], index: 1, kind: input, shape index: {}]   ;;  %s2177_s0 = inlined_call_operand.vmem [shape: bf16[512,144], index: 0, kind: input, shape index: {}]   ;;  %s2178_s2 = inlined_call_operand.vmem [shape: f32[1,8], index: 2, kind: input, shape index: {}]   ;;  %s2179_s3 = inlined_call_operand.vmem [shape: bf16[512,8], index: 3, kind: output, shape index: {}]  }
   0x1   :  { %543 = vmatprep.subr.bf16.mxu0 %v1579_v0  ;;  %1455 = vmatprep.subr.bf16.mxu1 %v1579_v0  ;;  %v1474_v1 = vld [vmem:[%s2176_s1 + $0x38] sm:$0xff]   ;;  %v1475_v2 = vld [vmem:[%s2176_s1 + $0x30] sm:$0xff]   ;;  %v1476_v3 = vld [vmem:[%s2176_s1 + $0x28] sm:$0xff]  }
   0x2   :  { %544 = vmatpush1.bf16.msra.mxu0 %v1474_v1  ;;  %1464 = vmatpush1.bf16.msra.mxu1 %v1474_v1  ;;  %v1477_v4 = vld [vmem:[%s2176_s1 + $0x20] sm:$0xff]   ;;  %v1478_v7 = vld [vmem:[%s2176_s1 + $0x18] sm:$0xff]   ;;  %v1479_v8 = vld [vmem:[%s2176_s1 + $0x10] sm:$0xff]  }
   0x3   :  { %545 = vmatprep.subr.bf16.mxu0 %v1579_v0  ;;  %1456 = vmatprep.subr.bf16.mxu1 %v1579_v0  ;;  %v1485_v5 = vld [vmem:[%s2177_s0 + $0x4] ss:$8 sps:$4 sm:$0xff]   ;;  %v1483_v12 = vld [vmem:[%s2177_s0] ss:$8 sps:$4 sm:$0xff]   ;;  %v1489_v14 = vld [vmem:[%s2177_s0 + $0x14] ss:$8 sps:$4 sm:$0xff]  }
   0x4   :  { %v1488_v6 = vld [vmem:[%s2177_s0 + $0x104] ss:$8 sps:$4 sm:$0xff]   ;;  %1295 = vmatprep.mubr.msk.bf16.mxu0 %vm446_vm0, %v1485_v5  ;;  %v1486_v13 = vld [vmem:[%s2177_s0 + $0x100] ss:$8 sps:$4 sm:$0xff]   ;;  %v1491_v15 = vld [vmem:[%s2177_s0 + $0x114] ss:$8 sps:$4 sm:$0xff]  }
   0x5   :  { %1311 = vmatprep.mubr.msk.bf16.mxu1 %vm446_vm0, %v1488_v6  ;;  %v1480_v9 = vld [vmem:[%s2176_s1 + $0x8] sm:$0xff]   ;;  %v1481_v10 = vld [vmem:[%s2176_s1] sm:$0xff]   ;;  %v1493_v16 = vld [vmem:[%s2177_s0 + $0x10] ss:$8 sps:$4 sm:$0xff]  }
   0x6   :  { %546 = vmatpush1.bf16.msra.mxu0 %v1475_v2  ;;  %1465 = vmatpush1.bf16.msra.mxu1 %v1475_v2  ;;  %v1482_v11 = vld [vmem:[%s2176_s1 + $0x40] sm:$0xff]   ;;  %v1494_v17 = vld [vmem:[%s2177_s0 + $0x110] ss:$8 sps:$4 sm:$0xff]   ;;  %v1501_v22 = vld [vmem:[%s2177_s0 + $0x34] ss:$8 sps:$4 sm:$0xff]  }
   0x7   :  { %547 = vmatprep.subr.bf16.mxu0 %v1579_v0  ;;  %1457 = vmatprep.subr.bf16.mxu1 %v1579_v0  ;;  %v1495_v18 = vld [vmem:[%s2177_s0 + $0x24] ss:$8 sps:$4 sm:$0xff]   ;;  %v1499_v20 = vld [vmem:[%s2177_s0 + $0x20] ss:$8 sps:$4 sm:$0xff]   ;;  %v1503_v23 = vld [vmem:[%s2177_s0 + $0x134] ss:$8 sps:$4 sm:$0xff]  }
   0x8   :  { %v1497_v19 = vld [vmem:[%s2177_s0 + $0x124] ss:$8 sps:$4 sm:$0xff]   ;;  %v1500_v21 = vld [vmem:[%s2177_s0 + $0x120] ss:$8 sps:$4 sm:$0xff]   ;;  %v1505_v24 = vld [vmem:[%s2177_s0 + $0x30] ss:$8 sps:$4 sm:$0xff]  }
   0x9   :  { %v1506_v25 = vld [vmem:[%s2177_s0 + $0x130] ss:$8 sps:$4 sm:$0xff]   ;;  %v1507_v26 = vld [vmem:[%s2177_s0 + $0x44] ss:$8 sps:$4 sm:$0xff]   ;;  %v1511_v28 = vld [vmem:[%s2177_s0 + $0x40] ss:$8 sps:$4 sm:$0xff]  }
   0xa   :  { %548 = vmatpush1.bf16.msra.mxu0 %v1476_v3  ;;  %1466 = vmatpush1.bf16.msra.mxu1 %v1476_v3  ;;  %v1509_v27 = vld [vmem:[%s2177_s0 + $0x144] ss:$8 sps:$4 sm:$0xff]   ;;  %v1512_v29 = vld [vmem:[%s2177_s0 + $0x140] ss:$8 sps:$4 sm:$0xff]   ;;  %v1513_v30 = vld [vmem:[%s2177_s0 + $0x54] ss:$8 sps:$4 sm:$0xff]  }
   0xb   :  { %549 = vmatprep.subr.bf16.mxu0 %v1579_v0  ;;  %1458 = vmatprep.subr.bf16.mxu1 %v1579_v0  ;;  %v1515_v31 = vld [vmem:[%s2177_s0 + $0x154] ss:$8 sps:$4 sm:$0xff]   ;;  %v1517_v32 = vld [vmem:[%s2177_s0 + $0x50] ss:$8 sps:$4 sm:$0xff]   ;;  %v1519_v34 = vld [vmem:[%s2177_s0 + $0x64] ss:$8 sps:$4 sm:$0xff]  }
   0xc   :  { %v1518_v33 = vld [vmem:[%s2177_s0 + $0x150] ss:$8 sps:$4 sm:$0xff]   ;;  %v1521_v35 = vld [vmem:[%s2177_s0 + $0x164] ss:$8 sps:$4 sm:$0xff]   ;;  %v1523_v36 = vld [vmem:[%s2177_s0 + $0x60] ss:$8 sps:$4 sm:$0xff]  }
   0xd   :  { %v1524_v37 = vld [vmem:[%s2177_s0 + $0x160] ss:$8 sps:$4 sm:$0xff]   ;;  %v1525_v38 = vld [vmem:[%s2177_s0 + $0x74] ss:$8 sps:$4 sm:$0xff]   ;;  %v1529_v40 = vld [vmem:[%s2177_s0 + $0x70] ss:$8 sps:$4 sm:$0xff]  }
   0xe   :  { %550 = vmatpush1.bf16.msra.mxu0 %v1477_v4  ;;  %1467 = vmatpush1.bf16.msra.mxu1 %v1477_v4  ;;  %v1527_v39 = vld [vmem:[%s2177_s0 + $0x174] ss:$8 sps:$4 sm:$0xff]   ;;  %v1530_v41 = vld [vmem:[%s2177_s0 + $0x170] ss:$8 sps:$4 sm:$0xff]   ;;  %v1531_v42 = vld [vmem:[%s2177_s0 + $0x84] ss:$8 sps:$4 sm:$0xff]  }
   0xf   :  { %551 = vmatprep.subr.bf16.mxu0 %v1579_v0  ;;  %1459 = vmatprep.subr.bf16.mxu1 %v1579_v0  ;;  %v1533_v43 = vld [vmem:[%s2177_s0 + $0x184] ss:$8 sps:$4 sm:$0xff]   ;;  %v1535_v44 = vld [vmem:[%s2177_s0 + $0x80] ss:$8 sps:$4 sm:$0xff]   ;;  %v1537_v46 = vld [vmem:[%s2177_s0 + $0x94] ss:$8 sps:$4 sm:$0xff]  }
  0x10   :  { %v1536_v45 = vld [vmem:[%s2177_s0 + $0x180] ss:$8 sps:$4 sm:$0xff]   ;;  %v1539_v47 = vld [vmem:[%s2177_s0 + $0x194] ss:$8 sps:$4 sm:$0xff]   ;;  %v1541_v48 = vld [vmem:[%s2177_s0 + $0x90] ss:$8 sps:$4 sm:$0xff]  }
  0x11   :  { %v1542_v49 = vld [vmem:[%s2177_s0 + $0x190] ss:$8 sps:$4 sm:$0xff]   ;;  %v1543_v50 = vld [vmem:[%s2177_s0 + $0xa4] ss:$8 sps:$4 sm:$0xff]   ;;  %v1547_v52 = vld [vmem:[%s2177_s0 + $0xa0] ss:$8 sps:$4 sm:$0xff]  }
  0x12   :  { %552 = vmatpush1.bf16.msra.mxu0 %v1478_v7  ;;  %1468 = vmatpush1.bf16.msra.mxu1 %v1478_v7  ;;  %v1545_v51 = vld [vmem:[%s2177_s0 + $0x1a4] ss:$8 sps:$4 sm:$0xff]   ;;  %v1548_v53 = vld [vmem:[%s2177_s0 + $0x1a0] ss:$8 sps:$4 sm:$0xff]   ;;  %v1549_v54 = vld [vmem:[%s2177_s0 + $0xb4] ss:$8 sps:$4 sm:$0xff]  }
  0x13   :  { %553 = vmatprep.subr.bf16.mxu0 %v1579_v0  ;;  %1460 = vmatprep.subr.bf16.mxu1 %v1579_v0  ;;  %v1551_v55 = vld [vmem:[%s2177_s0 + $0x1b4] ss:$8 sps:$4 sm:$0xff]   ;;  %v1553_v56 = vld [vmem:[%s2177_s0 + $0xb0] ss:$8 sps:$4 sm:$0xff]   ;;  %v1555_v58 = vld [vmem:[%s2177_s0 + $0xc4] ss:$8 sps:$4 sm:$0xff]  }
  0x14   :  { %v1554_v57 = vld [vmem:[%s2177_s0 + $0x1b0] ss:$8 sps:$4 sm:$0xff]   ;;  %v1557_v59 = vld [vmem:[%s2177_s0 + $0x1c4] ss:$8 sps:$4 sm:$0xff]   ;;  %v1559_v60 = vld [vmem:[%s2177_s0 + $0xc0] ss:$8 sps:$4 sm:$0xff]  }
  0x15   :  { %v1560_v61 = vld [vmem:[%s2177_s0 + $0x1c0] ss:$8 sps:$4 sm:$0xff]   ;;  %v1561_v62 = vld [vmem:[%s2177_s0 + $0xd4] ss:$8 sps:$4 sm:$0xff]   ;;  %v1566_v1 = vld [vmem:[%s2177_s0 + $0x1d0] ss:$8 sps:$4 sm:$0xff]  }
  0x16   :  { %554 = vmatpush1.bf16.msra.mxu0 %v1479_v8  ;;  %1469 = vmatpush1.bf16.msra.mxu1 %v1479_v8  ;;  %v1563_v63 = vld [vmem:[%s2177_s0 + $0x1d4] ss:$8 sps:$4 sm:$0xff]   ;;  %v1567_v2 = vld [vmem:[%s2177_s0 + $0xe4] ss:$8 sps:$4 sm:$0xff]   ;;  %v1571_v4 = vld [vmem:[%s2177_s0 + $0xe0] ss:$8 sps:$4 sm:$0xff]  }
  0x17   :  { %555 = vmatprep.subr.bf16.mxu0 %v1579_v0  ;;  %1461 = vmatprep.subr.bf16.mxu1 %v1579_v0  ;;  %v1569_v3 = vld [vmem:[%s2177_s0 + $0x1e4] ss:$8 sps:$4 sm:$0xff]   ;;  %v1572_v5 = vld [vmem:[%s2177_s0 + $0x1e0] ss:$8 sps:$4 sm:$0xff]   ;;  %v1573_v6 = vld [vmem:[%s2177_s0 + $0xf4] ss:$8 sps:$4 sm:$0xff]  }
  0x18   :  { %v1575_v7 = vld [vmem:[%s2177_s0 + $0x1f4] ss:$8 sps:$4 sm:$0xff]   ;;  %v1577_v8 = vld [vmem:[%s2177_s0 + $0xf0] ss:$8 sps:$4 sm:$0xff]  }
  0x1a   :  { %556 = vmatpush1.bf16.msra.mxu0 %v1480_v9  ;;  %1470 = vmatpush1.bf16.msra.mxu1 %v1480_v9  ;;  %v1578_v9 = vld [vmem:[%s2177_s0 + $0x1f0] ss:$8 sps:$4 sm:$0xff]  }
  0x1b   :  { %557 = vmatprep.subr.bf16.mxu0 %v1579_v0  ;;  %1462 = vmatprep.subr.bf16.mxu1 %v1579_v0 }
  0x1e   :  { %558 = vmatpush1.bf16.msra.mxu0 %v1481_v10  ;;  %1471 = vmatpush1.bf16.msra.mxu1 %v1481_v10  ;;  %v1854_v10 = vld [vmem:[%s2178_s2] ss:$0 sm:$0xff] }
  0x1f   :  { %573 = vmatprep.subr.bf16.mxu0 %v1579_v0  ;;  %1463 = vmatprep.subr.bf16.mxu1 %v1579_v0  ;;  %v1565_v0 = vld [vmem:[%s2177_s0 + $0xd0] ss:$8 sps:$4 sm:$0xff]  }
  0x22   :  { %574 = vmatpush2.bf16.msra.mxu0 %v1482_v11  ;;  %1472 = vmatpush2.bf16.msra.mxu1 %v1482_v11 }
  0x25   :  { %576 = vmatmul.mubr.bf16.vlgmr.msra.gmra.mxu0 %v1483_v12  ;;  %704 = vmatmul.mubr.bf16.vlgmr.msra.gmra.mxu1 %v1486_v13 }
  0x26   :  { %1296 = vmatprep.mubr.msk.bf16.mxu0 %vm446_vm0, %v1489_v14  ;;  %1312 = vmatprep.mubr.msk.bf16.mxu1 %vm446_vm0, %v1491_v15 }
  0x2d   :  { %584 = vmatmul.mubr.bf16.gmra.mxu0 %v1493_v16  ;;  %712 = vmatmul.mubr.bf16.gmra.mxu1 %v1494_v17 }
  0x2e   :  { %1297 = vmatprep.mubr.msk.bf16.mxu0 %vm446_vm0, %v1495_v18  ;;  %1313 = vmatprep.mubr.msk.bf16.mxu1 %vm446_vm0, %v1497_v19 }
  0x35   :  { %592 = vmatmul.mubr.bf16.gmra.mxu0 %v1499_v20  ;;  %720 = vmatmul.mubr.bf16.gmra.mxu1 %v1500_v21 }
  0x36   :  { %1298 = vmatprep.mubr.msk.bf16.mxu0 %vm446_vm0, %v1501_v22  ;;  %1314 = vmatprep.mubr.msk.bf16.mxu1 %vm446_vm0, %v1503_v23 }
  0x3d   :  { %600 = vmatmul.mubr.bf16.gmra.mxu0 %v1505_v24  ;;  %728 = vmatmul.mubr.bf16.gmra.mxu1 %v1506_v25 }
  0x3e   :  { %1299 = vmatprep.mubr.msk.bf16.mxu0 %vm446_vm0, %v1507_v26  ;;  %1315 = vmatprep.mubr.msk.bf16.mxu1 %vm446_vm0, %v1509_v27 }
  0x45   :  { %608 = vmatmul.mubr.bf16.gmra.mxu0 %v1511_v28  ;;  %736 = vmatmul.mubr.bf16.gmra.mxu1 %v1512_v29 }
  0x46   :  { %1300 = vmatprep.mubr.msk.bf16.mxu0 %vm446_vm0, %v1513_v30  ;;  %1316 = vmatprep.mubr.msk.bf16.mxu1 %vm446_vm0, %v1515_v31 }
  0x4d   :  { %616 = vmatmul.mubr.bf16.gmra.mxu0 %v1517_v32  ;;  %744 = vmatmul.mubr.bf16.gmra.mxu1 %v1518_v33 }
  0x4e   :  { %1301 = vmatprep.mubr.msk.bf16.mxu0 %vm446_vm0, %v1519_v34  ;;  %1317 = vmatprep.mubr.msk.bf16.mxu1 %vm446_vm0, %v1521_v35 }
  0x55   :  { %624 = vmatmul.mubr.bf16.gmra.mxu0 %v1523_v36  ;;  %752 = vmatmul.mubr.bf16.gmra.mxu1 %v1524_v37 }
  0x56   :  { %1302 = vmatprep.mubr.msk.bf16.mxu0 %vm446_vm0, %v1525_v38  ;;  %1318 = vmatprep.mubr.msk.bf16.mxu1 %vm446_vm0, %v1527_v39 }
  0x5d   :  { %632 = vmatmul.mubr.bf16.gmra.mxu0 %v1529_v40  ;;  %760 = vmatmul.mubr.bf16.gmra.mxu1 %v1530_v41 }
  0x5e   :  { %1303 = vmatprep.mubr.msk.bf16.mxu0 %vm446_vm0, %v1531_v42  ;;  %1319 = vmatprep.mubr.msk.bf16.mxu1 %vm446_vm0, %v1533_v43 }
  0x65   :  { %640 = vmatmul.mubr.bf16.gmra.mxu0 %v1535_v44  ;;  %768 = vmatmul.mubr.bf16.gmra.mxu1 %v1536_v45 }
  0x66   :  { %1304 = vmatprep.mubr.msk.bf16.mxu0 %vm446_vm0, %v1537_v46  ;;  %1320 = vmatprep.mubr.msk.bf16.mxu1 %vm446_vm0, %v1539_v47 }
  0x6d   :  { %648 = vmatmul.mubr.bf16.gmra.mxu0 %v1541_v48  ;;  %776 = vmatmul.mubr.bf16.gmra.mxu1 %v1542_v49 }
  0x6e   :  { %1305 = vmatprep.mubr.msk.bf16.mxu0 %vm446_vm0, %v1543_v50  ;;  %1321 = vmatprep.mubr.msk.bf16.mxu1 %vm446_vm0, %v1545_v51 }
  0x75   :  { %656 = vmatmul.mubr.bf16.gmra.mxu0 %v1547_v52  ;;  %784 = vmatmul.mubr.bf16.gmra.mxu1 %v1548_v53 }
  0x76   :  { %1306 = vmatprep.mubr.msk.bf16.mxu0 %vm446_vm0, %v1549_v54  ;;  %1322 = vmatprep.mubr.msk.bf16.mxu1 %vm446_vm0, %v1551_v55 }
  0x7d   :  { %664 = vmatmul.mubr.bf16.gmra.mxu0 %v1553_v56  ;;  %792 = vmatmul.mubr.bf16.gmra.mxu1 %v1554_v57 }
  0x7e   :  { %1307 = vmatprep.mubr.msk.bf16.mxu0 %vm446_vm0, %v1555_v58  ;;  %1323 = vmatprep.mubr.msk.bf16.mxu1 %vm446_vm0, %v1557_v59 }
  0x85   :  { %672 = vmatmul.mubr.bf16.gmra.mxu0 %v1559_v60  ;;  %800 = vmatmul.mubr.bf16.gmra.mxu1 %v1560_v61 }
  0x86   :  { %1308 = vmatprep.mubr.msk.bf16.mxu0 %vm446_vm0, %v1561_v62  ;;  %1324 = vmatprep.mubr.msk.bf16.mxu1 %vm446_vm0, %v1563_v63 }
  0x8d   :  { %680 = vmatmul.mubr.bf16.gmra.mxu0 %v1565_v0  ;;  %808 = vmatmul.mubr.bf16.gmra.mxu1 %v1566_v1 }
  0x8e   :  { %1309 = vmatprep.mubr.msk.bf16.mxu0 %vm446_vm0, %v1567_v2  ;;  %1325 = vmatprep.mubr.msk.bf16.mxu1 %vm446_vm0, %v1569_v3 }
  0x95   :  { %688 = vmatmul.mubr.bf16.gmra.mxu0 %v1571_v4  ;;  %816 = vmatmul.mubr.bf16.gmra.mxu1 %v1572_v5 }
  0x96   :  { %1310 = vmatprep.mubr.msk.bf16.mxu0 %vm446_vm0, %v1573_v6  ;;  %1326 = vmatprep.mubr.msk.bf16.mxu1 %vm446_vm0, %v1575_v7 }
  0x9d   :  { %696 = vmatmul.mubr.bf16.gmra.mxu0 %v1577_v8  ;;  %824 = vmatmul.mubr.bf16.gmra.mxu1 %v1578_v9 }
  0xe5   :  { %v577_v11 = vpop.f32.mrf.mxu0  ;;  %v705_v12 = vpop.f32.mrf.mxu1 }
  0xe6   :  { %v578_v13 = vadd.f32 %v1854_v10, %v577_v11  ;;  %v706_v14 = vadd.f32 %v1854_v10, %v705_v12 }
  0xe7   :  { %v579_v15 = vpop.f32.mrf.mxu0  ;;  %v707_v16 = vpop.f32.mrf.mxu1 }
  0xe8   :  { %v832_v17 = vmax.f32 %v578_v13, 0.0  ;;  %v864_v18 = vmax.f32 %v706_v14, 0.0 }
  0xe9   :  { %v580_v19 = vpop.f32.mrf.mxu0  ;;  %v708_v20 = vpop.f32.mrf.mxu1 }
  0xea   :  { %v1391_v21 = vpack.c.bf16 %v832_v17, %v832_v17  ;;  %v1423_v22 = vpack.c.bf16 %v864_v18, %v864_v18  ;;  %v581_v23 = vadd.f32 %v1854_v10, %v580_v19  ;;  %v709_v24 = vadd.f32 %v1854_v10, %v708_v20 }
  0xeb   :  { %v582_v25 = vpop.f32.mrf.mxu0  ;;  %v710_v26 = vpop.f32.mrf.mxu1 }
  0xec   :  { %1153 = vst.msk [vmem:[%s2179_s3] sm:$0xf] %vm1152_vm1, %v1391_v21  ;;  %1185 = vst.msk [vmem:[%s2179_s3 + $0x80] sm:$0xf] %vm1152_vm1, %v1423_v22  ;;  %v833_v27 = vmax.f32 %v581_v23, 0.0  ;;  %v865_v28 = vmax.f32 %v709_v24, 0.0 }
  0xed   :  { %v585_v29 = vpop.f32.mrf.mxu0  ;;  %v713_v30 = vpop.f32.mrf.mxu1 }
  0xee   :  { %v1392_v31 = vpack.c.bf16 %v833_v27, %v833_v27  ;;  %v1424_v32 = vpack.c.bf16 %v865_v28, %v865_v28  ;;  %v586_v33 = vadd.f32 %v1854_v10, %v585_v29  ;;  %v714_v34 = vadd.f32 %v1854_v10, %v713_v30 }
  0xef   :  { %v587_v35 = vpop.f32.mrf.mxu0  ;;  %v715_v36 = vpop.f32.mrf.mxu1 }
  0xf0   :  { %1154 = vst.msk [vmem:[%s2179_s3 + $0x4] sm:$0xf] %vm1152_vm1, %v1392_v31  ;;  %1186 = vst.msk [vmem:[%s2179_s3 + $0x84] sm:$0xf] %vm1152_vm1, %v1424_v32  ;;  %v834_v37 = vmax.f32 %v586_v33, 0.0  ;;  %v866_v38 = vmax.f32 %v714_v34, 0.0 }
  0xf1   :  { %v588_v39 = vpop.f32.mrf.mxu0  ;;  %v716_v40 = vpop.f32.mrf.mxu1 }
  0xf2   :  { %v1393_v41 = vpack.c.bf16 %v834_v37, %v834_v37  ;;  %v1425_v42 = vpack.c.bf16 %v866_v38, %v866_v38  ;;  %v589_v43 = vadd.f32 %v1854_v10, %v588_v39  ;;  %v717_v44 = vadd.f32 %v1854_v10, %v716_v40 }
  0xf3   :  { %v590_v45 = vpop.f32.mrf.mxu0  ;;  %v718_v46 = vpop.f32.mrf.mxu1 }
  0xf4   :  { %1155 = vst.msk [vmem:[%s2179_s3 + $0x8] sm:$0xf] %vm1152_vm1, %v1393_v41  ;;  %1187 = vst.msk [vmem:[%s2179_s3 + $0x88] sm:$0xf] %vm1152_vm1, %v1425_v42  ;;  %v835_v47 = vmax.f32 %v589_v43, 0.0  ;;  %v867_v48 = vmax.f32 %v717_v44, 0.0 }
  0xf5   :  { %v593_v49 = vpop.f32.mrf.mxu0  ;;  %v721_v50 = vpop.f32.mrf.mxu1 }
  0xf6   :  { %v1394_v51 = vpack.c.bf16 %v835_v47, %v835_v47  ;;  %v1426_v52 = vpack.c.bf16 %v867_v48, %v867_v48  ;;  %v594_v53 = vadd.f32 %v1854_v10, %v593_v49  ;;  %v722_v54 = vadd.f32 %v1854_v10, %v721_v50 }
  0xf7   :  { %v595_v55 = vpop.f32.mrf.mxu0  ;;  %v723_v56 = vpop.f32.mrf.mxu1 }
  0xf8   :  { %1156 = vst.msk [vmem:[%s2179_s3 + $0xc] sm:$0xf] %vm1152_vm1, %v1394_v51  ;;  %1188 = vst.msk [vmem:[%s2179_s3 + $0x8c] sm:$0xf] %vm1152_vm1, %v1426_v52  ;;  %v836_v57 = vmax.f32 %v594_v53, 0.0  ;;  %v868_v58 = vmax.f32 %v722_v54, 0.0 }
  0xf9   :  { %v596_v59 = vpop.f32.mrf.mxu0  ;;  %v724_v60 = vpop.f32.mrf.mxu1 }
  0xfa   :  { %v1395_v61 = vpack.c.bf16 %v836_v57, %v836_v57  ;;  %v1427_v62 = vpack.c.bf16 %v868_v58, %v868_v58  ;;  %v597_v63 = vadd.f32 %v1854_v10, %v596_v59  ;;  %v725_v0 = vadd.f32 %v1854_v10, %v724_v60 }
  0xfb   :  { %v598_v1 = vpop.f32.mrf.mxu0  ;;  %v726_v2 = vpop.f32.mrf.mxu1 }
  0xfc   :  { %1157 = vst.msk [vmem:[%s2179_s3 + $0x10] sm:$0xf] %vm1152_vm1, %v1395_v61  ;;  %1189 = vst.msk [vmem:[%s2179_s3 + $0x90] sm:$0xf] %vm1152_vm1, %v1427_v62  ;;  %v837_v3 = vmax.f32 %v597_v63, 0.0  ;;  %v869_v4 = vmax.f32 %v725_v0, 0.0 }
  0xfd   :  { %v601_v5 = vpop.f32.mrf.mxu0  ;;  %v729_v6 = vpop.f32.mrf.mxu1 }
  0xfe   :  { %v1396_v7 = vpack.c.bf16 %v837_v3, %v837_v3  ;;  %v1428_v8 = vpack.c.bf16 %v869_v4, %v869_v4  ;;  %v602_v9 = vadd.f32 %v1854_v10, %v601_v5  ;;  %v730_v11 = vadd.f32 %v1854_v10, %v729_v6 }
  0xff   :  { %v603_v12 = vpop.f32.mrf.mxu0  ;;  %v731_v13 = vpop.f32.mrf.mxu1 }
 0x100   :  { %1158 = vst.msk [vmem:[%s2179_s3 + $0x14] sm:$0xf] %vm1152_vm1, %v1396_v7  ;;  %1190 = vst.msk [vmem:[%s2179_s3 + $0x94] sm:$0xf] %vm1152_vm1, %v1428_v8  ;;  %v838_v14 = vmax.f32 %v602_v9, 0.0  ;;  %v870_v15 = vmax.f32 %v730_v11, 0.0 }
 0x101   :  { %v604_v16 = vpop.f32.mrf.mxu0  ;;  %v732_v17 = vpop.f32.mrf.mxu1 }
 0x102   :  { %v1397_v18 = vpack.c.bf16 %v838_v14, %v838_v14  ;;  %v1429_v19 = vpack.c.bf16 %v870_v15, %v870_v15  ;;  %v605_v20 = vadd.f32 %v1854_v10, %v604_v16  ;;  %v733_v21 = vadd.f32 %v1854_v10, %v732_v17 }
 0x103   :  { %v606_v22 = vpop.f32.mrf.mxu0  ;;  %v734_v23 = vpop.f32.mrf.mxu1 }
 0x104   :  { %1159 = vst.msk [vmem:[%s2179_s3 + $0x18] sm:$0xf] %vm1152_vm1, %v1397_v18  ;;  %1191 = vst.msk [vmem:[%s2179_s3 + $0x98] sm:$0xf] %vm1152_vm1, %v1429_v19  ;;  %v839_v24 = vmax.f32 %v605_v20, 0.0  ;;  %v871_v25 = vmax.f32 %v733_v21, 0.0 }
 0x105   :  { %v609_v26 = vpop.f32.mrf.mxu0  ;;  %v737_v27 = vpop.f32.mrf.mxu1 }
 0x106   :  { %v1398_v28 = vpack.c.bf16 %v839_v24, %v839_v24  ;;  %v1430_v29 = vpack.c.bf16 %v871_v25, %v871_v25  ;;  %v610_v30 = vadd.f32 %v1854_v10, %v609_v26  ;;  %v738_v31 = vadd.f32 %v1854_v10, %v737_v27 }
 0x107   :  { %v611_v32 = vpop.f32.mrf.mxu0  ;;  %v739_v33 = vpop.f32.mrf.mxu1 }
 0x108   :  { %1160 = vst.msk [vmem:[%s2179_s3 + $0x1c] sm:$0xf] %vm1152_vm1, %v1398_v28  ;;  %1192 = vst.msk [vmem:[%s2179_s3 + $0x9c] sm:$0xf] %vm1152_vm1, %v1430_v29  ;;  %v840_v34 = vmax.f32 %v610_v30, 0.0  ;;  %v872_v35 = vmax.f32 %v738_v31, 0.0 }
 0x109   :  { %v612_v36 = vpop.f32.mrf.mxu0  ;;  %v740_v37 = vpop.f32.mrf.mxu1 }
 0x10a   :  { %v1399_v38 = vpack.c.bf16 %v840_v34, %v840_v34  ;;  %v1431_v39 = vpack.c.bf16 %v872_v35, %v872_v35  ;;  %v613_v40 = vadd.f32 %v1854_v10, %v612_v36  ;;  %v741_v41 = vadd.f32 %v1854_v10, %v740_v37 }
 0x10b   :  { %v614_v42 = vpop.f32.mrf.mxu0  ;;  %v742_v43 = vpop.f32.mrf.mxu1 }
 0x10c   :  { %1161 = vst.msk [vmem:[%s2179_s3 + $0x20] sm:$0xf] %vm1152_vm1, %v1399_v38  ;;  %1193 = vst.msk [vmem:[%s2179_s3 + $0xa0] sm:$0xf] %vm1152_vm1, %v1431_v39  ;;  %v841_v44 = vmax.f32 %v613_v40, 0.0  ;;  %v873_v45 = vmax.f32 %v741_v41, 0.0 }
 0x10d   :  { %v617_v46 = vpop.f32.mrf.mxu0  ;;  %v745_v47 = vpop.f32.mrf.mxu1 }
 0x10e   :  { %v1400_v48 = vpack.c.bf16 %v841_v44, %v841_v44  ;;  %v1432_v49 = vpack.c.bf16 %v873_v45, %v873_v45  ;;  %v618_v50 = vadd.f32 %v1854_v10, %v617_v46  ;;  %v746_v51 = vadd.f32 %v1854_v10, %v745_v47 }
 0x10f   :  { %v619_v52 = vpop.f32.mrf.mxu0  ;;  %v747_v53 = vpop.f32.mrf.mxu1 }
 0x110   :  { %1162 = vst.msk [vmem:[%s2179_s3 + $0x24] sm:$0xf] %vm1152_vm1, %v1400_v48  ;;  %1194 = vst.msk [vmem:[%s2179_s3 + $0xa4] sm:$0xf] %vm1152_vm1, %v1432_v49  ;;  %v842_v54 = vmax.f32 %v618_v50, 0.0  ;;  %v874_v55 = vmax.f32 %v746_v51, 0.0 }
 0x111   :  { %v620_v56 = vpop.f32.mrf.mxu0  ;;  %v748_v57 = vpop.f32.mrf.mxu1 }
 0x112   :  { %v1401_v58 = vpack.c.bf16 %v842_v54, %v842_v54  ;;  %v1433_v59 = vpack.c.bf16 %v874_v55, %v874_v55  ;;  %v621_v60 = vadd.f32 %v1854_v10, %v620_v56  ;;  %v749_v61 = vadd.f32 %v1854_v10, %v748_v57 }
 0x113   :  { %v622_v62 = vpop.f32.mrf.mxu0  ;;  %v750_v63 = vpop.f32.mrf.mxu1 }
 0x114   :  { %1163 = vst.msk [vmem:[%s2179_s3 + $0x28] sm:$0xf] %vm1152_vm1, %v1401_v58  ;;  %1195 = vst.msk [vmem:[%s2179_s3 + $0xa8] sm:$0xf] %vm1152_vm1, %v1433_v59  ;;  %v843_v0 = vmax.f32 %v621_v60, 0.0  ;;  %v875_v1 = vmax.f32 %v749_v61, 0.0 }
 0x115   :  { %v625_v2 = vpop.f32.mrf.mxu0  ;;  %v753_v3 = vpop.f32.mrf.mxu1 }
 0x116   :  { %v1402_v4 = vpack.c.bf16 %v843_v0, %v843_v0  ;;  %v1434_v5 = vpack.c.bf16 %v875_v1, %v875_v1  ;;  %v626_v6 = vadd.f32 %v1854_v10, %v625_v2  ;;  %v754_v7 = vadd.f32 %v1854_v10, %v753_v3 }
 0x117   :  { %v627_v8 = vpop.f32.mrf.mxu0  ;;  %v755_v9 = vpop.f32.mrf.mxu1 }
 0x118   :  { %1164 = vst.msk [vmem:[%s2179_s3 + $0x2c] sm:$0xf] %vm1152_vm1, %v1402_v4  ;;  %1196 = vst.msk [vmem:[%s2179_s3 + $0xac] sm:$0xf] %vm1152_vm1, %v1434_v5  ;;  %v844_v11 = vmax.f32 %v626_v6, 0.0  ;;  %v876_v12 = vmax.f32 %v754_v7, 0.0 }
 0x119   :  { %v628_v13 = vpop.f32.mrf.mxu0  ;;  %v756_v14 = vpop.f32.mrf.mxu1 }
 0x11a   :  { %v1403_v15 = vpack.c.bf16 %v844_v11, %v844_v11  ;;  %v1435_v16 = vpack.c.bf16 %v876_v12, %v876_v12  ;;  %v629_v17 = vadd.f32 %v1854_v10, %v628_v13  ;;  %v757_v18 = vadd.f32 %v1854_v10, %v756_v14 }
 0x11b   :  { %v630_v19 = vpop.f32.mrf.mxu0  ;;  %v758_v20 = vpop.f32.mrf.mxu1 }
 0x11c   :  { %1165 = vst.msk [vmem:[%s2179_s3 + $0x30] sm:$0xf] %vm1152_vm1, %v1403_v15  ;;  %1197 = vst.msk [vmem:[%s2179_s3 + $0xb0] sm:$0xf] %vm1152_vm1, %v1435_v16  ;;  %v845_v21 = vmax.f32 %v629_v17, 0.0  ;;  %v877_v22 = vmax.f32 %v757_v18, 0.0 }
 0x11d   :  { %v633_v23 = vpop.f32.mrf.mxu0  ;;  %v761_v24 = vpop.f32.mrf.mxu1 }
 0x11e   :  { %v1404_v25 = vpack.c.bf16 %v845_v21, %v845_v21  ;;  %v1436_v26 = vpack.c.bf16 %v877_v22, %v877_v22  ;;  %v634_v27 = vadd.f32 %v1854_v10, %v633_v23  ;;  %v762_v28 = vadd.f32 %v1854_v10, %v761_v24 }
 0x11f   :  { %v635_v29 = vpop.f32.mrf.mxu0  ;;  %v763_v30 = vpop.f32.mrf.mxu1 }
 0x120   :  { %1166 = vst.msk [vmem:[%s2179_s3 + $0x34] sm:$0xf] %vm1152_vm1, %v1404_v25  ;;  %1198 = vst.msk [vmem:[%s2179_s3 + $0xb4] sm:$0xf] %vm1152_vm1, %v1436_v26  ;;  %v846_v31 = vmax.f32 %v634_v27, 0.0  ;;  %v878_v32 = vmax.f32 %v762_v28, 0.0 }
 0x121   :  { %v636_v33 = vpop.f32.mrf.mxu0  ;;  %v764_v34 = vpop.f32.mrf.mxu1 }
 0x122   :  { %v1405_v35 = vpack.c.bf16 %v846_v31, %v846_v31  ;;  %v1437_v36 = vpack.c.bf16 %v878_v32, %v878_v32  ;;  %v637_v37 = vadd.f32 %v1854_v10, %v636_v33  ;;  %v765_v38 = vadd.f32 %v1854_v10, %v764_v34 }
 0x123   :  { %v638_v39 = vpop.f32.mrf.mxu0  ;;  %v766_v40 = vpop.f32.mrf.mxu1 }
 0x124   :  { %1167 = vst.msk [vmem:[%s2179_s3 + $0x38] sm:$0xf] %vm1152_vm1, %v1405_v35  ;;  %1199 = vst.msk [vmem:[%s2179_s3 + $0xb8] sm:$0xf] %vm1152_vm1, %v1437_v36  ;;  %v847_v41 = vmax.f32 %v637_v37, 0.0  ;;  %v879_v42 = vmax.f32 %v765_v38, 0.0 }
 0x125   :  { %v641_v43 = vpop.f32.mrf.mxu0  ;;  %v769_v44 = vpop.f32.mrf.mxu1 }
 0x126   :  { %v1406_v45 = vpack.c.bf16 %v847_v41, %v847_v41  ;;  %v1438_v46 = vpack.c.bf16 %v879_v42, %v879_v42  ;;  %v642_v47 = vadd.f32 %v1854_v10, %v641_v43  ;;  %v770_v48 = vadd.f32 %v1854_v10, %v769_v44 }
 0x127   :  { %v643_v49 = vpop.f32.mrf.mxu0  ;;  %v771_v50 = vpop.f32.mrf.mxu1 }
 0x128   :  { %1168 = vst.msk [vmem:[%s2179_s3 + $0x3c] sm:$0xf] %vm1152_vm1, %v1406_v45  ;;  %1200 = vst.msk [vmem:[%s2179_s3 + $0xbc] sm:$0xf] %vm1152_vm1, %v1438_v46  ;;  %v848_v51 = vmax.f32 %v642_v47, 0.0  ;;  %v880_v52 = vmax.f32 %v770_v48, 0.0 }
 0x129   :  { %v644_v53 = vpop.f32.mrf.mxu0  ;;  %v772_v54 = vpop.f32.mrf.mxu1 }
 0x12a   :  { %v1407_v55 = vpack.c.bf16 %v848_v51, %v848_v51  ;;  %v1439_v56 = vpack.c.bf16 %v880_v52, %v880_v52  ;;  %v645_v57 = vadd.f32 %v1854_v10, %v644_v53  ;;  %v773_v58 = vadd.f32 %v1854_v10, %v772_v54 }
 0x12b   :  { %v646_v59 = vpop.f32.mrf.mxu0  ;;  %v774_v60 = vpop.f32.mrf.mxu1 }
 0x12c   :  { %1169 = vst.msk [vmem:[%s2179_s3 + $0x40] sm:$0xf] %vm1152_vm1, %v1407_v55  ;;  %1201 = vst.msk [vmem:[%s2179_s3 + $0xc0] sm:$0xf] %vm1152_vm1, %v1439_v56  ;;  %v849_v61 = vmax.f32 %v645_v57, 0.0  ;;  %v881_v62 = vmax.f32 %v773_v58, 0.0 }
 0x12d   :  { %v649_v63 = vpop.f32.mrf.mxu0  ;;  %v777_v0 = vpop.f32.mrf.mxu1 }
 0x12e   :  { %v1408_v1 = vpack.c.bf16 %v849_v61, %v849_v61  ;;  %v1440_v2 = vpack.c.bf16 %v881_v62, %v881_v62  ;;  %v650_v3 = vadd.f32 %v1854_v10, %v649_v63  ;;  %v778_v4 = vadd.f32 %v1854_v10, %v777_v0 }
 0x12f   :  { %v651_v5 = vpop.f32.mrf.mxu0  ;;  %v779_v6 = vpop.f32.mrf.mxu1 }
 0x130   :  { %1170 = vst.msk [vmem:[%s2179_s3 + $0x44] sm:$0xf] %vm1152_vm1, %v1408_v1  ;;  %1202 = vst.msk [vmem:[%s2179_s3 + $0xc4] sm:$0xf] %vm1152_vm1, %v1440_v2  ;;  %v850_v7 = vmax.f32 %v650_v3, 0.0  ;;  %v882_v8 = vmax.f32 %v778_v4, 0.0 }
 0x131   :  { %v652_v9 = vpop.f32.mrf.mxu0  ;;  %v780_v11 = vpop.f32.mrf.mxu1 }
 0x132   :  { %v1409_v12 = vpack.c.bf16 %v850_v7, %v850_v7  ;;  %v1441_v13 = vpack.c.bf16 %v882_v8, %v882_v8  ;;  %v653_v14 = vadd.f32 %v1854_v10, %v652_v9  ;;  %v781_v15 = vadd.f32 %v1854_v10, %v780_v11 }
 0x133   :  { %v654_v16 = vpop.f32.mrf.mxu0  ;;  %v782_v17 = vpop.f32.mrf.mxu1 }
 0x134   :  { %1171 = vst.msk [vmem:[%s2179_s3 + $0x48] sm:$0xf] %vm1152_vm1, %v1409_v12  ;;  %1203 = vst.msk [vmem:[%s2179_s3 + $0xc8] sm:$0xf] %vm1152_vm1, %v1441_v13  ;;  %v851_v18 = vmax.f32 %v653_v14, 0.0  ;;  %v883_v19 = vmax.f32 %v781_v15, 0.0 }
 0x135   :  { %v657_v20 = vpop.f32.mrf.mxu0  ;;  %v785_v21 = vpop.f32.mrf.mxu1 }
 0x136   :  { %v1410_v22 = vpack.c.bf16 %v851_v18, %v851_v18  ;;  %v1442_v23 = vpack.c.bf16 %v883_v19, %v883_v19  ;;  %v658_v24 = vadd.f32 %v1854_v10, %v657_v20  ;;  %v786_v25 = vadd.f32 %v1854_v10, %v785_v21 }
 0x137   :  { %v659_v26 = vpop.f32.mrf.mxu0  ;;  %v787_v27 = vpop.f32.mrf.mxu1 }
 0x138   :  { %1172 = vst.msk [vmem:[%s2179_s3 + $0x4c] sm:$0xf] %vm1152_vm1, %v1410_v22  ;;  %1204 = vst.msk [vmem:[%s2179_s3 + $0xcc] sm:$0xf] %vm1152_vm1, %v1442_v23  ;;  %v852_v28 = vmax.f32 %v658_v24, 0.0  ;;  %v884_v29 = vmax.f32 %v786_v25, 0.0 }
 0x139   :  { %v660_v30 = vpop.f32.mrf.mxu0  ;;  %v788_v31 = vpop.f32.mrf.mxu1 }
 0x13a   :  { %v1411_v32 = vpack.c.bf16 %v852_v28, %v852_v28  ;;  %v1443_v33 = vpack.c.bf16 %v884_v29, %v884_v29  ;;  %v661_v34 = vadd.f32 %v1854_v10, %v660_v30  ;;  %v789_v35 = vadd.f32 %v1854_v10, %v788_v31 }
 0x13b   :  { %v662_v36 = vpop.f32.mrf.mxu0  ;;  %v790_v37 = vpop.f32.mrf.mxu1 }
 0x13c   :  { %1173 = vst.msk [vmem:[%s2179_s3 + $0x50] sm:$0xf] %vm1152_vm1, %v1411_v32  ;;  %1205 = vst.msk [vmem:[%s2179_s3 + $0xd0] sm:$0xf] %vm1152_vm1, %v1443_v33  ;;  %v853_v38 = vmax.f32 %v661_v34, 0.0  ;;  %v885_v39 = vmax.f32 %v789_v35, 0.0 }
 0x13d   :  { %v665_v40 = vpop.f32.mrf.mxu0  ;;  %v793_v41 = vpop.f32.mrf.mxu1 }
 0x13e   :  { %v1412_v42 = vpack.c.bf16 %v853_v38, %v853_v38  ;;  %v1444_v43 = vpack.c.bf16 %v885_v39, %v885_v39  ;;  %v666_v44 = vadd.f32 %v1854_v10, %v665_v40  ;;  %v794_v45 = vadd.f32 %v1854_v10, %v793_v41 }
 0x13f   :  { %v667_v46 = vpop.f32.mrf.mxu0  ;;  %v795_v47 = vpop.f32.mrf.mxu1 }
 0x140   :  { %1174 = vst.msk [vmem:[%s2179_s3 + $0x54] sm:$0xf] %vm1152_vm1, %v1412_v42  ;;  %1206 = vst.msk [vmem:[%s2179_s3 + $0xd4] sm:$0xf] %vm1152_vm1, %v1444_v43  ;;  %v854_v48 = vmax.f32 %v666_v44, 0.0  ;;  %v886_v49 = vmax.f32 %v794_v45, 0.0 }
 0x141   :  { %v668_v50 = vpop.f32.mrf.mxu0  ;;  %v796_v51 = vpop.f32.mrf.mxu1 }
 0x142   :  { %v1413_v52 = vpack.c.bf16 %v854_v48, %v854_v48  ;;  %v1445_v53 = vpack.c.bf16 %v886_v49, %v886_v49  ;;  %v669_v54 = vadd.f32 %v1854_v10, %v668_v50  ;;  %v797_v55 = vadd.f32 %v1854_v10, %v796_v51 }
 0x143   :  { %v670_v56 = vpop.f32.mrf.mxu0  ;;  %v798_v57 = vpop.f32.mrf.mxu1 }
 0x144   :  { %1175 = vst.msk [vmem:[%s2179_s3 + $0x58] sm:$0xf] %vm1152_vm1, %v1413_v52  ;;  %1207 = vst.msk [vmem:[%s2179_s3 + $0xd8] sm:$0xf] %vm1152_vm1, %v1445_v53  ;;  %v855_v58 = vmax.f32 %v669_v54, 0.0  ;;  %v887_v59 = vmax.f32 %v797_v55, 0.0 }
 0x145   :  { %v673_v60 = vpop.f32.mrf.mxu0  ;;  %v801_v61 = vpop.f32.mrf.mxu1 }
 0x146   :  { %v1414_v62 = vpack.c.bf16 %v855_v58, %v855_v58  ;;  %v1446_v63 = vpack.c.bf16 %v887_v59, %v887_v59  ;;  %v674_v0 = vadd.f32 %v1854_v10, %v673_v60  ;;  %v802_v1 = vadd.f32 %v1854_v10, %v801_v61 }
 0x147   :  { %v675_v2 = vpop.f32.mrf.mxu0  ;;  %v803_v3 = vpop.f32.mrf.mxu1 }
 0x148   :  { %1176 = vst.msk [vmem:[%s2179_s3 + $0x5c] sm:$0xf] %vm1152_vm1, %v1414_v62  ;;  %1208 = vst.msk [vmem:[%s2179_s3 + $0xdc] sm:$0xf] %vm1152_vm1, %v1446_v63  ;;  %v856_v4 = vmax.f32 %v674_v0, 0.0  ;;  %v888_v5 = vmax.f32 %v802_v1, 0.0 }
 0x149   :  { %v676_v6 = vpop.f32.mrf.mxu0  ;;  %v804_v7 = vpop.f32.mrf.mxu1 }
 0x14a   :  { %v1415_v8 = vpack.c.bf16 %v856_v4, %v856_v4  ;;  %v1447_v9 = vpack.c.bf16 %v888_v5, %v888_v5  ;;  %v677_v11 = vadd.f32 %v1854_v10, %v676_v6  ;;  %v805_v12 = vadd.f32 %v1854_v10, %v804_v7 }
 0x14b   :  { %v678_v13 = vpop.f32.mrf.mxu0  ;;  %v806_v14 = vpop.f32.mrf.mxu1 }
 0x14c   :  { %1177 = vst.msk [vmem:[%s2179_s3 + $0x60] sm:$0xf] %vm1152_vm1, %v1415_v8  ;;  %1209 = vst.msk [vmem:[%s2179_s3 + $0xe0] sm:$0xf] %vm1152_vm1, %v1447_v9  ;;  %v857_v15 = vmax.f32 %v677_v11, 0.0  ;;  %v889_v16 = vmax.f32 %v805_v12, 0.0 }
 0x14d   :  { %v681_v17 = vpop.f32.mrf.mxu0  ;;  %v809_v18 = vpop.f32.mrf.mxu1 }
 0x14e   :  { %v1416_v19 = vpack.c.bf16 %v857_v15, %v857_v15  ;;  %v1448_v20 = vpack.c.bf16 %v889_v16, %v889_v16  ;;  %v682_v21 = vadd.f32 %v1854_v10, %v681_v17  ;;  %v810_v22 = vadd.f32 %v1854_v10, %v809_v18 }
 0x14f   :  { %v683_v23 = vpop.f32.mrf.mxu0  ;;  %v811_v24 = vpop.f32.mrf.mxu1 }
 0x150   :  { %1178 = vst.msk [vmem:[%s2179_s3 + $0x64] sm:$0xf] %vm1152_vm1, %v1416_v19  ;;  %1210 = vst.msk [vmem:[%s2179_s3 + $0xe4] sm:$0xf] %vm1152_vm1, %v1448_v20  ;;  %v858_v25 = vmax.f32 %v682_v21, 0.0  ;;  %v890_v26 = vmax.f32 %v810_v22, 0.0 }
 0x151   :  { %v684_v27 = vpop.f32.mrf.mxu0  ;;  %v812_v28 = vpop.f32.mrf.mxu1 }
 0x152   :  { %v1417_v29 = vpack.c.bf16 %v858_v25, %v858_v25  ;;  %v1449_v30 = vpack.c.bf16 %v890_v26, %v890_v26  ;;  %v685_v31 = vadd.f32 %v1854_v10, %v684_v27  ;;  %v813_v32 = vadd.f32 %v1854_v10, %v812_v28 }
 0x153   :  { %v686_v33 = vpop.f32.mrf.mxu0  ;;  %v814_v34 = vpop.f32.mrf.mxu1 }
 0x154   :  { %1179 = vst.msk [vmem:[%s2179_s3 + $0x68] sm:$0xf] %vm1152_vm1, %v1417_v29  ;;  %1211 = vst.msk [vmem:[%s2179_s3 + $0xe8] sm:$0xf] %vm1152_vm1, %v1449_v30  ;;  %v859_v35 = vmax.f32 %v685_v31, 0.0  ;;  %v891_v36 = vmax.f32 %v813_v32, 0.0 }
 0x155   :  { %v689_v37 = vpop.f32.mrf.mxu0  ;;  %v817_v38 = vpop.f32.mrf.mxu1 }
 0x156   :  { %v1418_v39 = vpack.c.bf16 %v859_v35, %v859_v35  ;;  %v1450_v40 = vpack.c.bf16 %v891_v36, %v891_v36  ;;  %v690_v41 = vadd.f32 %v1854_v10, %v689_v37  ;;  %v818_v42 = vadd.f32 %v1854_v10, %v817_v38 }
 0x157   :  { %v691_v43 = vpop.f32.mrf.mxu0  ;;  %v819_v44 = vpop.f32.mrf.mxu1 }
 0x158   :  { %1180 = vst.msk [vmem:[%s2179_s3 + $0x6c] sm:$0xf] %vm1152_vm1, %v1418_v39  ;;  %1212 = vst.msk [vmem:[%s2179_s3 + $0xec] sm:$0xf] %vm1152_vm1, %v1450_v40  ;;  %v860_v45 = vmax.f32 %v690_v41, 0.0  ;;  %v892_v46 = vmax.f32 %v818_v42, 0.0 }
 0x159   :  { %v692_v47 = vpop.f32.mrf.mxu0  ;;  %v820_v48 = vpop.f32.mrf.mxu1 }
 0x15a   :  { %v1419_v49 = vpack.c.bf16 %v860_v45, %v860_v45  ;;  %v1451_v50 = vpack.c.bf16 %v892_v46, %v892_v46  ;;  %v693_v51 = vadd.f32 %v1854_v10, %v692_v47  ;;  %v821_v52 = vadd.f32 %v1854_v10, %v820_v48 }
 0x15b   :  { %v694_v53 = vpop.f32.mrf.mxu0  ;;  %v822_v54 = vpop.f32.mrf.mxu1 }
 0x15c   :  { %1181 = vst.msk [vmem:[%s2179_s3 + $0x70] sm:$0xf] %vm1152_vm1, %v1419_v49  ;;  %1213 = vst.msk [vmem:[%s2179_s3 + $0xf0] sm:$0xf] %vm1152_vm1, %v1451_v50  ;;  %v861_v55 = vmax.f32 %v693_v51, 0.0  ;;  %v893_v56 = vmax.f32 %v821_v52, 0.0 }
 0x15d   :  { %v697_v57 = vpop.f32.mrf.mxu0  ;;  %v825_v58 = vpop.f32.mrf.mxu1 }
 0x15e   :  { %v1420_v59 = vpack.c.bf16 %v861_v55, %v861_v55  ;;  %v1452_v60 = vpack.c.bf16 %v893_v56, %v893_v56  ;;  %v698_v61 = vadd.f32 %v1854_v10, %v697_v57  ;;  %v826_v62 = vadd.f32 %v1854_v10, %v825_v58 }
 0x15f   :  { %v699_v63 = vpop.f32.mrf.mxu0  ;;  %v827_v0 = vpop.f32.mrf.mxu1 }
 0x160   :  { %1182 = vst.msk [vmem:[%s2179_s3 + $0x74] sm:$0xf] %vm1152_vm1, %v1420_v59  ;;  %1214 = vst.msk [vmem:[%s2179_s3 + $0xf4] sm:$0xf] %vm1152_vm1, %v1452_v60  ;;  %v862_v1 = vmax.f32 %v698_v61, 0.0  ;;  %v894_v2 = vmax.f32 %v826_v62, 0.0 }
 0x161   :  { %v700_v3 = vpop.f32.mrf.mxu0  ;;  %v828_v4 = vpop.f32.mrf.mxu1 }
 0x162   :  { %v1421_v5 = vpack.c.bf16 %v862_v1, %v862_v1  ;;  %v1453_v6 = vpack.c.bf16 %v894_v2, %v894_v2  ;;  %v701_v7 = vadd.f32 %v1854_v10, %v700_v3  ;;  %v829_v8 = vadd.f32 %v1854_v10, %v828_v4 }
 0x163   :  { %v702_v9 = vpop.f32.mrf.mxu0  ;;  %v830_v11 = vpop.f32.mrf.mxu1 }
 0x164   :  { %1183 = vst.msk [vmem:[%s2179_s3 + $0x78] sm:$0xf] %vm1152_vm1, %v1421_v5  ;;  %1215 = vst.msk [vmem:[%s2179_s3 + $0xf8] sm:$0xf] %vm1152_vm1, %v1453_v6  ;;  %v863_v12 = vmax.f32 %v701_v7, 0.0  ;;  %v895_v13 = vmax.f32 %v829_v8, 0.0 }
 0x166   :  { %v1422_v14 = vpack.c.bf16 %v863_v12, %v863_v12  ;;  %v1454_v15 = vpack.c.bf16 %v895_v13, %v895_v13 }
 0x168   :  { %1184 = vst.msk [vmem:[%s2179_s3 + $0x7c] sm:$0xf] %vm1152_vm1, %v1422_v14  ;;  %1216 = vst.msk [vmem:[%s2179_s3 + $0xfc] sm:$0xf] %vm1152_vm1, %v1454_v15 }

// kernel: _lambda_.14
= control target key start
LH: loop header
LB: loop body
LE: loop exit
PB: predicated region body
PF: predicated region fallthrough
CT: control target
= control target key end

     0   :  { %v1639_v0 = vmov 0   ;;  %vm482_vm0 = vcmask 719872   ;;  %vm579_vm1 = vcmask 1043456   ;;  %vm1192_vm2 = vcmask 60416   ;;  %s2279_s1 = inlined_call_operand.vmem [shape: bf16[216,8], index: 1, kind: input, shape index: {}]   ;;  %s2280_s0 = inlined_call_operand.vmem [shape: bf16[512,216], index: 0, kind: input, shape index: {}]   ;;  %s2281_s2 = inlined_call_operand.vmem [shape: f32[1,8], index: 2, kind: input, shape index: {}]   ;;  %s2282_s3 = inlined_call_operand.vmem [shape: bf16[512,8], index: 3, kind: output, shape index: {}]  }
   0x1   :  { %583 = vmatprep.subr.bf16.mxu0 %v1639_v0  ;;  %1500 = vmatprep.subr.bf16.mxu1 %v1639_v0  ;;  %v1529_v1 = vld [vmem:[%s2279_s1 + $0x38] sm:$0xff]   ;;  %v1530_v2 = vld [vmem:[%s2279_s1 + $0x30] sm:$0xff]   ;;  %v1531_v3 = vld [vmem:[%s2279_s1 + $0x28] sm:$0xff]  }
   0x2   :  { %584 = vmatpush1.bf16.msra.mxu0 %v1529_v1  ;;  %1514 = vmatpush1.bf16.msra.mxu1 %v1529_v1  ;;  %v1532_v4 = vld [vmem:[%s2279_s1 + $0x20] sm:$0xff]   ;;  %v1533_v5 = vld [vmem:[%s2279_s1 + $0x18] sm:$0xff]   ;;  %v1534_v8 = vld [vmem:[%s2279_s1 + $0x10] sm:$0xff]  }
   0x3   :  { %585 = vmatprep.subr.bf16.mxu0 %v1639_v0  ;;  %1501 = vmatprep.subr.bf16.mxu1 %v1639_v0  ;;  %v1545_v6 = vld [vmem:[%s2280_s0 + $0x4] ss:$8 sps:$4 sm:$0xff]   ;;  %v1537_v11 = vld [vmem:[%s2279_s1 + $0x68] ss:$0 sps:$4 sm:$0xff]   ;;  %v1539_v14 = vld [vmem:[%s2279_s1 + $0x58] sm:$0xff]  }
   0x4   :  { %1340 = vmatprep.mubr.msk.bf16.mxu0 %vm482_vm0, %v1545_v6  ;;  %v1548_v7 = vld [vmem:[%s2280_s0 + $0x104] ss:$8 sps:$4 sm:$0xff]   ;;  %v581_v12 = vsel %vm579_vm1, %v1537_v11, 0  ;;  %v1540_v15 = vld [vmem:[%s2279_s1 + $0x50] sm:$0xff]   ;;  %v1543_v18 = vld [vmem:[%s2280_s0] ss:$8 sps:$4 sm:$0xff]  }
   0x5   :  { %1356 = vmatprep.mubr.msk.bf16.mxu1 %vm482_vm0, %v1548_v7  ;;  %v1535_v9 = vld [vmem:[%s2279_s1 + $0x8] sm:$0xff]   ;;  %v1536_v10 = vld [vmem:[%s2279_s1] sm:$0xff]   ;;  %v1549_v20 = vld [vmem:[%s2280_s0 + $0x14] ss:$8 sps:$4 sm:$0xff]  }
   0x6   :  { %586 = vmatpush1.bf16.msra.mxu0 %v1530_v2  ;;  %1515 = vmatpush1.bf16.msra.mxu1 %v1530_v2  ;;  %v1538_v13 = vld [vmem:[%s2279_s1 + $0x60] sm:$0xff]   ;;  %v1541_v16 = vld [vmem:[%s2279_s1 + $0x48] sm:$0xff]   ;;  %v1551_v21 = vld [vmem:[%s2280_s0 + $0x114] ss:$8 sps:$4 sm:$0xff]  }
   0x7   :  { %587 = vmatprep.subr.bf16.mxu0 %v1639_v0  ;;  %1502 = vmatprep.subr.bf16.mxu1 %v1639_v0  ;;  %v1542_v17 = vld [vmem:[%s2279_s1 + $0x40] sm:$0xff]   ;;  %v1553_v22 = vld [vmem:[%s2280_s0 + $0x10] ss:$8 sps:$4 sm:$0xff]   ;;  %v1561_v28 = vld [vmem:[%s2280_s0 + $0x34] ss:$8 sps:$4 sm:$0xff]  }
   0x8   :  { %v1546_v19 = vld [vmem:[%s2280_s0 + $0x100] ss:$8 sps:$4 sm:$0xff]   ;;  %v1554_v23 = vld [vmem:[%s2280_s0 + $0x110] ss:$8 sps:$4 sm:$0xff]   ;;  %v1555_v24 = vld [vmem:[%s2280_s0 + $0x24] ss:$8 sps:$4 sm:$0xff]  }
   0x9   :  { %v1557_v25 = vld [vmem:[%s2280_s0 + $0x124] ss:$8 sps:$4 sm:$0xff]   ;;  %v1559_v26 = vld [vmem:[%s2280_s0 + $0x20] ss:$8 sps:$4 sm:$0xff]   ;;  %v1563_v29 = vld [vmem:[%s2280_s0 + $0x134] ss:$8 sps:$4 sm:$0xff]  }
   0xa   :  { %588 = vmatpush1.bf16.msra.mxu0 %v1531_v3  ;;  %1516 = vmatpush1.bf16.msra.mxu1 %v1531_v3  ;;  %v1560_v27 = vld [vmem:[%s2280_s0 + $0x120] ss:$8 sps:$4 sm:$0xff]   ;;  %v1565_v30 = vld [vmem:[%s2280_s0 + $0x30] ss:$8 sps:$4 sm:$0xff]   ;;  %v1567_v32 = vld [vmem:[%s2280_s0 + $0x44] ss:$8 sps:$4 sm:$0xff]  }
   0xb   :  { %589 = vmatprep.subr.bf16.mxu0 %v1639_v0  ;;  %1503 = vmatprep.subr.bf16.mxu1 %v1639_v0  ;;  %v1566_v31 = vld [vmem:[%s2280_s0 + $0x130] ss:$8 sps:$4 sm:$0xff]   ;;  %v1569_v33 = vld [vmem:[%s2280_s0 + $0x144] ss:$8 sps:$4 sm:$0xff]   ;;  %v1571_v34 = vld [vmem:[%s2280_s0 + $0x40] ss:$8 sps:$4 sm:$0xff]  }
   0xc   :  { %v1572_v35 = vld [vmem:[%s2280_s0 + $0x140] ss:$8 sps:$4 sm:$0xff]   ;;  %v1573_v36 = vld [vmem:[%s2280_s0 + $0x54] ss:$8 sps:$4 sm:$0xff]   ;;  %v1577_v38 = vld [vmem:[%s2280_s0 + $0x50] ss:$8 sps:$4 sm:$0xff]  }
   0xd   :  { %v1575_v37 = vld [vmem:[%s2280_s0 + $0x154] ss:$8 sps:$4 sm:$0xff]   ;;  %v1578_v39 = vld [vmem:[%s2280_s0 + $0x150] ss:$8 sps:$4 sm:$0xff]   ;;  %v1579_v40 = vld [vmem:[%s2280_s0 + $0x64] ss:$8 sps:$4 sm:$0xff]  }
   0xe   :  { %590 = vmatpush1.bf16.msra.mxu0 %v1532_v4  ;;  %1517 = vmatpush1.bf16.msra.mxu1 %v1532_v4  ;;  %v1581_v41 = vld [vmem:[%s2280_s0 + $0x164] ss:$8 sps:$4 sm:$0xff]   ;;  %v1583_v42 = vld [vmem:[%s2280_s0 + $0x60] ss:$8 sps:$4 sm:$0xff]   ;;  %v1585_v44 = vld [vmem:[%s2280_s0 + $0x74] ss:$8 sps:$4 sm:$0xff]  }
   0xf   :  { %591 = vmatprep.subr.bf16.mxu0 %v1639_v0  ;;  %1504 = vmatprep.subr.bf16.mxu1 %v1639_v0  ;;  %v1584_v43 = vld [vmem:[%s2280_s0 + $0x160] ss:$8 sps:$4 sm:$0xff]   ;;  %v1587_v45 = vld [vmem:[%s2280_s0 + $0x174] ss:$8 sps:$4 sm:$0xff]   ;;  %v1589_v46 = vld [vmem:[%s2280_s0 + $0x70] ss:$8 sps:$4 sm:$0xff]  }
  0x10   :  { %v1590_v47 = vld [vmem:[%s2280_s0 + $0x170] ss:$8 sps:$4 sm:$0xff]   ;;  %v1591_v48 = vld [vmem:[%s2280_s0 + $0x84] ss:$8 sps:$4 sm:$0xff]   ;;  %v1595_v50 = vld [vmem:[%s2280_s0 + $0x80] ss:$8 sps:$4 sm:$0xff]  }
  0x11   :  { %v1593_v49 = vld [vmem:[%s2280_s0 + $0x184] ss:$8 sps:$4 sm:$0xff]   ;;  %v1596_v51 = vld [vmem:[%s2280_s0 + $0x180] ss:$8 sps:$4 sm:$0xff]   ;;  %v1597_v52 = vld [vmem:[%s2280_s0 + $0x94] ss:$8 sps:$4 sm:$0xff]  }
  0x12   :  { %592 = vmatpush1.bf16.msra.mxu0 %v1533_v5  ;;  %1518 = vmatpush1.bf16.msra.mxu1 %v1533_v5  ;;  %v1599_v53 = vld [vmem:[%s2280_s0 + $0x194] ss:$8 sps:$4 sm:$0xff]   ;;  %v1601_v54 = vld [vmem:[%s2280_s0 + $0x90] ss:$8 sps:$4 sm:$0xff]   ;;  %v1603_v56 = vld [vmem:[%s2280_s0 + $0xa4] ss:$8 sps:$4 sm:$0xff]  }
  0x13   :  { %593 = vmatprep.subr.bf16.mxu0 %v1639_v0  ;;  %1505 = vmatprep.subr.bf16.mxu1 %v1639_v0  ;;  %v1602_v55 = vld [vmem:[%s2280_s0 + $0x190] ss:$8 sps:$4 sm:$0xff]   ;;  %v1605_v57 = vld [vmem:[%s2280_s0 + $0x1a4] ss:$8 sps:$4 sm:$0xff]   ;;  %v1607_v58 = vld [vmem:[%s2280_s0 + $0xa0] ss:$8 sps:$4 sm:$0xff]  }
  0x14   :  { %v1608_v59 = vld [vmem:[%s2280_s0 + $0x1a0] ss:$8 sps:$4 sm:$0xff]   ;;  %v1609_v60 = vld [vmem:[%s2280_s0 + $0xb4] ss:$8 sps:$4 sm:$0xff]   ;;  %v1613_v62 = vld [vmem:[%s2280_s0 + $0xb0] ss:$8 sps:$4 sm:$0xff]  }
  0x15   :  { %v1611_v61 = vld [vmem:[%s2280_s0 + $0x1b4] ss:$8 sps:$4 sm:$0xff]   ;;  %v1614_v63 = vld [vmem:[%s2280_s0 + $0x1b0] ss:$8 sps:$4 sm:$0xff]   ;;  %v1617_v1 = vld [vmem:[%s2280_s0 + $0x1c4] ss:$8 sps:$4 sm:$0xff]  }
  0x16   :  { %594 = vmatpush1.bf16.msra.mxu0 %v1534_v8  ;;  %1519 = vmatpush1.bf16.msra.mxu1 %v1534_v8  ;;  %v1619_v2 = vld [vmem:[%s2280_s0 + $0xc0] ss:$8 sps:$4 sm:$0xff]   ;;  %v1621_v4 = vld [vmem:[%s2280_s0 + $0xd4] ss:$8 sps:$4 sm:$0xff]   ;;  %v1625_v6 = vld [vmem:[%s2280_s0 + $0xd0] ss:$8 sps:$4 sm:$0xff]  }
  0x17   :  { %595 = vmatprep.subr.bf16.mxu0 %v1639_v0  ;;  %1506 = vmatprep.subr.bf16.mxu1 %v1639_v0  ;;  %v1620_v3 = vld [vmem:[%s2280_s0 + $0x1c0] ss:$8 sps:$4 sm:$0xff]   ;;  %v1623_v5 = vld [vmem:[%s2280_s0 + $0x1d4] ss:$8 sps:$4 sm:$0xff]   ;;  %v1626_v7 = vld [vmem:[%s2280_s0 + $0x1d0] ss:$8 sps:$4 sm:$0xff]  }
  0x18   :  { %v1627_v8 = vld [vmem:[%s2280_s0 + $0xe4] ss:$8 sps:$4 sm:$0xff]   ;;  %v1632_v11 = vld [vmem:[%s2280_s0 + $0x1e0] ss:$8 sps:$4 sm:$0xff]  }
  0x1a   :  { %596 = vmatpush1.bf16.msra.mxu0 %v1535_v9  ;;  %1520 = vmatpush1.bf16.msra.mxu1 %v1535_v9  ;;  %v1629_v9 = vld [vmem:[%s2280_s0 + $0x1e4] ss:$8 sps:$4 sm:$0xff]  }
  0x1b   :  { %597 = vmatprep.subr.bf16.mxu0 %v1639_v0  ;;  %1507 = vmatprep.subr.bf16.mxu1 %v1639_v0 }
  0x1e   :  { %598 = vmatpush1.bf16.msra.mxu0 %v1536_v10  ;;  %1521 = vmatpush1.bf16.msra.mxu1 %v1536_v10  ;;  %v1631_v10 = vld [vmem:[%s2280_s0 + $0xe0] ss:$8 sps:$4 sm:$0xff]  }
  0x1f   :  { %603 = vmatprep.subr.bf16.mxu0 %v1639_v0  ;;  %1508 = vmatprep.subr.bf16.mxu1 %v1639_v0 }
  0x22   :  { %604 = vmatpush2.bf16.msra.mxu0 %v581_v12  ;;  %1522 = vmatpush2.bf16.msra.mxu1 %v581_v12  ;;  %v1633_v12 = vld [vmem:[%s2280_s0 + $0xf4] ss:$8 sps:$4 sm:$0xff]  }
  0x23   :  { %605 = vmatprep.subr.bf16.mxu0 %v1639_v0  ;;  %1509 = vmatprep.subr.bf16.mxu1 %v1639_v0 }
  0x26   :  { %606 = vmatpush2.bf16.msra.mxu0 %v1538_v13  ;;  %1523 = vmatpush2.bf16.msra.mxu1 %v1538_v13  ;;  %v1635_v13 = vld [vmem:[%s2280_s0 + $0x1f4] ss:$8 sps:$4 sm:$0xff]  }
  0x27   :  { %607 = vmatprep.subr.bf16.mxu0 %v1639_v0  ;;  %1510 = vmatprep.subr.bf16.mxu1 %v1639_v0 }
  0x2a   :  { %608 = vmatpush2.bf16.msra.mxu0 %v1539_v14  ;;  %1524 = vmatpush2.bf16.msra.mxu1 %v1539_v14  ;;  %v1637_v14 = vld [vmem:[%s2280_s0 + $0xf0] ss:$8 sps:$4 sm:$0xff]  }
  0x2b   :  { %609 = vmatprep.subr.bf16.mxu0 %v1639_v0  ;;  %1511 = vmatprep.subr.bf16.mxu1 %v1639_v0 }
  0x2e   :  { %610 = vmatpush2.bf16.msra.mxu0 %v1540_v15  ;;  %1525 = vmatpush2.bf16.msra.mxu1 %v1540_v15  ;;  %v1638_v15 = vld [vmem:[%s2280_s0 + $0x1f0] ss:$8 sps:$4 sm:$0xff]  }
  0x2f   :  { %611 = vmatprep.subr.bf16.mxu0 %v1639_v0  ;;  %1512 = vmatprep.subr.bf16.mxu1 %v1639_v0 }
  0x32   :  { %612 = vmatpush2.bf16.msra.mxu0 %v1541_v16  ;;  %1526 = vmatpush2.bf16.msra.mxu1 %v1541_v16  ;;  %v1957_v16 = vld [vmem:[%s2281_s2] ss:$0 sm:$0xff] }
  0x33   :  { %613 = vmatprep.subr.bf16.mxu0 %v1639_v0  ;;  %1513 = vmatprep.subr.bf16.mxu1 %v1639_v0  ;;  %v1615_v0 = vld [vmem:[%s2280_s0 + $0xc4] ss:$8 sps:$4 sm:$0xff]  }
  0x36   :  { %614 = vmatpush2.bf16.msra.mxu0 %v1542_v17  ;;  %1527 = vmatpush2.bf16.msra.mxu1 %v1542_v17 }
  0x39   :  { %616 = vmatmul.mubr.bf16.vlgmr.msra.gmra.mxu0 %v1543_v18  ;;  %744 = vmatmul.mubr.bf16.vlgmr.msra.gmra.mxu1 %v1546_v19 }
  0x3a   :  { %1341 = vmatprep.mubr.msk.bf16.mxu0 %vm482_vm0, %v1549_v20  ;;  %1357 = vmatprep.mubr.msk.bf16.mxu1 %vm482_vm0, %v1551_v21 }
  0x41   :  { %624 = vmatmul.mubr.bf16.gmra.mxu0 %v1553_v22  ;;  %752 = vmatmul.mubr.bf16.gmra.mxu1 %v1554_v23 }
  0x42   :  { %1342 = vmatprep.mubr.msk.bf16.mxu0 %vm482_vm0, %v1555_v24  ;;  %1358 = vmatprep.mubr.msk.bf16.mxu1 %vm482_vm0, %v1557_v25 }
  0x49   :  { %632 = vmatmul.mubr.bf16.gmra.mxu0 %v1559_v26  ;;  %760 = vmatmul.mubr.bf16.gmra.mxu1 %v1560_v27 }
  0x4a   :  { %1343 = vmatprep.mubr.msk.bf16.mxu0 %vm482_vm0, %v1561_v28  ;;  %1359 = vmatprep.mubr.msk.bf16.mxu1 %vm482_vm0, %v1563_v29 }
  0x51   :  { %640 = vmatmul.mubr.bf16.gmra.mxu0 %v1565_v30  ;;  %768 = vmatmul.mubr.bf16.gmra.mxu1 %v1566_v31 }
  0x52   :  { %1344 = vmatprep.mubr.msk.bf16.mxu0 %vm482_vm0, %v1567_v32  ;;  %1360 = vmatprep.mubr.msk.bf16.mxu1 %vm482_vm0, %v1569_v33 }
  0x59   :  { %648 = vmatmul.mubr.bf16.gmra.mxu0 %v1571_v34  ;;  %776 = vmatmul.mubr.bf16.gmra.mxu1 %v1572_v35 }
  0x5a   :  { %1345 = vmatprep.mubr.msk.bf16.mxu0 %vm482_vm0, %v1573_v36  ;;  %1361 = vmatprep.mubr.msk.bf16.mxu1 %vm482_vm0, %v1575_v37 }
  0x61   :  { %656 = vmatmul.mubr.bf16.gmra.mxu0 %v1577_v38  ;;  %784 = vmatmul.mubr.bf16.gmra.mxu1 %v1578_v39 }
  0x62   :  { %1346 = vmatprep.mubr.msk.bf16.mxu0 %vm482_vm0, %v1579_v40  ;;  %1362 = vmatprep.mubr.msk.bf16.mxu1 %vm482_vm0, %v1581_v41 }
  0x69   :  { %664 = vmatmul.mubr.bf16.gmra.mxu0 %v1583_v42  ;;  %792 = vmatmul.mubr.bf16.gmra.mxu1 %v1584_v43 }
  0x6a   :  { %1347 = vmatprep.mubr.msk.bf16.mxu0 %vm482_vm0, %v1585_v44  ;;  %1363 = vmatprep.mubr.msk.bf16.mxu1 %vm482_vm0, %v1587_v45 }
  0x71   :  { %672 = vmatmul.mubr.bf16.gmra.mxu0 %v1589_v46  ;;  %800 = vmatmul.mubr.bf16.gmra.mxu1 %v1590_v47 }
  0x72   :  { %1348 = vmatprep.mubr.msk.bf16.mxu0 %vm482_vm0, %v1591_v48  ;;  %1364 = vmatprep.mubr.msk.bf16.mxu1 %vm482_vm0, %v1593_v49 }
  0x79   :  { %680 = vmatmul.mubr.bf16.gmra.mxu0 %v1595_v50  ;;  %808 = vmatmul.mubr.bf16.gmra.mxu1 %v1596_v51 }
  0x7a   :  { %1349 = vmatprep.mubr.msk.bf16.mxu0 %vm482_vm0, %v1597_v52  ;;  %1365 = vmatprep.mubr.msk.bf16.mxu1 %vm482_vm0, %v1599_v53 }
  0x81   :  { %688 = vmatmul.mubr.bf16.gmra.mxu0 %v1601_v54  ;;  %816 = vmatmul.mubr.bf16.gmra.mxu1 %v1602_v55 }
  0x82   :  { %1350 = vmatprep.mubr.msk.bf16.mxu0 %vm482_vm0, %v1603_v56  ;;  %1366 = vmatprep.mubr.msk.bf16.mxu1 %vm482_vm0, %v1605_v57 }
  0x89   :  { %696 = vmatmul.mubr.bf16.gmra.mxu0 %v1607_v58  ;;  %824 = vmatmul.mubr.bf16.gmra.mxu1 %v1608_v59 }
  0x8a   :  { %1351 = vmatprep.mubr.msk.bf16.mxu0 %vm482_vm0, %v1609_v60  ;;  %1367 = vmatprep.mubr.msk.bf16.mxu1 %vm482_vm0, %v1611_v61 }
  0x91   :  { %704 = vmatmul.mubr.bf16.gmra.mxu0 %v1613_v62  ;;  %832 = vmatmul.mubr.bf16.gmra.mxu1 %v1614_v63 }
  0x92   :  { %1352 = vmatprep.mubr.msk.bf16.mxu0 %vm482_vm0, %v1615_v0  ;;  %1368 = vmatprep.mubr.msk.bf16.mxu1 %vm482_vm0, %v1617_v1 }
  0x99   :  { %712 = vmatmul.mubr.bf16.gmra.mxu0 %v1619_v2  ;;  %840 = vmatmul.mubr.bf16.gmra.mxu1 %v1620_v3 }
  0x9a   :  { %1353 = vmatprep.mubr.msk.bf16.mxu0 %vm482_vm0, %v1621_v4  ;;  %1369 = vmatprep.mubr.msk.bf16.mxu1 %vm482_vm0, %v1623_v5 }
  0xa1   :  { %720 = vmatmul.mubr.bf16.gmra.mxu0 %v1625_v6  ;;  %848 = vmatmul.mubr.bf16.gmra.mxu1 %v1626_v7 }
  0xa2   :  { %1354 = vmatprep.mubr.msk.bf16.mxu0 %vm482_vm0, %v1627_v8  ;;  %1370 = vmatprep.mubr.msk.bf16.mxu1 %vm482_vm0, %v1629_v9 }
  0xa9   :  { %728 = vmatmul.mubr.bf16.gmra.mxu0 %v1631_v10  ;;  %856 = vmatmul.mubr.bf16.gmra.mxu1 %v1632_v11 }
  0xaa   :  { %1355 = vmatprep.mubr.msk.bf16.mxu0 %vm482_vm0, %v1633_v12  ;;  %1371 = vmatprep.mubr.msk.bf16.mxu1 %vm482_vm0, %v1635_v13 }
  0xb1   :  { %736 = vmatmul.mubr.bf16.gmra.mxu0 %v1637_v14  ;;  %864 = vmatmul.mubr.bf16.gmra.mxu1 %v1638_v15 }
  0xf9   :  { %v617_v17 = vpop.f32.mrf.mxu0  ;;  %v745_v18 = vpop.f32.mrf.mxu1 }
  0xfa   :  { %v618_v19 = vadd.f32 %v1957_v16, %v617_v17  ;;  %v746_v20 = vadd.f32 %v1957_v16, %v745_v18 }
  0xfb   :  { %v619_v21 = vpop.f32.mrf.mxu0  ;;  %v747_v22 = vpop.f32.mrf.mxu1 }
  0xfc   :  { %v872_v23 = vmax.f32 %v618_v19, 0.0  ;;  %v904_v24 = vmax.f32 %v746_v20, 0.0 }
  0xfd   :  { %v620_v25 = vpop.f32.mrf.mxu0  ;;  %v748_v26 = vpop.f32.mrf.mxu1 }
  0xfe   :  { %v1436_v27 = vpack.c.bf16 %v872_v23, %v872_v23  ;;  %v1468_v28 = vpack.c.bf16 %v904_v24, %v904_v24  ;;  %v621_v29 = vadd.f32 %v1957_v16, %v620_v25  ;;  %v749_v30 = vadd.f32 %v1957_v16, %v748_v26 }
  0xff   :  { %v622_v31 = vpop.f32.mrf.mxu0  ;;  %v750_v32 = vpop.f32.mrf.mxu1 }
 0x100   :  { %1193 = vst.msk [vmem:[%s2282_s3] sm:$0xf] %vm1192_vm2, %v1436_v27  ;;  %1225 = vst.msk [vmem:[%s2282_s3 + $0x80] sm:$0xf] %vm1192_vm2, %v1468_v28  ;;  %v873_v33 = vmax.f32 %v621_v29, 0.0  ;;  %v905_v34 = vmax.f32 %v749_v30, 0.0 }
 0x101   :  { %v625_v35 = vpop.f32.mrf.mxu0  ;;  %v753_v36 = vpop.f32.mrf.mxu1 }
 0x102   :  { %v1437_v37 = vpack.c.bf16 %v873_v33, %v873_v33  ;;  %v1469_v38 = vpack.c.bf16 %v905_v34, %v905_v34  ;;  %v626_v39 = vadd.f32 %v1957_v16, %v625_v35  ;;  %v754_v40 = vadd.f32 %v1957_v16, %v753_v36 }
 0x103   :  { %v627_v41 = vpop.f32.mrf.mxu0  ;;  %v755_v42 = vpop.f32.mrf.mxu1 }
 0x104   :  { %1194 = vst.msk [vmem:[%s2282_s3 + $0x4] sm:$0xf] %vm1192_vm2, %v1437_v37  ;;  %1226 = vst.msk [vmem:[%s2282_s3 + $0x84] sm:$0xf] %vm1192_vm2, %v1469_v38  ;;  %v874_v43 = vmax.f32 %v626_v39, 0.0  ;;  %v906_v44 = vmax.f32 %v754_v40, 0.0 }
 0x105   :  { %v628_v45 = vpop.f32.mrf.mxu0  ;;  %v756_v46 = vpop.f32.mrf.mxu1 }
 0x106   :  { %v1438_v47 = vpack.c.bf16 %v874_v43, %v874_v43  ;;  %v1470_v48 = vpack.c.bf16 %v906_v44, %v906_v44  ;;  %v629_v49 = vadd.f32 %v1957_v16, %v628_v45  ;;  %v757_v50 = vadd.f32 %v1957_v16, %v756_v46 }
 0x107   :  { %v630_v51 = vpop.f32.mrf.mxu0  ;;  %v758_v52 = vpop.f32.mrf.mxu1 }
 0x108   :  { %1195 = vst.msk [vmem:[%s2282_s3 + $0x8] sm:$0xf] %vm1192_vm2, %v1438_v47  ;;  %1227 = vst.msk [vmem:[%s2282_s3 + $0x88] sm:$0xf] %vm1192_vm2, %v1470_v48  ;;  %v875_v53 = vmax.f32 %v629_v49, 0.0  ;;  %v907_v54 = vmax.f32 %v757_v50, 0.0 }
 0x109   :  { %v633_v55 = vpop.f32.mrf.mxu0  ;;  %v761_v56 = vpop.f32.mrf.mxu1 }
 0x10a   :  { %v1439_v57 = vpack.c.bf16 %v875_v53, %v875_v53  ;;  %v1471_v58 = vpack.c.bf16 %v907_v54, %v907_v54  ;;  %v634_v59 = vadd.f32 %v1957_v16, %v633_v55  ;;  %v762_v60 = vadd.f32 %v1957_v16, %v761_v56 }
 0x10b   :  { %v635_v61 = vpop.f32.mrf.mxu0  ;;  %v763_v62 = vpop.f32.mrf.mxu1 }
 0x10c   :  { %1196 = vst.msk [vmem:[%s2282_s3 + $0xc] sm:$0xf] %vm1192_vm2, %v1439_v57  ;;  %1228 = vst.msk [vmem:[%s2282_s3 + $0x8c] sm:$0xf] %vm1192_vm2, %v1471_v58  ;;  %v876_v63 = vmax.f32 %v634_v59, 0.0  ;;  %v908_v0 = vmax.f32 %v762_v60, 0.0 }
 0x10d   :  { %v636_v1 = vpop.f32.mrf.mxu0  ;;  %v764_v2 = vpop.f32.mrf.mxu1 }
 0x10e   :  { %v1440_v3 = vpack.c.bf16 %v876_v63, %v876_v63  ;;  %v1472_v4 = vpack.c.bf16 %v908_v0, %v908_v0  ;;  %v637_v5 = vadd.f32 %v1957_v16, %v636_v1  ;;  %v765_v6 = vadd.f32 %v1957_v16, %v764_v2 }
 0x10f   :  { %v638_v7 = vpop.f32.mrf.mxu0  ;;  %v766_v8 = vpop.f32.mrf.mxu1 }
 0x110   :  { %1197 = vst.msk [vmem:[%s2282_s3 + $0x10] sm:$0xf] %vm1192_vm2, %v1440_v3  ;;  %1229 = vst.msk [vmem:[%s2282_s3 + $0x90] sm:$0xf] %vm1192_vm2, %v1472_v4  ;;  %v877_v9 = vmax.f32 %v637_v5, 0.0  ;;  %v909_v10 = vmax.f32 %v765_v6, 0.0 }
 0x111   :  { %v641_v11 = vpop.f32.mrf.mxu0  ;;  %v769_v12 = vpop.f32.mrf.mxu1 }
 0x112   :  { %v1441_v13 = vpack.c.bf16 %v877_v9, %v877_v9  ;;  %v1473_v14 = vpack.c.bf16 %v909_v10, %v909_v10  ;;  %v642_v15 = vadd.f32 %v1957_v16, %v641_v11  ;;  %v770_v17 = vadd.f32 %v1957_v16, %v769_v12 }
 0x113   :  { %v643_v18 = vpop.f32.mrf.mxu0  ;;  %v771_v19 = vpop.f32.mrf.mxu1 }
 0x114   :  { %1198 = vst.msk [vmem:[%s2282_s3 + $0x14] sm:$0xf] %vm1192_vm2, %v1441_v13  ;;  %1230 = vst.msk [vmem:[%s2282_s3 + $0x94] sm:$0xf] %vm1192_vm2, %v1473_v14  ;;  %v878_v20 = vmax.f32 %v642_v15, 0.0  ;;  %v910_v21 = vmax.f32 %v770_v17, 0.0 }
 0x115   :  { %v644_v22 = vpop.f32.mrf.mxu0  ;;  %v772_v23 = vpop.f32.mrf.mxu1 }
 0x116   :  { %v1442_v24 = vpack.c.bf16 %v878_v20, %v878_v20  ;;  %v1474_v25 = vpack.c.bf16 %v910_v21, %v910_v21  ;;  %v645_v26 = vadd.f32 %v1957_v16, %v644_v22  ;;  %v773_v27 = vadd.f32 %v1957_v16, %v772_v23 }
 0x117   :  { %v646_v28 = vpop.f32.mrf.mxu0  ;;  %v774_v29 = vpop.f32.mrf.mxu1 }
 0x118   :  { %1199 = vst.msk [vmem:[%s2282_s3 + $0x18] sm:$0xf] %vm1192_vm2, %v1442_v24  ;;  %1231 = vst.msk [vmem:[%s2282_s3 + $0x98] sm:$0xf] %vm1192_vm2, %v1474_v25  ;;  %v879_v30 = vmax.f32 %v645_v26, 0.0  ;;  %v911_v31 = vmax.f32 %v773_v27, 0.0 }
 0x119   :  { %v649_v32 = vpop.f32.mrf.mxu0  ;;  %v777_v33 = vpop.f32.mrf.mxu1 }
 0x11a   :  { %v1443_v34 = vpack.c.bf16 %v879_v30, %v879_v30  ;;  %v1475_v35 = vpack.c.bf16 %v911_v31, %v911_v31  ;;  %v650_v36 = vadd.f32 %v1957_v16, %v649_v32  ;;  %v778_v37 = vadd.f32 %v1957_v16, %v777_v33 }
 0x11b   :  { %v651_v38 = vpop.f32.mrf.mxu0  ;;  %v779_v39 = vpop.f32.mrf.mxu1 }
 0x11c   :  { %1200 = vst.msk [vmem:[%s2282_s3 + $0x1c] sm:$0xf] %vm1192_vm2, %v1443_v34  ;;  %1232 = vst.msk [vmem:[%s2282_s3 + $0x9c] sm:$0xf] %vm1192_vm2, %v1475_v35  ;;  %v880_v40 = vmax.f32 %v650_v36, 0.0  ;;  %v912_v41 = vmax.f32 %v778_v37, 0.0 }
 0x11d   :  { %v652_v42 = vpop.f32.mrf.mxu0  ;;  %v780_v43 = vpop.f32.mrf.mxu1 }
 0x11e   :  { %v1444_v44 = vpack.c.bf16 %v880_v40, %v880_v40  ;;  %v1476_v45 = vpack.c.bf16 %v912_v41, %v912_v41  ;;  %v653_v46 = vadd.f32 %v1957_v16, %v652_v42  ;;  %v781_v47 = vadd.f32 %v1957_v16, %v780_v43 }
 0x11f   :  { %v654_v48 = vpop.f32.mrf.mxu0  ;;  %v782_v49 = vpop.f32.mrf.mxu1 }
 0x120   :  { %1201 = vst.msk [vmem:[%s2282_s3 + $0x20] sm:$0xf] %vm1192_vm2, %v1444_v44  ;;  %1233 = vst.msk [vmem:[%s2282_s3 + $0xa0] sm:$0xf] %vm1192_vm2, %v1476_v45  ;;  %v881_v50 = vmax.f32 %v653_v46, 0.0  ;;  %v913_v51 = vmax.f32 %v781_v47, 0.0 }
 0x121   :  { %v657_v52 = vpop.f32.mrf.mxu0  ;;  %v785_v53 = vpop.f32.mrf.mxu1 }
 0x122   :  { %v1445_v54 = vpack.c.bf16 %v881_v50, %v881_v50  ;;  %v1477_v55 = vpack.c.bf16 %v913_v51, %v913_v51  ;;  %v658_v56 = vadd.f32 %v1957_v16, %v657_v52  ;;  %v786_v57 = vadd.f32 %v1957_v16, %v785_v53 }
 0x123   :  { %v659_v58 = vpop.f32.mrf.mxu0  ;;  %v787_v59 = vpop.f32.mrf.mxu1 }
 0x124   :  { %1202 = vst.msk [vmem:[%s2282_s3 + $0x24] sm:$0xf] %vm1192_vm2, %v1445_v54  ;;  %1234 = vst.msk [vmem:[%s2282_s3 + $0xa4] sm:$0xf] %vm1192_vm2, %v1477_v55  ;;  %v882_v60 = vmax.f32 %v658_v56, 0.0  ;;  %v914_v61 = vmax.f32 %v786_v57, 0.0 }
 0x125   :  { %v660_v62 = vpop.f32.mrf.mxu0  ;;  %v788_v63 = vpop.f32.mrf.mxu1 }
 0x126   :  { %v1446_v0 = vpack.c.bf16 %v882_v60, %v882_v60  ;;  %v1478_v1 = vpack.c.bf16 %v914_v61, %v914_v61  ;;  %v661_v2 = vadd.f32 %v1957_v16, %v660_v62  ;;  %v789_v3 = vadd.f32 %v1957_v16, %v788_v63 }
 0x127   :  { %v662_v4 = vpop.f32.mrf.mxu0  ;;  %v790_v5 = vpop.f32.mrf.mxu1 }
 0x128   :  { %1203 = vst.msk [vmem:[%s2282_s3 + $0x28] sm:$0xf] %vm1192_vm2, %v1446_v0  ;;  %1235 = vst.msk [vmem:[%s2282_s3 + $0xa8] sm:$0xf] %vm1192_vm2, %v1478_v1  ;;  %v883_v6 = vmax.f32 %v661_v2, 0.0  ;;  %v915_v7 = vmax.f32 %v789_v3, 0.0 }
 0x129   :  { %v665_v8 = vpop.f32.mrf.mxu0  ;;  %v793_v9 = vpop.f32.mrf.mxu1 }
 0x12a   :  { %v1447_v10 = vpack.c.bf16 %v883_v6, %v883_v6  ;;  %v1479_v11 = vpack.c.bf16 %v915_v7, %v915_v7  ;;  %v666_v12 = vadd.f32 %v1957_v16, %v665_v8  ;;  %v794_v13 = vadd.f32 %v1957_v16, %v793_v9 }
 0x12b   :  { %v667_v14 = vpop.f32.mrf.mxu0  ;;  %v795_v15 = vpop.f32.mrf.mxu1 }
 0x12c   :  { %1204 = vst.msk [vmem:[%s2282_s3 + $0x2c] sm:$0xf] %vm1192_vm2, %v1447_v10  ;;  %1236 = vst.msk [vmem:[%s2282_s3 + $0xac] sm:$0xf] %vm1192_vm2, %v1479_v11  ;;  %v884_v17 = vmax.f32 %v666_v12, 0.0  ;;  %v916_v18 = vmax.f32 %v794_v13, 0.0 }
 0x12d   :  { %v668_v19 = vpop.f32.mrf.mxu0  ;;  %v796_v20 = vpop.f32.mrf.mxu1 }
 0x12e   :  { %v1448_v21 = vpack.c.bf16 %v884_v17, %v884_v17  ;;  %v1480_v22 = vpack.c.bf16 %v916_v18, %v916_v18  ;;  %v669_v23 = vadd.f32 %v1957_v16, %v668_v19  ;;  %v797_v24 = vadd.f32 %v1957_v16, %v796_v20 }
 0x12f   :  { %v670_v25 = vpop.f32.mrf.mxu0  ;;  %v798_v26 = vpop.f32.mrf.mxu1 }
 0x130   :  { %1205 = vst.msk [vmem:[%s2282_s3 + $0x30] sm:$0xf] %vm1192_vm2, %v1448_v21  ;;  %1237 = vst.msk [vmem:[%s2282_s3 + $0xb0] sm:$0xf] %vm1192_vm2, %v1480_v22  ;;  %v885_v27 = vmax.f32 %v669_v23, 0.0  ;;  %v917_v28 = vmax.f32 %v797_v24, 0.0 }
 0x131   :  { %v673_v29 = vpop.f32.mrf.mxu0  ;;  %v801_v30 = vpop.f32.mrf.mxu1 }
 0x132   :  { %v1449_v31 = vpack.c.bf16 %v885_v27, %v885_v27  ;;  %v1481_v32 = vpack.c.bf16 %v917_v28, %v917_v28  ;;  %v674_v33 = vadd.f32 %v1957_v16, %v673_v29  ;;  %v802_v34 = vadd.f32 %v1957_v16, %v801_v30 }
 0x133   :  { %v675_v35 = vpop.f32.mrf.mxu0  ;;  %v803_v36 = vpop.f32.mrf.mxu1 }
 0x134   :  { %1206 = vst.msk [vmem:[%s2282_s3 + $0x34] sm:$0xf] %vm1192_vm2, %v1449_v31  ;;  %1238 = vst.msk [vmem:[%s2282_s3 + $0xb4] sm:$0xf] %vm1192_vm2, %v1481_v32  ;;  %v886_v37 = vmax.f32 %v674_v33, 0.0  ;;  %v918_v38 = vmax.f32 %v802_v34, 0.0 }
 0x135   :  { %v676_v39 = vpop.f32.mrf.mxu0  ;;  %v804_v40 = vpop.f32.mrf.mxu1 }
 0x136   :  { %v1450_v41 = vpack.c.bf16 %v886_v37, %v886_v37  ;;  %v1482_v42 = vpack.c.bf16 %v918_v38, %v918_v38  ;;  %v677_v43 = vadd.f32 %v1957_v16, %v676_v39  ;;  %v805_v44 = vadd.f32 %v1957_v16, %v804_v40 }
 0x137   :  { %v678_v45 = vpop.f32.mrf.mxu0  ;;  %v806_v46 = vpop.f32.mrf.mxu1 }
 0x138   :  { %1207 = vst.msk [vmem:[%s2282_s3 + $0x38] sm:$0xf] %vm1192_vm2, %v1450_v41  ;;  %1239 = vst.msk [vmem:[%s2282_s3 + $0xb8] sm:$0xf] %vm1192_vm2, %v1482_v42  ;;  %v887_v47 = vmax.f32 %v677_v43, 0.0  ;;  %v919_v48 = vmax.f32 %v805_v44, 0.0 }
 0x139   :  { %v681_v49 = vpop.f32.mrf.mxu0  ;;  %v809_v50 = vpop.f32.mrf.mxu1 }
 0x13a   :  { %v1451_v51 = vpack.c.bf16 %v887_v47, %v887_v47  ;;  %v1483_v52 = vpack.c.bf16 %v919_v48, %v919_v48  ;;  %v682_v53 = vadd.f32 %v1957_v16, %v681_v49  ;;  %v810_v54 = vadd.f32 %v1957_v16, %v809_v50 }
 0x13b   :  { %v683_v55 = vpop.f32.mrf.mxu0  ;;  %v811_v56 = vpop.f32.mrf.mxu1 }
 0x13c   :  { %1208 = vst.msk [vmem:[%s2282_s3 + $0x3c] sm:$0xf] %vm1192_vm2, %v1451_v51  ;;  %1240 = vst.msk [vmem:[%s2282_s3 + $0xbc] sm:$0xf] %vm1192_vm2, %v1483_v52  ;;  %v888_v57 = vmax.f32 %v682_v53, 0.0  ;;  %v920_v58 = vmax.f32 %v810_v54, 0.0 }
 0x13d   :  { %v684_v59 = vpop.f32.mrf.mxu0  ;;  %v812_v60 = vpop.f32.mrf.mxu1 }
 0x13e   :  { %v1452_v61 = vpack.c.bf16 %v888_v57, %v888_v57  ;;  %v1484_v62 = vpack.c.bf16 %v920_v58, %v920_v58  ;;  %v685_v63 = vadd.f32 %v1957_v16, %v684_v59  ;;  %v813_v0 = vadd.f32 %v1957_v16, %v812_v60 }
 0x13f   :  { %v686_v1 = vpop.f32.mrf.mxu0  ;;  %v814_v2 = vpop.f32.mrf.mxu1 }
 0x140   :  { %1209 = vst.msk [vmem:[%s2282_s3 + $0x40] sm:$0xf] %vm1192_vm2, %v1452_v61  ;;  %1241 = vst.msk [vmem:[%s2282_s3 + $0xc0] sm:$0xf] %vm1192_vm2, %v1484_v62  ;;  %v889_v3 = vmax.f32 %v685_v63, 0.0  ;;  %v921_v4 = vmax.f32 %v813_v0, 0.0 }
 0x141   :  { %v689_v5 = vpop.f32.mrf.mxu0  ;;  %v817_v6 = vpop.f32.mrf.mxu1 }
 0x142   :  { %v1453_v7 = vpack.c.bf16 %v889_v3, %v889_v3  ;;  %v1485_v8 = vpack.c.bf16 %v921_v4, %v921_v4  ;;  %v690_v9 = vadd.f32 %v1957_v16, %v689_v5  ;;  %v818_v10 = vadd.f32 %v1957_v16, %v817_v6 }
 0x143   :  { %v691_v11 = vpop.f32.mrf.mxu0  ;;  %v819_v12 = vpop.f32.mrf.mxu1 }
 0x144   :  { %1210 = vst.msk [vmem:[%s2282_s3 + $0x44] sm:$0xf] %vm1192_vm2, %v1453_v7  ;;  %1242 = vst.msk [vmem:[%s2282_s3 + $0xc4] sm:$0xf] %vm1192_vm2, %v1485_v8  ;;  %v890_v13 = vmax.f32 %v690_v9, 0.0  ;;  %v922_v14 = vmax.f32 %v818_v10, 0.0 }
 0x145   :  { %v692_v15 = vpop.f32.mrf.mxu0  ;;  %v820_v17 = vpop.f32.mrf.mxu1 }
 0x146   :  { %v1454_v18 = vpack.c.bf16 %v890_v13, %v890_v13  ;;  %v1486_v19 = vpack.c.bf16 %v922_v14, %v922_v14  ;;  %v693_v20 = vadd.f32 %v1957_v16, %v692_v15  ;;  %v821_v21 = vadd.f32 %v1957_v16, %v820_v17 }
 0x147   :  { %v694_v22 = vpop.f32.mrf.mxu0  ;;  %v822_v23 = vpop.f32.mrf.mxu1 }
 0x148   :  { %1211 = vst.msk [vmem:[%s2282_s3 + $0x48] sm:$0xf] %vm1192_vm2, %v1454_v18  ;;  %1243 = vst.msk [vmem:[%s2282_s3 + $0xc8] sm:$0xf] %vm1192_vm2, %v1486_v19  ;;  %v891_v24 = vmax.f32 %v693_v20, 0.0  ;;  %v923_v25 = vmax.f32 %v821_v21, 0.0 }
 0x149   :  { %v697_v26 = vpop.f32.mrf.mxu0  ;;  %v825_v27 = vpop.f32.mrf.mxu1 }
 0x14a   :  { %v1455_v28 = vpack.c.bf16 %v891_v24, %v891_v24  ;;  %v1487_v29 = vpack.c.bf16 %v923_v25, %v923_v25  ;;  %v698_v30 = vadd.f32 %v1957_v16, %v697_v26  ;;  %v826_v31 = vadd.f32 %v1957_v16, %v825_v27 }
 0x14b   :  { %v699_v32 = vpop.f32.mrf.mxu0  ;;  %v827_v33 = vpop.f32.mrf.mxu1 }
 0x14c   :  { %1212 = vst.msk [vmem:[%s2282_s3 + $0x4c] sm:$0xf] %vm1192_vm2, %v1455_v28  ;;  %1244 = vst.msk [vmem:[%s2282_s3 + $0xcc] sm:$0xf] %vm1192_vm2, %v1487_v29  ;;  %v892_v34 = vmax.f32 %v698_v30, 0.0  ;;  %v924_v35 = vmax.f32 %v826_v31, 0.0 }
 0x14d   :  { %v700_v36 = vpop.f32.mrf.mxu0  ;;  %v828_v37 = vpop.f32.mrf.mxu1 }
 0x14e   :  { %v1456_v38 = vpack.c.bf16 %v892_v34, %v892_v34  ;;  %v1488_v39 = vpack.c.bf16 %v924_v35, %v924_v35  ;;  %v701_v40 = vadd.f32 %v1957_v16, %v700_v36  ;;  %v829_v41 = vadd.f32 %v1957_v16, %v828_v37 }
 0x14f   :  { %v702_v42 = vpop.f32.mrf.mxu0  ;;  %v830_v43 = vpop.f32.mrf.mxu1 }
 0x150   :  { %1213 = vst.msk [vmem:[%s2282_s3 + $0x50] sm:$0xf] %vm1192_vm2, %v1456_v38  ;;  %1245 = vst.msk [vmem:[%s2282_s3 + $0xd0] sm:$0xf] %vm1192_vm2, %v1488_v39  ;;  %v893_v44 = vmax.f32 %v701_v40, 0.0  ;;  %v925_v45 = vmax.f32 %v829_v41, 0.0 }
 0x151   :  { %v705_v46 = vpop.f32.mrf.mxu0  ;;  %v833_v47 = vpop.f32.mrf.mxu1 }
 0x152   :  { %v1457_v48 = vpack.c.bf16 %v893_v44, %v893_v44  ;;  %v1489_v49 = vpack.c.bf16 %v925_v45, %v925_v45  ;;  %v706_v50 = vadd.f32 %v1957_v16, %v705_v46  ;;  %v834_v51 = vadd.f32 %v1957_v16, %v833_v47 }
 0x153   :  { %v707_v52 = vpop.f32.mrf.mxu0  ;;  %v835_v53 = vpop.f32.mrf.mxu1 }
 0x154   :  { %1214 = vst.msk [vmem:[%s2282_s3 + $0x54] sm:$0xf] %vm1192_vm2, %v1457_v48  ;;  %1246 = vst.msk [vmem:[%s2282_s3 + $0xd4] sm:$0xf] %vm1192_vm2, %v1489_v49  ;;  %v894_v54 = vmax.f32 %v706_v50, 0.0  ;;  %v926_v55 = vmax.f32 %v834_v51, 0.0 }
 0x155   :  { %v708_v56 = vpop.f32.mrf.mxu0  ;;  %v836_v57 = vpop.f32.mrf.mxu1 }
 0x156   :  { %v1458_v58 = vpack.c.bf16 %v894_v54, %v894_v54  ;;  %v1490_v59 = vpack.c.bf16 %v926_v55, %v926_v55  ;;  %v709_v60 = vadd.f32 %v1957_v16, %v708_v56  ;;  %v837_v61 = vadd.f32 %v1957_v16, %v836_v57 }
 0x157   :  { %v710_v62 = vpop.f32.mrf.mxu0  ;;  %v838_v63 = vpop.f32.mrf.mxu1 }
 0x158   :  { %1215 = vst.msk [vmem:[%s2282_s3 + $0x58] sm:$0xf] %vm1192_vm2, %v1458_v58  ;;  %1247 = vst.msk [vmem:[%s2282_s3 + $0xd8] sm:$0xf] %vm1192_vm2, %v1490_v59  ;;  %v895_v0 = vmax.f32 %v709_v60, 0.0  ;;  %v927_v1 = vmax.f32 %v837_v61, 0.0 }
 0x159   :  { %v713_v2 = vpop.f32.mrf.mxu0  ;;  %v841_v3 = vpop.f32.mrf.mxu1 }
 0x15a   :  { %v1459_v4 = vpack.c.bf16 %v895_v0, %v895_v0  ;;  %v1491_v5 = vpack.c.bf16 %v927_v1, %v927_v1  ;;  %v714_v6 = vadd.f32 %v1957_v16, %v713_v2  ;;  %v842_v7 = vadd.f32 %v1957_v16, %v841_v3 }
 0x15b   :  { %v715_v8 = vpop.f32.mrf.mxu0  ;;  %v843_v9 = vpop.f32.mrf.mxu1 }
 0x15c   :  { %1216 = vst.msk [vmem:[%s2282_s3 + $0x5c] sm:$0xf] %vm1192_vm2, %v1459_v4  ;;  %1248 = vst.msk [vmem:[%s2282_s3 + $0xdc] sm:$0xf] %vm1192_vm2, %v1491_v5  ;;  %v896_v10 = vmax.f32 %v714_v6, 0.0  ;;  %v928_v11 = vmax.f32 %v842_v7, 0.0 }
 0x15d   :  { %v716_v12 = vpop.f32.mrf.mxu0  ;;  %v844_v13 = vpop.f32.mrf.mxu1 }
 0x15e   :  { %v1460_v14 = vpack.c.bf16 %v896_v10, %v896_v10  ;;  %v1492_v15 = vpack.c.bf16 %v928_v11, %v928_v11  ;;  %v717_v17 = vadd.f32 %v1957_v16, %v716_v12  ;;  %v845_v18 = vadd.f32 %v1957_v16, %v844_v13 }
 0x15f   :  { %v718_v19 = vpop.f32.mrf.mxu0  ;;  %v846_v20 = vpop.f32.mrf.mxu1 }
 0x160   :  { %1217 = vst.msk [vmem:[%s2282_s3 + $0x60] sm:$0xf] %vm1192_vm2, %v1460_v14  ;;  %1249 = vst.msk [vmem:[%s2282_s3 + $0xe0] sm:$0xf] %vm1192_vm2, %v1492_v15  ;;  %v897_v21 = vmax.f32 %v717_v17, 0.0  ;;  %v929_v22 = vmax.f32 %v845_v18, 0.0 }
 0x161   :  { %v721_v23 = vpop.f32.mrf.mxu0  ;;  %v849_v24 = vpop.f32.mrf.mxu1 }
 0x162   :  { %v1461_v25 = vpack.c.bf16 %v897_v21, %v897_v21  ;;  %v1493_v26 = vpack.c.bf16 %v929_v22, %v929_v22  ;;  %v722_v27 = vadd.f32 %v1957_v16, %v721_v23  ;;  %v850_v28 = vadd.f32 %v1957_v16, %v849_v24 }
 0x163   :  { %v723_v29 = vpop.f32.mrf.mxu0  ;;  %v851_v30 = vpop.f32.mrf.mxu1 }
 0x164   :  { %1218 = vst.msk [vmem:[%s2282_s3 + $0x64] sm:$0xf] %vm1192_vm2, %v1461_v25  ;;  %1250 = vst.msk [vmem:[%s2282_s3 + $0xe4] sm:$0xf] %vm1192_vm2, %v1493_v26  ;;  %v898_v31 = vmax.f32 %v722_v27, 0.0  ;;  %v930_v32 = vmax.f32 %v850_v28, 0.0 }
 0x165   :  { %v724_v33 = vpop.f32.mrf.mxu0  ;;  %v852_v34 = vpop.f32.mrf.mxu1 }
 0x166   :  { %v1462_v35 = vpack.c.bf16 %v898_v31, %v898_v31  ;;  %v1494_v36 = vpack.c.bf16 %v930_v32, %v930_v32  ;;  %v725_v37 = vadd.f32 %v1957_v16, %v724_v33  ;;  %v853_v38 = vadd.f32 %v1957_v16, %v852_v34 }
 0x167   :  { %v726_v39 = vpop.f32.mrf.mxu0  ;;  %v854_v40 = vpop.f32.mrf.mxu1 }
 0x168   :  { %1219 = vst.msk [vmem:[%s2282_s3 + $0x68] sm:$0xf] %vm1192_vm2, %v1462_v35  ;;  %1251 = vst.msk [vmem:[%s2282_s3 + $0xe8] sm:$0xf] %vm1192_vm2, %v1494_v36  ;;  %v899_v41 = vmax.f32 %v725_v37, 0.0  ;;  %v931_v42 = vmax.f32 %v853_v38, 0.0 }
 0x169   :  { %v729_v43 = vpop.f32.mrf.mxu0  ;;  %v857_v44 = vpop.f32.mrf.mxu1 }
 0x16a   :  { %v1463_v45 = vpack.c.bf16 %v899_v41, %v899_v41  ;;  %v1495_v46 = vpack.c.bf16 %v931_v42, %v931_v42  ;;  %v730_v47 = vadd.f32 %v1957_v16, %v729_v43  ;;  %v858_v48 = vadd.f32 %v1957_v16, %v857_v44 }
 0x16b   :  { %v731_v49 = vpop.f32.mrf.mxu0  ;;  %v859_v50 = vpop.f32.mrf.mxu1 }
 0x16c   :  { %1220 = vst.msk [vmem:[%s2282_s3 + $0x6c] sm:$0xf] %vm1192_vm2, %v1463_v45  ;;  %1252 = vst.msk [vmem:[%s2282_s3 + $0xec] sm:$0xf] %vm1192_vm2, %v1495_v46  ;;  %v900_v51 = vmax.f32 %v730_v47, 0.0  ;;  %v932_v52 = vmax.f32 %v858_v48, 0.0 }
 0x16d   :  { %v732_v53 = vpop.f32.mrf.mxu0  ;;  %v860_v54 = vpop.f32.mrf.mxu1 }
 0x16e   :  { %v1464_v55 = vpack.c.bf16 %v900_v51, %v900_v51  ;;  %v1496_v56 = vpack.c.bf16 %v932_v52, %v932_v52  ;;  %v733_v57 = vadd.f32 %v1957_v16, %v732_v53  ;;  %v861_v58 = vadd.f32 %v1957_v16, %v860_v54 }
 0x16f   :  { %v734_v59 = vpop.f32.mrf.mxu0  ;;  %v862_v60 = vpop.f32.mrf.mxu1 }
 0x170   :  { %1221 = vst.msk [vmem:[%s2282_s3 + $0x70] sm:$0xf] %vm1192_vm2, %v1464_v55  ;;  %1253 = vst.msk [vmem:[%s2282_s3 + $0xf0] sm:$0xf] %vm1192_vm2, %v1496_v56  ;;  %v901_v61 = vmax.f32 %v733_v57, 0.0  ;;  %v933_v62 = vmax.f32 %v861_v58, 0.0 }
 0x171   :  { %v737_v63 = vpop.f32.mrf.mxu0  ;;  %v865_v0 = vpop.f32.mrf.mxu1 }
 0x172   :  { %v1465_v1 = vpack.c.bf16 %v901_v61, %v901_v61  ;;  %v1497_v2 = vpack.c.bf16 %v933_v62, %v933_v62  ;;  %v738_v3 = vadd.f32 %v1957_v16, %v737_v63  ;;  %v866_v4 = vadd.f32 %v1957_v16, %v865_v0 }
 0x173   :  { %v739_v5 = vpop.f32.mrf.mxu0  ;;  %v867_v6 = vpop.f32.mrf.mxu1 }
 0x174   :  { %1222 = vst.msk [vmem:[%s2282_s3 + $0x74] sm:$0xf] %vm1192_vm2, %v1465_v1  ;;  %1254 = vst.msk [vmem:[%s2282_s3 + $0xf4] sm:$0xf] %vm1192_vm2, %v1497_v2  ;;  %v902_v7 = vmax.f32 %v738_v3, 0.0  ;;  %v934_v8 = vmax.f32 %v866_v4, 0.0 }
 0x175   :  { %v740_v9 = vpop.f32.mrf.mxu0  ;;  %v868_v10 = vpop.f32.mrf.mxu1 }
 0x176   :  { %v1466_v11 = vpack.c.bf16 %v902_v7, %v902_v7  ;;  %v1498_v12 = vpack.c.bf16 %v934_v8, %v934_v8  ;;  %v741_v13 = vadd.f32 %v1957_v16, %v740_v9  ;;  %v869_v14 = vadd.f32 %v1957_v16, %v868_v10 }
 0x177   :  { %v742_v15 = vpop.f32.mrf.mxu0  ;;  %v870_v17 = vpop.f32.mrf.mxu1 }
 0x178   :  { %1223 = vst.msk [vmem:[%s2282_s3 + $0x78] sm:$0xf] %vm1192_vm2, %v1466_v11  ;;  %1255 = vst.msk [vmem:[%s2282_s3 + $0xf8] sm:$0xf] %vm1192_vm2, %v1498_v12  ;;  %v903_v18 = vmax.f32 %v741_v13, 0.0  ;;  %v935_v19 = vmax.f32 %v869_v14, 0.0 }
 0x17a   :  { %v1467_v20 = vpack.c.bf16 %v903_v18, %v903_v18  ;;  %v1499_v21 = vpack.c.bf16 %v935_v19, %v935_v19 }
 0x17c   :  { %1224 = vst.msk [vmem:[%s2282_s3 + $0x7c] sm:$0xf] %vm1192_vm2, %v1467_v20  ;;  %1256 = vst.msk [vmem:[%s2282_s3 + $0xfc] sm:$0xf] %vm1192_vm2, %v1499_v21 }

// kernel: _lambda_.15
= control target key start
LH: loop header
LB: loop body
LE: loop exit
PB: predicated region body
PF: predicated region fallthrough
CT: control target
= control target key end

     0   :  { %vm363_vm0 = vcmask 1043456   ;;  %vm266_vm1 = vcmask 326656   ;;  %vm976_vm2 = vcmask 257024   ;;  %s1871_s1 = inlined_call_operand.vmem [shape: bf16[40,32], index: 1, kind: input, shape index: {}]   ;;  %s1872_s0 = inlined_call_operand.vmem [shape: bf16[512,40], index: 0, kind: input, shape index: {}]   ;;  %s1873_s2 = inlined_call_operand.vmem [shape: f32[1,32], index: 2, kind: input, shape index: {}]   ;;  %s1874_s3 = inlined_call_operand.vmem [shape: bf16[512,32], index: 3, kind: output, shape index: {}]  }
   0x1   :  { %v1354_v0 = vld [vmem:[%s1871_s1 + $0x10] ss:$0 sps:$4 sm:$0xff]   ;;  %v1355_v1 = vld [vmem:[%s1871_s1 + $0x8] sm:$0xff]   ;;  %v1356_v3 = vld [vmem:[%s1871_s1] sm:$0xff]  }
   0x2   :  { %1352 = vmatprep.subr.msk.bf16.mxu0 %vm363_vm0, %v1354_v0  ;;  %1353 = vmatprep.subr.msk.bf16.mxu1 %vm363_vm0, %v1354_v0  ;;  %v365_v2 = vsel %vm363_vm0, %v1354_v0, 0  ;;  %v1357_v4 = vld [vmem:[%s1872_s0] sm:$0xff]   ;;  %v1359_v6 = vld [vmem:[%s1872_s0 + $0x8] sm:$0xff]   ;;  %v1361_v8 = vld [vmem:[%s1872_s0 + $0x10] sm:$0xff]  }
   0x3   :  { %1277 = vmatpush3.bf16.msra.mxu0 %v365_v2  ;;  %1349 = vmatpush3.bf16.msra.mxu1 %v365_v2  ;;  %v1358_v5 = vld [vmem:[%s1872_s0 + $0x80] sm:$0xff]   ;;  %v1360_v7 = vld [vmem:[%s1872_s0 + $0x88] sm:$0xff]   ;;  %v1362_v9 = vld [vmem:[%s1872_s0 + $0x90] sm:$0xff]  }
   0x4   :  { %1278 = vmatprep.subr.bf16.mxu0 %v1355_v1  ;;  %1347 = vmatprep.subr.bf16.mxu1 %v1355_v1  ;;  %v1363_v10 = vld [vmem:[%s1872_s0 + $0x18] sm:$0xff]   ;;  %v1365_v12 = vld [vmem:[%s1872_s0 + $0x20] sm:$0xff]   ;;  %v1367_v14 = vld [vmem:[%s1872_s0 + $0x28] sm:$0xff]  }
   0x5   :  { %1282 = vmatprep.mubr.msk.bf16.mxu0 %vm266_vm1, %v1357_v4  ;;  %1314 = vmatprep.mubr.msk.bf16.mxu1 %vm266_vm1, %v1358_v5  ;;  %v1364_v11 = vld [vmem:[%s1872_s0 + $0x98] sm:$0xff]   ;;  %v1366_v13 = vld [vmem:[%s1872_s0 + $0xa0] sm:$0xff]   ;;  %v1368_v15 = vld [vmem:[%s1872_s0 + $0xa8] sm:$0xff]  }
   0x6   :  { %v1369_v16 = vld [vmem:[%s1872_s0 + $0x30] sm:$0xff]   ;;  %v1371_v18 = vld [vmem:[%s1872_s0 + $0x38] sm:$0xff]   ;;  %v1373_v20 = vld [vmem:[%s1872_s0 + $0x40] sm:$0xff]  }
   0x7   :  { %1279 = vmatpush3.bf16.msra.mxu0 %v1355_v1  ;;  %1350 = vmatpush3.bf16.msra.mxu1 %v1355_v1  ;;  %v1370_v17 = vld [vmem:[%s1872_s0 + $0xb0] sm:$0xff]   ;;  %v1372_v19 = vld [vmem:[%s1872_s0 + $0xb8] sm:$0xff]   ;;  %v1374_v21 = vld [vmem:[%s1872_s0 + $0xc0] sm:$0xff]  }
   0x8   :  { %1280 = vmatprep.subr.bf16.mxu0 %v1356_v3  ;;  %1348 = vmatprep.subr.bf16.mxu1 %v1356_v3  ;;  %v1375_v22 = vld [vmem:[%s1872_s0 + $0x48] sm:$0xff]   ;;  %v1377_v24 = vld [vmem:[%s1872_s0 + $0x50] sm:$0xff]   ;;  %v1379_v26 = vld [vmem:[%s1872_s0 + $0x58] sm:$0xff]  }
   0x9   :  { %v1376_v23 = vld [vmem:[%s1872_s0 + $0xc8] sm:$0xff]   ;;  %v1378_v25 = vld [vmem:[%s1872_s0 + $0xd0] sm:$0xff]   ;;  %v1380_v27 = vld [vmem:[%s1872_s0 + $0xd8] sm:$0xff]  }
   0xa   :  { %v1381_v28 = vld [vmem:[%s1872_s0 + $0x60] sm:$0xff]   ;;  %v1383_v30 = vld [vmem:[%s1872_s0 + $0x68] sm:$0xff]   ;;  %v1385_v32 = vld [vmem:[%s1872_s0 + $0x70] sm:$0xff]  }
   0xb   :  { %1281 = vmatpush3.bf16.msra.mxu0 %v1356_v3  ;;  %1351 = vmatpush3.bf16.msra.mxu1 %v1356_v3  ;;  %v1382_v29 = vld [vmem:[%s1872_s0 + $0xe0] sm:$0xff]   ;;  %v1384_v31 = vld [vmem:[%s1872_s0 + $0xe8] sm:$0xff]   ;;  %v1386_v33 = vld [vmem:[%s1872_s0 + $0xf0] sm:$0xff]  }
   0xc   :  { %v1387_v34 = vld [vmem:[%s1872_s0 + $0x78] sm:$0xff]   ;;  %v1549_v36 = vld [vmem:[%s1873_s2] ss:$0 sm:$0xff] }
   0xd   :  { %v1388_v35 = vld [vmem:[%s1872_s0 + $0xf8] sm:$0xff]  }
   0xe   :  { %1283 = vmatmul.mubr.msk.bf16.vlgmr.msra.gmra.mxu0 %vm266_vm1, %v1359_v6  ;;  %1315 = vmatmul.mubr.msk.bf16.vlgmr.msra.gmra.mxu1 %vm266_vm1, %v1360_v7 }
   0xf   :  { %1286 = vmatprep.mubr.msk.bf16.mxu0 %vm266_vm1, %v1361_v8  ;;  %1318 = vmatprep.mubr.msk.bf16.mxu1 %vm266_vm1, %v1362_v9 }
  0x16   :  { %1287 = vmatmul.mubr.msk.bf16.gmra.mxu0 %vm266_vm1, %v1363_v10  ;;  %1319 = vmatmul.mubr.msk.bf16.gmra.mxu1 %vm266_vm1, %v1364_v11 }
  0x17   :  { %1290 = vmatprep.mubr.msk.bf16.mxu0 %vm266_vm1, %v1365_v12  ;;  %1322 = vmatprep.mubr.msk.bf16.mxu1 %vm266_vm1, %v1366_v13 }
  0x1e   :  { %1291 = vmatmul.mubr.msk.bf16.gmra.mxu0 %vm266_vm1, %v1367_v14  ;;  %1323 = vmatmul.mubr.msk.bf16.gmra.mxu1 %vm266_vm1, %v1368_v15 }
  0x1f   :  { %1294 = vmatprep.mubr.msk.bf16.mxu0 %vm266_vm1, %v1369_v16  ;;  %1326 = vmatprep.mubr.msk.bf16.mxu1 %vm266_vm1, %v1370_v17 }
  0x26   :  { %1295 = vmatmul.mubr.msk.bf16.gmra.mxu0 %vm266_vm1, %v1371_v18  ;;  %1327 = vmatmul.mubr.msk.bf16.gmra.mxu1 %vm266_vm1, %v1372_v19 }
  0x27   :  { %1298 = vmatprep.mubr.msk.bf16.mxu0 %vm266_vm1, %v1373_v20  ;;  %1330 = vmatprep.mubr.msk.bf16.mxu1 %vm266_vm1, %v1374_v21 }
  0x2e   :  { %1299 = vmatmul.mubr.msk.bf16.gmra.mxu0 %vm266_vm1, %v1375_v22  ;;  %1331 = vmatmul.mubr.msk.bf16.gmra.mxu1 %vm266_vm1, %v1376_v23 }
  0x2f   :  { %1302 = vmatprep.mubr.msk.bf16.mxu0 %vm266_vm1, %v1377_v24  ;;  %1334 = vmatprep.mubr.msk.bf16.mxu1 %vm266_vm1, %v1378_v25 }
  0x36   :  { %1303 = vmatmul.mubr.msk.bf16.gmra.mxu0 %vm266_vm1, %v1379_v26  ;;  %1335 = vmatmul.mubr.msk.bf16.gmra.mxu1 %vm266_vm1, %v1380_v27 }
  0x37   :  { %1306 = vmatprep.mubr.msk.bf16.mxu0 %vm266_vm1, %v1381_v28  ;;  %1338 = vmatprep.mubr.msk.bf16.mxu1 %vm266_vm1, %v1382_v29 }
  0x3e   :  { %1307 = vmatmul.mubr.msk.bf16.gmra.mxu0 %vm266_vm1, %v1383_v30  ;;  %1339 = vmatmul.mubr.msk.bf16.gmra.mxu1 %vm266_vm1, %v1384_v31 }
  0x3f   :  { %1310 = vmatprep.mubr.msk.bf16.mxu0 %vm266_vm1, %v1385_v32  ;;  %1342 = vmatprep.mubr.msk.bf16.mxu1 %vm266_vm1, %v1386_v33 }
  0x46   :  { %1311 = vmatmul.mubr.msk.bf16.gmra.mxu0 %vm266_vm1, %v1387_v34  ;;  %1343 = vmatmul.mubr.msk.bf16.gmra.mxu1 %vm266_vm1, %v1388_v35 }
  0xce   :  { %v1284_v37 = vpop.f32.mrf.mxu0  ;;  %v1316_v38 = vpop.f32.mrf.mxu1 }
  0xcf   :  { %v410_v39 = vadd.f32 %v1284_v37, %v1549_v36  ;;  %v538_v40 = vadd.f32 %v1316_v38, %v1549_v36 }
  0xd0   :  { %v401_v41 = vpop.f32.mrf.mxu0  ;;  %v529_v42 = vpop.f32.mrf.mxu1 }
  0xd1   :  { %v658_v43 = vmax.f32 %v410_v39, 0.0  ;;  %v690_v44 = vmax.f32 %v538_v40, 0.0  ;;  %v402_v45 = vadd.f32 %v1549_v36, %v401_v41  ;;  %v530_v46 = vadd.f32 %v1549_v36, %v529_v42 }
  0xd2   :  { %v1285_v47 = vpop.f32.mrf.mxu0  ;;  %v1317_v48 = vpop.f32.mrf.mxu1 }
  0xd3   :  { %v1179_v49 = vpack.c.bf16 %v658_v43, %v658_v43  ;;  %v1211_v50 = vpack.c.bf16 %v690_v44, %v690_v44  ;;  %v656_v51 = vmax.f32 %v402_v45, 0.0  ;;  %v688_v52 = vmax.f32 %v530_v46, 0.0 }
  0xd4   :  { %v413_v53 = vadd.f32 %v1285_v47, %v1549_v36  ;;  %v541_v54 = vadd.f32 %v1317_v48, %v1549_v36  ;;  %v404_v55 = vpop.f32.mrf.mxu0  ;;  %v532_v56 = vpop.f32.mrf.mxu1 }
  0xd5   :  { %979 = vst.msk [vmem:[%s1874_s3 + $0x8] sm:$0xf] %vm976_vm2, %v1179_v49  ;;  %1011 = vst.msk [vmem:[%s1874_s3 + $0x88] sm:$0xf] %vm976_vm2, %v1211_v50  ;;  %v1177_v57 = vpack.c.bf16 %v656_v51, %v656_v51  ;;  %v1209_v58 = vpack.c.bf16 %v688_v52, %v688_v52  ;;  %v405_v59 = vadd.f32 %v1549_v36, %v404_v55 }
  0xd6   :  { %v533_v60 = vadd.f32 %v1549_v36, %v532_v56  ;;  %v659_v61 = vmax.f32 %v413_v53, 0.0  ;;  %v691_v62 = vmax.f32 %v541_v54, 0.0  ;;  %v1288_v63 = vpop.f32.mrf.mxu0  ;;  %v1320_v0 = vpop.f32.mrf.mxu1 }
  0xd7   :  { %977 = vst.msk [vmem:[%s1874_s3] sm:$0xf] %vm976_vm2, %v1177_v57  ;;  %1009 = vst.msk [vmem:[%s1874_s3 + $0x80] sm:$0xf] %vm976_vm2, %v1209_v58  ;;  %v657_v1 = vmax.f32 %v405_v59, 0.0  ;;  %v426_v3 = vadd.f32 %v1288_v63, %v1549_v36  ;;  %v554_v4 = vadd.f32 %v1320_v0, %v1549_v36 }
  0xd8   :  { %v689_v2 = vmax.f32 %v533_v60, 0.0  ;;  %v1180_v5 = vpack.c.bf16 %v659_v61, %v659_v61  ;;  %v1212_v6 = vpack.c.bf16 %v691_v62, %v691_v62  ;;  %v417_v7 = vpop.f32.mrf.mxu0  ;;  %v545_v8 = vpop.f32.mrf.mxu1 }
  0xd9   :  { %v1178_v9 = vpack.c.bf16 %v657_v1, %v657_v1  ;;  %v662_v11 = vmax.f32 %v426_v3, 0.0  ;;  %v694_v12 = vmax.f32 %v554_v4, 0.0  ;;  %v418_v13 = vadd.f32 %v1549_v36, %v417_v7 }
  0xda   :  { %v1210_v10 = vpack.c.bf16 %v689_v2, %v689_v2  ;;  %980 = vst.msk [vmem:[%s1874_s3 + $0xc] sm:$0xf] %vm976_vm2, %v1180_v5  ;;  %1012 = vst.msk [vmem:[%s1874_s3 + $0x8c] sm:$0xf] %vm976_vm2, %v1212_v6  ;;  %v546_v14 = vadd.f32 %v1549_v36, %v545_v8  ;;  %v1289_v15 = vpop.f32.mrf.mxu0  ;;  %v1321_v16 = vpop.f32.mrf.mxu1 }
  0xdb   :  { %978 = vst.msk [vmem:[%s1874_s3 + $0x4] sm:$0xf] %vm976_vm2, %v1178_v9  ;;  %v1183_v17 = vpack.c.bf16 %v662_v11, %v662_v11  ;;  %v1215_v18 = vpack.c.bf16 %v694_v12, %v694_v12  ;;  %v429_v19 = vadd.f32 %v1289_v15, %v1549_v36  ;;  %v557_v20 = vadd.f32 %v1321_v16, %v1549_v36 }
  0xdc   :  { %1010 = vst.msk [vmem:[%s1874_s3 + $0x84] sm:$0xf] %vm976_vm2, %v1210_v10  ;;  %v660_v21 = vmax.f32 %v418_v13, 0.0  ;;  %v692_v22 = vmax.f32 %v546_v14, 0.0  ;;  %v420_v23 = vpop.f32.mrf.mxu0  ;;  %v548_v24 = vpop.f32.mrf.mxu1 }
  0xdd   :  { %983 = vst.msk [vmem:[%s1874_s3 + $0x18] sm:$0xf] %vm976_vm2, %v1183_v17  ;;  %1015 = vst.msk [vmem:[%s1874_s3 + $0x98] sm:$0xf] %vm976_vm2, %v1215_v18  ;;  %v663_v25 = vmax.f32 %v429_v19, 0.0  ;;  %v695_v26 = vmax.f32 %v557_v20, 0.0  ;;  %v421_v27 = vadd.f32 %v1549_v36, %v420_v23  ;;  %v549_v28 = vadd.f32 %v1549_v36, %v548_v24 }
  0xde   :  { %v1181_v29 = vpack.c.bf16 %v660_v21, %v660_v21  ;;  %v1213_v30 = vpack.c.bf16 %v692_v22, %v692_v22  ;;  %v1292_v31 = vpop.f32.mrf.mxu0  ;;  %v1324_v32 = vpop.f32.mrf.mxu1 }
  0xdf   :  { %v1184_v33 = vpack.c.bf16 %v663_v25, %v663_v25  ;;  %v1216_v34 = vpack.c.bf16 %v695_v26, %v695_v26  ;;  %v661_v35 = vmax.f32 %v421_v27, 0.0  ;;  %v693_v37 = vmax.f32 %v549_v28, 0.0 }
  0xe0   :  { %981 = vst.msk [vmem:[%s1874_s3 + $0x10] sm:$0xf] %vm976_vm2, %v1181_v29  ;;  %1013 = vst.msk [vmem:[%s1874_s3 + $0x90] sm:$0xf] %vm976_vm2, %v1213_v30  ;;  %v442_v38 = vadd.f32 %v1292_v31, %v1549_v36  ;;  %v570_v39 = vadd.f32 %v1324_v32, %v1549_v36  ;;  %v433_v40 = vpop.f32.mrf.mxu0  ;;  %v561_v41 = vpop.f32.mrf.mxu1 }
  0xe1   :  { %984 = vst.msk [vmem:[%s1874_s3 + $0x1c] sm:$0xf] %vm976_vm2, %v1184_v33  ;;  %1016 = vst.msk [vmem:[%s1874_s3 + $0x9c] sm:$0xf] %vm976_vm2, %v1216_v34  ;;  %v1182_v42 = vpack.c.bf16 %v661_v35, %v661_v35  ;;  %v1214_v43 = vpack.c.bf16 %v693_v37, %v693_v37  ;;  %v434_v44 = vadd.f32 %v1549_v36, %v433_v40 }
  0xe2   :  { %v562_v45 = vadd.f32 %v1549_v36, %v561_v41  ;;  %v666_v46 = vmax.f32 %v442_v38, 0.0  ;;  %v698_v47 = vmax.f32 %v570_v39, 0.0  ;;  %v1293_v48 = vpop.f32.mrf.mxu0  ;;  %v1325_v49 = vpop.f32.mrf.mxu1 }
  0xe3   :  { %982 = vst.msk [vmem:[%s1874_s3 + $0x14] sm:$0xf] %vm976_vm2, %v1182_v42  ;;  %1014 = vst.msk [vmem:[%s1874_s3 + $0x94] sm:$0xf] %vm976_vm2, %v1214_v43  ;;  %v664_v50 = vmax.f32 %v434_v44, 0.0  ;;  %v445_v52 = vadd.f32 %v1293_v48, %v1549_v36  ;;  %v573_v53 = vadd.f32 %v1325_v49, %v1549_v36 }
  0xe4   :  { %v696_v51 = vmax.f32 %v562_v45, 0.0  ;;  %v1187_v54 = vpack.c.bf16 %v666_v46, %v666_v46  ;;  %v1219_v55 = vpack.c.bf16 %v698_v47, %v698_v47  ;;  %v436_v56 = vpop.f32.mrf.mxu0  ;;  %v564_v57 = vpop.f32.mrf.mxu1 }
  0xe5   :  { %v1185_v58 = vpack.c.bf16 %v664_v50, %v664_v50  ;;  %v667_v60 = vmax.f32 %v445_v52, 0.0  ;;  %v699_v61 = vmax.f32 %v573_v53, 0.0  ;;  %v437_v62 = vadd.f32 %v1549_v36, %v436_v56 }
  0xe6   :  { %v1217_v59 = vpack.c.bf16 %v696_v51, %v696_v51  ;;  %987 = vst.msk [vmem:[%s1874_s3 + $0x28] sm:$0xf] %vm976_vm2, %v1187_v54  ;;  %1019 = vst.msk [vmem:[%s1874_s3 + $0xa8] sm:$0xf] %vm976_vm2, %v1219_v55  ;;  %v565_v63 = vadd.f32 %v1549_v36, %v564_v57  ;;  %v1296_v0 = vpop.f32.mrf.mxu0  ;;  %v1328_v1 = vpop.f32.mrf.mxu1 }
  0xe7   :  { %985 = vst.msk [vmem:[%s1874_s3 + $0x20] sm:$0xf] %vm976_vm2, %v1185_v58  ;;  %v1188_v2 = vpack.c.bf16 %v667_v60, %v667_v60  ;;  %v1220_v3 = vpack.c.bf16 %v699_v61, %v699_v61  ;;  %v458_v4 = vadd.f32 %v1296_v0, %v1549_v36  ;;  %v586_v5 = vadd.f32 %v1328_v1, %v1549_v36 }
  0xe8   :  { %1017 = vst.msk [vmem:[%s1874_s3 + $0xa0] sm:$0xf] %vm976_vm2, %v1217_v59  ;;  %v665_v6 = vmax.f32 %v437_v62, 0.0  ;;  %v697_v7 = vmax.f32 %v565_v63, 0.0  ;;  %v449_v8 = vpop.f32.mrf.mxu0  ;;  %v577_v9 = vpop.f32.mrf.mxu1 }
  0xe9   :  { %988 = vst.msk [vmem:[%s1874_s3 + $0x2c] sm:$0xf] %vm976_vm2, %v1188_v2  ;;  %1020 = vst.msk [vmem:[%s1874_s3 + $0xac] sm:$0xf] %vm976_vm2, %v1220_v3  ;;  %v670_v10 = vmax.f32 %v458_v4, 0.0  ;;  %v702_v11 = vmax.f32 %v586_v5, 0.0  ;;  %v450_v12 = vadd.f32 %v1549_v36, %v449_v8  ;;  %v578_v13 = vadd.f32 %v1549_v36, %v577_v9 }
  0xea   :  { %v1186_v14 = vpack.c.bf16 %v665_v6, %v665_v6  ;;  %v1218_v15 = vpack.c.bf16 %v697_v7, %v697_v7  ;;  %v1297_v16 = vpop.f32.mrf.mxu0  ;;  %v1329_v17 = vpop.f32.mrf.mxu1 }
  0xeb   :  { %v1191_v18 = vpack.c.bf16 %v670_v10, %v670_v10  ;;  %v1223_v19 = vpack.c.bf16 %v702_v11, %v702_v11  ;;  %v668_v20 = vmax.f32 %v450_v12, 0.0  ;;  %v700_v21 = vmax.f32 %v578_v13, 0.0 }
  0xec   :  { %986 = vst.msk [vmem:[%s1874_s3 + $0x24] sm:$0xf] %vm976_vm2, %v1186_v14  ;;  %1018 = vst.msk [vmem:[%s1874_s3 + $0xa4] sm:$0xf] %vm976_vm2, %v1218_v15  ;;  %v461_v22 = vadd.f32 %v1297_v16, %v1549_v36  ;;  %v589_v23 = vadd.f32 %v1329_v17, %v1549_v36  ;;  %v452_v24 = vpop.f32.mrf.mxu0  ;;  %v580_v25 = vpop.f32.mrf.mxu1 }
  0xed   :  { %991 = vst.msk [vmem:[%s1874_s3 + $0x38] sm:$0xf] %vm976_vm2, %v1191_v18  ;;  %1023 = vst.msk [vmem:[%s1874_s3 + $0xb8] sm:$0xf] %vm976_vm2, %v1223_v19  ;;  %v1189_v26 = vpack.c.bf16 %v668_v20, %v668_v20  ;;  %v1221_v27 = vpack.c.bf16 %v700_v21, %v700_v21  ;;  %v453_v28 = vadd.f32 %v1549_v36, %v452_v24 }
  0xee   :  { %v581_v29 = vadd.f32 %v1549_v36, %v580_v25  ;;  %v671_v30 = vmax.f32 %v461_v22, 0.0  ;;  %v703_v31 = vmax.f32 %v589_v23, 0.0  ;;  %v1300_v32 = vpop.f32.mrf.mxu0  ;;  %v1332_v33 = vpop.f32.mrf.mxu1 }
  0xef   :  { %989 = vst.msk [vmem:[%s1874_s3 + $0x30] sm:$0xf] %vm976_vm2, %v1189_v26  ;;  %1021 = vst.msk [vmem:[%s1874_s3 + $0xb0] sm:$0xf] %vm976_vm2, %v1221_v27  ;;  %v669_v34 = vmax.f32 %v453_v28, 0.0  ;;  %v474_v37 = vadd.f32 %v1300_v32, %v1549_v36  ;;  %v602_v38 = vadd.f32 %v1332_v33, %v1549_v36 }
  0xf0   :  { %v701_v35 = vmax.f32 %v581_v29, 0.0  ;;  %v1192_v39 = vpack.c.bf16 %v671_v30, %v671_v30  ;;  %v1224_v40 = vpack.c.bf16 %v703_v31, %v703_v31  ;;  %v465_v41 = vpop.f32.mrf.mxu0  ;;  %v593_v42 = vpop.f32.mrf.mxu1 }
  0xf1   :  { %v1190_v43 = vpack.c.bf16 %v669_v34, %v669_v34  ;;  %v674_v45 = vmax.f32 %v474_v37, 0.0  ;;  %v706_v46 = vmax.f32 %v602_v38, 0.0  ;;  %v466_v47 = vadd.f32 %v1549_v36, %v465_v41 }
  0xf2   :  { %v1222_v44 = vpack.c.bf16 %v701_v35, %v701_v35  ;;  %992 = vst.msk [vmem:[%s1874_s3 + $0x3c] sm:$0xf] %vm976_vm2, %v1192_v39  ;;  %1024 = vst.msk [vmem:[%s1874_s3 + $0xbc] sm:$0xf] %vm976_vm2, %v1224_v40  ;;  %v594_v48 = vadd.f32 %v1549_v36, %v593_v42  ;;  %v1301_v49 = vpop.f32.mrf.mxu0  ;;  %v1333_v50 = vpop.f32.mrf.mxu1 }
  0xf3   :  { %990 = vst.msk [vmem:[%s1874_s3 + $0x34] sm:$0xf] %vm976_vm2, %v1190_v43  ;;  %v1195_v51 = vpack.c.bf16 %v674_v45, %v674_v45  ;;  %v1227_v52 = vpack.c.bf16 %v706_v46, %v706_v46  ;;  %v477_v53 = vadd.f32 %v1301_v49, %v1549_v36  ;;  %v605_v54 = vadd.f32 %v1333_v50, %v1549_v36 }
  0xf4   :  { %1022 = vst.msk [vmem:[%s1874_s3 + $0xb4] sm:$0xf] %vm976_vm2, %v1222_v44  ;;  %v672_v55 = vmax.f32 %v466_v47, 0.0  ;;  %v704_v56 = vmax.f32 %v594_v48, 0.0  ;;  %v468_v57 = vpop.f32.mrf.mxu0  ;;  %v596_v58 = vpop.f32.mrf.mxu1 }
  0xf5   :  { %995 = vst.msk [vmem:[%s1874_s3 + $0x48] sm:$0xf] %vm976_vm2, %v1195_v51  ;;  %1027 = vst.msk [vmem:[%s1874_s3 + $0xc8] sm:$0xf] %vm976_vm2, %v1227_v52  ;;  %v675_v59 = vmax.f32 %v477_v53, 0.0  ;;  %v707_v60 = vmax.f32 %v605_v54, 0.0  ;;  %v469_v61 = vadd.f32 %v1549_v36, %v468_v57  ;;  %v597_v62 = vadd.f32 %v1549_v36, %v596_v58 }
  0xf6   :  { %v1193_v63 = vpack.c.bf16 %v672_v55, %v672_v55  ;;  %v1225_v0 = vpack.c.bf16 %v704_v56, %v704_v56  ;;  %v1304_v1 = vpop.f32.mrf.mxu0  ;;  %v1336_v2 = vpop.f32.mrf.mxu1 }
  0xf7   :  { %v1196_v3 = vpack.c.bf16 %v675_v59, %v675_v59  ;;  %v1228_v4 = vpack.c.bf16 %v707_v60, %v707_v60  ;;  %v673_v5 = vmax.f32 %v469_v61, 0.0  ;;  %v705_v6 = vmax.f32 %v597_v62, 0.0 }
  0xf8   :  { %993 = vst.msk [vmem:[%s1874_s3 + $0x40] sm:$0xf] %vm976_vm2, %v1193_v63  ;;  %1025 = vst.msk [vmem:[%s1874_s3 + $0xc0] sm:$0xf] %vm976_vm2, %v1225_v0  ;;  %v490_v7 = vadd.f32 %v1304_v1, %v1549_v36  ;;  %v618_v8 = vadd.f32 %v1336_v2, %v1549_v36  ;;  %v481_v9 = vpop.f32.mrf.mxu0  ;;  %v609_v10 = vpop.f32.mrf.mxu1 }
  0xf9   :  { %996 = vst.msk [vmem:[%s1874_s3 + $0x4c] sm:$0xf] %vm976_vm2, %v1196_v3  ;;  %1028 = vst.msk [vmem:[%s1874_s3 + $0xcc] sm:$0xf] %vm976_vm2, %v1228_v4  ;;  %v1194_v11 = vpack.c.bf16 %v673_v5, %v673_v5  ;;  %v1226_v12 = vpack.c.bf16 %v705_v6, %v705_v6  ;;  %v482_v13 = vadd.f32 %v1549_v36, %v481_v9 }
  0xfa   :  { %v610_v14 = vadd.f32 %v1549_v36, %v609_v10  ;;  %v678_v15 = vmax.f32 %v490_v7, 0.0  ;;  %v710_v16 = vmax.f32 %v618_v8, 0.0  ;;  %v1305_v17 = vpop.f32.mrf.mxu0  ;;  %v1337_v18 = vpop.f32.mrf.mxu1 }
  0xfb   :  { %994 = vst.msk [vmem:[%s1874_s3 + $0x44] sm:$0xf] %vm976_vm2, %v1194_v11  ;;  %1026 = vst.msk [vmem:[%s1874_s3 + $0xc4] sm:$0xf] %vm976_vm2, %v1226_v12  ;;  %v676_v19 = vmax.f32 %v482_v13, 0.0  ;;  %v493_v21 = vadd.f32 %v1305_v17, %v1549_v36  ;;  %v621_v22 = vadd.f32 %v1337_v18, %v1549_v36 }
  0xfc   :  { %v708_v20 = vmax.f32 %v610_v14, 0.0  ;;  %v1199_v23 = vpack.c.bf16 %v678_v15, %v678_v15  ;;  %v1231_v24 = vpack.c.bf16 %v710_v16, %v710_v16  ;;  %v484_v25 = vpop.f32.mrf.mxu0  ;;  %v612_v26 = vpop.f32.mrf.mxu1 }
  0xfd   :  { %v1197_v27 = vpack.c.bf16 %v676_v19, %v676_v19  ;;  %v679_v29 = vmax.f32 %v493_v21, 0.0  ;;  %v711_v30 = vmax.f32 %v621_v22, 0.0  ;;  %v485_v31 = vadd.f32 %v1549_v36, %v484_v25 }
  0xfe   :  { %v1229_v28 = vpack.c.bf16 %v708_v20, %v708_v20  ;;  %999 = vst.msk [vmem:[%s1874_s3 + $0x58] sm:$0xf] %vm976_vm2, %v1199_v23  ;;  %1031 = vst.msk [vmem:[%s1874_s3 + $0xd8] sm:$0xf] %vm976_vm2, %v1231_v24  ;;  %v613_v32 = vadd.f32 %v1549_v36, %v612_v26  ;;  %v1308_v33 = vpop.f32.mrf.mxu0  ;;  %v1340_v34 = vpop.f32.mrf.mxu1 }
  0xff   :  { %997 = vst.msk [vmem:[%s1874_s3 + $0x50] sm:$0xf] %vm976_vm2, %v1197_v27  ;;  %v1200_v35 = vpack.c.bf16 %v679_v29, %v679_v29  ;;  %v1232_v37 = vpack.c.bf16 %v711_v30, %v711_v30  ;;  %v506_v38 = vadd.f32 %v1308_v33, %v1549_v36  ;;  %v634_v39 = vadd.f32 %v1340_v34, %v1549_v36 }
 0x100   :  { %1029 = vst.msk [vmem:[%s1874_s3 + $0xd0] sm:$0xf] %vm976_vm2, %v1229_v28  ;;  %v677_v40 = vmax.f32 %v485_v31, 0.0  ;;  %v709_v41 = vmax.f32 %v613_v32, 0.0  ;;  %v497_v42 = vpop.f32.mrf.mxu0  ;;  %v625_v43 = vpop.f32.mrf.mxu1 }
 0x101   :  { %1000 = vst.msk [vmem:[%s1874_s3 + $0x5c] sm:$0xf] %vm976_vm2, %v1200_v35  ;;  %1032 = vst.msk [vmem:[%s1874_s3 + $0xdc] sm:$0xf] %vm976_vm2, %v1232_v37  ;;  %v682_v44 = vmax.f32 %v506_v38, 0.0  ;;  %v714_v45 = vmax.f32 %v634_v39, 0.0  ;;  %v498_v46 = vadd.f32 %v1549_v36, %v497_v42  ;;  %v626_v47 = vadd.f32 %v1549_v36, %v625_v43 }
 0x102   :  { %v1198_v48 = vpack.c.bf16 %v677_v40, %v677_v40  ;;  %v1230_v49 = vpack.c.bf16 %v709_v41, %v709_v41  ;;  %v1309_v50 = vpop.f32.mrf.mxu0  ;;  %v1341_v51 = vpop.f32.mrf.mxu1 }
 0x103   :  { %v1203_v52 = vpack.c.bf16 %v682_v44, %v682_v44  ;;  %v1235_v53 = vpack.c.bf16 %v714_v45, %v714_v45  ;;  %v680_v54 = vmax.f32 %v498_v46, 0.0  ;;  %v712_v55 = vmax.f32 %v626_v47, 0.0 }
 0x104   :  { %998 = vst.msk [vmem:[%s1874_s3 + $0x54] sm:$0xf] %vm976_vm2, %v1198_v48  ;;  %1030 = vst.msk [vmem:[%s1874_s3 + $0xd4] sm:$0xf] %vm976_vm2, %v1230_v49  ;;  %v509_v56 = vadd.f32 %v1309_v50, %v1549_v36  ;;  %v637_v57 = vadd.f32 %v1341_v51, %v1549_v36  ;;  %v500_v58 = vpop.f32.mrf.mxu0  ;;  %v628_v59 = vpop.f32.mrf.mxu1 }
 0x105   :  { %1003 = vst.msk [vmem:[%s1874_s3 + $0x68] sm:$0xf] %vm976_vm2, %v1203_v52  ;;  %1035 = vst.msk [vmem:[%s1874_s3 + $0xe8] sm:$0xf] %vm976_vm2, %v1235_v53  ;;  %v1201_v60 = vpack.c.bf16 %v680_v54, %v680_v54  ;;  %v1233_v61 = vpack.c.bf16 %v712_v55, %v712_v55  ;;  %v501_v62 = vadd.f32 %v1549_v36, %v500_v58 }
 0x106   :  { %v629_v63 = vadd.f32 %v1549_v36, %v628_v59  ;;  %v683_v0 = vmax.f32 %v509_v56, 0.0  ;;  %v715_v1 = vmax.f32 %v637_v57, 0.0  ;;  %v1312_v2 = vpop.f32.mrf.mxu0  ;;  %v1344_v3 = vpop.f32.mrf.mxu1 }
 0x107   :  { %1001 = vst.msk [vmem:[%s1874_s3 + $0x60] sm:$0xf] %vm976_vm2, %v1201_v60  ;;  %1033 = vst.msk [vmem:[%s1874_s3 + $0xe0] sm:$0xf] %vm976_vm2, %v1233_v61  ;;  %v681_v4 = vmax.f32 %v501_v62, 0.0  ;;  %v522_v6 = vadd.f32 %v1312_v2, %v1549_v36  ;;  %v650_v7 = vadd.f32 %v1344_v3, %v1549_v36 }
 0x108   :  { %v713_v5 = vmax.f32 %v629_v63, 0.0  ;;  %v1204_v8 = vpack.c.bf16 %v683_v0, %v683_v0  ;;  %v1236_v9 = vpack.c.bf16 %v715_v1, %v715_v1  ;;  %v513_v10 = vpop.f32.mrf.mxu0  ;;  %v641_v11 = vpop.f32.mrf.mxu1 }
 0x109   :  { %v1202_v12 = vpack.c.bf16 %v681_v4, %v681_v4  ;;  %v686_v14 = vmax.f32 %v522_v6, 0.0  ;;  %v718_v15 = vmax.f32 %v650_v7, 0.0  ;;  %v514_v16 = vadd.f32 %v1549_v36, %v513_v10 }
 0x10a   :  { %v1234_v13 = vpack.c.bf16 %v713_v5, %v713_v5  ;;  %1004 = vst.msk [vmem:[%s1874_s3 + $0x6c] sm:$0xf] %vm976_vm2, %v1204_v8  ;;  %1036 = vst.msk [vmem:[%s1874_s3 + $0xec] sm:$0xf] %vm976_vm2, %v1236_v9  ;;  %v642_v17 = vadd.f32 %v1549_v36, %v641_v11  ;;  %v1313_v18 = vpop.f32.mrf.mxu0  ;;  %v1345_v19 = vpop.f32.mrf.mxu1 }
 0x10b   :  { %1002 = vst.msk [vmem:[%s1874_s3 + $0x64] sm:$0xf] %vm976_vm2, %v1202_v12  ;;  %v1207_v20 = vpack.c.bf16 %v686_v14, %v686_v14  ;;  %v1239_v21 = vpack.c.bf16 %v718_v15, %v718_v15  ;;  %v525_v22 = vadd.f32 %v1313_v18, %v1549_v36  ;;  %v653_v23 = vadd.f32 %v1345_v19, %v1549_v36 }
 0x10c   :  { %1034 = vst.msk [vmem:[%s1874_s3 + $0xe4] sm:$0xf] %vm976_vm2, %v1234_v13  ;;  %v684_v24 = vmax.f32 %v514_v16, 0.0  ;;  %v716_v25 = vmax.f32 %v642_v17, 0.0  ;;  %v516_v26 = vpop.f32.mrf.mxu0  ;;  %v644_v27 = vpop.f32.mrf.mxu1 }
 0x10d   :  { %1007 = vst.msk [vmem:[%s1874_s3 + $0x78] sm:$0xf] %vm976_vm2, %v1207_v20  ;;  %1039 = vst.msk [vmem:[%s1874_s3 + $0xf8] sm:$0xf] %vm976_vm2, %v1239_v21  ;;  %v687_v28 = vmax.f32 %v525_v22, 0.0  ;;  %v719_v29 = vmax.f32 %v653_v23, 0.0  ;;  %v517_v30 = vadd.f32 %v1549_v36, %v516_v26  ;;  %v645_v31 = vadd.f32 %v1549_v36, %v644_v27 }
 0x10e   :  { %v1205_v32 = vpack.c.bf16 %v684_v24, %v684_v24  ;;  %v1237_v33 = vpack.c.bf16 %v716_v25, %v716_v25 }
 0x10f   :  { %v1208_v34 = vpack.c.bf16 %v687_v28, %v687_v28  ;;  %v1240_v35 = vpack.c.bf16 %v719_v29, %v719_v29  ;;  %v685_v37 = vmax.f32 %v517_v30, 0.0  ;;  %v717_v38 = vmax.f32 %v645_v31, 0.0 }
 0x110   :  { %1005 = vst.msk [vmem:[%s1874_s3 + $0x70] sm:$0xf] %vm976_vm2, %v1205_v32  ;;  %1037 = vst.msk [vmem:[%s1874_s3 + $0xf0] sm:$0xf] %vm976_vm2, %v1237_v33 }
 0x111   :  { %1008 = vst.msk [vmem:[%s1874_s3 + $0x7c] sm:$0xf] %vm976_vm2, %v1208_v34  ;;  %1040 = vst.msk [vmem:[%s1874_s3 + $0xfc] sm:$0xf] %vm976_vm2, %v1240_v35  ;;  %v1206_v36 = vpack.c.bf16 %v685_v37, %v685_v37  ;;  %v1238_v39 = vpack.c.bf16 %v717_v38, %v717_v38 }
 0x113   :  { %1006 = vst.msk [vmem:[%s1874_s3 + $0x74] sm:$0xf] %vm976_vm2, %v1206_v36  ;;  %1038 = vst.msk [vmem:[%s1874_s3 + $0xf4] sm:$0xf] %vm976_vm2, %v1238_v39 }

// kernel: _lambda_.18
= control target key start
LH: loop header
LB: loop body
LE: loop exit
PB: predicated region body
PF: predicated region fallthrough
CT: control target
= control target key end

     0   :  { %vm94_vm0 = vcmask 261120   ;;  %vm296_vm1 = vcmask 257024   ;;  %s555_s1 = inlined_call_operand.vmem [shape: bf16[32,32], index: 1, kind: input, shape index: {}]   ;;  %s556_s0 = inlined_call_operand.vmem [shape: bf16[128,32], index: 0, kind: input, shape index: {}]   ;;  %s557_s2 = inlined_call_operand.vmem [shape: f32[1,32], index: 2, kind: input, shape index: {}]   ;;  %s558_s3 = inlined_call_operand.vmem [shape: bf16[128,32], index: 3, kind: output, shape index: {}]  }
   0x1   :  { %v402_v0 = vld [vmem:[%s555_s1 + $0x8] sm:$0xff]   ;;  %v403_v1 = vld [vmem:[%s555_s1] sm:$0xff]   ;;  %v408_v6 = vld [vmem:[%s556_s0 + $0x10] sm:$0xff]  }
   0x2   :  { %378 = vmatprep.subr.bf16.mxu0 %v402_v0  ;;  %398 = vmatprep.subr.bf16.mxu1 %v402_v0  ;;  %v404_v2 = vld [vmem:[%s556_s0] sm:$0xff]   ;;  %v406_v4 = vld [vmem:[%s556_s0 + $0x8] sm:$0xff]   ;;  %v409_v7 = vld [vmem:[%s556_s0 + $0x30] sm:$0xff]  }
   0x3   :  { %379 = vmatpush3.bf16.msra.mxu0 %v402_v0  ;;  %400 = vmatpush3.bf16.msra.mxu1 %v402_v0  ;;  %v405_v3 = vld [vmem:[%s556_s0 + $0x20] sm:$0xff]   ;;  %v407_v5 = vld [vmem:[%s556_s0 + $0x28] sm:$0xff]   ;;  %v410_v8 = vld [vmem:[%s556_s0 + $0x18] sm:$0xff]  }
   0x4   :  { %380 = vmatprep.subr.bf16.mxu0 %v403_v1  ;;  %399 = vmatprep.subr.bf16.mxu1 %v403_v1  ;;  %v411_v9 = vld [vmem:[%s556_s0 + $0x38] sm:$0xff]   ;;  %v473_v10 = vld [vmem:[%s557_s2] ss:$0 sm:$0xff] }
   0x5   :  { %382 = vmatprep.mubr.msk.bf16.mxu0 %vm94_vm0, %v404_v2  ;;  %390 = vmatprep.mubr.msk.bf16.mxu1 %vm94_vm0, %v405_v3 }
   0x7   :  { %381 = vmatpush3.bf16.msra.mxu0 %v403_v1  ;;  %401 = vmatpush3.bf16.msra.mxu1 %v403_v1 }
   0xa   :  { %383 = vmatmul.mubr.msk.bf16.vlgmr.msra.gmra.mxu0 %vm94_vm0, %v406_v4  ;;  %391 = vmatmul.mubr.msk.bf16.vlgmr.msra.gmra.mxu1 %vm94_vm0, %v407_v5 }
   0xb   :  { %386 = vmatprep.mubr.msk.bf16.mxu0 %vm94_vm0, %v408_v6  ;;  %394 = vmatprep.mubr.msk.bf16.mxu1 %vm94_vm0, %v409_v7 }
  0x12   :  { %387 = vmatmul.mubr.msk.bf16.gmra.mxu0 %vm94_vm0, %v410_v8  ;;  %395 = vmatmul.mubr.msk.bf16.gmra.mxu1 %vm94_vm0, %v411_v9 }
  0xca   :  { %v384_v11 = vpop.f32.mrf.mxu0  ;;  %v392_v12 = vpop.f32.mrf.mxu1 }
  0xcb   :  { %v162_v13 = vadd.f32 %v384_v11, %v473_v10  ;;  %v194_v14 = vadd.f32 %v392_v12, %v473_v10 }
  0xcc   :  { %v153_v15 = vpop.f32.mrf.mxu0  ;;  %v185_v16 = vpop.f32.mrf.mxu1 }
  0xcd   :  { %v218_v17 = vmax.f32 %v162_v13, 0.0  ;;  %v226_v18 = vmax.f32 %v194_v14, 0.0  ;;  %v154_v19 = vadd.f32 %v473_v10, %v153_v15  ;;  %v186_v20 = vadd.f32 %v473_v10, %v185_v16 }
  0xce   :  { %v385_v21 = vpop.f32.mrf.mxu0  ;;  %v393_v22 = vpop.f32.mrf.mxu1 }
  0xcf   :  { %v354_v23 = vpack.c.bf16 %v218_v17, %v218_v17  ;;  %v362_v24 = vpack.c.bf16 %v226_v18, %v226_v18  ;;  %v216_v25 = vmax.f32 %v154_v19, 0.0  ;;  %v224_v26 = vmax.f32 %v186_v20, 0.0 }
  0xd0   :  { %v165_v27 = vadd.f32 %v385_v21, %v473_v10  ;;  %v197_v28 = vadd.f32 %v393_v22, %v473_v10  ;;  %v156_v29 = vpop.f32.mrf.mxu0  ;;  %v188_v30 = vpop.f32.mrf.mxu1 }
  0xd1   :  { %299 = vst.msk [vmem:[%s558_s3 + $0x8] sm:$0xf] %vm296_vm1, %v354_v23  ;;  %307 = vst.msk [vmem:[%s558_s3 + $0x28] sm:$0xf] %vm296_vm1, %v362_v24  ;;  %v352_v31 = vpack.c.bf16 %v216_v25, %v216_v25  ;;  %v360_v32 = vpack.c.bf16 %v224_v26, %v224_v26  ;;  %v157_v33 = vadd.f32 %v473_v10, %v156_v29 }
  0xd2   :  { %v189_v34 = vadd.f32 %v473_v10, %v188_v30  ;;  %v219_v35 = vmax.f32 %v165_v27, 0.0  ;;  %v227_v36 = vmax.f32 %v197_v28, 0.0  ;;  %v388_v37 = vpop.f32.mrf.mxu0  ;;  %v396_v38 = vpop.f32.mrf.mxu1 }
  0xd3   :  { %297 = vst.msk [vmem:[%s558_s3] sm:$0xf] %vm296_vm1, %v352_v31  ;;  %305 = vst.msk [vmem:[%s558_s3 + $0x20] sm:$0xf] %vm296_vm1, %v360_v32  ;;  %v217_v39 = vmax.f32 %v157_v33, 0.0  ;;  %v178_v41 = vadd.f32 %v388_v37, %v473_v10  ;;  %v210_v42 = vadd.f32 %v396_v38, %v473_v10 }
  0xd4   :  { %v225_v40 = vmax.f32 %v189_v34, 0.0  ;;  %v355_v43 = vpack.c.bf16 %v219_v35, %v219_v35  ;;  %v363_v44 = vpack.c.bf16 %v227_v36, %v227_v36  ;;  %v169_v45 = vpop.f32.mrf.mxu0  ;;  %v201_v46 = vpop.f32.mrf.mxu1 }
  0xd5   :  { %v353_v47 = vpack.c.bf16 %v217_v39, %v217_v39  ;;  %v222_v49 = vmax.f32 %v178_v41, 0.0  ;;  %v230_v50 = vmax.f32 %v210_v42, 0.0  ;;  %v170_v51 = vadd.f32 %v473_v10, %v169_v45 }
  0xd6   :  { %v361_v48 = vpack.c.bf16 %v225_v40, %v225_v40  ;;  %300 = vst.msk [vmem:[%s558_s3 + $0xc] sm:$0xf] %vm296_vm1, %v355_v43  ;;  %308 = vst.msk [vmem:[%s558_s3 + $0x2c] sm:$0xf] %vm296_vm1, %v363_v44  ;;  %v202_v52 = vadd.f32 %v473_v10, %v201_v46  ;;  %v389_v53 = vpop.f32.mrf.mxu0  ;;  %v397_v54 = vpop.f32.mrf.mxu1 }
  0xd7   :  { %298 = vst.msk [vmem:[%s558_s3 + $0x4] sm:$0xf] %vm296_vm1, %v353_v47  ;;  %v358_v55 = vpack.c.bf16 %v222_v49, %v222_v49  ;;  %v366_v56 = vpack.c.bf16 %v230_v50, %v230_v50  ;;  %v181_v57 = vadd.f32 %v389_v53, %v473_v10  ;;  %v213_v58 = vadd.f32 %v397_v54, %v473_v10 }
  0xd8   :  { %306 = vst.msk [vmem:[%s558_s3 + $0x24] sm:$0xf] %vm296_vm1, %v361_v48  ;;  %v220_v59 = vmax.f32 %v170_v51, 0.0  ;;  %v228_v60 = vmax.f32 %v202_v52, 0.0  ;;  %v172_v61 = vpop.f32.mrf.mxu0  ;;  %v204_v62 = vpop.f32.mrf.mxu1 }
  0xd9   :  { %303 = vst.msk [vmem:[%s558_s3 + $0x18] sm:$0xf] %vm296_vm1, %v358_v55  ;;  %311 = vst.msk [vmem:[%s558_s3 + $0x38] sm:$0xf] %vm296_vm1, %v366_v56  ;;  %v223_v63 = vmax.f32 %v181_v57, 0.0  ;;  %v231_v0 = vmax.f32 %v213_v58, 0.0  ;;  %v173_v1 = vadd.f32 %v473_v10, %v172_v61  ;;  %v205_v2 = vadd.f32 %v473_v10, %v204_v62 }
  0xda   :  { %v356_v3 = vpack.c.bf16 %v220_v59, %v220_v59  ;;  %v364_v4 = vpack.c.bf16 %v228_v60, %v228_v60 }
  0xdb   :  { %v359_v5 = vpack.c.bf16 %v223_v63, %v223_v63  ;;  %v367_v6 = vpack.c.bf16 %v231_v0, %v231_v0  ;;  %v221_v7 = vmax.f32 %v173_v1, 0.0  ;;  %v229_v8 = vmax.f32 %v205_v2, 0.0 }
  0xdc   :  { %301 = vst.msk [vmem:[%s558_s3 + $0x10] sm:$0xf] %vm296_vm1, %v356_v3  ;;  %309 = vst.msk [vmem:[%s558_s3 + $0x30] sm:$0xf] %vm296_vm1, %v364_v4 }
  0xdd   :  { %304 = vst.msk [vmem:[%s558_s3 + $0x1c] sm:$0xf] %vm296_vm1, %v359_v5  ;;  %312 = vst.msk [vmem:[%s558_s3 + $0x3c] sm:$0xf] %vm296_vm1, %v367_v6  ;;  %v357_v9 = vpack.c.bf16 %v221_v7, %v221_v7  ;;  %v365_v10 = vpack.c.bf16 %v229_v8, %v229_v8 }
  0xdf   :  { %302 = vst.msk [vmem:[%s558_s3 + $0x14] sm:$0xf] %vm296_vm1, %v357_v9  ;;  %310 = vst.msk [vmem:[%s558_s3 + $0x34] sm:$0xf] %vm296_vm1, %v365_v10 }

// kernel: _lambda_.16
= control target key start
LH: loop header
LB: loop body
LE: loop exit
PB: predicated region body
PF: predicated region fallthrough
CT: control target
= control target key end

     0   :  { %vm318_vm0 = vcmask 261120   ;;  %vm617_vm1 = vcmask 125952   ;;  %s1144_s1 = inlined_call_operand.vmem [shape: bf16[288,16], index: 1, kind: input, shape index: {}]   ;;  %s1145_s0 = inlined_call_operand.vmem [shape: bf16[128,288], index: 0, kind: input, shape index: {}]   ;;  %s1146_s2 = inlined_call_operand.vmem [shape: f32[1,16], index: 2, kind: input, shape index: {}]   ;;  %s1147_s3 = inlined_call_operand.vmem [shape: bf16[128,16], index: 3, kind: output, shape index: {}]  }
   0x1   :  { %v831_v0 = vld [vmem:[%s1144_s1 + $0x78] sm:$0xff]   ;;  %v833_v2 = vld [vmem:[%s1144_s1 + $0x70] sm:$0xff]   ;;  %v835_v4 = vld [vmem:[%s1144_s1 + $0x68] sm:$0xff]  }
   0x2   :  { %v832_v1 = vld [vmem:[%s1144_s1 + $0x38] sm:$0xff]   ;;  %721 = vmatprep.subr.bf16.mxu0 %v831_v0  ;;  %815 = vmatprep.subr.bf16.mxu1 %v831_v0  ;;  %v834_v3 = vld [vmem:[%s1144_s1 + $0x30] sm:$0xff]   ;;  %v836_v5 = vld [vmem:[%s1144_s1 + $0x28] sm:$0xff]  }
   0x3   :  { %722 = vmatpush3.bf16.msra.mxu0 %v832_v1  ;;  %823 = vmatpush3.bf16.msra.mxu1 %v832_v1  ;;  %v837_v6 = vld [vmem:[%s1144_s1 + $0x60] sm:$0xff]   ;;  %v839_v8 = vld [vmem:[%s1144_s1 + $0x58] sm:$0xff]   ;;  %v841_v10 = vld [vmem:[%s1144_s1 + $0x50] sm:$0xff]  }
   0x4   :  { %723 = vmatprep.subr.bf16.mxu0 %v833_v2  ;;  %816 = vmatprep.subr.bf16.mxu1 %v833_v2  ;;  %v838_v7 = vld [vmem:[%s1144_s1 + $0x20] sm:$0xff]   ;;  %v840_v9 = vld [vmem:[%s1144_s1 + $0x18] sm:$0xff]   ;;  %v842_v13 = vld [vmem:[%s1144_s1 + $0x10] sm:$0xff]  }
   0x5   :  { %v849_v11 = vld [vmem:[%s1145_s0 + $0x4] ss:$12 sps:$4 sm:$0xff]   ;;  %v852_v12 = vld [vmem:[%s1145_s0 + $0x94] ss:$12 sps:$4 sm:$0xff]   ;;  %v843_v14 = vld [vmem:[%s1144_s1 + $0x48] sm:$0xff]  }
   0x6   :  { %375 = vmatprep.mubr.bf16.mxu0 %v849_v11  ;;  %423 = vmatprep.mubr.bf16.mxu1 %v852_v12  ;;  %v844_v15 = vld [vmem:[%s1144_s1 + $0x8] sm:$0xff]   ;;  %v845_v16 = vld [vmem:[%s1144_s1 + $0x40] sm:$0xff]   ;;  %v850_v20 = vld [vmem:[%s1145_s0 + $0x90] ss:$12 sps:$4 sm:$0xff]  }
   0x7   :  { %724 = vmatpush3.bf16.msra.mxu0 %v834_v3  ;;  %824 = vmatpush3.bf16.msra.mxu1 %v834_v3  ;;  %v846_v17 = vld [vmem:[%s1144_s1] sm:$0xff]   ;;  %v853_v19 = vld [vmem:[%s1144_s1 + $0x88] sm:$0xff]   ;;  %v864_v28 = vld [vmem:[%s1145_s0 + $0x30] ss:$12 sps:$4 sm:$0xff]  }
   0x8   :  { %725 = vmatprep.subr.bf16.mxu0 %v835_v4  ;;  %817 = vmatprep.subr.bf16.mxu1 %v835_v4  ;;  %v847_v18 = vld [vmem:[%s1145_s0] ss:$12 sps:$4 sm:$0xff]   ;;  %v854_v21 = vld [vmem:[%s1145_s0 + $0x1c] ss:$12 sps:$4 sm:$0xff]   ;;  %v858_v24 = vld [vmem:[%s1145_s0 + $0x18] ss:$12 sps:$4 sm:$0xff]  }
   0x9   :  { %v856_v22 = vld [vmem:[%s1145_s0 + $0xac] ss:$12 sps:$4 sm:$0xff]   ;;  %v860_v23 = vld [vmem:[%s1144_s1 + $0x80] sm:$0xff]   ;;  %v859_v25 = vld [vmem:[%s1145_s0 + $0xa8] ss:$12 sps:$4 sm:$0xff]  }
   0xa   :  { %v861_v26 = vld [vmem:[%s1145_s0 + $0x34] ss:$12 sps:$4 sm:$0xff]   ;;  %v866_v30 = vld [vmem:[%s1145_s0 + $0x4c] ss:$12 sps:$4 sm:$0xff]   ;;  %v870_v33 = vld [vmem:[%s1145_s0 + $0x50] ss:$12 sps:$4 sm:$0xff]  }
   0xb   :  { %726 = vmatpush3.bf16.msra.mxu0 %v836_v5  ;;  %825 = vmatpush3.bf16.msra.mxu1 %v836_v5  ;;  %v863_v27 = vld [vmem:[%s1145_s0 + $0x8] ss:$12 sps:$4 sm:$0xff]   ;;  %v865_v29 = vld [vmem:[%s1145_s0 + $0x20] ss:$12 sps:$4 sm:$0xff]   ;;  %v868_v31 = vld [vmem:[%s1145_s0 + $0x38] ss:$12 sps:$4 sm:$0xff]  }
   0xc   :  { %727 = vmatprep.subr.bf16.mxu0 %v837_v6  ;;  %818 = vmatprep.subr.bf16.mxu1 %v837_v6  ;;  %v869_v32 = vld [vmem:[%s1145_s0 + $0x48] ss:$12 sps:$4 sm:$0xff]   ;;  %v871_v34 = vld [vmem:[%s1145_s0 + $0x64] ss:$12 sps:$4 sm:$0xff]   ;;  %v874_v36 = vld [vmem:[%s1145_s0 + $0x60] ss:$12 sps:$4 sm:$0xff]  }
   0xd   :  { %v873_v35 = vld [vmem:[%s1145_s0 + $0x68] ss:$12 sps:$4 sm:$0xff]   ;;  %v875_v37 = vld [vmem:[%s1145_s0 + $0x80] ss:$12 sps:$4 sm:$0xff]   ;;  %v878_v39 = vld [vmem:[%s1145_s0 + $0x98] ss:$12 sps:$4 sm:$0xff]  }
   0xe   :  { %v876_v38 = vld [vmem:[%s1145_s0 + $0x7c] ss:$12 sps:$4 sm:$0xff]   ;;  %v879_v40 = vld [vmem:[%s1145_s0 + $0x78] ss:$12 sps:$4 sm:$0xff]   ;;  %v1054_v60 = vld [vmem:[%s1146_s2] ss:$0 sm:$0xff] }
   0xf   :  { %728 = vmatpush3.bf16.msra.mxu0 %v838_v7  ;;  %826 = vmatpush3.bf16.msra.mxu1 %v838_v7  ;;  %v880_v41 = vld [vmem:[%s1145_s0 + $0xb0] ss:$12 sps:$4 sm:$0xff]  }
  0x10   :  { %729 = vmatprep.subr.bf16.mxu0 %v839_v8  ;;  %819 = vmatprep.subr.bf16.mxu1 %v839_v8 }
  0x13   :  { %730 = vmatpush3.bf16.msra.mxu0 %v840_v9  ;;  %827 = vmatpush3.bf16.msra.mxu1 %v840_v9 }
  0x14   :  { %731 = vmatprep.subr.bf16.mxu0 %v841_v10  ;;  %820 = vmatprep.subr.bf16.mxu1 %v841_v10 }
  0x17   :  { %732 = vmatpush3.bf16.msra.mxu0 %v842_v13  ;;  %828 = vmatpush3.bf16.msra.mxu1 %v842_v13 }
  0x18   :  { %733 = vmatprep.subr.bf16.mxu0 %v843_v14  ;;  %821 = vmatprep.subr.bf16.mxu1 %v843_v14 }
  0x1b   :  { %734 = vmatpush3.bf16.msra.mxu0 %v844_v15  ;;  %829 = vmatpush3.bf16.msra.mxu1 %v844_v15 }
  0x1c   :  { %735 = vmatprep.subr.bf16.mxu0 %v845_v16  ;;  %822 = vmatprep.subr.bf16.mxu1 %v845_v16 }
  0x1f   :  { %736 = vmatpush3.bf16.msra.mxu0 %v846_v17  ;;  %830 = vmatpush3.bf16.msra.mxu1 %v846_v17 }
  0x20   :  { %795 = vmatprep.subr.bf16.mxu1 %v853_v19 }
  0x22   :  { %376 = vmatmul.mubr.bf16.vlgmr.msra.gmra.mxu0 %v847_v18  ;;  %424 = vmatmul.mubr.bf16.vlgmr.msra.gmra.mxu1 %v850_v20 }
  0x23   :  { %796 = vmatpush3.bf16.msra.mxu1 %v853_v19  ;;  %383 = vmatprep.mubr.bf16.mxu0 %v854_v21 }
  0x24   :  { %431 = vmatprep.mubr.bf16.mxu1 %v856_v22  ;;  %797 = vmatprep.subr.bf16.mxu1 %v860_v23 }
  0x27   :  { %798 = vmatpush3.bf16.msra.mxu1 %v860_v23 }
  0x2a   :  { %384 = vmatmul.mubr.bf16.gmra.mxu0 %v858_v24  ;;  %432 = vmatmul.mubr.bf16.gmra.mxu1 %v859_v25 }
  0x2b   :  { %391 = vmatprep.mubr.bf16.mxu0 %v861_v26  ;;  %799 = vmatprep.mubr.msk.bf16.mxu1 %vm318_vm0, %v863_v27 }
  0x32   :  { %392 = vmatmul.mubr.bf16.gmra.mxu0 %v864_v28  ;;  %800 = vmatmul.mubr.msk.bf16.vlgmr.msra.gmra.mxu1 %vm318_vm0, %v865_v29 }
  0x33   :  { %399 = vmatprep.mubr.bf16.mxu0 %v866_v30  ;;  %803 = vmatprep.mubr.msk.bf16.mxu1 %vm318_vm0, %v868_v31 }
  0x3a   :  { %400 = vmatmul.mubr.bf16.gmra.mxu0 %v869_v32  ;;  %804 = vmatmul.mubr.msk.bf16.gmra.mxu1 %vm318_vm0, %v870_v33 }
  0x3b   :  { %407 = vmatprep.mubr.bf16.mxu0 %v871_v34  ;;  %807 = vmatprep.mubr.msk.bf16.mxu1 %vm318_vm0, %v873_v35 }
  0x42   :  { %408 = vmatmul.mubr.bf16.gmra.mxu0 %v874_v36  ;;  %808 = vmatmul.mubr.msk.bf16.gmra.mxu1 %vm318_vm0, %v875_v37 }
  0x43   :  { %415 = vmatprep.mubr.bf16.mxu0 %v876_v38  ;;  %811 = vmatprep.mubr.msk.bf16.mxu1 %vm318_vm0, %v878_v39 }
  0x4a   :  { %416 = vmatmul.mubr.bf16.gmra.mxu0 %v879_v40  ;;  %812 = vmatmul.mubr.msk.bf16.gmra.mxu1 %vm318_vm0, %v880_v41 }
  0xe2   :  { %v737_v42 = vpop.f32.mrf.mxu0  ;;  %v1035_v43 = vpop.f32.mrf.mxu1 }
  0xe4   :  { %v738_v44 = vpop.f32.mrf.mxu0  ;;  %v1037_v45 = vpop.f32.mrf.mxu1 }
  0xe5   :  { %v739_v57 = vadd.f32 %v738_v44, %v737_v42 }
  0xe6   :  { %v740_v46 = vpop.f32.mrf.mxu0  ;;  %v1039_v47 = vpop.f32.mrf.mxu1 }
  0xe7   :  { %v378_v3 = vadd.f32 %v739_v57, %v1054_v60 }
  0xe8   :  { %v741_v48 = vpop.f32.mrf.mxu0  ;;  %v1041_v49 = vpop.f32.mrf.mxu1 }
  0xe9   :  { %v742_v63 = vadd.f32 %v741_v48, %v740_v46 }
  0xea   :  { %v743_v50 = vpop.f32.mrf.mxu0  ;;  %v1043_v51 = vpop.f32.mrf.mxu1 }
  0xeb   :  { %v381_v11 = vadd.f32 %v742_v63, %v1054_v60 }
  0xec   :  { %v744_v52 = vpop.f32.mrf.mxu0  ;;  %v1045_v53 = vpop.f32.mrf.mxu1 }
  0xed   :  { %v745_v54 = vadd.f32 %v744_v52, %v743_v50 }
  0xee   :  { %v746_v55 = vpop.f32.mrf.mxu0  ;;  %v1047_v56 = vpop.f32.mrf.mxu1 }
  0xef   :  { %v386_v62 = vadd.f32 %v745_v54, %v1054_v60  ;;  %v781_v54 = vadd.f32 %v1045_v53, %v1043_v51  ;;  %v775_v53 = vadd.f32 %v1037_v45, %v1035_v43 }
  0xf0   :  { %v747_v58 = vpop.f32.mrf.mxu0  ;;  %v1049_v59 = vpop.f32.mrf.mxu1 }
  0xf1   :  { %v748_v61 = vadd.f32 %v747_v58, %v746_v55 }
  0xf2   :  { %v749_v0 = vpop.f32.mrf.mxu0  ;;  %v801_v1 = vpop.f32.mrf.mxu1 }
  0xf3   :  { %v483_v2 = vadd.f32 %v801_v1, %v386_v62  ;;  %v389_v8 = vadd.f32 %v748_v61, %v1054_v60 }
  0xf4   :  { %v750_v4 = vpop.f32.mrf.mxu0  ;;  %v474_v5 = vpop.f32.mrf.mxu1 }
  0xf5   :  { %v539_v6 = vmax.f32 %v483_v2, 0.0  ;;  %v475_v7 = vadd.f32 %v474_v5, %v378_v3  ;;  %v751_v13 = vadd.f32 %v750_v4, %v749_v0  ;;  %v784_v3 = vadd.f32 %v1049_v59, %v1047_v56 }
  0xf6   :  { %v752_v9 = vpop.f32.mrf.mxu0  ;;  %v802_v10 = vpop.f32.mrf.mxu1  ;;  %v778_v56 = vadd.f32 %v1041_v49, %v1039_v47 }
  0xf7   :  { %v707_v12 = vpack.c.bf16 %v539_v6, %v539_v6  ;;  %v537_v14 = vmax.f32 %v475_v7, 0.0  ;;  %v486_v15 = vadd.f32 %v802_v10, %v389_v8  ;;  %v394_v26 = vadd.f32 %v751_v13, %v1054_v60 }
  0xf8   :  { %v753_v16 = vpop.f32.mrf.mxu0  ;;  %v477_v17 = vpop.f32.mrf.mxu1  ;;  %v426_v13 = vadd.f32 %v775_v53, %v1054_v60 }
  0xf9   :  { %620 = vst.msk [vmem:[%s1147_s3 + $0x8] sm:$0xf] %vm617_vm1, %v707_v12  ;;  %v705_v18 = vpack.c.bf16 %v537_v14, %v537_v14  ;;  %v540_v19 = vmax.f32 %v486_v15, 0.0  ;;  %v478_v20 = vadd.f32 %v477_v17, %v381_v11  ;;  %v754_v24 = vadd.f32 %v753_v16, %v752_v9 }
  0xfa   :  { %v755_v21 = vpop.f32.mrf.mxu0  ;;  %v805_v22 = vpop.f32.mrf.mxu1  ;;  %v434_v9 = vadd.f32 %v781_v54, %v1054_v60  ;;  %v437_v15 = vadd.f32 %v784_v3, %v1054_v60 }
  0xfb   :  { %618 = vst.msk [vmem:[%s1147_s3] sm:$0xf] %vm617_vm1, %v705_v18  ;;  %v708_v23 = vpack.c.bf16 %v540_v19, %v540_v19  ;;  %v538_v25 = vmax.f32 %v478_v20, 0.0  ;;  %v397_v36 = vadd.f32 %v754_v24, %v1054_v60 }
  0xfc   :  { %v756_v27 = vpop.f32.mrf.mxu0  ;;  %v490_v28 = vpop.f32.mrf.mxu1 }
  0xfd   :  { %621 = vst.msk [vmem:[%s1147_s3 + $0xc] sm:$0xf] %vm617_vm1, %v708_v23  ;;  %v706_v29 = vpack.c.bf16 %v538_v25, %v538_v25  ;;  %v757_v30 = vadd.f32 %v756_v27, %v755_v21  ;;  %v491_v31 = vadd.f32 %v490_v28, %v394_v26  ;;  %v429_v27 = vadd.f32 %v778_v56, %v1054_v60 }
  0xfe   :  { %v758_v32 = vpop.f32.mrf.mxu0  ;;  %v806_v33 = vpop.f32.mrf.mxu1 }
  0xff   :  { %619 = vst.msk [vmem:[%s1147_s3 + $0x4] sm:$0xf] %vm617_vm1, %v706_v29  ;;  %v402_v34 = vadd.f32 %v757_v30, %v1054_v60  ;;  %v541_v35 = vmax.f32 %v491_v31, 0.0 }
 0x100   :  { %v759_v37 = vpop.f32.mrf.mxu0  ;;  %v493_v38 = vpop.f32.mrf.mxu1 }
 0x101   :  { %v499_v39 = vadd.f32 %v805_v22, %v402_v34  ;;  %v709_v40 = vpack.c.bf16 %v541_v35, %v541_v35  ;;  %v760_v41 = vadd.f32 %v759_v37, %v758_v32  ;;  %v494_v42 = vadd.f32 %v493_v38, %v397_v36 }
 0x102   :  { %v761_v44 = vpop.f32.mrf.mxu0  ;;  %v809_v46 = vpop.f32.mrf.mxu1 }
 0x103   :  { %v543_v48 = vmax.f32 %v499_v39, 0.0  ;;  %622 = vst.msk [vmem:[%s1147_s3 + $0x10] sm:$0xf] %vm617_vm1, %v709_v40  ;;  %v405_v50 = vadd.f32 %v760_v41, %v1054_v60  ;;  %v542_v52 = vmax.f32 %v494_v42, 0.0 }
 0x104   :  { %v762_v55 = vpop.f32.mrf.mxu0  ;;  %v506_v57 = vpop.f32.mrf.mxu1 }
 0x105   :  { %v711_v58 = vpack.c.bf16 %v543_v48, %v543_v48  ;;  %v502_v61 = vadd.f32 %v806_v33, %v405_v50  ;;  %v710_v62 = vpack.c.bf16 %v542_v52, %v542_v52  ;;  %v763_v63 = vadd.f32 %v762_v55, %v761_v44 }
 0x106   :  { %v764_v0 = vpop.f32.mrf.mxu0  ;;  %v810_v1 = vpop.f32.mrf.mxu1 }
 0x107   :  { %624 = vst.msk [vmem:[%s1147_s3 + $0x18] sm:$0xf] %vm617_vm1, %v711_v58  ;;  %v544_v2 = vmax.f32 %v502_v61, 0.0  ;;  %623 = vst.msk [vmem:[%s1147_s3 + $0x14] sm:$0xf] %vm617_vm1, %v710_v62  ;;  %v410_v51 = vadd.f32 %v763_v63, %v1054_v60 }
 0x108   :  { %v765_v4 = vpop.f32.mrf.mxu0  ;;  %v509_v5 = vpop.f32.mrf.mxu1 }
 0x109   :  { %v712_v6 = vpack.c.bf16 %v544_v2, %v544_v2  ;;  %v507_v7 = vadd.f32 %v506_v57, %v410_v51  ;;  %v766_v8 = vadd.f32 %v765_v4, %v764_v0 }
 0x10a   :  { %v767_v10 = vpop.f32.mrf.mxu0  ;;  %v813_v11 = vpop.f32.mrf.mxu1 }
 0x10b   :  { %625 = vst.msk [vmem:[%s1147_s3 + $0x1c] sm:$0xf] %vm617_vm1, %v712_v6  ;;  %v545_v12 = vmax.f32 %v507_v7, 0.0  ;;  %v413_v43 = vadd.f32 %v766_v8, %v1054_v60  ;;  %v531_v45 = vadd.f32 %v813_v11, %v434_v9 }
 0x10c   :  { %v768_v59 = vpop.f32.mrf.mxu0  ;;  %v522_v14 = vpop.f32.mrf.mxu1 }
 0x10d   :  { %v713_v16 = vpack.c.bf16 %v545_v12, %v545_v12  ;;  %v510_v17 = vadd.f32 %v509_v5, %v413_v43  ;;  %v551_v18 = vmax.f32 %v531_v45, 0.0  ;;  %v769_v19 = vadd.f32 %v768_v59, %v767_v10 }
 0x10e   :  { %v523_v20 = vadd.f32 %v522_v14, %v426_v13  ;;  %v770_v21 = vpop.f32.mrf.mxu0  ;;  %v814_v22 = vpop.f32.mrf.mxu1 }
 0x10f   :  { %626 = vst.msk [vmem:[%s1147_s3 + $0x20] sm:$0xf] %vm617_vm1, %v713_v16  ;;  %v546_v23 = vmax.f32 %v510_v17, 0.0  ;;  %v719_v47 = vpack.c.bf16 %v551_v18, %v551_v18  ;;  %v418_v49 = vadd.f32 %v769_v19, %v1054_v60  ;;  %v534_v24 = vadd.f32 %v814_v22, %v437_v15 }
 0x110   :  { %v549_v25 = vmax.f32 %v523_v20, 0.0  ;;  %v771_v26 = vpop.f32.mrf.mxu0  ;;  %v525_v28 = vpop.f32.mrf.mxu1 }
 0x111   :  { %v714_v29 = vpack.c.bf16 %v546_v23, %v546_v23  ;;  %632 = vst.msk [vmem:[%s1147_s3 + $0x38] sm:$0xf] %vm617_vm1, %v719_v47  ;;  %v515_v30 = vadd.f32 %v809_v46, %v418_v49  ;;  %v552_v31 = vmax.f32 %v534_v24, 0.0  ;;  %v772_v32 = vadd.f32 %v771_v26, %v770_v21 }
 0x112   :  { %v717_v33 = vpack.c.bf16 %v549_v25, %v549_v25  ;;  %v526_v34 = vadd.f32 %v525_v28, %v429_v27 }
 0x113   :  { %627 = vst.msk [vmem:[%s1147_s3 + $0x24] sm:$0xf] %vm617_vm1, %v714_v29  ;;  %v547_v35 = vmax.f32 %v515_v30, 0.0  ;;  %v720_v36 = vpack.c.bf16 %v552_v31, %v552_v31  ;;  %v421_v37 = vadd.f32 %v772_v32, %v1054_v60 }
 0x114   :  { %630 = vst.msk [vmem:[%s1147_s3 + $0x30] sm:$0xf] %vm617_vm1, %v717_v33  ;;  %v550_v38 = vmax.f32 %v526_v34, 0.0 }
 0x115   :  { %v715_v39 = vpack.c.bf16 %v547_v35, %v547_v35  ;;  %633 = vst.msk [vmem:[%s1147_s3 + $0x3c] sm:$0xf] %vm617_vm1, %v720_v36  ;;  %v518_v40 = vadd.f32 %v810_v1, %v421_v37 }
 0x116   :  { %v718_v41 = vpack.c.bf16 %v550_v38, %v550_v38 }
 0x117   :  { %628 = vst.msk [vmem:[%s1147_s3 + $0x28] sm:$0xf] %vm617_vm1, %v715_v39  ;;  %v548_v60 = vmax.f32 %v518_v40, 0.0 }
 0x118   :  { %631 = vst.msk [vmem:[%s1147_s3 + $0x34] sm:$0xf] %vm617_vm1, %v718_v41 }
 0x119   :  { %v716_v42 = vpack.c.bf16 %v548_v60, %v548_v60 }
 0x11b   :  { %629 = vst.msk [vmem:[%s1147_s3 + $0x2c] sm:$0xf] %vm617_vm1, %v716_v42 }

// kernel: _lambda_.17
= control target key start
LH: loop header
LB: loop body
LE: loop exit
PB: predicated region body
PF: predicated region fallthrough
CT: control target
= control target key end

     0   :  { %v982_v0 = vmov 0   ;;  %vm422_vm0 = vcmask 392192   ;;  %vm721_vm1 = vcmask 125952   ;;  %s1284_s1 = inlined_call_operand.vmem [shape: bf16[432,16], index: 1, kind: input, shape index: {}]   ;;  %s1285_s0 = inlined_call_operand.vmem [shape: bf16[128,432], index: 0, kind: input, shape index: {}]   ;;  %s1286_s2 = inlined_call_operand.vmem [shape: f32[1,16], index: 2, kind: input, shape index: {}]   ;;  %s1287_s3 = inlined_call_operand.vmem [shape: bf16[128,16], index: 3, kind: output, shape index: {}]  }
   0x1   :  { %544 = vmatprep.subr.bf16.mxu1 %v982_v0  ;;  %v907_v1 = vld [vmem:[%s1284_s1 + $0x78] sm:$0xff]   ;;  %v910_v4 = vld [vmem:[%s1284_s1 + $0x70] sm:$0xff]   ;;  %v913_v7 = vld [vmem:[%s1284_s1 + $0x68] sm:$0xff]  }
   0x2   :  { %v908_v2 = vld [vmem:[%s1284_s1 + $0xb8] sm:$0xff]   ;;  %842 = vmatprep.subr.bf16.mxu0 %v907_v1  ;;  %v911_v5 = vld [vmem:[%s1284_s1 + $0xb0] sm:$0xff]   ;;  %v914_v8 = vld [vmem:[%s1284_s1 + $0xa8] sm:$0xff]  }
   0x3   :  { %v909_v3 = vld [vmem:[%s1284_s1 + $0x38] sm:$0xff]   ;;  %545 = vmatpush1.bf16.msra.mxu1 %v908_v2  ;;  %v912_v6 = vld [vmem:[%s1284_s1 + $0x30] sm:$0xff]   ;;  %v915_v9 = vld [vmem:[%s1284_s1 + $0x28] sm:$0xff]  }
   0x4   :  { %843 = vmatpush3.bf16.msra.mxu0 %v909_v3  ;;  %546 = vmatprep.subr.bf16.mxu1 %v982_v0  ;;  %v916_v10 = vld [vmem:[%s1284_s1 + $0x60] sm:$0xff]   ;;  %v919_v13 = vld [vmem:[%s1284_s1 + $0x58] sm:$0xff]   ;;  %v922_v16 = vld [vmem:[%s1284_s1 + $0x50] sm:$0xff]  }
   0x5   :  { %844 = vmatprep.subr.bf16.mxu0 %v910_v4  ;;  %v917_v11 = vld [vmem:[%s1284_s1 + $0xa0] sm:$0xff]   ;;  %v920_v14 = vld [vmem:[%s1284_s1 + $0x98] sm:$0xff]   ;;  %v923_v17 = vld [vmem:[%s1284_s1 + $0x90] sm:$0xff]  }
   0x6   :  { %v918_v12 = vld [vmem:[%s1284_s1 + $0x20] sm:$0xff]   ;;  %v921_v15 = vld [vmem:[%s1284_s1 + $0x18] sm:$0xff]   ;;  %v924_v18 = vld [vmem:[%s1284_s1 + $0x10] sm:$0xff]  }
   0x7   :  { %547 = vmatpush1.bf16.msra.mxu1 %v911_v5  ;;  %v925_v19 = vld [vmem:[%s1284_s1 + $0x48] sm:$0xff]   ;;  %v928_v22 = vld [vmem:[%s1284_s1 + $0x40] sm:$0xff]   ;;  %v934_v28 = vld [vmem:[%s1284_s1 + $0xd0] sm:$0xff]  }
   0x8   :  { %845 = vmatpush3.bf16.msra.mxu0 %v912_v6  ;;  %548 = vmatprep.subr.bf16.mxu1 %v982_v0  ;;  %v926_v20 = vld [vmem:[%s1284_s1 + $0x88] sm:$0xff]   ;;  %v933_v23 = vld [vmem:[%s1285_s0 + $0x4] ss:$16 sps:$4 sm:$0xff]   ;;  %v931_v26 = vld [vmem:[%s1285_s0] ss:$16 sps:$4 sm:$0xff]  }
   0x9   :  { %846 = vmatprep.subr.bf16.mxu0 %v913_v7  ;;  %v927_v21 = vld [vmem:[%s1284_s1 + $0x8] sm:$0xff]   ;;  %v929_v24 = vld [vmem:[%s1284_s1 + $0x80] sm:$0xff]   ;;  %479 = vmatprep.mubr.bf16.mxu0 %v933_v23 }
   0xa   :  { %v930_v25 = vld [vmem:[%s1284_s1] sm:$0xff]   ;;  %v942_v27 = vld [vmem:[%s1285_s0 + $0xc] ss:$16 sps:$4 sm:$0xff]   ;;  %v940_v34 = vld [vmem:[%s1285_s0 + $0x8] ss:$16 sps:$4 sm:$0xff]  }
   0xb   :  { %549 = vmatpush1.bf16.msra.mxu1 %v914_v8  ;;  %v936_v29 = vld [vmem:[%s1285_s0 + $0x24] ss:$16 sps:$4 sm:$0xff]   ;;  %802 = vmatprep.mubr.msk.bf16.mxu1 %vm422_vm0, %v942_v27  ;;  %v935_v30 = vld [vmem:[%s1284_s1 + $0xc8] sm:$0xff]   ;;  %v938_v31 = vld [vmem:[%s1285_s0 + $0x20] ss:$16 sps:$4 sm:$0xff]  }
   0xc   :  { %847 = vmatpush3.bf16.msra.mxu0 %v915_v9  ;;  %550 = vmatprep.subr.bf16.mxu1 %v982_v0  ;;  %v939_v32 = vld [vmem:[%s1284_s1 + $0xc0] sm:$0xff]   ;;  %v946_v35 = vld [vmem:[%s1285_s0 + $0x2c] ss:$16 sps:$4 sm:$0xff]   ;;  %v948_v38 = vld [vmem:[%s1285_s0 + $0x28] ss:$16 sps:$4 sm:$0xff]  }
   0xd   :  { %848 = vmatprep.subr.bf16.mxu0 %v916_v10  ;;  %v943_v33 = vld [vmem:[%s1285_s0 + $0x44] ss:$16 sps:$4 sm:$0xff]   ;;  %v945_v36 = vld [vmem:[%s1285_s0 + $0x40] ss:$16 sps:$4 sm:$0xff]   ;;  %v952_v39 = vld [vmem:[%s1285_s0 + $0x4c] ss:$16 sps:$4 sm:$0xff]  }
   0xe   :  { %v949_v37 = vld [vmem:[%s1285_s0 + $0x64] ss:$16 sps:$4 sm:$0xff]   ;;  %v951_v40 = vld [vmem:[%s1285_s0 + $0x60] ss:$16 sps:$4 sm:$0xff]   ;;  %v954_v42 = vld [vmem:[%s1285_s0 + $0x48] ss:$16 sps:$4 sm:$0xff]  }
   0xf   :  { %551 = vmatpush1.bf16.msra.mxu1 %v917_v11  ;;  %v955_v41 = vld [vmem:[%s1285_s0 + $0x84] ss:$16 sps:$4 sm:$0xff]   ;;  %v958_v43 = vld [vmem:[%s1285_s0 + $0x6c] ss:$16 sps:$4 sm:$0xff]   ;;  %v957_v44 = vld [vmem:[%s1285_s0 + $0x80] ss:$16 sps:$4 sm:$0xff]  }
  0x10   :  { %849 = vmatpush3.bf16.msra.mxu0 %v918_v12  ;;  %552 = vmatprep.subr.bf16.mxu1 %v982_v0  ;;  %v961_v45 = vld [vmem:[%s1285_s0 + $0xa4] ss:$16 sps:$4 sm:$0xff]   ;;  %v960_v46 = vld [vmem:[%s1285_s0 + $0x68] ss:$16 sps:$4 sm:$0xff]   ;;  %v964_v47 = vld [vmem:[%s1285_s0 + $0x8c] ss:$16 sps:$4 sm:$0xff]  }
  0x11   :  { %850 = vmatprep.subr.bf16.mxu0 %v919_v13  ;;  %v963_v48 = vld [vmem:[%s1285_s0 + $0xa0] ss:$16 sps:$4 sm:$0xff]   ;;  %v967_v49 = vld [vmem:[%s1285_s0 + $0xc4] ss:$16 sps:$4 sm:$0xff]   ;;  %v966_v50 = vld [vmem:[%s1285_s0 + $0x88] ss:$16 sps:$4 sm:$0xff]  }
  0x12   :  { %v970_v51 = vld [vmem:[%s1285_s0 + $0xac] ss:$16 sps:$4 sm:$0xff]   ;;  %v969_v52 = vld [vmem:[%s1285_s0 + $0xc0] ss:$16 sps:$4 sm:$0xff]   ;;  %v973_v53 = vld [vmem:[%s1285_s0 + $0xe4] ss:$16 sps:$4 sm:$0xff]  }
  0x13   :  { %553 = vmatpush1.bf16.msra.mxu1 %v920_v14  ;;  %v972_v54 = vld [vmem:[%s1285_s0 + $0xa8] ss:$16 sps:$4 sm:$0xff]   ;;  %v976_v55 = vld [vmem:[%s1285_s0 + $0xcc] ss:$16 sps:$4 sm:$0xff]   ;;  %v975_v56 = vld [vmem:[%s1285_s0 + $0xe0] ss:$16 sps:$4 sm:$0xff]  }
  0x14   :  { %851 = vmatpush3.bf16.msra.mxu0 %v921_v15  ;;  %554 = vmatprep.subr.bf16.mxu1 %v982_v0  ;;  %v978_v57 = vld [vmem:[%s1285_s0 + $0xc8] ss:$16 sps:$4 sm:$0xff]   ;;  %v979_v58 = vld [vmem:[%s1285_s0 + $0xec] ss:$16 sps:$4 sm:$0xff]   ;;  %v1202_v1 = vld [vmem:[%s1286_s2] ss:$0 sm:$0xff] }
  0x15   :  { %852 = vmatprep.subr.bf16.mxu0 %v922_v16  ;;  %v981_v59 = vld [vmem:[%s1285_s0 + $0xe8] ss:$16 sps:$4 sm:$0xff]  }
  0x17   :  { %555 = vmatpush1.bf16.msra.mxu1 %v923_v17 }
  0x18   :  { %853 = vmatpush3.bf16.msra.mxu0 %v924_v18  ;;  %556 = vmatprep.subr.bf16.mxu1 %v982_v0 }
  0x19   :  { %854 = vmatprep.subr.bf16.mxu0 %v925_v19 }
  0x1b   :  { %557 = vmatpush1.bf16.msra.mxu1 %v926_v20 }
  0x1c   :  { %855 = vmatpush3.bf16.msra.mxu0 %v927_v21  ;;  %558 = vmatprep.subr.bf16.mxu1 %v982_v0 }
  0x1d   :  { %856 = vmatprep.subr.bf16.mxu0 %v928_v22 }
  0x1f   :  { %559 = vmatpush1.bf16.msra.mxu1 %v929_v24 }
  0x20   :  { %857 = vmatpush3.bf16.msra.mxu0 %v930_v25  ;;  %570 = vmatprep.subr.bf16.mxu1 %v982_v0 }
  0x23   :  { %480 = vmatmul.mubr.bf16.vlgmr.msra.gmra.mxu0 %v931_v26  ;;  %571 = vmatpush2.bf16.msra.mxu1 %v934_v28 }
  0x24   :  { %572 = vmatprep.subr.bf16.mxu1 %v982_v0  ;;  %487 = vmatprep.mubr.bf16.mxu0 %v936_v29 }
  0x27   :  { %573 = vmatpush2.bf16.msra.mxu1 %v935_v30 }
  0x28   :  { %574 = vmatprep.subr.bf16.mxu1 %v982_v0 }
  0x2b   :  { %488 = vmatmul.mubr.bf16.gmra.mxu0 %v938_v31  ;;  %575 = vmatpush2.bf16.msra.mxu1 %v939_v32 }
  0x2c   :  { %495 = vmatprep.mubr.bf16.mxu0 %v943_v33 }
  0x2e   :  { %577 = vmatmul.mubr.bf16.vlgmr.msra.gmra.mxu1 %v940_v34 }
  0x2f   :  { %803 = vmatprep.mubr.msk.bf16.mxu1 %vm422_vm0, %v946_v35 }
  0x33   :  { %496 = vmatmul.mubr.bf16.gmra.mxu0 %v945_v36 }
  0x34   :  { %503 = vmatprep.mubr.bf16.mxu0 %v949_v37 }
  0x36   :  { %585 = vmatmul.mubr.bf16.gmra.mxu1 %v948_v38 }
  0x37   :  { %804 = vmatprep.mubr.msk.bf16.mxu1 %vm422_vm0, %v952_v39 }
  0x3b   :  { %504 = vmatmul.mubr.bf16.gmra.mxu0 %v951_v40 }
  0x3c   :  { %511 = vmatprep.mubr.bf16.mxu0 %v955_v41 }
  0x3e   :  { %593 = vmatmul.mubr.bf16.gmra.mxu1 %v954_v42 }
  0x3f   :  { %805 = vmatprep.mubr.msk.bf16.mxu1 %vm422_vm0, %v958_v43 }
  0x43   :  { %512 = vmatmul.mubr.bf16.gmra.mxu0 %v957_v44 }
  0x44   :  { %519 = vmatprep.mubr.bf16.mxu0 %v961_v45 }
  0x46   :  { %601 = vmatmul.mubr.bf16.gmra.mxu1 %v960_v46 }
  0x47   :  { %806 = vmatprep.mubr.msk.bf16.mxu1 %vm422_vm0, %v964_v47 }
  0x4b   :  { %520 = vmatmul.mubr.bf16.gmra.mxu0 %v963_v48 }
  0x4c   :  { %527 = vmatprep.mubr.bf16.mxu0 %v967_v49 }
  0x4e   :  { %609 = vmatmul.mubr.bf16.gmra.mxu1 %v966_v50 }
  0x4f   :  { %807 = vmatprep.mubr.msk.bf16.mxu1 %vm422_vm0, %v970_v51 }
  0x53   :  { %528 = vmatmul.mubr.bf16.gmra.mxu0 %v969_v52 }
  0x54   :  { %535 = vmatprep.mubr.bf16.mxu0 %v973_v53 }
  0x56   :  { %617 = vmatmul.mubr.bf16.gmra.mxu1 %v972_v54 }
  0x57   :  { %808 = vmatprep.mubr.msk.bf16.mxu1 %vm422_vm0, %v976_v55 }
  0x5b   :  { %536 = vmatmul.mubr.bf16.gmra.mxu0 %v975_v56 }
  0x5e   :  { %625 = vmatmul.mubr.bf16.gmra.mxu1 %v978_v57 }
  0x5f   :  { %809 = vmatprep.mubr.msk.bf16.mxu1 %vm422_vm0, %v979_v58 }
  0x66   :  { %633 = vmatmul.mubr.bf16.gmra.mxu1 %v981_v59 }
  0xe3   :  { %v858_v60 = vpop.f32.mrf.mxu0 }
  0xe5   :  { %v859_v61 = vpop.f32.mrf.mxu0 }
  0xe6   :  { %v860_v63 = vadd.f32 %v859_v61, %v858_v60 }
  0xe7   :  { %v861_v62 = vpop.f32.mrf.mxu0 }
  0xe8   :  { %v482_v5 = vadd.f32 %v860_v63, %v1202_v1 }
  0xe9   :  { %v862_v0 = vpop.f32.mrf.mxu0 }
  0xea   :  { %v863_v3 = vadd.f32 %v862_v0, %v861_v62 }
  0xeb   :  { %v864_v2 = vpop.f32.mrf.mxu0 }
  0xec   :  { %v485_v13 = vadd.f32 %v863_v3, %v1202_v1 }
  0xed   :  { %v865_v4 = vpop.f32.mrf.mxu0 }
  0xee   :  { %v578_v6 = vpop.f32.mrf.mxu1  ;;  %v866_v10 = vadd.f32 %v865_v4, %v864_v2 }
  0xef   :  { %v579_v7 = vadd.f32 %v578_v6, %v482_v5  ;;  %v867_v8 = vpop.f32.mrf.mxu0 }
  0xf0   :  { %v580_v9 = vpop.f32.mrf.mxu1  ;;  %v490_v22 = vadd.f32 %v866_v10, %v1202_v1 }
  0xf1   :  { %v641_v11 = vmax.f32 %v579_v7, 0.0  ;;  %v868_v12 = vpop.f32.mrf.mxu0 }
  0xf2   :  { %v581_v14 = vpop.f32.mrf.mxu1  ;;  %v869_v19 = vadd.f32 %v868_v12, %v867_v8 }
  0xf3   :  { %v826_v15 = vpack.c.bf16 %v641_v11, %v641_v11  ;;  %v582_v16 = vadd.f32 %v581_v14, %v485_v13  ;;  %v870_v17 = vpop.f32.mrf.mxu0 }
  0xf4   :  { %v583_v18 = vpop.f32.mrf.mxu1  ;;  %v493_v31 = vadd.f32 %v869_v19, %v1202_v1 }
  0xf5   :  { %722 = vst.msk [vmem:[%s1287_s3] sm:$0xf] %vm721_vm1, %v826_v15  ;;  %v642_v20 = vmax.f32 %v582_v16, 0.0  ;;  %v871_v21 = vpop.f32.mrf.mxu0 }
  0xf6   :  { %v586_v23 = vpop.f32.mrf.mxu1  ;;  %v872_v28 = vadd.f32 %v871_v21, %v870_v17 }
  0xf7   :  { %v827_v24 = vpack.c.bf16 %v642_v20, %v642_v20  ;;  %v587_v25 = vadd.f32 %v586_v23, %v490_v22  ;;  %v873_v26 = vpop.f32.mrf.mxu0 }
  0xf8   :  { %v588_v27 = vpop.f32.mrf.mxu1  ;;  %v498_v40 = vadd.f32 %v872_v28, %v1202_v1 }
  0xf9   :  { %723 = vst.msk [vmem:[%s1287_s3 + $0x4] sm:$0xf] %vm721_vm1, %v827_v24  ;;  %v643_v29 = vmax.f32 %v587_v25, 0.0  ;;  %v874_v30 = vpop.f32.mrf.mxu0 }
  0xfa   :  { %v589_v32 = vpop.f32.mrf.mxu1  ;;  %v875_v37 = vadd.f32 %v874_v30, %v873_v26 }
  0xfb   :  { %v828_v33 = vpack.c.bf16 %v643_v29, %v643_v29  ;;  %v590_v34 = vadd.f32 %v589_v32, %v493_v31  ;;  %v876_v35 = vpop.f32.mrf.mxu0 }
  0xfc   :  { %v591_v36 = vpop.f32.mrf.mxu1  ;;  %v501_v49 = vadd.f32 %v875_v37, %v1202_v1 }
  0xfd   :  { %724 = vst.msk [vmem:[%s1287_s3 + $0x8] sm:$0xf] %vm721_vm1, %v828_v33  ;;  %v644_v38 = vmax.f32 %v590_v34, 0.0  ;;  %v877_v39 = vpop.f32.mrf.mxu0 }
  0xfe   :  { %v594_v41 = vpop.f32.mrf.mxu1  ;;  %v878_v46 = vadd.f32 %v877_v39, %v876_v35 }
  0xff   :  { %v829_v42 = vpack.c.bf16 %v644_v38, %v644_v38  ;;  %v595_v43 = vadd.f32 %v594_v41, %v498_v40  ;;  %v879_v44 = vpop.f32.mrf.mxu0 }
 0x100   :  { %v596_v45 = vpop.f32.mrf.mxu1  ;;  %v506_v58 = vadd.f32 %v878_v46, %v1202_v1 }
 0x101   :  { %725 = vst.msk [vmem:[%s1287_s3 + $0xc] sm:$0xf] %vm721_vm1, %v829_v42  ;;  %v645_v47 = vmax.f32 %v595_v43, 0.0  ;;  %v880_v48 = vpop.f32.mrf.mxu0 }
 0x102   :  { %v597_v50 = vpop.f32.mrf.mxu1  ;;  %v881_v55 = vadd.f32 %v880_v48, %v879_v44 }
 0x103   :  { %v830_v51 = vpack.c.bf16 %v645_v47, %v645_v47  ;;  %v598_v52 = vadd.f32 %v597_v50, %v501_v49  ;;  %v882_v53 = vpop.f32.mrf.mxu0 }
 0x104   :  { %v599_v54 = vpop.f32.mrf.mxu1  ;;  %v509_v4 = vadd.f32 %v881_v55, %v1202_v1 }
 0x105   :  { %726 = vst.msk [vmem:[%s1287_s3 + $0x10] sm:$0xf] %vm721_vm1, %v830_v51  ;;  %v646_v56 = vmax.f32 %v598_v52, 0.0  ;;  %v883_v57 = vpop.f32.mrf.mxu0 }
 0x106   :  { %v602_v59 = vpop.f32.mrf.mxu1  ;;  %v884_v0 = vadd.f32 %v883_v57, %v882_v53 }
 0x107   :  { %v831_v60 = vpack.c.bf16 %v646_v56, %v646_v56  ;;  %v603_v61 = vadd.f32 %v602_v59, %v506_v58  ;;  %v885_v62 = vpop.f32.mrf.mxu0 }
 0x108   :  { %v604_v63 = vpop.f32.mrf.mxu1  ;;  %v514_v13 = vadd.f32 %v884_v0, %v1202_v1 }
 0x109   :  { %727 = vst.msk [vmem:[%s1287_s3 + $0x14] sm:$0xf] %vm721_vm1, %v831_v60  ;;  %v647_v2 = vmax.f32 %v603_v61, 0.0  ;;  %v886_v3 = vpop.f32.mrf.mxu0 }
 0x10a   :  { %v605_v5 = vpop.f32.mrf.mxu1  ;;  %v887_v10 = vadd.f32 %v886_v3, %v885_v62 }
 0x10b   :  { %v832_v6 = vpack.c.bf16 %v647_v2, %v647_v2  ;;  %v606_v7 = vadd.f32 %v605_v5, %v509_v4  ;;  %v888_v8 = vpop.f32.mrf.mxu0 }
 0x10c   :  { %v607_v9 = vpop.f32.mrf.mxu1  ;;  %v517_v22 = vadd.f32 %v887_v10, %v1202_v1 }
 0x10d   :  { %728 = vst.msk [vmem:[%s1287_s3 + $0x18] sm:$0xf] %vm721_vm1, %v832_v6  ;;  %v648_v11 = vmax.f32 %v606_v7, 0.0  ;;  %v889_v12 = vpop.f32.mrf.mxu0 }
 0x10e   :  { %v610_v14 = vpop.f32.mrf.mxu1  ;;  %v890_v19 = vadd.f32 %v889_v12, %v888_v8 }
 0x10f   :  { %v833_v15 = vpack.c.bf16 %v648_v11, %v648_v11  ;;  %v611_v16 = vadd.f32 %v610_v14, %v514_v13  ;;  %v891_v17 = vpop.f32.mrf.mxu0 }
 0x110   :  { %v612_v18 = vpop.f32.mrf.mxu1  ;;  %v522_v31 = vadd.f32 %v890_v19, %v1202_v1 }
 0x111   :  { %729 = vst.msk [vmem:[%s1287_s3 + $0x1c] sm:$0xf] %vm721_vm1, %v833_v15  ;;  %v649_v20 = vmax.f32 %v611_v16, 0.0  ;;  %v892_v21 = vpop.f32.mrf.mxu0 }
 0x112   :  { %v613_v23 = vpop.f32.mrf.mxu1  ;;  %v893_v28 = vadd.f32 %v892_v21, %v891_v17 }
 0x113   :  { %v834_v24 = vpack.c.bf16 %v649_v20, %v649_v20  ;;  %v614_v25 = vadd.f32 %v613_v23, %v517_v22  ;;  %v894_v26 = vpop.f32.mrf.mxu0 }
 0x114   :  { %v615_v27 = vpop.f32.mrf.mxu1  ;;  %v525_v40 = vadd.f32 %v893_v28, %v1202_v1 }
 0x115   :  { %730 = vst.msk [vmem:[%s1287_s3 + $0x20] sm:$0xf] %vm721_vm1, %v834_v24  ;;  %v650_v29 = vmax.f32 %v614_v25, 0.0  ;;  %v895_v30 = vpop.f32.mrf.mxu0 }
 0x116   :  { %v618_v32 = vpop.f32.mrf.mxu1  ;;  %v896_v37 = vadd.f32 %v895_v30, %v894_v26 }
 0x117   :  { %v835_v33 = vpack.c.bf16 %v650_v29, %v650_v29  ;;  %v619_v34 = vadd.f32 %v618_v32, %v522_v31  ;;  %v897_v35 = vpop.f32.mrf.mxu0 }
 0x118   :  { %v620_v36 = vpop.f32.mrf.mxu1  ;;  %v530_v49 = vadd.f32 %v896_v37, %v1202_v1 }
 0x119   :  { %731 = vst.msk [vmem:[%s1287_s3 + $0x24] sm:$0xf] %vm721_vm1, %v835_v33  ;;  %v651_v38 = vmax.f32 %v619_v34, 0.0  ;;  %v898_v39 = vpop.f32.mrf.mxu0 }
 0x11a   :  { %v621_v41 = vpop.f32.mrf.mxu1  ;;  %v899_v46 = vadd.f32 %v898_v39, %v897_v35 }
 0x11b   :  { %v836_v42 = vpack.c.bf16 %v651_v38, %v651_v38  ;;  %v622_v43 = vadd.f32 %v621_v41, %v525_v40  ;;  %v900_v44 = vpop.f32.mrf.mxu0 }
 0x11c   :  { %v623_v45 = vpop.f32.mrf.mxu1  ;;  %v533_v57 = vadd.f32 %v899_v46, %v1202_v1 }
 0x11d   :  { %732 = vst.msk [vmem:[%s1287_s3 + $0x28] sm:$0xf] %vm721_vm1, %v836_v42  ;;  %v652_v47 = vmax.f32 %v622_v43, 0.0  ;;  %v901_v48 = vpop.f32.mrf.mxu0 }
 0x11e   :  { %v626_v50 = vpop.f32.mrf.mxu1  ;;  %v902_v55 = vadd.f32 %v901_v48, %v900_v44 }
 0x11f   :  { %v837_v51 = vpack.c.bf16 %v652_v47, %v652_v47  ;;  %v627_v52 = vadd.f32 %v626_v50, %v530_v49  ;;  %v903_v53 = vpop.f32.mrf.mxu0 }
 0x120   :  { %v628_v54 = vpop.f32.mrf.mxu1  ;;  %v538_v2 = vadd.f32 %v902_v55, %v1202_v1 }
 0x121   :  { %733 = vst.msk [vmem:[%s1287_s3 + $0x2c] sm:$0xf] %vm721_vm1, %v837_v51  ;;  %v653_v56 = vmax.f32 %v627_v52, 0.0  ;;  %v904_v58 = vpop.f32.mrf.mxu0 }
 0x122   :  { %v629_v59 = vpop.f32.mrf.mxu1  ;;  %v905_v63 = vadd.f32 %v904_v58, %v903_v53 }
 0x123   :  { %v838_v60 = vpack.c.bf16 %v653_v56, %v653_v56  ;;  %v630_v61 = vadd.f32 %v629_v59, %v533_v57 }
 0x124   :  { %v631_v62 = vpop.f32.mrf.mxu1  ;;  %v541_v8 = vadd.f32 %v905_v63, %v1202_v1 }
 0x125   :  { %734 = vst.msk [vmem:[%s1287_s3 + $0x30] sm:$0xf] %vm721_vm1, %v838_v60  ;;  %v654_v0 = vmax.f32 %v630_v61, 0.0 }
 0x126   :  { %v634_v3 = vpop.f32.mrf.mxu1 }
 0x127   :  { %v839_v4 = vpack.c.bf16 %v654_v0, %v654_v0  ;;  %v635_v5 = vadd.f32 %v634_v3, %v538_v2 }
 0x128   :  { %v636_v6 = vpop.f32.mrf.mxu1 }
 0x129   :  { %735 = vst.msk [vmem:[%s1287_s3 + $0x34] sm:$0xf] %vm721_vm1, %v839_v4  ;;  %v655_v7 = vmax.f32 %v635_v5, 0.0 }
 0x12a   :  { %v637_v9 = vpop.f32.mrf.mxu1 }
 0x12b   :  { %v840_v10 = vpack.c.bf16 %v655_v7, %v655_v7  ;;  %v638_v11 = vadd.f32 %v637_v9, %v541_v8 }
 0x12c   :  { %v639_v12 = vpop.f32.mrf.mxu1 }
 0x12d   :  { %736 = vst.msk [vmem:[%s1287_s3 + $0x38] sm:$0xf] %vm721_vm1, %v840_v10  ;;  %v656_v13 = vmax.f32 %v638_v11, 0.0 }
 0x12f   :  { %v841_v14 = vpack.c.bf16 %v656_v13, %v656_v13 }
 0x131   :  { %737 = vst.msk [vmem:[%s1287_s3 + $0x3c] sm:$0xf] %vm721_vm1, %v841_v14 }

// kernel: _lambda_.20
= control target key start
LH: loop header
LB: loop body
LE: loop exit
PB: predicated region body
PF: predicated region fallthrough
CT: control target
= control target key end

     0   :  { %vm374_vm0 = vcmask 523264   ;;  %vm528_vm1 = vcmask 261120   ;;  %vm553_vm2 = vcmask 257024   ;;  %s945_s1 = inlined_call_operand.vmem [shape: bf16[576,32], index: 1, kind: input, shape index: {}]   ;;  %s946_s0 = inlined_call_operand.vmem [shape: bf16[32,576], index: 0, kind: input, shape index: {}]   ;;  %s947_s2 = inlined_call_operand.vmem [shape: f32[1,32], index: 2, kind: input, shape index: {}]   ;;  %s948_s3 = inlined_call_operand.vmem [shape: f32[32,32], index: 3, kind: output, shape index: {0}]   ;;  %s949_s4 = inlined_call_operand.vmem [shape: bf16[32,32], index: 4, kind: output, shape index: {1}]  }
   0x1   :  { %v697_v0 = vld [vmem:[%s945_s1 + $0x78] sm:$0xff]   ;;  %v701_v4 = vld [vmem:[%s945_s1 + $0x70] sm:$0xff]   ;;  %v705_v8 = vld [vmem:[%s945_s1 + $0x68] sm:$0xff]  }
   0x2   :  { %v698_v1 = vld [vmem:[%s945_s1 + $0xf8] sm:$0xff]   ;;  %623 = vmatprep.subr.bf16.mxu0 %v697_v0  ;;  %v702_v5 = vld [vmem:[%s945_s1 + $0xf0] sm:$0xff]   ;;  %v706_v9 = vld [vmem:[%s945_s1 + $0xe8] sm:$0xff]  }
   0x3   :  { %v699_v2 = vld [vmem:[%s945_s1 + $0x38] sm:$0xff]   ;;  %651 = vmatprep.subr.bf16.mxu1 %v698_v1  ;;  %v703_v6 = vld [vmem:[%s945_s1 + $0x30] sm:$0xff]   ;;  %v707_v10 = vld [vmem:[%s945_s1 + $0x28] sm:$0xff]  }
   0x4   :  { %v700_v3 = vld [vmem:[%s945_s1 + $0xb8] sm:$0xff]   ;;  %624 = vmatpush3.bf16.msra.mxu0 %v699_v2  ;;  %v704_v7 = vld [vmem:[%s945_s1 + $0xb0] sm:$0xff]   ;;  %v708_v11 = vld [vmem:[%s945_s1 + $0xa8] sm:$0xff]  }
   0x5   :  { %652 = vmatpush3.bf16.msra.mxu1 %v700_v3  ;;  %625 = vmatprep.subr.bf16.mxu0 %v701_v4  ;;  %v709_v12 = vld [vmem:[%s945_s1 + $0x60] sm:$0xff]   ;;  %v713_v16 = vld [vmem:[%s945_s1 + $0x58] sm:$0xff]   ;;  %v717_v20 = vld [vmem:[%s945_s1 + $0x50] sm:$0xff]  }
   0x6   :  { %653 = vmatprep.subr.bf16.mxu1 %v702_v5  ;;  %v710_v13 = vld [vmem:[%s945_s1 + $0xe0] sm:$0xff]   ;;  %v714_v17 = vld [vmem:[%s945_s1 + $0xd8] sm:$0xff]   ;;  %v718_v21 = vld [vmem:[%s945_s1 + $0xd0] sm:$0xff]  }
   0x7   :  { %v711_v14 = vld [vmem:[%s945_s1 + $0x20] sm:$0xff]   ;;  %v715_v18 = vld [vmem:[%s945_s1 + $0x18] sm:$0xff]   ;;  %v719_v22 = vld [vmem:[%s945_s1 + $0x10] sm:$0xff]  }
   0x8   :  { %626 = vmatpush3.bf16.msra.mxu0 %v703_v6  ;;  %v712_v15 = vld [vmem:[%s945_s1 + $0xa0] sm:$0xff]   ;;  %v716_v19 = vld [vmem:[%s945_s1 + $0x98] sm:$0xff]   ;;  %v720_v23 = vld [vmem:[%s945_s1 + $0x90] sm:$0xff]  }
   0x9   :  { %654 = vmatpush3.bf16.msra.mxu1 %v704_v7  ;;  %627 = vmatprep.subr.bf16.mxu0 %v705_v8  ;;  %v721_v24 = vld [vmem:[%s945_s1 + $0x48] sm:$0xff]   ;;  %v725_v28 = vld [vmem:[%s945_s1 + $0x40] sm:$0xff]   ;;  %v735_v36 = vld [vmem:[%s945_s1 + $0x118] sm:$0xff]  }
   0xa   :  { %655 = vmatprep.subr.bf16.mxu1 %v706_v9  ;;  %v722_v25 = vld [vmem:[%s945_s1 + $0xc8] sm:$0xff]   ;;  %v726_v29 = vld [vmem:[%s945_s1 + $0xc0] sm:$0xff]   ;;  %v736_v37 = vld [vmem:[%s945_s1 + $0x110] sm:$0xff]  }
   0xb   :  { %v723_v26 = vld [vmem:[%s945_s1 + $0x8] sm:$0xff]   ;;  %v727_v30 = vld [vmem:[%s945_s1] sm:$0xff]  }
   0xc   :  { %628 = vmatpush3.bf16.msra.mxu0 %v707_v10  ;;  %v724_v27 = vld [vmem:[%s945_s1 + $0x88] sm:$0xff]   ;;  %v728_v31 = vld [vmem:[%s945_s1 + $0x80] sm:$0xff]  }
   0xd   :  { %656 = vmatpush3.bf16.msra.mxu1 %v708_v11  ;;  %629 = vmatprep.subr.bf16.mxu0 %v709_v12  ;;  %v729_v32 = vld [vmem:[%s946_s0] ss:$20 sps:$4 sm:$0xff]   ;;  %v731_v33 = vld [vmem:[%s946_s0 + $0x4] ss:$20 sps:$4 sm:$0xff]   ;;  %v732_v34 = vld [vmem:[%s946_s0 + $0x8] ss:$20 sps:$4 sm:$0xff]  }
   0xe   :  { %657 = vmatprep.subr.bf16.mxu1 %v710_v13  ;;  %v734_v35 = vld [vmem:[%s946_s0 + $0xc] ss:$20 sps:$4 sm:$0xff]   ;;  %413 = vmatprep.mubr.bf16.mxu0 %v731_v33  ;;  %v739_v39 = vld [vmem:[%s946_s0 + $0x34] ss:$20 sps:$4 sm:$0xff]   ;;  %v742_v42 = vld [vmem:[%s946_s0 + $0x30] ss:$20 sps:$4 sm:$0xff]  }
   0xf   :  { %462 = vmatprep.mubr.bf16.mxu1 %v734_v35  ;;  %v737_v38 = vld [vmem:[%s946_s0 + $0x2c] ss:$20 sps:$4 sm:$0xff]   ;;  %v741_v40 = vld [vmem:[%s946_s0 + $0x28] ss:$20 sps:$4 sm:$0xff]   ;;  %v745_v43 = vld [vmem:[%s946_s0 + $0x10] ss:$20 sps:$4 sm:$0xff]  }
  0x10   :  { %630 = vmatpush3.bf16.msra.mxu0 %v711_v14  ;;  %v743_v41 = vld [vmem:[%s945_s1 + $0x108] sm:$0xff]   ;;  %v744_v44 = vld [vmem:[%s945_s1 + $0x100] sm:$0xff]  }
  0x11   :  { %658 = vmatpush3.bf16.msra.mxu1 %v712_v15  ;;  %631 = vmatprep.subr.bf16.mxu0 %v713_v16  ;;  %v746_v45 = vld [vmem:[%s946_s0 + $0x38] ss:$20 sps:$4 sm:$0xff]   ;;  %v566_v58 = vld [vmem:[%s947_s2] ss:$0 sm:$0xff] }
  0x12   :  { %659 = vmatprep.subr.bf16.mxu1 %v714_v17 }
  0x14   :  { %632 = vmatpush3.bf16.msra.mxu0 %v715_v18 }
  0x15   :  { %660 = vmatpush3.bf16.msra.mxu1 %v716_v19  ;;  %633 = vmatprep.subr.bf16.mxu0 %v717_v20 }
  0x16   :  { %661 = vmatprep.subr.bf16.mxu1 %v718_v21 }
  0x18   :  { %634 = vmatpush3.bf16.msra.mxu0 %v719_v22 }
  0x19   :  { %662 = vmatpush3.bf16.msra.mxu1 %v720_v23  ;;  %635 = vmatprep.subr.bf16.mxu0 %v721_v24 }
  0x1a   :  { %663 = vmatprep.subr.bf16.mxu1 %v722_v25 }
  0x1c   :  { %636 = vmatpush3.bf16.msra.mxu0 %v723_v26 }
  0x1d   :  { %664 = vmatpush3.bf16.msra.mxu1 %v724_v27  ;;  %637 = vmatprep.subr.bf16.mxu0 %v725_v28 }
  0x1e   :  { %665 = vmatprep.subr.bf16.mxu1 %v726_v29 }
  0x20   :  { %638 = vmatpush3.bf16.msra.mxu0 %v727_v30 }
  0x21   :  { %666 = vmatpush3.bf16.msra.mxu1 %v728_v31  ;;  %685 = vmatprep.subr.bf16.mxu0 %v735_v36 }
  0x23   :  { %414 = vmatmul.mubr.bf16.vlgmr.msra.gmra.mxu0 %v729_v32 }
  0x24   :  { %463 = vmatmul.mubr.bf16.vlgmr.msra.gmra.mxu1 %v732_v34  ;;  %686 = vmatpush3.bf16.msra.mxu0 %v735_v36 }
  0x25   :  { %687 = vmatprep.subr.bf16.mxu0 %v736_v37  ;;  %421 = vmatprep.mubr.bf16.mxu0 %v737_v38 }
  0x26   :  { %470 = vmatprep.mubr.bf16.mxu1 %v739_v39 }
  0x28   :  { %688 = vmatpush3.bf16.msra.mxu0 %v736_v37 }
  0x29   :  { %689 = vmatprep.subr.bf16.mxu0 %v743_v41 }
  0x2b   :  { %422 = vmatmul.mubr.bf16.gmra.mxu0 %v741_v40 }
  0x2c   :  { %471 = vmatmul.mubr.bf16.gmra.mxu1 %v742_v42  ;;  %693 = vmatprep.mubr.msk.bf16.mxu0 %vm374_vm0, %v745_v43 }
  0x2d   :  { %690 = vmatpush3.bf16.msra.mxu0 %v743_v41 }
  0x2e   :  { %691 = vmatprep.subr.bf16.mxu0 %v744_v44 }
  0x31   :  { %692 = vmatpush3.bf16.msra.mxu0 %v744_v44 }
  0x34   :  { %694 = vmatmul.mubr.msk.bf16.vlgmr.msra.gmra.mxu0 %vm374_vm0, %v746_v45 }
  0xe3   :  { %v639_v46 = vpop.f32.mrf.mxu0 }
  0xe4   :  { %v667_v47 = vpop.f32.mrf.mxu1 }
  0xe5   :  { %v640_v48 = vpop.f32.mrf.mxu0 }
  0xe6   :  { %v668_v49 = vpop.f32.mrf.mxu1  ;;  %v641_v56 = vadd.f32 %v640_v48, %v639_v46 }
  0xe7   :  { %v642_v50 = vpop.f32.mrf.mxu0  ;;  %v669_v2 = vadd.f32 %v668_v49, %v667_v47 }
  0xe8   :  { %v670_v51 = vpop.f32.mrf.mxu1  ;;  %v416_v1 = vadd.f32 %v641_v56, %v566_v58 }
  0xe9   :  { %v643_v52 = vpop.f32.mrf.mxu0 }
  0xea   :  { %v671_v53 = vpop.f32.mrf.mxu1  ;;  %v644_v3 = vadd.f32 %v643_v52, %v642_v50  ;;  %v465_v13 = vadd.f32 %v669_v2, %v416_v1 }
  0xeb   :  { %v645_v54 = vpop.f32.mrf.mxu0  ;;  %v672_v16 = vadd.f32 %v671_v53, %v670_v51 }
  0xec   :  { %v673_v55 = vpop.f32.mrf.mxu1  ;;  %v419_v11 = vadd.f32 %v644_v3, %v566_v58 }
  0xed   :  { %v646_v57 = vpop.f32.mrf.mxu0 }
  0xee   :  { %v647_v59 = vadd.f32 %v646_v57, %v645_v54  ;;  %v674_v60 = vpop.f32.mrf.mxu1  ;;  %v468_v23 = vadd.f32 %v672_v16, %v419_v11 }
  0xef   :  { %v675_v61 = vadd.f32 %v674_v60, %v673_v55  ;;  %v648_v62 = vpop.f32.mrf.mxu0 }
  0xf0   :  { %v424_v63 = vadd.f32 %v647_v59, %v566_v58  ;;  %v676_v0 = vpop.f32.mrf.mxu1 }
  0xf1   :  { %v649_v4 = vpop.f32.mrf.mxu0 }
  0xf2   :  { %v650_v5 = vadd.f32 %v649_v4, %v648_v62  ;;  %v677_v6 = vpop.f32.mrf.mxu1  ;;  %v473_v7 = vadd.f32 %v675_v61, %v424_v63 }
  0xf3   :  { %v678_v9 = vadd.f32 %v677_v6, %v676_v0 }
  0xf4   :  { %v427_v8 = vadd.f32 %v650_v5, %v566_v58  ;;  %v695_v10 = vpop.f32.mrf.mxu0 }
  0xf5   :  { %v522_v12 = vadd.f32 %v695_v10, %v473_v7 }
  0xf6   :  { %v513_v14 = vpop.f32.mrf.mxu0  ;;  %v476_v15 = vadd.f32 %v678_v9, %v427_v8 }
  0xf7   :  { %531 = vst.msk [vmem:[%s948_s3 + $0x10] sm:$0xff] %vm528_vm1, %v522_v12  ;;  %v535_v17 = vmax.f32 %v522_v12, 0.0  ;;  %v514_v18 = vadd.f32 %v513_v14, %v465_v13 }
  0xf8   :  { %v696_v19 = vpop.f32.mrf.mxu0 }
  0xf9   :  { %v621_v20 = vpack.c.bf16 %v535_v17, %v535_v17  ;;  %529 = vst.msk [vmem:[%s948_s3] sm:$0xff] %vm528_vm1, %v514_v18  ;;  %v533_v21 = vmax.f32 %v514_v18, 0.0  ;;  %v525_v22 = vadd.f32 %v696_v19, %v476_v15 }
  0xfa   :  { %v516_v24 = vpop.f32.mrf.mxu0 }
  0xfb   :  { %556 = vst.msk [vmem:[%s949_s4 + $0x8] sm:$0xf] %vm553_vm2, %v621_v20  ;;  %v619_v25 = vpack.c.bf16 %v533_v21, %v533_v21  ;;  %v536_v26 = vmax.f32 %v525_v22, 0.0  ;;  %v517_v27 = vadd.f32 %v516_v24, %v468_v23 }
  0xfc   :  { %532 = vst.msk [vmem:[%s948_s3 + $0x18] sm:$0xff] %vm528_vm1, %v525_v22 }
  0xfd   :  { %554 = vst.msk [vmem:[%s949_s4] sm:$0xf] %vm553_vm2, %v619_v25  ;;  %v622_v28 = vpack.c.bf16 %v536_v26, %v536_v26  ;;  %v534_v29 = vmax.f32 %v517_v27, 0.0 }
  0xfe   :  { %530 = vst.msk [vmem:[%s948_s3 + $0x8] sm:$0xff] %vm528_vm1, %v517_v27 }
  0xff   :  { %557 = vst.msk [vmem:[%s949_s4 + $0xc] sm:$0xf] %vm553_vm2, %v622_v28  ;;  %v620_v30 = vpack.c.bf16 %v534_v29, %v534_v29 }
 0x101   :  { %555 = vst.msk [vmem:[%s949_s4 + $0x4] sm:$0xf] %vm553_vm2, %v620_v30 }

// kernel: _lambda_.21
= control target key start
LH: loop header
LB: loop body
LE: loop exit
PB: predicated region body
PF: predicated region fallthrough
CT: control target
= control target key end

     0   :  { %vm543_vm0 = vcmask 785408   ;;  %s1342_s0 = inlined_call_operand.vmem [shape: bf16[32,864], index: 0, kind: input, shape index: {}]   ;;  %s1343_s1 = inlined_call_operand.vmem [shape: bf16[864,32], index: 1, kind: input, shape index: {}]   ;;  %s1344_s2 = inlined_call_operand.vmem [shape: f32[1,32], index: 2, kind: input, shape index: {}]   ;;  %s1345_s3 = inlined_call_operand.vmem [shape: f32[32,32], index: 3, kind: output, shape index: {0}]   ;;  %s1346_s4 = inlined_call_operand.hbm [shape: bf16[32,32], index: 4, kind: output, shape index: {1}]  }
   0x1   :  { %v986_v0 = vld [vmem:[%s1343_s1 + $0x78] sm:$0xff]   ;;  %v990_v4 = vld [vmem:[%s1343_s1 + $0x70] sm:$0xff]   ;;  %v994_v8 = vld [vmem:[%s1343_s1 + $0x68] sm:$0xff]  }
   0x2   :  { %v987_v1 = vld [vmem:[%s1343_s1 + $0x38] sm:$0xff]   ;;  %875 = vmatprep.subr.bf16.mxu0 %v986_v0  ;;  %v991_v5 = vld [vmem:[%s1343_s1 + $0x30] sm:$0xff]   ;;  %v995_v9 = vld [vmem:[%s1343_s1 + $0x28] sm:$0xff]  }
   0x3   :  { %v988_v2 = vld [vmem:[%s1343_s1 + $0xf8] sm:$0xff]   ;;  %876 = vmatpush3.bf16.msra.mxu0 %v987_v1  ;;  %v992_v6 = vld [vmem:[%s1343_s1 + $0xf0] sm:$0xff]   ;;  %v996_v10 = vld [vmem:[%s1343_s1 + $0xe8] sm:$0xff]  }
   0x4   :  { %v989_v3 = vld [vmem:[%s1343_s1 + $0xb8] sm:$0xff]   ;;  %903 = vmatprep.subr.bf16.mxu1 %v988_v2  ;;  %877 = vmatprep.subr.bf16.mxu0 %v990_v4  ;;  %v993_v7 = vld [vmem:[%s1343_s1 + $0xb0] sm:$0xff]   ;;  %v997_v11 = vld [vmem:[%s1343_s1 + $0xa8] sm:$0xff]  }
   0x5   :  { %904 = vmatpush3.bf16.msra.mxu1 %v989_v3  ;;  %v998_v12 = vld [vmem:[%s1343_s1 + $0x60] sm:$0xff]   ;;  %v1002_v16 = vld [vmem:[%s1343_s1 + $0x58] sm:$0xff]   ;;  %v1006_v20 = vld [vmem:[%s1343_s1 + $0x50] sm:$0xff]  }
   0x6   :  { %905 = vmatprep.subr.bf16.mxu1 %v992_v6  ;;  %v999_v13 = vld [vmem:[%s1343_s1 + $0x20] sm:$0xff]   ;;  %v1003_v17 = vld [vmem:[%s1343_s1 + $0x18] sm:$0xff]   ;;  %v1007_v21 = vld [vmem:[%s1343_s1 + $0x10] sm:$0xff]  }
   0x7   :  { %878 = vmatpush3.bf16.msra.mxu0 %v991_v5  ;;  %v1000_v14 = vld [vmem:[%s1343_s1 + $0xe0] sm:$0xff]   ;;  %v1004_v18 = vld [vmem:[%s1343_s1 + $0xd8] sm:$0xff]   ;;  %v1008_v22 = vld [vmem:[%s1343_s1 + $0xd0] sm:$0xff]  }
   0x8   :  { %879 = vmatprep.subr.bf16.mxu0 %v994_v8  ;;  %v1001_v15 = vld [vmem:[%s1343_s1 + $0xa0] sm:$0xff]   ;;  %v1005_v19 = vld [vmem:[%s1343_s1 + $0x98] sm:$0xff]   ;;  %v1009_v23 = vld [vmem:[%s1343_s1 + $0x90] sm:$0xff]  }
   0x9   :  { %906 = vmatpush3.bf16.msra.mxu1 %v993_v7  ;;  %v1010_v24 = vld [vmem:[%s1343_s1 + $0x48] sm:$0xff]   ;;  %v1014_v28 = vld [vmem:[%s1343_s1 + $0x40] sm:$0xff]   ;;  %v1021_v34 = vld [vmem:[%s1343_s1 + $0x178] sm:$0xff]  }
   0xa   :  { %907 = vmatprep.subr.bf16.mxu1 %v996_v10  ;;  %v1011_v25 = vld [vmem:[%s1343_s1 + $0x8] sm:$0xff]   ;;  %v1015_v29 = vld [vmem:[%s1343_s1] sm:$0xff]   ;;  %v1025_v37 = vld [vmem:[%s1343_s1 + $0x138] sm:$0xff]  }
   0xb   :  { %880 = vmatpush3.bf16.msra.mxu0 %v995_v9  ;;  %v1012_v26 = vld [vmem:[%s1343_s1 + $0xc8] sm:$0xff]   ;;  %v1016_v30 = vld [vmem:[%s1343_s1 + $0xc0] sm:$0xff]   ;;  %v1026_v38 = vld [vmem:[%s1343_s1 + $0x170] sm:$0xff]  }
   0xc   :  { %881 = vmatprep.subr.bf16.mxu0 %v998_v12  ;;  %v1013_v27 = vld [vmem:[%s1343_s1 + $0x88] sm:$0xff]   ;;  %v1017_v31 = vld [vmem:[%s1342_s0] ss:$28 sps:$4 sm:$0xff]   ;;  %v1027_v39 = vld [vmem:[%s1343_s1 + $0x130] sm:$0xff]  }
   0xd   :  { %908 = vmatpush3.bf16.msra.mxu1 %v997_v11  ;;  %v1019_v32 = vld [vmem:[%s1342_s0 + $0x4] ss:$28 sps:$4 sm:$0xff]   ;;  %v1024_v36 = vld [vmem:[%s1342_s0 + $0xc] ss:$28 sps:$4 sm:$0xff]   ;;  %v1035_v46 = vld [vmem:[%s1342_s0 + $0x3c] ss:$28 sps:$4 sm:$0xff]  }
   0xe   :  { %909 = vmatprep.subr.bf16.mxu1 %v1000_v14  ;;  %v1020_v33 = vld [vmem:[%s1343_s1 + $0x80] sm:$0xff]   ;;  %582 = vmatprep.mubr.bf16.mxu0 %v1019_v32  ;;  %v1028_v40 = vld [vmem:[%s1343_s1 + $0x168] sm:$0xff]   ;;  %v1033_v47 = vld [vmem:[%s1343_s1 + $0x158] sm:$0xff]  }
   0xf   :  { %882 = vmatpush3.bf16.msra.mxu0 %v999_v13  ;;  %v1022_v35 = vld [vmem:[%s1342_s0 + $0x8] ss:$28 sps:$4 sm:$0xff]   ;;  %631 = vmatprep.mubr.bf16.mxu1 %v1024_v36  ;;  %v1038_v48 = vld [vmem:[%s1342_s0 + $0x38] ss:$28 sps:$4 sm:$0xff]   ;;  %v1041_v51 = vld [vmem:[%s1342_s0 + $0x40] ss:$28 sps:$4 sm:$0xff]  }
  0x10   :  { %883 = vmatprep.subr.bf16.mxu0 %v1002_v16  ;;  %v1029_v41 = vld [vmem:[%s1343_s1 + $0x128] sm:$0xff]   ;;  %v1030_v43 = vld [vmem:[%s1343_s1 + $0x160] sm:$0xff]   ;;  %v1037_v49 = vld [vmem:[%s1343_s1 + $0x118] sm:$0xff]  }
  0x11   :  { %910 = vmatpush3.bf16.msra.mxu1 %v1001_v15  ;;  %v1031_v42 = vld [vmem:[%s1343_s1 + $0x1a8] sm:$0xff]   ;;  %v1032_v44 = vld [vmem:[%s1343_s1 + $0x120] sm:$0xff]   ;;  %v1042_v52 = vld [vmem:[%s1343_s1 + $0x150] sm:$0xff]  }
  0x12   :  { %911 = vmatprep.subr.bf16.mxu1 %v1004_v18  ;;  %v1034_v45 = vld [vmem:[%s1343_s1 + $0x1a0] sm:$0xff]   ;;  %v1043_v53 = vld [vmem:[%s1343_s1 + $0x198] sm:$0xff]   ;;  %v1044_v54 = vld [vmem:[%s1343_s1 + $0x110] sm:$0xff]  }
  0x13   :  { %884 = vmatpush3.bf16.msra.mxu0 %v1003_v17  ;;  %v1039_v50 = vld [vmem:[%s1342_s0 + $0x44] ss:$28 sps:$4 sm:$0xff]   ;;  %v1046_v55 = vld [vmem:[%s1343_s1 + $0x190] sm:$0xff]   ;;  %v1045_v56 = vld [vmem:[%s1343_s1 + $0x148] sm:$0xff]  }
  0x14   :  { %885 = vmatprep.subr.bf16.mxu0 %v1006_v20  ;;  %v1049_v57 = vld [vmem:[%s1343_s1 + $0x188] sm:$0xff]   ;;  %v1048_v59 = vld [vmem:[%s1343_s1 + $0x140] sm:$0xff]   ;;  %v1053_v60 = vld [vmem:[%s1342_s0 + $0x14] ss:$28 sps:$4 sm:$0xff]  }
  0x15   :  { %912 = vmatpush3.bf16.msra.mxu1 %v1005_v19  ;;  %v1047_v58 = vld [vmem:[%s1343_s1 + $0x108] sm:$0xff]   ;;  %v1054_v61 = vld [vmem:[%s1343_s1 + $0x180] sm:$0xff]   ;;  %v1055_v62 = vld [vmem:[%s1342_s0 + $0x18] ss:$28 sps:$4 sm:$0xff]  }
  0x16   :  { %913 = vmatprep.subr.bf16.mxu1 %v1008_v22  ;;  %v1050_v63 = vld [vmem:[%s1343_s1 + $0x100] sm:$0xff]  }
  0x17   :  { %886 = vmatpush3.bf16.msra.mxu0 %v1007_v21 }
  0x18   :  { %887 = vmatprep.subr.bf16.mxu0 %v1010_v24 }
  0x19   :  { %914 = vmatpush3.bf16.msra.mxu1 %v1009_v23 }
  0x1a   :  { %915 = vmatprep.subr.bf16.mxu1 %v1012_v26 }
  0x1b   :  { %888 = vmatpush3.bf16.msra.mxu0 %v1011_v25 }
  0x1c   :  { %889 = vmatprep.subr.bf16.mxu0 %v1014_v28 }
  0x1d   :  { %916 = vmatpush3.bf16.msra.mxu1 %v1013_v27 }
  0x1e   :  { %917 = vmatprep.subr.bf16.mxu1 %v1016_v30 }
  0x1f   :  { %890 = vmatpush3.bf16.msra.mxu0 %v1015_v29 }
  0x20   :  { %931 = vmatprep.subr.bf16.mxu0 %v1021_v34 }
  0x21   :  { %918 = vmatpush3.bf16.msra.mxu1 %v1020_v33 }
  0x22   :  { %583 = vmatmul.mubr.bf16.vlgmr.msra.gmra.mxu0 %v1017_v31  ;;  %967 = vmatprep.subr.bf16.mxu1 %v1031_v42 }
  0x23   :  { %932 = vmatpush3.bf16.msra.mxu0 %v1025_v37  ;;  %590 = vmatprep.mubr.bf16.mxu0 %v1035_v46 }
  0x24   :  { %632 = vmatmul.mubr.bf16.vlgmr.msra.gmra.mxu1 %v1022_v35  ;;  %933 = vmatprep.subr.bf16.mxu0 %v1026_v38 }
  0x25   :  { %968 = vmatpush3.bf16.msra.mxu1 %v1031_v42  ;;  %639 = vmatprep.mubr.bf16.mxu1 %v1039_v50 }
  0x26   :  { %969 = vmatprep.subr.bf16.mxu1 %v1034_v45 }
  0x27   :  { %934 = vmatpush3.bf16.msra.mxu0 %v1027_v39 }
  0x28   :  { %935 = vmatprep.subr.bf16.mxu0 %v1028_v40 }
  0x29   :  { %970 = vmatpush3.bf16.msra.mxu1 %v1034_v45 }
  0x2a   :  { %591 = vmatmul.mubr.bf16.gmra.mxu0 %v1038_v48  ;;  %971 = vmatprep.subr.bf16.mxu1 %v1043_v53 }
  0x2b   :  { %936 = vmatpush3.bf16.msra.mxu0 %v1029_v41  ;;  %680 = vmatprep.mubr.bf16.mxu0 %v1053_v60 }
  0x2c   :  { %937 = vmatprep.subr.bf16.mxu0 %v1030_v43  ;;  %640 = vmatmul.mubr.bf16.gmra.mxu1 %v1041_v51 }
  0x2d   :  { %972 = vmatpush3.bf16.msra.mxu1 %v1043_v53  ;;  %979 = vmatprep.mubr.msk.bf16.mxu1 %vm543_vm0, %v1055_v62 }
  0x2e   :  { %973 = vmatprep.subr.bf16.mxu1 %v1046_v55 }
  0x2f   :  { %938 = vmatpush3.bf16.msra.mxu0 %v1032_v44 }
  0x30   :  { %939 = vmatprep.subr.bf16.mxu0 %v1033_v47 }
  0x31   :  { %974 = vmatpush3.bf16.msra.mxu1 %v1046_v55 }
  0x32   :  { %975 = vmatprep.subr.bf16.mxu1 %v1049_v57 }
  0x33   :  { %940 = vmatpush3.bf16.msra.mxu0 %v1037_v49 }
  0x34   :  { %941 = vmatprep.subr.bf16.mxu0 %v1042_v52 }
  0x35   :  { %976 = vmatpush3.bf16.msra.mxu1 %v1049_v57 }
  0x36   :  { %977 = vmatprep.subr.bf16.mxu1 %v1054_v61 }
  0x37   :  { %942 = vmatpush3.bf16.msra.mxu0 %v1044_v54 }
  0x38   :  { %943 = vmatprep.subr.bf16.mxu0 %v1045_v56 }
  0x3b   :  { %944 = vmatpush3.bf16.msra.mxu0 %v1047_v58 }
  0x3c   :  { %945 = vmatprep.subr.bf16.mxu0 %v1048_v59 }
  0x3d   :  { %10 = vsyncpa [#allocation3], 0  ;;  %v1051_v0 = vld [vmem:[%s1342_s0 + $0x10] ss:$28 sps:$4 sm:$0xff]   ;;  %978 = vmatpush3.bf16.msra.mxu1 %v1054_v61  ;;  %v1059_v3 = vld [vmem:[%s1342_s0 + $0x48] ss:$28 sps:$4 sm:$0xff]  }
  0x3e   :  { %v1056_v1 = vld [vmem:[%s1342_s0 + $0x50] ss:$28 sps:$4 sm:$0xff]   ;;  %v796_v19 = vld [vmem:[%s1344_s2] ss:$0 sm:$0xff]  ;;  %vm746_vm1 = vcmask 261120   ;;  %vm771_vm2 = vcmask 257024  }
  0x3f   :  { %946 = vmatpush3.bf16.msra.mxu0 %v1050_v63  ;;  %v1057_v2 = vld [vmem:[%s1342_s0 + $0x4c] ss:$28 sps:$4 sm:$0xff]   ;;  %s1082_s26 = smov [#allocation2]  }
  0x40   :  { %980 = vmatmul.mubr.msk.bf16.vlgmr.msra.gmra.mxu1 %vm543_vm0, %v1056_v1  ;;  %s783_s27 = sshll.u32 %s1082_s26, 4  ;;  %s784_s27 = int_to_ptr.vmem [resolvable:$true] %s783_s27 }
  0x41   :  { %s1060_s30 = scalar_lea.vmem %s784_s27, 256  ;;  %p1065_p1 = scmp.lt.s32.totalorder %s784_s27, %s784_s27 }
  0x42   :  { %681 = vmatmul.mubr.bf16.vlgmr.msra.gmra.mxu0 %v1051_v0  ;;  %p1061_p0 = scmp.ne.s32.totalorder %s784_s27, %s1060_s30  ;;  %p1066_p2 = scmp.lt.s32.totalorder %s1060_s30, %s1060_s30 }
  0x43   :  { %688 = vmatprep.mubr.bf16.mxu0 %v1057_v2 }
  0x44   :  { %p1067_p3 = por %p1066_p2, %p1065_p1 }
  0x46   :  { %p1068_p4 = pnand %p1067_p3, %p1061_p0 }
  0x4a   :  { %689 = vmatmul.mubr.bf16.gmra.mxu0 %v1059_v3 }
  0xe2   :  { %v891_v4 = vpop.f32.mrf.mxu0 }
  0xe4   :  { %v919_v5 = vpop.f32.mrf.mxu1  ;;  %v892_v6 = vpop.f32.mrf.mxu0 }
  0xe5   :  { %v893_v18 = vadd.f32 %v892_v6, %v891_v4 }
  0xe6   :  { %v920_v7 = vpop.f32.mrf.mxu1  ;;  %v894_v8 = vpop.f32.mrf.mxu0 }
  0xe7   :  { %v585_v22 = vadd.f32 %v893_v18, %v796_v19  ;;  %v921_v23 = vadd.f32 %v920_v7, %v919_v5 }
  0xe8   :  { %v922_v9 = vpop.f32.mrf.mxu1  ;;  %v895_v10 = vpop.f32.mrf.mxu0 }
  0xe9   :  { %v896_v24 = vadd.f32 %v895_v10, %v894_v8  ;;  %v634_v30 = vadd.f32 %v921_v23, %v585_v22 }
  0xea   :  { %v923_v11 = vpop.f32.mrf.mxu1  ;;  %v897_v12 = vpop.f32.mrf.mxu0 }
  0xeb   :  { %v588_v31 = vadd.f32 %v896_v24, %v796_v19  ;;  %v924_v32 = vadd.f32 %v923_v11, %v922_v9 }
  0xec   :  { %v925_v13 = vpop.f32.mrf.mxu1  ;;  %v898_v14 = vpop.f32.mrf.mxu0 }
  0xed   :  { %v899_v27 = vadd.f32 %v898_v14, %v897_v12  ;;  %v637_v41 = vadd.f32 %v924_v32, %v588_v31 }
  0xee   :  { %v926_v15 = vpop.f32.mrf.mxu1  ;;  %v900_v16 = vpop.f32.mrf.mxu0 }
  0xef   :  { %v593_v37 = vadd.f32 %v899_v27, %v796_v19  ;;  %v927_v38 = vadd.f32 %v926_v15, %v925_v13 }
  0xf0   :  { %v928_v17 = vpop.f32.mrf.mxu1  ;;  %v901_v20 = vpop.f32.mrf.mxu0 }
  0xf1   :  { %v902_v39 = vadd.f32 %v901_v20, %v900_v16  ;;  %v642_v48 = vadd.f32 %v927_v38, %v593_v37 }
  0xf2   :  { %v929_v21 = vpop.f32.mrf.mxu1 }
  0xf3   :  { %v596_v49 = vadd.f32 %v902_v39, %v796_v19  ;;  %v930_v51 = vadd.f32 %v929_v21, %v928_v17 }
  0xf5   :  { %v645_v59 = vadd.f32 %v930_v51, %v596_v49 }
 0x100   :  { %v981_v26 = vpop.f32.mrf.mxu1 }
 0x102   :  { %v947_v25 = vpop.f32.mrf.mxu0  ;;  %v731_v29 = vpop.f32.mrf.mxu1 }
 0x104   :  { %v948_v28 = vpop.f32.mrf.mxu0  ;;  %v982_v35 = vpop.f32.mrf.mxu1 }
 0x105   :  { %v949_v33 = vadd.f32 %v948_v28, %v947_v25 }
 0x106   :  { %v950_v34 = vpop.f32.mrf.mxu0  ;;  %v734_v45 = vpop.f32.mrf.mxu1 }
 0x107   :  { %v683_v36 = vadd.f32 %v949_v33, %v634_v30 }
 0x108   :  { %v951_v40 = vpop.f32.mrf.mxu0 }
 0x109   :  { %v952_v42 = vadd.f32 %v951_v40, %v950_v34  ;;  %v732_v43 = vadd.f32 %v731_v29, %v683_v36 }
 0x10a   :  { %v953_v44 = vpop.f32.mrf.mxu0 }
 0x10b   :  { %747 = vst.msk [vmem:[%s1345_s3] sm:$0xff] %vm746_vm1, %v732_v43  ;;  %v751_v46 = vmax.f32 %v732_v43, 0.0  ;;  %v686_v47 = vadd.f32 %v952_v42, %v637_v41 }
 0x10c   :  { %v954_v50 = vpop.f32.mrf.mxu0 }
 0x10d   :  { %v871_v52 = vpack.c.bf16 %v751_v46, %v751_v46  ;;  %v955_v53 = vadd.f32 %v954_v50, %v953_v44  ;;  %v735_v54 = vadd.f32 %v734_v45, %v686_v47 }
 0x10e   :  { %v956_v55 = vpop.f32.mrf.mxu0 }
 0x10f   :  { %772 = vst.msk [vmem:[#allocation2] sm:$0xf] %vm771_vm2, %v871_v52  ;;  %v691_v56 = vadd.f32 %v955_v53, %v642_v48  ;;  %v752_v57 = vmax.f32 %v735_v54, 0.0 }
 0x110   :  { %748 = vst.msk [vmem:[%s1345_s3 + $0x8] sm:$0xff] %vm746_vm1, %v735_v54  ;;  %v957_v58 = vpop.f32.mrf.mxu0 }
 0x111   :  { %v740_v60 = vadd.f32 %v981_v26, %v691_v56  ;;  %v872_v61 = vpack.c.bf16 %v752_v57, %v752_v57  ;;  %v958_v62 = vadd.f32 %v957_v58, %v956_v55 }
 0x113   :  { %749 = vst.msk [vmem:[%s1345_s3 + $0x10] sm:$0xff] %vm746_vm1, %v740_v60  ;;  %v753_v63 = vmax.f32 %v740_v60, 0.0  ;;  %v694_v0 = vadd.f32 %v958_v62, %v645_v59 }
 0x114   :  { %773 = vst.msk [vmem:[#allocation2 + $0x4] sm:$0xf] %vm771_vm2, %v872_v61 }
 0x115   :  { %v873_v1 = vpack.c.bf16 %v753_v63, %v753_v63  ;;  %v743_v2 = vadd.f32 %v982_v35, %v694_v0 }
 0x117   :  { %774 = vst.msk [vmem:[#allocation2 + $0x8] sm:$0xf] %vm771_vm2, %v873_v1  ;;  %v754_v3 = vmax.f32 %v743_v2, 0.0 }
 0x118   :  { %750 = vst.msk [vmem:[%s1345_s3 + $0x18] sm:$0xff] %vm746_vm1, %v743_v2 }
 0x119   :  { %v874_v4 = vpack.c.bf16 %v754_v3, %v754_v3 }
 0x11b   :  { %775 = vst.msk [vmem:[#allocation2 + $0xc] sm:$0xf] %vm771_vm2, %v874_v4 }
 0x11c   :  { %1071 = shalt.err (!%p1068_p4)
}
 0x11d   :  { %s1083_s5 = smov 64   ;;  %s1084_s6 = smov 4  }
 0x11e   :  { %789 = dma.vmem_to_hbm [thread:$0]  %s784_s27, 256, %s1346_s4, [#allocation3], %s1083_s5, %s1083_s5, %s1084_s6  }
 0x11f   :  { %1080 = dma.done.wait [#allocation3], 256  }
 0x120   :  { %1081 = vsyncadd [#allocation3], 4294967040 }
 0x121   :  { %795 = vsyncpa [#allocation3], 1 }

</bundles_post_ra>
